<compile_context>
chip_gen: v6e
topology: v6e:2x2x1
jax: 0.10.0
libtpu: 0.0.40
codegen_flags: <defaults>
</compile_context>

<pallas_src>
import functools

import jax
import jax.numpy as jnp
import numpy as np
from jax import lax
from jax.experimental import pallas as pl
from jax.experimental.pallas import tpu as pltpu


def _round_up(v, m):
    return (v + m - 1) // m * m


def _resnet_block_kernel(x_ref, te_ref,
                         g1_ref, b1_ref, w1_ref, cb1_ref,
                         we_ref,
                         g2_ref, b2_ref, w2_ref, cb2_ref,
                         out_ref, pad_ref,
                         *, H, W, C, G, eps, border):
    HW = H * W
    gs = C // G
    inv_n = 1.0 / float(HW * gs)
    B = border                      # multiple of 8, >= W + 1

    # Zero only the two borders of the flat pad scratch (the interior is fully
    # overwritten by every conv call).  Re-zeroed every grid step so the kernel
    # stays correct when the "parallel" batch axis is split across TensorCores
    # (each core has its own scratch buffer).
    pad_ref[0:B, :] = jnp.zeros((B, C), jnp.float32)
    pad_ref[B + HW:B + HW + B, :] = jnp.zeros((B, C), jnp.float32)

    # x-position (within an image row) of every flat spatial index; used for
    # the dx != 0 boundary masks of the 3x3 conv.
    fx = lax.broadcasted_iota(jnp.int32, (HW, C), 0) % W

    def group_norm(hw, gamma, beta):
        # hw: (HW, C) f32
        s1 = jnp.sum(hw, axis=0, keepdims=True)          # (1, C)
        s2 = jnp.sum(hw * hw, axis=0, keepdims=True)     # (1, C)
        if gs == 1:
            # groups == channels (test config): per-channel stats, no mixing.
            mean_c = s1 * inv_n
            var_c = jnp.maximum(s2 * inv_n - mean_c * mean_c, 0.0)
            inv_c = lax.rsqrt(var_c + eps)
        else:
            # General case: mix channel sums into group sums with a tiny
            # membership matmul (not traced for the test config).
            ci = lax.broadcasted_iota(jnp.int32, (C, G), 0)
            gi = lax.broadcasted_iota(jnp.int32, (C, G), 1)
            M = (ci // gs == gi).astype(jnp.float32)      # (C, G)
            giT = lax.broadcasted_iota(jnp.int32, (G, C), 0)
            ciT = lax.broadcasted_iota(jnp.int32, (G, C), 1)
            MT = (ciT // gs == giT).astype(jnp.float32)   # (G, C)
            mean_g = jnp.dot(s1, M, preferred_element_type=jnp.float32) * inv_n
            msq_g = jnp.dot(s2, M, preferred_element_type=jnp.float32) * inv_n
            var_g = jnp.maximum(msq_g - mean_g * mean_g, 0.0)
            inv_g = lax.rsqrt(var_g + eps)
            mean_c = jnp.dot(mean_g, MT, preferred_element_type=jnp.float32)
            inv_c = jnp.dot(inv_g, MT, preferred_element_type=jnp.float32)
        return (hw - mean_c) * inv_c * gamma + beta

    def silu(h):
        # exp and the approximate reciprocal both run on the EUP slot.
        return h * pl.reciprocal(1.0 + jnp.exp(-h), approx=True)

    def conv3x3(h, wcat_ref, bias):
        # SAME 3x3 conv as ONE im2col matmul:
        #   patches (HW, 9C) bf16  @  wcat (9C, C) bf16  -> f32 accumulator.
        # Vertical (dy) padding is supplied by the zeroed borders of the flat
        # pad scratch; horizontal (dx) row-wrap is masked with fx.
        pad_ref[B:B + HW, :] = h            # aligned interior store (B % 8 == 0)
        pieces = []
        for t in range(9):
            dy, dx = t // 3 - 1, t % 3 - 1
            off = dy * W + dx
            if off == 0:
                piece = h                   # center tap: reuse the live value
            else:
                piece = pad_ref[B + off:B + off + HW, :]
            if dx == -1:
                piece = jnp.where(fx >= 1, piece, 0.0)
            elif dx == 1:
                piece = jnp.where(fx <= W - 2, piece, 0.0)
            pieces.append(piece.astype(jnp.bfloat16))
        patches = jnp.concatenate(pieces, axis=-1)        # (HW, 9*C) bf16
        acc = jnp.dot(patches, wcat_ref[...],
                      preferred_element_type=jnp.float32)  # (HW, C) f32
        return acc + bias

    # conv_in: GroupNorm -> SiLU -> Conv3x3
    h = group_norm(x_ref[0].astype(jnp.float32), g1_ref[...], b1_ref[...])
    h = silu(h)
    h = conv3x3(h, w1_ref, cb1_ref[...])

    # time-embedding projection (Linear, no bias), broadcast over (H, W)
    emb = jnp.dot(te_ref[0].astype(jnp.bfloat16), we_ref[...],
                  preferred_element_type=jnp.float32)       # (1, C)
    h = h + emb

    # conv_out: GroupNorm -> SiLU -> Conv3x3
    h = group_norm(h, g2_ref[...], b2_ref[...])
    h = silu(h)
    h = conv3x3(h, w2_ref, cb2_ref[...])

    # residual: re-read x from VMEM here instead of pinning it in vregs
    # across both convs.
    out_ref[0] = (h + x_ref[0].astype(jnp.float32)).astype(out_ref.dtype)


def resnet_block(x, te, p, *, groups, eps=1e-5):
    """x: (N, H, W, C) NHWC, te: (N, T). Returns (N, H, W, C)."""
    N, H, W, C = x.shape
    T = te.shape[1]
    HW = H * W
    border = _round_up(W + 1, 8)

    # Flatten the spatial dims (free reshapes outside the kernel) and pre-pack
    # the conv weights into im2col layout (9*C, C) in bf16 (also halves their
    # VMEM footprint -> v7x-friendly).
    x_flat = x.reshape(N, HW, C)
    te3 = te.reshape(N, 1, T)
    w1cat = p["w1_hwio"].reshape(9 * C, C).astype(jnp.bfloat16)
    w2cat = p["w2_hwio"].reshape(9 * C, C).astype(jnp.bfloat16)
    we_bf = p["we"].astype(jnp.bfloat16)

    kern = functools.partial(_resnet_block_kernel,
                             H=H, W=W, C=C, G=groups, eps=eps, border=border)

    def full_spec(a):
        return pl.BlockSpec(a.shape, lambda b, _nd=a.ndim: (0,) * _nd)

    args = (x_flat, te3, p["g1"], p["b1"], w1cat, p["cb1"], we_bf,
            p["g2"], p["b2"], w2cat, p["cb2"])
    in_specs = [pl.BlockSpec((1, HW, C), lambda b: (b, 0, 0)),
                pl.BlockSpec((1, 1, T), lambda b: (b, 0, 0))]
    in_specs += [full_spec(a) for a in args[2:]]

    out = pl.pallas_call(
        kern,
        out_shape=jax.ShapeDtypeStruct((N, HW, C), x.dtype),
        grid=(N,),
        in_specs=in_specs,
        out_specs=pl.BlockSpec((1, HW, C), lambda b: (b, 0, 0)),
        scratch_shapes=[pltpu.VMEM((2 * border + HW, C), jnp.float32)],
        compiler_params=pltpu.CompilerParams(
            dimension_semantics=("parallel",),
            vmem_limit_bytes=32 * 1024 * 1024),
    )(*args)
    return out.reshape(N, H, W, C)


def _ref_forward(x, te, p, *, groups, eps=1e-5):
    """Pure-JAX (NHWC, f32) reference matching the PyTorch forward pass."""
    def gn(h, gamma, beta):
        N_, H_, W_, C_ = h.shape
        gs = C_ // groups
        hg = h.reshape(N_, H_, W_, groups, gs)
        mean = hg.mean(axis=(1, 2, 4), keepdims=True)
        var = ((hg - mean) ** 2).mean(axis=(1, 2, 4), keepdims=True)
        hn = ((hg - mean) / jnp.sqrt(var + eps)).reshape(N_, H_, W_, C_)
        return hn * gamma.reshape(1, 1, 1, C_) + beta.reshape(1, 1, 1, C_)

    def conv(h, w_hwio, bias):
        y = lax.conv_general_dilated(
            h, w_hwio, (1, 1), "SAME",
            dimension_numbers=("NHWC", "HWIO", "NHWC"),
            precision=lax.Precision.HIGHEST)
        return y + bias.reshape(1, 1, 1, -1)

    def silu(h):
        return h * jax.nn.sigmoid(h)

    h = conv(silu(gn(x, p["g1"], p["b1"])), p["w1_hwio"], p["cb1"])
    h = h + (te @ p["we"])[:, None, None, :]
    h = conv(silu(gn(h, p["g2"], p["b2"])), p["w2_hwio"], p["cb2"])
    return h + x


if __name__ == "__main__":
    # ResnetBlock defaults: kernel_size=3, groups=32, time_embedding_dim=128.
    # dim must be divisible by groups -> smallest non-trivial dim = 32.
    N, H, W, C = 2, 16, 16, 32
    G = 32
    T = 128

    key = jax.random.PRNGKey(0)
    ks = jax.random.split(key, 11)

    x = jax.random.normal(ks[0], (N, H, W, C), jnp.float32)
    te = jax.random.normal(ks[1], (N, T), jnp.float32)

    # Parameter shapes follow the module's __init__ (GroupNorm affine params,
    # Conv2d weight/bias, Linear weight without bias).
    # NOTE: the PyTorch module zero-inits conv_out's weight/bias and embed_in's
    # weight; here every parameter gets small deterministic non-zero values so
    # the entire compute path is actually exercised by the kernel.
    p = {
        "g1": 1.0 + 0.1 * jax.random.normal(ks[2], (1, C), jnp.float32),
        "b1": 0.1 * jax.random.normal(ks[3], (1, C), jnp.float32),
        "w1_hwio": 0.05 * jax.random.normal(ks[4], (3, 3, C, C), jnp.float32),
        "cb1": 0.05 * jax.random.normal(ks[5], (1, C), jnp.float32),
        "we": 0.05 * jax.random.normal(ks[6], (T, C), jnp.float32),  # Linear W^T
        "g2": 1.0 + 0.1 * jax.random.normal(ks[7], (1, C), jnp.float32),
        "b2": 0.1 * jax.random.normal(ks[8], (1, C), jnp.float32),
        "w2_hwio": 0.05 * jax.random.normal(ks[9], (3, 3, C, C), jnp.float32),
        "cb2": 0.05 * jax.random.normal(ks[10], (1, C), jnp.float32),
    }

    out = resnet_block(x, te, p, groups=G)
    out = jax.block_until_ready(out)

    ref = _ref_forward(x, te, p, groups=G)
    assert out.shape == ref.shape and out.dtype == ref.dtype
    # Kernel uses bf16 matmul operands (f32 accumulation) + an EUP approximate
    # reciprocal in SiLU; the reference is full f32, hence the tolerance.
    np.testing.assert_allclose(np.asarray(out), np.asarray(ref),
                               atol=3e-2, rtol=3e-2)
    print("KERNEL_OK")
</pallas_src>

<mosaic_0001>
module attributes {stable_mosaic.version = 11 : i64} {
  func.func @_resnet_block_kernel(%arg0: i32, %arg1: memref<1x256x32xf32, #tpu.memory_space<vmem>>, %arg2: memref<1x1x128xf32, #tpu.memory_space<vmem>>, %arg3: memref<1x32xf32, #tpu.memory_space<vmem>>, %arg4: memref<1x32xf32, #tpu.memory_space<vmem>>, %arg5: memref<288x32xbf16, #tpu.memory_space<vmem>>, %arg6: memref<1x32xf32, #tpu.memory_space<vmem>>, %arg7: memref<128x32xbf16, #tpu.memory_space<vmem>>, %arg8: memref<1x32xf32, #tpu.memory_space<vmem>>, %arg9: memref<1x32xf32, #tpu.memory_space<vmem>>, %arg10: memref<288x32xbf16, #tpu.memory_space<vmem>>, %arg11: memref<1x32xf32, #tpu.memory_space<vmem>>, %arg12: memref<1x256x32xf32, #tpu.memory_space<vmem>>, %arg13: memref<304x32xf32, #tpu.memory_space<vmem>>) attributes {dimension_semantics = [#tpu.dimension_semantics<parallel>], iteration_bounds = array<i64: 2>, scalar_prefetch = 0 : i64, scratch_operands = 1 : i64, tpu.core_type = #tpu.core_type<tc>, window_params = [{transform_indices = @transform_0, window_bounds = array<i64: 1, 256, 32>}, {transform_indices = @transform_1, window_bounds = array<i64: 1, 1, 128>}, {pipeline_mode = #tpu.pipeline_mode<synchronous>, transform_indices = @transform_2, window_bounds = array<i64: 1, 32>}, {pipeline_mode = #tpu.pipeline_mode<synchronous>, transform_indices = @transform_3, window_bounds = array<i64: 1, 32>}, {pipeline_mode = #tpu.pipeline_mode<synchronous>, transform_indices = @transform_4, window_bounds = array<i64: 288, 32>}, {pipeline_mode = #tpu.pipeline_mode<synchronous>, transform_indices = @transform_5, window_bounds = array<i64: 1, 32>}, {pipeline_mode = #tpu.pipeline_mode<synchronous>, transform_indices = @transform_6, window_bounds = array<i64: 128, 32>}, {pipeline_mode = #tpu.pipeline_mode<synchronous>, transform_indices = @transform_7, window_bounds = array<i64: 1, 32>}, {pipeline_mode = #tpu.pipeline_mode<synchronous>, transform_indices = @transform_8, window_bounds = array<i64: 1, 32>}, {pipeline_mode = #tpu.pipeline_mode<synchronous>, transform_indices = @transform_9, window_bounds = array<i64: 288, 32>}, {pipeline_mode = #tpu.pipeline_mode<synchronous>, transform_indices = @transform_10, window_bounds = array<i64: 1, 32>}, {transform_indices = @transform_11, window_bounds = array<i64: 1, 256, 32>}]} {
    %cst = arith.constant 0.000000e+00 : f32
    %0 = vector.broadcast %cst : f32 to vector<24x32xf32>
    %c0 = arith.constant 0 : index
    %c0_0 = arith.constant 0 : index
    %1 = vector.load %arg13[%c0, %c0_0] : memref<304x32xf32, #tpu.memory_space<vmem>>, vector<24x32xf32>
    tpu.vector_store %arg13[%c0, %c0_0], %0 {strides = array<i32>} : memref<304x32xf32, #tpu.memory_space<vmem>>, vector<24x32xf32>,
    %cst_1 = arith.constant 0.000000e+00 : f32
    %2 = vector.broadcast %cst_1 : f32 to vector<24x32xf32>
    %c280 = arith.constant 280 : index
    %c0_2 = arith.constant 0 : index
    %3 = vector.load %arg13[%c280, %c0_2] : memref<304x32xf32, #tpu.memory_space<vmem>>, vector<24x32xf32>
    tpu.vector_store %arg13[%c280, %c0_2], %2 {strides = array<i32>} : memref<304x32xf32, #tpu.memory_space<vmem>>, vector<24x32xf32>,
    %4 = tpu.iota {dimensions = array<i32: 0>} : vector<256x32xi32>
    %c16_i32 = arith.constant 16 : i32
    %c0_i32 = arith.constant 0 : i32
    %5 = arith.cmpi eq, %c16_i32, %c0_i32 : i32
    %c1_i32 = arith.constant 1 : i32
    %6 = arith.select %5, %c1_i32, %c16_i32 : i32
    %7 = vector.broadcast %6 : i32 to vector<256x32xi32>
    %8 = arith.remsi %4, %7 : vector<256x32xi32>
    %c0_i32_3 = arith.constant 0 : i32
    %9 = vector.broadcast %c0_i32_3 : i32 to vector<256x32xi32>
    %10 = arith.cmpi ne, %8, %9 : vector<256x32xi32>
    %c0_i32_4 = arith.constant 0 : i32
    %11 = vector.broadcast %c0_i32_4 : i32 to vector<256x32xi32>
    %12 = arith.cmpi slt, %8, %11 : vector<256x32xi32>
    %c0_i32_5 = arith.constant 0 : i32
    %13 = arith.cmpi slt, %6, %c0_i32_5 : i32
    %14 = vector.broadcast %13 : i1 to vector<256x32xi1>
    %15 = vector.broadcast %14 : vector<256x32xi1> to vector<256x32xi1>
    %16 = arith.xori %12, %15 : vector<256x32xi1>
    %17 = arith.andi %16, %10 : vector<256x32xi1>
    %18 = vector.broadcast %6 : i32 to vector<256x32xi32>
    %19 = arith.addi %8, %18 : vector<256x32xi32>
    %20 = arith.select %17, %19, %8 : vector<256x32xi1>, vector<256x32xi32>
    %c0_6 = arith.constant 0 : index
    %c0_7 = arith.constant 0 : index
    %c0_8 = arith.constant 0 : index
    %21 = vector.load %arg1[%c0_6, %c0_7, %c0_8] : memref<1x256x32xf32, #tpu.memory_space<vmem>>, vector<1x256x32xf32>
    %22 = vector.shape_cast %21 : vector<1x256x32xf32> to vector<256x32xf32>
    %c0_9 = arith.constant 0 : index
    %c0_10 = arith.constant 0 : index
    %23 = vector.load %arg3[%c0_9, %c0_10] : memref<1x32xf32, #tpu.memory_space<vmem>>, vector<1x32xf32>
    %c0_11 = arith.constant 0 : index
    %c0_12 = arith.constant 0 : index
    %24 = vector.load %arg4[%c0_11, %c0_12] : memref<1x32xf32, #tpu.memory_space<vmem>>, vector<1x32xf32>
    %cst_13 = arith.constant dense<0.000000e+00> : vector<32xf32>
    %25 = vector.multi_reduction <add>, %22, %cst_13 [0] : vector<256x32xf32> to vector<32xf32>
    %26 = vector.shape_cast %25 : vector<32xf32> to vector<1x32xf32>
    %27 = arith.mulf %22, %22 : vector<256x32xf32>
    %cst_14 = arith.constant dense<0.000000e+00> : vector<32xf32>
    %28 = vector.multi_reduction <add>, %27, %cst_14 [0] : vector<256x32xf32> to vector<32xf32>
    %29 = vector.shape_cast %28 : vector<32xf32> to vector<1x32xf32>
    %cst_15 = arith.constant 3.906250e-03 : f32
    %30 = vector.broadcast %cst_15 : f32 to vector<1x32xf32>
    %31 = arith.mulf %26, %30 : vector<1x32xf32>
    %cst_16 = arith.constant 3.906250e-03 : f32
    %32 = vector.broadcast %cst_16 : f32 to vector<1x32xf32>
    %33 = arith.mulf %29, %32 : vector<1x32xf32>
    %34 = arith.mulf %31, %31 : vector<1x32xf32>
    %35 = arith.subf %33, %34 : vector<1x32xf32>
    %cst_17 = arith.constant 0.000000e+00 : f32
    %36 = vector.broadcast %cst_17 : f32 to vector<1x32xf32>
    %37 = arith.maximumf %35, %36 : vector<1x32xf32>
    %cst_18 = arith.constant 9.99999974E-6 : f32
    %38 = vector.broadcast %cst_18 : f32 to vector<1x32xf32>
    %39 = arith.addf %37, %38 : vector<1x32xf32>
    %40 = math.rsqrt %39 : vector<1x32xf32>
    %41 = vector.broadcast %31 : vector<1x32xf32> to vector<256x32xf32>
    %42 = arith.subf %22, %41 : vector<256x32xf32>
    %43 = vector.broadcast %40 : vector<1x32xf32> to vector<256x32xf32>
    %44 = arith.mulf %42, %43 : vector<256x32xf32>
    %45 = vector.broadcast %23 : vector<1x32xf32> to vector<256x32xf32>
    %46 = arith.mulf %44, %45 : vector<256x32xf32>
    %47 = vector.broadcast %24 : vector<1x32xf32> to vector<256x32xf32>
    %48 = arith.addf %46, %47 : vector<256x32xf32>
    %cst_19 = arith.constant 0.000000e+00 : f32
    %49 = vector.broadcast %cst_19 : f32 to vector<256x32xf32>
    %50 = arith.subf %49, %48 : vector<256x32xf32>
    %51 = math.exp %50 : vector<256x32xf32>
    %cst_20 = arith.constant 1.000000e+00 : f32
    %52 = vector.broadcast %cst_20 : f32 to vector<256x32xf32>
    %53 = arith.addf %52, %51 : vector<256x32xf32>
    %54 = tpu.reciprocal %53 {approx = true} : vector<256x32xf32> -> vector<256x32xf32>
    %55 = arith.mulf %48, %54 : vector<256x32xf32>
    %c0_21 = arith.constant 0 : index
    %c0_22 = arith.constant 0 : index
    %56 = vector.load %arg6[%c0_21, %c0_22] : memref<1x32xf32, #tpu.memory_space<vmem>>, vector<1x32xf32>
    %c24 = arith.constant 24 : index
    %c0_23 = arith.constant 0 : index
    %57 = vector.load %arg13[%c24, %c0_23] : memref<304x32xf32, #tpu.memory_space<vmem>>, vector<256x32xf32>
    tpu.vector_store %arg13[%c24, %c0_23], %55 {strides = array<i32>} : memref<304x32xf32, #tpu.memory_space<vmem>>, vector<256x32xf32>,
    %c7 = arith.constant 7 : index
    %c0_24 = arith.constant 0 : index
    %58 = vector.load %arg13[%c7, %c0_24] : memref<304x32xf32, #tpu.memory_space<vmem>>, vector<256x32xf32>
    %c1_i32_25 = arith.constant 1 : i32
    %59 = vector.broadcast %c1_i32_25 : i32 to vector<256x32xi32>
    %60 = arith.cmpi sge, %20, %59 : vector<256x32xi32>
    %cst_26 = arith.constant 0.000000e+00 : f32
    %61 = vector.broadcast %cst_26 : f32 to vector<256x32xf32>
    %62 = arith.select %60, %58, %61 : vector<256x32xi1>, vector<256x32xf32>
    %63 = arith.truncf %62 : vector<256x32xf32> to vector<256x32xbf16>
    %c8 = arith.constant 8 : index
    %c0_27 = arith.constant 0 : index
    %64 = vector.load %arg13[%c8, %c0_27] : memref<304x32xf32, #tpu.memory_space<vmem>>, vector<256x32xf32>
    %65 = arith.truncf %64 : vector<256x32xf32> to vector<256x32xbf16>
    %c9 = arith.constant 9 : index
    %c0_28 = arith.constant 0 : index
    %66 = vector.load %arg13[%c9, %c0_28] : memref<304x32xf32, #tpu.memory_space<vmem>>, vector<256x32xf32>
    %c14_i32 = arith.constant 14 : i32
    %67 = vector.broadcast %c14_i32 : i32 to vector<256x32xi32>
    %68 = arith.cmpi sle, %20, %67 : vector<256x32xi32>
    %cst_29 = arith.constant 0.000000e+00 : f32
    %69 = vector.broadcast %cst_29 : f32 to vector<256x32xf32>
    %70 = arith.select %68, %66, %69 : vector<256x32xi1>, vector<256x32xf32>
    %71 = arith.truncf %70 : vector<256x32xf32> to vector<256x32xbf16>
    %c23 = arith.constant 23 : index
    %c0_30 = arith.constant 0 : index
    %72 = vector.load %arg13[%c23, %c0_30] : memref<304x32xf32, #tpu.memory_space<vmem>>, vector<256x32xf32>
    %c1_i32_31 = arith.constant 1 : i32
    %73 = vector.broadcast %c1_i32_31 : i32 to vector<256x32xi32>
    %74 = arith.cmpi sge, %20, %73 : vector<256x32xi32>
    %cst_32 = arith.constant 0.000000e+00 : f32
    %75 = vector.broadcast %cst_32 : f32 to vector<256x32xf32>
    %76 = arith.select %74, %72, %75 : vector<256x32xi1>, vector<256x32xf32>
    %77 = arith.truncf %76 : vector<256x32xf32> to vector<256x32xbf16>
    %78 = arith.truncf %55 : vector<256x32xf32> to vector<256x32xbf16>
    %c25 = arith.constant 25 : index
    %c0_33 = arith.constant 0 : index
    %79 = vector.load %arg13[%c25, %c0_33] : memref<304x32xf32, #tpu.memory_space<vmem>>, vector<256x32xf32>
    %c14_i32_34 = arith.constant 14 : i32
    %80 = vector.broadcast %c14_i32_34 : i32 to vector<256x32xi32>
    %81 = arith.cmpi sle, %20, %80 : vector<256x32xi32>
    %cst_35 = arith.constant 0.000000e+00 : f32
    %82 = vector.broadcast %cst_35 : f32 to vector<256x32xf32>
    %83 = arith.select %81, %79, %82 : vector<256x32xi1>, vector<256x32xf32>
    %84 = arith.truncf %83 : vector<256x32xf32> to vector<256x32xbf16>
    %c39 = arith.constant 39 : index
    %c0_36 = arith.constant 0 : index
    %85 = vector.load %arg13[%c39, %c0_36] : memref<304x32xf32, #tpu.memory_space<vmem>>, vector<256x32xf32>
    %c1_i32_37 = arith.constant 1 : i32
    %86 = vector.broadcast %c1_i32_37 : i32 to vector<256x32xi32>
    %87 = arith.cmpi sge, %20, %86 : vector<256x32xi32>
    %cst_38 = arith.constant 0.000000e+00 : f32
    %88 = vector.broadcast %cst_38 : f32 to vector<256x32xf32>
    %89 = arith.select %87, %85, %88 : vector<256x32xi1>, vector<256x32xf32>
    %90 = arith.truncf %89 : vector<256x32xf32> to vector<256x32xbf16>
    %c40 = arith.constant 40 : index
    %c0_39 = arith.constant 0 : index
    %91 = vector.load %arg13[%c40, %c0_39] : memref<304x32xf32, #tpu.memory_space<vmem>>, vector<256x32xf32>
    %92 = arith.truncf %91 : vector<256x32xf32> to vector<256x32xbf16>
    %c41 = arith.constant 41 : index
    %c0_40 = arith.constant 0 : index
    %93 = vector.load %arg13[%c41, %c0_40] : memref<304x32xf32, #tpu.memory_space<vmem>>, vector<256x32xf32>
    %c14_i32_41 = arith.constant 14 : i32
    %94 = vector.broadcast %c14_i32_41 : i32 to vector<256x32xi32>
    %95 = arith.cmpi sle, %20, %94 : vector<256x32xi32>
    %cst_42 = arith.constant 0.000000e+00 : f32
    %96 = vector.broadcast %cst_42 : f32 to vector<256x32xf32>
    %97 = arith.select %95, %93, %96 : vector<256x32xi1>, vector<256x32xf32>
    %98 = arith.truncf %97 : vector<256x32xf32> to vector<256x32xbf16>
    %99 = tpu.concatenate %63, %65, %71, %77, %78, %84, %90, %92, %98 in 1 : vector<256x32xbf16>, vector<256x32xbf16>, vector<256x32xbf16>, vector<256x32xbf16>, vector<256x32xbf16>, vector<256x32xbf16>, vector<256x32xbf16>, vector<256x32xbf16>, vector<256x32xbf16> -> vector<256x288xbf16>
    %c0_43 = arith.constant 0 : index
    %c0_44 = arith.constant 0 : index
    %100 = vector.load %arg5[%c0_43, %c0_44] : memref<288x32xbf16, #tpu.memory_space<vmem>>, vector<288x32xbf16>
    %cst_45 = arith.constant dense<0.000000e+00> : vector<256x32xf32>
    %101 = tpu.matmul %99, %100, %cst_45 {dimension_numbers = #tpu.dot_dimension_numbers<[1], [0], [0], [1], [0, 0, 1, 1], [], []>} : vector<256x288xbf16>, vector<288x32xbf16>, vector<256x32xf32> -> vector<256x32xf32>
    %102 = vector.broadcast %56 : vector<1x32xf32> to vector<256x32xf32>
    %103 = arith.addf %101, %102 : vector<256x32xf32>
    %c0_46 = arith.constant 0 : index
    %c0_47 = arith.constant 0 : index
    %c0_48 = arith.constant 0 : index
    %104 = vector.load %arg2[%c0_46, %c0_47, %c0_48] : memref<1x1x128xf32, #tpu.memory_space<vmem>>, vector<1x1x128xf32>
    %105 = vector.shape_cast %104 : vector<1x1x128xf32> to vector<1x128xf32>
    %106 = arith.truncf %105 : vector<1x128xf32> to vector<1x128xbf16>
    %c0_49 = arith.constant 0 : index
    %c0_50 = arith.constant 0 : index
    %107 = vector.load %arg7[%c0_49, %c0_50] : memref<128x32xbf16, #tpu.memory_space<vmem>>, vector<128x32xbf16>
    %cst_51 = arith.constant dense<0.000000e+00> : vector<1x32xf32>
    %108 = tpu.matmul %106, %107, %cst_51 {dimension_numbers = #tpu.dot_dimension_numbers<[1], [0], [0], [1], [0, 0, 1, 1], [], []>} : vector<1x128xbf16>, vector<128x32xbf16>, vector<1x32xf32> -> vector<1x32xf32>
    %109 = vector.broadcast %108 : vector<1x32xf32> to vector<256x32xf32>
    %110 = arith.addf %103, %109 : vector<256x32xf32>
    %c0_52 = arith.constant 0 : index
    %c0_53 = arith.constant 0 : index
    %111 = vector.load %arg8[%c0_52, %c0_53] : memref<1x32xf32, #tpu.memory_space<vmem>>, vector<1x32xf32>
    %c0_54 = arith.constant 0 : index
    %c0_55 = arith.constant 0 : index
    %112 = vector.load %arg9[%c0_54, %c0_55] : memref<1x32xf32, #tpu.memory_space<vmem>>, vector<1x32xf32>
    %cst_56 = arith.constant dense<0.000000e+00> : vector<32xf32>
    %113 = vector.multi_reduction <add>, %110, %cst_56 [0] : vector<256x32xf32> to vector<32xf32>
    %114 = vector.shape_cast %113 : vector<32xf32> to vector<1x32xf32>
    %115 = arith.mulf %110, %110 : vector<256x32xf32>
    %cst_57 = arith.constant dense<0.000000e+00> : vector<32xf32>
    %116 = vector.multi_reduction <add>, %115, %cst_57 [0] : vector<256x32xf32> to vector<32xf32>
    %117 = vector.shape_cast %116 : vector<32xf32> to vector<1x32xf32>
    %cst_58 = arith.constant 3.906250e-03 : f32
    %118 = vector.broadcast %cst_58 : f32 to vector<1x32xf32>
    %119 = arith.mulf %114, %118 : vector<1x32xf32>
    %cst_59 = arith.constant 3.906250e-03 : f32
    %120 = vector.broadcast %cst_59 : f32 to vector<1x32xf32>
    %121 = arith.mulf %117, %120 : vector<1x32xf32>
    %122 = arith.mulf %119, %119 : vector<1x32xf32>
    %123 = arith.subf %121, %122 : vector<1x32xf32>
    %cst_60 = arith.constant 0.000000e+00 : f32
    %124 = vector.broadcast %cst_60 : f32 to vector<1x32xf32>
    %125 = arith.maximumf %123, %124 : vector<1x32xf32>
    %cst_61 = arith.constant 9.99999974E-6 : f32
    %126 = vector.broadcast %cst_61 : f32 to vector<1x32xf32>
    %127 = arith.addf %125, %126 : vector<1x32xf32>
    %128 = math.rsqrt %127 : vector<1x32xf32>
    %129 = vector.broadcast %119 : vector<1x32xf32> to vector<256x32xf32>
    %130 = arith.subf %110, %129 : vector<256x32xf32>
    %131 = vector.broadcast %128 : vector<1x32xf32> to vector<256x32xf32>
    %132 = arith.mulf %130, %131 : vector<256x32xf32>
    %133 = vector.broadcast %111 : vector<1x32xf32> to vector<256x32xf32>
    %134 = arith.mulf %132, %133 : vector<256x32xf32>
    %135 = vector.broadcast %112 : vector<1x32xf32> to vector<256x32xf32>
    %136 = arith.addf %134, %135 : vector<256x32xf32>
    %cst_62 = arith.constant 0.000000e+00 : f32
    %137 = vector.broadcast %cst_62 : f32 to vector<256x32xf32>
    %138 = arith.subf %137, %136 : vector<256x32xf32>
    %139 = math.exp %138 : vector<256x32xf32>
    %cst_63 = arith.constant 1.000000e+00 : f32
    %140 = vector.broadcast %cst_63 : f32 to vector<256x32xf32>
    %141 = arith.addf %140, %139 : vector<256x32xf32>
    %142 = tpu.reciprocal %141 {approx = true} : vector<256x32xf32> -> vector<256x32xf32>
    %143 = arith.mulf %136, %142 : vector<256x32xf32>
    %c0_64 = arith.constant 0 : index
    %c0_65 = arith.constant 0 : index
    %144 = vector.load %arg11[%c0_64, %c0_65] : memref<1x32xf32, #tpu.memory_space<vmem>>, vector<1x32xf32>
    %c24_66 = arith.constant 24 : index
    %c0_67 = arith.constant 0 : index
    %145 = vector.load %arg13[%c24_66, %c0_67] : memref<304x32xf32, #tpu.memory_space<vmem>>, vector<256x32xf32>
    tpu.vector_store %arg13[%c24_66, %c0_67], %143 {strides = array<i32>} : memref<304x32xf32, #tpu.memory_space<vmem>>, vector<256x32xf32>,
    %c7_68 = arith.constant 7 : index
    %c0_69 = arith.constant 0 : index
    %146 = vector.load %arg13[%c7_68, %c0_69] : memref<304x32xf32, #tpu.memory_space<vmem>>, vector<256x32xf32>
    %c1_i32_70 = arith.constant 1 : i32
    %147 = vector.broadcast %c1_i32_70 : i32 to vector<256x32xi32>
    %148 = arith.cmpi sge, %20, %147 : vector<256x32xi32>
    %cst_71 = arith.constant 0.000000e+00 : f32
    %149 = vector.broadcast %cst_71 : f32 to vector<256x32xf32>
    %150 = arith.select %148, %146, %149 : vector<256x32xi1>, vector<256x32xf32>
    %151 = arith.truncf %150 : vector<256x32xf32> to vector<256x32xbf16>
    %c8_72 = arith.constant 8 : index
    %c0_73 = arith.constant 0 : index
    %152 = vector.load %arg13[%c8_72, %c0_73] : memref<304x32xf32, #tpu.memory_space<vmem>>, vector<256x32xf32>
    %153 = arith.truncf %152 : vector<256x32xf32> to vector<256x32xbf16>
    %c9_74 = arith.constant 9 : index
    %c0_75 = arith.constant 0 : index
    %154 = vector.load %arg13[%c9_74, %c0_75] : memref<304x32xf32, #tpu.memory_space<vmem>>, vector<256x32xf32>
    %c14_i32_76 = arith.constant 14 : i32
    %155 = vector.broadcast %c14_i32_76 : i32 to vector<256x32xi32>
    %156 = arith.cmpi sle, %20, %155 : vector<256x32xi32>
    %cst_77 = arith.constant 0.000000e+00 : f32
    %157 = vector.broadcast %cst_77 : f32 to vector<256x32xf32>
    %158 = arith.select %156, %154, %157 : vector<256x32xi1>, vector<256x32xf32>
    %159 = arith.truncf %158 : vector<256x32xf32> to vector<256x32xbf16>
    %c23_78 = arith.constant 23 : index
    %c0_79 = arith.constant 0 : index
    %160 = vector.load %arg13[%c23_78, %c0_79] : memref<304x32xf32, #tpu.memory_space<vmem>>, vector<256x32xf32>
    %c1_i32_80 = arith.constant 1 : i32
    %161 = vector.broadcast %c1_i32_80 : i32 to vector<256x32xi32>
    %162 = arith.cmpi sge, %20, %161 : vector<256x32xi32>
    %cst_81 = arith.constant 0.000000e+00 : f32
    %163 = vector.broadcast %cst_81 : f32 to vector<256x32xf32>
    %164 = arith.select %162, %160, %163 : vector<256x32xi1>, vector<256x32xf32>
    %165 = arith.truncf %164 : vector<256x32xf32> to vector<256x32xbf16>
    %166 = arith.truncf %143 : vector<256x32xf32> to vector<256x32xbf16>
    %c25_82 = arith.constant 25 : index
    %c0_83 = arith.constant 0 : index
    %167 = vector.load %arg13[%c25_82, %c0_83] : memref<304x32xf32, #tpu.memory_space<vmem>>, vector<256x32xf32>
    %c14_i32_84 = arith.constant 14 : i32
    %168 = vector.broadcast %c14_i32_84 : i32 to vector<256x32xi32>
    %169 = arith.cmpi sle, %20, %168 : vector<256x32xi32>
    %cst_85 = arith.constant 0.000000e+00 : f32
    %170 = vector.broadcast %cst_85 : f32 to vector<256x32xf32>
    %171 = arith.select %169, %167, %170 : vector<256x32xi1>, vector<256x32xf32>
    %172 = arith.truncf %171 : vector<256x32xf32> to vector<256x32xbf16>
    %c39_86 = arith.constant 39 : index
    %c0_87 = arith.constant 0 : index
    %173 = vector.load %arg13[%c39_86, %c0_87] : memref<304x32xf32, #tpu.memory_space<vmem>>, vector<256x32xf32>
    %c1_i32_88 = arith.constant 1 : i32
    %174 = vector.broadcast %c1_i32_88 : i32 to vector<256x32xi32>
    %175 = arith.cmpi sge, %20, %174 : vector<256x32xi32>
    %cst_89 = arith.constant 0.000000e+00 : f32
    %176 = vector.broadcast %cst_89 : f32 to vector<256x32xf32>
    %177 = arith.select %175, %173, %176 : vector<256x32xi1>, vector<256x32xf32>
    %178 = arith.truncf %177 : vector<256x32xf32> to vector<256x32xbf16>
    %c40_90 = arith.constant 40 : index
    %c0_91 = arith.constant 0 : index
    %179 = vector.load %arg13[%c40_90, %c0_91] : memref<304x32xf32, #tpu.memory_space<vmem>>, vector<256x32xf32>
    %180 = arith.truncf %179 : vector<256x32xf32> to vector<256x32xbf16>
    %c41_92 = arith.constant 41 : index
    %c0_93 = arith.constant 0 : index
    %181 = vector.load %arg13[%c41_92, %c0_93] : memref<304x32xf32, #tpu.memory_space<vmem>>, vector<256x32xf32>
    %c14_i32_94 = arith.constant 14 : i32
    %182 = vector.broadcast %c14_i32_94 : i32 to vector<256x32xi32>
    %183 = arith.cmpi sle, %20, %182 : vector<256x32xi32>
    %cst_95 = arith.constant 0.000000e+00 : f32
    %184 = vector.broadcast %cst_95 : f32 to vector<256x32xf32>
    %185 = arith.select %183, %181, %184 : vector<256x32xi1>, vector<256x32xf32>
    %186 = arith.truncf %185 : vector<256x32xf32> to vector<256x32xbf16>
    %187 = tpu.concatenate %151, %153, %159, %165, %166, %172, %178, %180, %186 in 1 : vector<256x32xbf16>, vector<256x32xbf16>, vector<256x32xbf16>, vector<256x32xbf16>, vector<256x32xbf16>, vector<256x32xbf16>, vector<256x32xbf16>, vector<256x32xbf16>, vector<256x32xbf16> -> vector<256x288xbf16>
    %c0_96 = arith.constant 0 : index
    %c0_97 = arith.constant 0 : index
    %188 = vector.load %arg10[%c0_96, %c0_97] : memref<288x32xbf16, #tpu.memory_space<vmem>>, vector<288x32xbf16>
    %cst_98 = arith.constant dense<0.000000e+00> : vector<256x32xf32>
    %189 = tpu.matmul %187, %188, %cst_98 {dimension_numbers = #tpu.dot_dimension_numbers<[1], [0], [0], [1], [0, 0, 1, 1], [], []>} : vector<256x288xbf16>, vector<288x32xbf16>, vector<256x32xf32> -> vector<256x32xf32>
    %190 = vector.broadcast %144 : vector<1x32xf32> to vector<256x32xf32>
    %191 = arith.addf %189, %190 : vector<256x32xf32>
    %c0_99 = arith.constant 0 : index
    %c0_100 = arith.constant 0 : index
    %c0_101 = arith.constant 0 : index
    %192 = vector.load %arg1[%c0_99, %c0_100, %c0_101] : memref<1x256x32xf32, #tpu.memory_space<vmem>>, vector<1x256x32xf32>
    %193 = vector.shape_cast %192 : vector<1x256x32xf32> to vector<256x32xf32>
    %194 = arith.addf %191, %193 : vector<256x32xf32>
    %c0_102 = arith.constant 0 : index
    %c0_103 = arith.constant 0 : index
    %c0_104 = arith.constant 0 : index
    %195 = vector.load %arg12[%c0_102, %c0_103, %c0_104] : memref<1x256x32xf32, #tpu.memory_space<vmem>>, vector<1x256x32xf32>
    %196 = vector.shape_cast %195 : vector<1x256x32xf32> to vector<256x32xf32>
    %197 = vector.shape_cast %194 : vector<256x32xf32> to vector<1x256x32xf32>
    tpu.vector_store %arg12[%c0_102, %c0_103, %c0_104], %197 {strides = array<i32>} : memref<1x256x32xf32, #tpu.memory_space<vmem>>, vector<1x256x32xf32>,
    return
  }
  func.func @transform_0(%arg0: i32) -> (i32, i32, i32) {
    %c0_i32 = arith.constant 0 : i32
    %c0_i32_0 = arith.constant 0 : i32
    %c0_i32_1 = arith.constant 0 : i32
    return %arg0, %c0_i32, %c0_i32_0 : i32, i32, i32
  }
  func.func @transform_1(%arg0: i32) -> (i32, i32, i32) {
    %c0_i32 = arith.constant 0 : i32
    %c0_i32_0 = arith.constant 0 : i32
    %c0_i32_1 = arith.constant 0 : i32
    return %arg0, %c0_i32, %c0_i32_0 : i32, i32, i32
  }
  func.func @transform_2(%arg0: i32) -> (i32, i32) {
    %c0_i32 = arith.constant 0 : i32
    %c0_i32_0 = arith.constant 0 : i32
    %c0_i32_1 = arith.constant 0 : i32
    return %c0_i32, %c0_i32_0 : i32, i32
  }
  func.func @transform_3(%arg0: i32) -> (i32, i32) {
    %c0_i32 = arith.constant 0 : i32
    %c0_i32_0 = arith.constant 0 : i32
    %c0_i32_1 = arith.constant 0 : i32
    return %c0_i32, %c0_i32_0 : i32, i32
  }
  func.func @transform_4(%arg0: i32) -> (i32, i32) {
    %c0_i32 = arith.constant 0 : i32
    %c0_i32_0 = arith.constant 0 : i32
    %c0_i32_1 = arith.constant 0 : i32
    return %c0_i32, %c0_i32_0 : i32, i32
  }
  func.func @transform_5(%arg0: i32) -> (i32, i32) {
    %c0_i32 = arith.constant 0 : i32
    %c0_i32_0 = arith.constant 0 : i32
    %c0_i32_1 = arith.constant 0 : i32
    return %c0_i32, %c0_i32_0 : i32, i32
  }
  func.func @transform_6(%arg0: i32) -> (i32, i32) {
    %c0_i32 = arith.constant 0 : i32
    %c0_i32_0 = arith.constant 0 : i32
    %c0_i32_1 = arith.constant 0 : i32
    return %c0_i32, %c0_i32_0 : i32, i32
  }
  func.func @transform_7(%arg0: i32) -> (i32, i32) {
    %c0_i32 = arith.constant 0 : i32
    %c0_i32_0 = arith.constant 0 : i32
    %c0_i32_1 = arith.constant 0 : i32
    return %c0_i32, %c0_i32_0 : i32, i32
  }
  func.func @transform_8(%arg0: i32) -> (i32, i32) {
    %c0_i32 = arith.constant 0 : i32
    %c0_i32_0 = arith.constant 0 : i32
    %c0_i32_1 = arith.constant 0 : i32
    return %c0_i32, %c0_i32_0 : i32, i32
  }
  func.func @transform_9(%arg0: i32) -> (i32, i32) {
    %c0_i32 = arith.constant 0 : i32
    %c0_i32_0 = arith.constant 0 : i32
    %c0_i32_1 = arith.constant 0 : i32
    return %c0_i32, %c0_i32_0 : i32, i32
  }
  func.func @transform_10(%arg0: i32) -> (i32, i32) {
    %c0_i32 = arith.constant 0 : i32
    %c0_i32_0 = arith.constant 0 : i32
    %c0_i32_1 = arith.constant 0 : i32
    return %c0_i32, %c0_i32_0 : i32, i32
  }
  func.func @transform_11(%arg0: i32) -> (i32, i32, i32) {
    %c0_i32 = arith.constant 0 : i32
    %c0_i32_0 = arith.constant 0 : i32
    %c0_i32_1 = arith.constant 0 : i32
    return %arg0, %c0_i32, %c0_i32_0 : i32, i32, i32
  }
}

</mosaic_0001>

<bundles_post_ra>
// kernel: tpu_custom_call.1
= control target key start
LH: loop header
LB: loop body
LE: loop exit
PB: predicated region body
PF: predicated region fallthrough
CT: control target
= control target key end

     0   :  { %s6128_s17 = smov 0   ;;  %s10077_s0 = inlined_call_operand.vmem [shape: f32[2,256,32], index: 0, kind: input, shape index: {}]   ;;  %s10078_s1 = inlined_call_operand.vmem [shape: f32[2,1,128], index: 1, kind: input, shape index: {}]   ;;  %s10079_s2 = inlined_call_operand.vmem [shape: f32[1,32], index: 2, kind: input, shape index: {}]   ;;  %s10080_s3 = inlined_call_operand.vmem [shape: f32[1,32], index: 3, kind: input, shape index: {}]   ;;  %s10081_s4 = inlined_call_operand.vmem [shape: bf16[288,32], index: 4, kind: input, shape index: {}]   ;;  %s10082_s5 = inlined_call_operand.vmem [shape: f32[1,32], index: 5, kind: input, shape index: {}]   ;;  %s10083_s6 = inlined_call_operand.vmem [shape: bf16[128,32], index: 6, kind: input, shape index: {}]   ;;  %s10084_s7 = inlined_call_operand.vmem [shape: f32[1,32], index: 7, kind: input, shape index: {}]   ;;  %s10085_s8 = inlined_call_operand.vmem [shape: f32[1,32], index: 8, kind: input, shape index: {}]   ;;  %s10086_s9 = inlined_call_operand.vmem [shape: bf16[288,32], index: 9, kind: input, shape index: {}]   ;;  %s10087_s10 = inlined_call_operand.vmem [shape: f32[1,32], index: 10, kind: input, shape index: {}]   ;;  %s10088_s11 = inlined_call_operand.vmem [shape: f32[2,256,32], index: 11, kind: output, shape index: {}]  }
   0x1 LB: > { %s5274_s18 = sadd.s32 4294967295, %s6061_s17   ;;  %p5278_p0 = scmp.ge.s32.totalorder %s6061_s17, 1  ;;  %s6061_s17 = sphi %s6128_s17, %s21_s17  }
   0x2   : > { %p345_p1 = scmp.lt.s32.totalorder %s6061_s17, 3 }
   0x4   : > { %p346_p2 = pnand %p5278_p0, %p345_p1 }
   0x6   : > { %349 = sbr.rel (%p346_p2) target bundleno = 1344 (0x540), region = 64 }
   0xb   : > { %vm10131_vm0 = vcmask 261120   ;;  %p388_p3 = scmp.lt.s32.totalorder %s5274_s18, 1  ;;  %v10089_v0 = vmov 0.0   ;;  %s6064_s23 = smov 32  }
   0xc   : > { %404 = vst.msk [vmem:[#allocation2 + $0x8] sm:$0xff] %vm10131_vm0, %v10089_v0  ;;  %405 = vst.msk [vmem:[#allocation2 + $0x10] sm:$0xff] %vm10131_vm0, %v10089_v0  ;;  %s6065_s13 = smov 96   ;;  %s6066_s29 = smov 64  }
   0xd   : > { %403 = vst.msk [vmem:[#allocation2] sm:$0xff] %vm10131_vm0, %v10089_v0  ;;  %406 = vst.msk [vmem:[#allocation2 + $0x118] sm:$0xff] %vm10131_vm0, %v10089_v0  ;;  %s11030_s18 = smov (!%p388_p3, %s5274_s18), 1 }
   0xe   : > { %407 = vst.msk [vmem:[#allocation2 + $0x120] sm:$0xff] %vm10131_vm0, %v10089_v0  ;;  %408 = vst.msk [vmem:[#allocation2 + $0x128] sm:$0xff] %vm10131_vm0, %v10089_v0  ;;  %s5367_s19 = sshll.u32 %s11030_s18, 8  ;;  %s395_s21 = scalar_lea.vmem %s10078_s1, %s11030_s18 }
   0xf   : > { %s6156_s22 = scalar_lea.vmem %s10077_s0, %s5367_s19  ;;  %s9946_s14 = scalar_lea.vmem %s10088_s11, %s5367_s19 }
  0x10   : > { %v6159_v1 = vld [vmem:[%s6156_s22] sm:$0xff]  ;;  %v6162_v2 = vld [vmem:[%s6156_s22 + $0x8] sm:$0xff]  ;;  %v6165_v3 = vld [vmem:[%s6156_s22 + $0x10] sm:$0xff] }
  0x11   : > { %v6168_v4 = vld [vmem:[%s6156_s22 + $0x18] sm:$0xff]  ;;  %v860_v5 = vsel %vm10131_vm0, %v6159_v1, 0.0  ;;  %v861_v6 = vsel %vm10131_vm0, %v6162_v2, 0.0  ;;  %v863_v7 = vsel %vm10131_vm0, %v6165_v3, 0.0  ;;  %v6177_v10 = vld [vmem:[%s6156_s22 + $0x20] sm:$0xff]  ;;  %v6182_v14 = vld [vmem:[%s6156_s22 + $0x28] sm:$0xff]  ;;  %v929_v37 = vmul.f32 %v6159_v1, %v6159_v1 }
  0x12   : > { %v862_v11 = vadd.f32 %v861_v6, %v860_v5  ;;  %v865_v13 = vsel %vm10131_vm0, %v6168_v4, 0.0  ;;  %v867_v16 = vsel %vm10131_vm0, %v6177_v10, 0.0  ;;  %v6188_v17 = vld [vmem:[%s6156_s22 + $0x30] sm:$0xff]  ;;  %v6191_v19 = vld [vmem:[%s6156_s22 + $0x38] sm:$0xff]  ;;  %v869_v20 = vsel %vm10131_vm0, %v6182_v14, 0.0  ;;  %v6196_v21 = vld [vmem:[%s6156_s22 + $0x40] sm:$0xff] }
  0x13   : > { %v1514_v8 = vld [vmem:[#allocation2 + $0x8] sm:$0xff]  ;;  %v1515_v9 = vld [vmem:[#allocation2 + $0x10] sm:$0xff]  ;;  %v6205_v25 = vld [vmem:[%s6156_s22 + $0x58] sm:$0xff]  ;;  %v871_v27 = vsel %vm10131_vm0, %v6188_v17, 0.0  ;;  %v873_v29 = vsel %vm10131_vm0, %v6191_v19, 0.0  ;;  %v875_v30 = vsel %vm10131_vm0, %v6196_v21, 0.0  ;;  %v930_v38 = vmul.f32 %v6162_v2, %v6162_v2 }
  0x14   : > { %v1546_v12 = vpack.c.bf16 %v1515_v9, %v1514_v8  ;;  %v864_v15 = vadd.f32 %v863_v7, %v862_v11  ;;  %v6199_v22 = vld [vmem:[%s6156_s22 + $0x48] sm:$0xff]  ;;  %v6202_v23 = vld [vmem:[%s6156_s22 + $0x50] sm:$0xff]  ;;  %v6208_v26 = vld [vmem:[%s6156_s22 + $0x60] sm:$0xff]  ;;  %v881_v34 = vsel %vm10131_vm0, %v6205_v25, 0.0  ;;  %v931_v41 = vmul.f32 %v6165_v3, %v6165_v3 }
  0x15   : > { %v877_v31 = vsel %vm10131_vm0, %v6199_v22, 0.0  ;;  %v879_v32 = vsel %vm10131_vm0, %v6202_v23, 0.0  ;;  %v883_v35 = vsel %vm10131_vm0, %v6208_v26, 0.0  ;;  %v6229_v39 = vld [vmem:[%s6156_s22 + $0x68] sm:$0xff]  ;;  %v6234_v42 = vld [vmem:[%s6156_s22 + $0x70] sm:$0xff]  ;;  %v6237_v43 = vld [vmem:[%s6156_s22 + $0x78] sm:$0xff]  ;;  %v932_v44 = vmul.f32 %v6168_v4, %v6168_v4 }
  0x16   : > { %1912 = vrot.lane.b32.xlu0 %v1546_v12, %s6064_s23  ;;  %v866_v18 = vadd.f32 %v865_v13, %v864_v15  ;;  %v933_v46 = vmul.f32 %v6177_v10, %v6177_v10  ;;  %v961_v47 = vsel %vm10131_vm0, %v929_v37, 0.0  ;;  %v962_v48 = vsel %vm10131_vm0, %v930_v38, 0.0  ;;  %v6246_v49 = vld [vmem:[%s6156_s22 + $0x80] sm:$0xff]  ;;  %v6250_v53 = vld [vmem:[%s6156_s22 + $0x88] sm:$0xff]  ;;  %v6253_v54 = vld [vmem:[%s6156_s22 + $0x90] sm:$0xff] }
  0x17   : > { %v963_v51 = vadd.f32 %v962_v48, %v961_v47  ;;  %v964_v52 = vsel %vm10131_vm0, %v931_v41, 0.0  ;;  %v885_v55 = vsel %vm10131_vm0, %v6229_v39, 0.0  ;;  %v934_v56 = vmul.f32 %v6182_v14, %v6182_v14  ;;  %v6265_v62 = vld [vmem:[%s6156_s22 + $0x98] sm:$0xff]  ;;  %v6268_v63 = vld [vmem:[%s6156_s22 + $0xa0] sm:$0xff]  ;;  %v6276_v8 = vld [vmem:[%s6156_s22 + $0xa8] sm:$0xff] }
  0x18   : > { %v868_v24 = vadd.f32 %v867_v16, %v866_v18  ;;  %v966_v57 = vsel %vm10131_vm0, %v932_v44, 0.0  ;;  %v887_v59 = vsel %vm10131_vm0, %v6234_v42, 0.0  ;;  %v889_v60 = vsel %vm10131_vm0, %v6237_v43, 0.0  ;;  %v6283_v15 = vld [vmem:[%s6156_s22 + $0xb0] sm:$0xff] }
  0x19   : > { %v965_v61 = vadd.f32 %v964_v52, %v963_v51  ;;  %v891_v5 = vsel %vm10131_vm0, %v6246_v49, 0.0  ;;  %v935_v6 = vmul.f32 %v6188_v17, %v6188_v17  ;;  %v968_v7 = vsel %vm10131_vm0, %v933_v46, 0.0 }
  0x1a   : > { %v870_v28 = vadd.f32 %v869_v20, %v868_v24  ;;  %v936_v11 = vmul.f32 %v6191_v19, %v6191_v19  ;;  %v937_v12 = vmul.f32 %v6196_v21, %v6196_v21  ;;  %v938_v16 = vmul.f32 %v6199_v22, %v6199_v22 }
  0x1b   : > { %v967_v13 = vadd.f32 %v966_v57, %v965_v61  ;;  %v939_v18 = vmul.f32 %v6202_v23, %v6202_v23  ;;  %v940_v20 = vmul.f32 %v6205_v25, %v6205_v25  ;;  %v970_v24 = vsel %vm10131_vm0, %v934_v56, 0.0 }
  0x1c   : > { %v872_v33 = vadd.f32 %v871_v27, %v870_v28  ;;  %v893_v28 = vsel %vm10131_vm0, %v6250_v53, 0.0  ;;  %v974_v38 = vsel %vm10131_vm0, %v936_v11, 0.0  ;;  %v978_v41 = vsel %vm10131_vm0, %v938_v16, 0.0 }
  0x1d   : > { %v980_v44 = vsel %vm10131_vm0, %v939_v18, 0.0  ;;  %v942_v56 = vmul.f32 %v6229_v39, %v6229_v39 }
  0x1e   : > { %v874_v36 = vadd.f32 %v873_v29, %v872_v33  ;;  %v895_v29 = vsel %vm10131_vm0, %v6253_v54, 0.0  ;;  %v901_v33 = vsel %vm10131_vm0, %v6276_v8, 0.0 }
  0x20   : > { %v876_v40 = vadd.f32 %v875_v30, %v874_v36  ;;  %v969_v30 = vadd.f32 %v968_v7, %v967_v13  ;;  %v903_v36 = vsel %vm10131_vm0, %v6283_v15, 0.0  ;;  %v986_v7 = vsel %vm10131_vm0, %v942_v56, 0.0 }
  0x21   : > { %v944_v13 = vmul.f32 %v6237_v43, %v6237_v43  ;;  %v949_v56 = vmul.f32 %v6268_v63, %v6268_v63 }
  0x22   : > { %v878_v45 = vadd.f32 %v877_v31, %v876_v40  ;;  %v897_v31 = vsel %vm10131_vm0, %v6265_v62, 0.0  ;;  %v971_v37 = vadd.f32 %v970_v24, %v969_v30  ;;  %v976_v40 = vsel %vm10131_vm0, %v937_v12, 0.0 }
  0x23   : > { %v945_v24 = vmul.f32 %v6246_v49, %v6246_v49 }
  0x24   : > { %v880_v50 = vadd.f32 %v879_v32, %v878_v45  ;;  %v899_v32 = vsel %vm10131_vm0, %v6268_v63, 0.0  ;;  %v982_v45 = vsel %vm10131_vm0, %v940_v20, 0.0 }
  0x26   : > { %v882_v58 = vadd.f32 %v881_v34, %v880_v50  ;;  %v972_v34 = vsel %vm10131_vm0, %v935_v6, 0.0 }
  0x27   : > { %v973_v47 = vadd.f32 %v972_v34, %v971_v37  ;;  %v6340_v34 = vld [vmem:[%s6156_s22 + $0xd0] sm:$0xff] }
  0x28   : > { %v884_v9 = vadd.f32 %v883_v35, %v882_v58 }
  0x29   : > { %v975_v50 = vadd.f32 %v974_v38, %v973_v47  ;;  %v948_v47 = vmul.f32 %v6265_v62, %v6265_v62 }
  0x2a   : > { %v886_v27 = vadd.f32 %v885_v55, %v884_v9  ;;  %v941_v55 = vmul.f32 %v6208_v26, %v6208_v26  ;;  %v6322_v9 = vld [vmem:[%s6156_s22 + $0xc0] sm:$0xff] }
  0x2b   : > { %v977_v52 = vadd.f32 %v976_v40, %v975_v50  ;;  %v992_v40 = vsel %vm10131_vm0, %v945_v24, 0.0  ;;  %v854_v50 = vld [vmem:[%s6156_s22 + $0xe0] sm:$0xff]  ;;  %v857_v24 = vld [vmem:[%s6156_s22 + $0xf8] sm:$0xff] }
  0x2c   : > { %v888_v35 = vadd.f32 %v887_v59, %v886_v27  ;;  %v6315_v59 = vld [vmem:[%s6156_s22 + $0xb8] sm:$0xff] }
  0x2d   : > { %v979_v58 = vadd.f32 %v978_v41, %v977_v52  ;;  %v905_v20 = vsel %vm10131_vm0, %v6315_v59, 0.0  ;;  %v6348_v41 = vld [vmem:[%s6156_s22 + $0xd8] sm:$0xff] }
  0x2e   : > { %v890_v46 = vadd.f32 %v889_v60, %v888_v35  ;;  %v943_v60 = vmul.f32 %v6234_v42, %v6234_v42 }
  0x2f   : > { %v981_v6 = vadd.f32 %v980_v44, %v979_v58  ;;  %v855_v58 = vld [vmem:[%s6156_s22 + $0xe8] sm:$0xff] }
  0x30   : > { %v892_v48 = vadd.f32 %v891_v5, %v890_v46  ;;  %v984_v5 = vsel %vm10131_vm0, %v941_v55, 0.0  ;;  %v988_v27 = vsel %vm10131_vm0, %v943_v60, 0.0  ;;  %v911_v46 = vsel %vm10131_vm0, %v6340_v34, 0.0 }
  0x31   : > { %v983_v12 = vadd.f32 %v982_v45, %v981_v6  ;;  %v913_v55 = vsel %vm10131_vm0, %v6348_v41, 0.0  ;;  %v915_v60 = vsel %vm10131_vm0, %v854_v50, 0.0 }
  0x32   : > { %v894_v51 = vadd.f32 %v893_v28, %v892_v48  ;;  %v6332_v28 = vld [vmem:[%s6156_s22 + $0xc8] sm:$0xff] }
  0x33   : > { %v985_v18 = vadd.f32 %v984_v5, %v983_v12  ;;  %v909_v38 = vsel %vm10131_vm0, %v6332_v28, 0.0  ;;  %v950_v5 = vmul.f32 %v6276_v8, %v6276_v8 }
  0x34   : > { %v896_v57 = vadd.f32 %v895_v29, %v894_v51 }
  0x35   : > { %v987_v30 = vadd.f32 %v986_v7, %v985_v18  ;;  %v998_v7 = vsel %vm10131_vm0, %v948_v47, 0.0  ;;  %v951_v18 = vmul.f32 %v6283_v15, %v6283_v15 }
  0x36   : > { %v898_v61 = vadd.f32 %v897_v31, %v896_v57  ;;  %v907_v31 = vsel %vm10131_vm0, %v6322_v9, 0.0 }
  0x37   : > { %v989_v37 = vadd.f32 %v988_v27, %v987_v30 }
  0x38   : > { %v900_v11 = vadd.f32 %v899_v32, %v898_v61  ;;  %v946_v32 = vmul.f32 %v6250_v53, %v6250_v53 }
  0x3a   : > { %v902_v16 = vadd.f32 %v901_v33, %v900_v11  ;;  %v990_v33 = vsel %vm10131_vm0, %v944_v13, 0.0  ;;  %v994_v48 = vsel %vm10131_vm0, %v946_v32, 0.0  ;;  %v856_v11 = vld [vmem:[%s6156_s22 + $0xf0] sm:$0xff]  ;;  %v1002_v32 = vsel %vm10131_vm0, %v950_v5, 0.0 }
  0x3b   : > { %v991_v45 = vadd.f32 %v990_v33, %v989_v37  ;;  %v919_v30 = vsel %vm10131_vm0, %v856_v11, 0.0  ;;  %v921_v37 = vsel %vm10131_vm0, %v857_v24, 0.0 }
  0x3c   : > { %v904_v29 = vadd.f32 %v903_v36, %v902_v16  ;;  %v947_v36 = vmul.f32 %v6253_v54, %v6253_v54  ;;  %v917_v16 = vsel %vm10131_vm0, %v855_v58, 0.0 }
  0x3d   : > { %v993_v52 = vadd.f32 %v992_v40, %v991_v45  ;;  %v954_v45 = vmul.f32 %v6332_v28, %v6332_v28 }
  0x3e   : > { %v906_v35 = vadd.f32 %v905_v20, %v904_v29  ;;  %v996_v57 = vsel %vm10131_vm0, %v947_v36, 0.0  ;;  %v1000_v20 = vsel %vm10131_vm0, %v949_v56, 0.0  ;;  %v1004_v36 = vsel %vm10131_vm0, %v951_v18, 0.0 }
  0x3f   : > { %v995_v6 = vadd.f32 %v994_v48, %v993_v52 }
  0x40   : > { %v908_v44 = vadd.f32 %v907_v31, %v906_v35  ;;  %v952_v31 = vmul.f32 %v6315_v59, %v6315_v59 }
  0x41   : > { %v997_v13 = vadd.f32 %v996_v57, %v995_v6  ;;  %v956_v57 = vmul.f32 %v6348_v41, %v6348_v41 }
  0x42   : > { %v910_v51 = vadd.f32 %v909_v38, %v908_v44  ;;  %v953_v38 = vmul.f32 %v6322_v9, %v6322_v9 }
  0x43   : > { %v999_v29 = vadd.f32 %v998_v7, %v997_v13  ;;  %v958_v13 = vmul.f32 %v855_v58, %v855_v58 }
  0x44   : > { %v912_v61 = vadd.f32 %v911_v46, %v910_v51  ;;  %v1006_v46 = vsel %vm10131_vm0, %v952_v31, 0.0  ;;  %v955_v51 = vmul.f32 %v6340_v34, %v6340_v34  ;;  %v1008_v52 = vsel %vm10131_vm0, %v953_v38, 0.0 }
  0x45   : > { %v1001_v35 = vadd.f32 %v1000_v20, %v999_v29  ;;  %v959_v20 = vmul.f32 %v856_v11, %v856_v11  ;;  %v960_v31 = vmul.f32 %v857_v24, %v857_v24 }
  0x46   : > { %v914_v12 = vadd.f32 %v913_v55, %v912_v61  ;;  %v1010_v61 = vsel %vm10131_vm0, %v954_v45, 0.0  ;;  %v1012_v5 = vsel %vm10131_vm0, %v955_v51, 0.0 }
  0x47   : > { %v1003_v44 = vadd.f32 %v1002_v32, %v1001_v35  ;;  %v1018_v32 = vsel %vm10131_vm0, %v958_v13, 0.0  ;;  %v1020_v35 = vsel %vm10131_vm0, %v959_v20, 0.0  ;;  %v1022_v38 = vsel %vm10131_vm0, %v960_v31, 0.0 }
  0x48   : > { %v916_v27 = vadd.f32 %v915_v60, %v914_v12  ;;  %v957_v60 = vmul.f32 %v854_v50, %v854_v50 }
  0x49   : > { %v1005_v48 = vadd.f32 %v1004_v36, %v1003_v44 }
  0x4a   : > { %v918_v33 = vadd.f32 %v917_v16, %v916_v27  ;;  %v1014_v16 = vsel %vm10131_vm0, %v956_v57, 0.0  ;;  %v1016_v27 = vsel %vm10131_vm0, %v957_v60, 0.0 }
  0x4b   : > { %v1007_v56 = vadd.f32 %v1006_v46, %v1005_v48 }
  0x4c   : > { %v920_v40 = vadd.f32 %v919_v30, %v918_v33 }
  0x4d   : > { %v1009_v6 = vadd.f32 %v1008_v52, %v1007_v56 }
  0x4e   : > { %v922_v47 = vadd.f32 %v921_v37, %v920_v40 }
  0x4f   : > { %v1011_v12 = vadd.f32 %v1010_v61, %v1009_v6 }
  0x50   : > { %v923_v55 = vrot.slane %v922_v47, 4 }
  0x51   : > { %v1013_v18 = vadd.f32 %v1012_v5, %v1011_v12 }
  0x52   : > { %v924_v7 = vadd.f32 %v923_v55, %v922_v47 }
  0x53   : > { %v1015_v30 = vadd.f32 %v1014_v16, %v1013_v18 }
  0x54   : > { %v925_v29 = vrot.slane %v924_v7, 2 }
  0x55   : > { %v1017_v33 = vadd.f32 %v1016_v27, %v1015_v30 }
  0x56   : > { %v926_v50 = vadd.f32 %v925_v29, %v924_v7 }
  0x57   : > { %v1019_v37 = vadd.f32 %v1018_v32, %v1017_v33 }
  0x58   : > { %v927_v58 = vrot.slane %v926_v50, 1 }
  0x59   : > { %v1021_v36 = vadd.f32 %v1020_v35, %v1019_v37  ;;  %v6452_v35 = vld [vmem:[%s10079_s2] ss:$0 sm:$0xff] }
  0x5a   : > { %v928_v45 = vadd.f32 %v927_v58, %v926_v50 }
  0x5b   : > { %v1023_v40 = vadd.f32 %v1022_v38, %v1021_v36 }
  0x5c   : > { %v6395_v48 = vmul.f32 0.00390625, %v928_v45 }
  0x5d   : > { %v1024_v44 = vrot.slane %v1023_v40, 4 }
  0x5e   : > { %v1032_v52 = vmul.f32 %v6395_v48, %v6395_v48  ;;  %v1039_v6 = vsub.f32 %v6165_v3, %v6395_v48  ;;  %v1040_v60 = vsub.f32 %v6168_v4, %v6395_v48  ;;  %v1037_v5 = vsub.f32 %v6159_v1, %v6395_v48 }
  0x5f   : > { %v1025_v11 = vadd.f32 %v1024_v44, %v1023_v40  ;;  %v1038_v7 = vsub.f32 %v6162_v2, %v6395_v48  ;;  %v1041_v12 = vsub.f32 %v6177_v10, %v6395_v48  ;;  %v1042_v13 = vsub.f32 %v6182_v14, %v6395_v48 }
  0x60   : > { %v1043_v16 = vsub.f32 %v6188_v17, %v6395_v48  ;;  %v1044_v3 = vsub.f32 %v6191_v19, %v6395_v48  ;;  %v1045_v4 = vsub.f32 %v6196_v21, %v6395_v48  ;;  %v1046_v1 = vsub.f32 %v6199_v22, %v6395_v48 }
  0x61   : > { %v1026_v46 = vrot.slane %v1025_v11, 2  ;;  %v1047_v2 = vsub.f32 %v6202_v23, %v6395_v48  ;;  %v1048_v10 = vsub.f32 %v6205_v25, %v6395_v48  ;;  %v1049_v14 = vsub.f32 %v6208_v26, %v6395_v48 }
  0x62   : > { %v1050_v17 = vsub.f32 %v6229_v39, %v6395_v48  ;;  %v1051_v19 = vsub.f32 %v6234_v42, %v6395_v48  ;;  %v1052_v21 = vsub.f32 %v6237_v43, %v6395_v48  ;;  %v1053_v22 = vsub.f32 %v6246_v49, %v6395_v48 }
  0x63   : > { %v1027_v47 = vadd.f32 %v1026_v46, %v1025_v11  ;;  %v1054_v18 = vsub.f32 %v6250_v53, %v6395_v48  ;;  %v1055_v20 = vsub.f32 %v6253_v54, %v6395_v48  ;;  %v1056_v27 = vsub.f32 %v6265_v62, %v6395_v48  ;;  %v6469_v11 = vld [vmem:[%s10080_s3] ss:$0 sm:$0xff] }
  0x64   : > { %v1057_v29 = vsub.f32 %v6268_v63, %v6395_v48  ;;  %v1058_v30 = vsub.f32 %v6276_v8, %v6395_v48  ;;  %v10308_v8 = vsub.f32 %v6283_v15, %v6395_v48 }
  0x65   : > { %v1028_v24 = vrot.slane %v1027_v47, 1 }
  0x67   : > { %v1029_v51 = vadd.f32 %v1028_v24, %v1027_v47 }
  0x69   : > { %v1031_v55 = vmul.f32 0.00390625, %v1029_v51 }
  0x6b   : > { %v1033_v56 = vsub.f32 %v1031_v55, %v1032_v52 }
  0x6d   : > { %v1034_v57 = vmax.f32 %v1033_v56, 0.0 }
  0x6f   : > { %v1035_v61 = vadd.f32 1e-05, %v1034_v57 }
  0x71   : > { %5787 = vrsqrt.f32 %v1035_v61 }
  0x7e   : > { %v6447_v33 = vpop.eup %5787 }
  0x7f   : > { %v1071_v58 = vmul.f32 %v6447_v33, %v1039_v6  ;;  %v1072_v40 = vmul.f32 %v6447_v33, %v1040_v60  ;;  %v1069_v44 = vmul.f32 %v6447_v33, %v1037_v5  ;;  %v1070_v45 = vmul.f32 %v6447_v33, %v1038_v7 }
  0x80   : > { %v1073_v46 = vmul.f32 %v6447_v33, %v1041_v12  ;;  %v1074_v47 = vmul.f32 %v6447_v33, %v1042_v13  ;;  %v1075_v24 = vmul.f32 %v6447_v33, %v1043_v16  ;;  %v1076_v51 = vmul.f32 %v6447_v33, %v1044_v3 }
  0x81   : > { %v1109_v52 = vmul.f32 %v6452_v35, %v1071_v58  ;;  %v1110_v55 = vmul.f32 %v6452_v35, %v1072_v40  ;;  %v1107_v56 = vmul.f32 %v6452_v35, %v1069_v44  ;;  %v1108_v57 = vmul.f32 %v6452_v35, %v1070_v45 }
  0x82   : > { %v1111_v61 = vmul.f32 %v6452_v35, %v1073_v46  ;;  %v1112_v6 = vmul.f32 %v6452_v35, %v1074_v47  ;;  %v1113_v60 = vmul.f32 %v6452_v35, %v1075_v24  ;;  %v1114_v5 = vmul.f32 %v6452_v35, %v1076_v51 }
  0x83   : > { %v6484_v7 = vadd.f32 %v6469_v11, %v1109_v52  ;;  %v6487_v12 = vadd.f32 %v6469_v11, %v1110_v55  ;;  %v6490_v13 = vadd.f32 %v6469_v11, %v1107_v56  ;;  %v6493_v16 = vadd.f32 %v6469_v11, %v1108_v57 }
  0x84   : > { %v6496_v3 = vadd.f32 %v6469_v11, %v1111_v61  ;;  %v6499_v58 = vadd.f32 %v6469_v11, %v1112_v6  ;;  %v6502_v40 = vadd.f32 %v6469_v11, %v1113_v60  ;;  %v6505_v44 = vadd.f32 %v6469_v11, %v1114_v5 }
  0x85   : > { %v1179_v45 = vsub.f32 0.0, %v6484_v7  ;;  %v1180_v46 = vsub.f32 0.0, %v6487_v12  ;;  %v1177_v47 = vsub.f32 0.0, %v6490_v13  ;;  %v1178_v24 = vsub.f32 0.0, %v6493_v16 }
  0x86   : > { %v1181_v51 = vsub.f32 0.0, %v6496_v3  ;;  %v1182_v52 = vsub.f32 0.0, %v6499_v58  ;;  %v1183_v55 = vsub.f32 0.0, %v6502_v40  ;;  %v1184_v56 = vsub.f32 0.0, %v6505_v44 }
  0x87   : > { %v1213_v57 = vmul.f32 1.442695, %v1179_v45  ;;  %v1215_v61 = vmul.f32 1.442695, %v1180_v46  ;;  %v1209_v6 = vmul.f32 1.442695, %v1177_v47  ;;  %v1077_v60 = vmul.f32 %v6447_v33, %v1045_v4 }
  0x88   : > { %v1211_v5 = vmul.f32 1.442695, %v1178_v24  ;;  %v1217_v0 = vmul.f32 1.442695, %v1181_v51  ;;  %v1219_v36 = vmul.f32 1.442695, %v1182_v52  ;;  %v1078_v38 = vmul.f32 %v6447_v33, %v1046_v1 }
  0x89   : > { %5789 = vpow2.f32 %v1213_v57  ;;  %v1221_v37 = vmul.f32 1.442695, %v1183_v55  ;;  %v1223_v50 = vmul.f32 1.442695, %v1184_v56  ;;  %v1115_v32 = vmul.f32 %v6452_v35, %v1077_v60 }
  0x8a   : > { %5791 = vpow2.f32 %v1215_v61  ;;  %v1116_v31 = vmul.f32 %v6452_v35, %v1078_v38  ;;  %v1079_v45 = vmul.f32 %v6447_v33, %v1047_v2  ;;  %v1080_v4 = vmul.f32 %v6447_v33, %v1048_v10 }
  0x8b   : > { %5793 = vpow2.f32 %v1209_v6  ;;  %v6528_v1 = vadd.f32 %v6469_v11, %v1115_v32  ;;  %v1081_v46 = vmul.f32 %v6447_v33, %v1049_v14  ;;  %v1082_v23 = vmul.f32 %v6447_v33, %v1050_v17 }
  0x8c   : > { %5795 = vpow2.f32 %v1211_v5  ;;  %v6539_v2 = vadd.f32 %v6469_v11, %v1116_v31  ;;  %v1117_v25 = vmul.f32 %v6452_v35, %v1079_v45  ;;  %v1118_v10 = vmul.f32 %v6452_v35, %v1080_v4 }
  0x8d   : > { %5797 = vpow2.f32 %v1217_v0  ;;  %v1185_v32 = vsub.f32 0.0, %v6528_v1  ;;  %v1119_v26 = vmul.f32 %v6452_v35, %v1081_v46  ;;  %v1120_v14 = vmul.f32 %v6452_v35, %v1082_v23 }
  0x8e   : > { %5799 = vpow2.f32 %v1219_v36  ;;  %v1186_v39 = vsub.f32 0.0, %v6539_v2  ;;  %v6548_v17 = vadd.f32 %v6469_v11, %v1117_v25  ;;  %v6551_v31 = vadd.f32 %v6469_v11, %v1118_v10 }
  0x8f   : > { %5801 = vpow2.f32 %v1221_v37  ;;  %v1225_v38 = vmul.f32 1.442695, %v1185_v32  ;;  %v6554_v47 = vadd.f32 %v6469_v11, %v1119_v26  ;;  %v6557_v0 = vadd.f32 %v6469_v11, %v1120_v14 }
  0x90   : > { %5803 = vpow2.f32 %v1223_v50  ;;  %v1227_v24 = vmul.f32 1.442695, %v1186_v39  ;;  %v1187_v36 = vsub.f32 0.0, %v6548_v17  ;;  %v1188_v51 = vsub.f32 0.0, %v6551_v31 }
  0x91   : > { %5805 = vpow2.f32 %v1225_v38  ;;  %v1189_v52 = vsub.f32 0.0, %v6554_v47  ;;  %v1190_v55 = vsub.f32 0.0, %v6557_v0  ;;  %v1083_v37 = vmul.f32 %v6447_v33, %v1051_v19 }
  0x92   : > { %5807 = vpow2.f32 %v1227_v24  ;;  %v1229_v56 = vmul.f32 1.442695, %v1187_v36  ;;  %v1231_v57 = vmul.f32 1.442695, %v1188_v51  ;;  %v1084_v50 = vmul.f32 %v6447_v33, %v1052_v21 }
  0x93   : > { %v1233_v61 = vmul.f32 1.442695, %v1189_v52  ;;  %v1235_v6 = vmul.f32 1.442695, %v1190_v55  ;;  %v1121_v60 = vmul.f32 %v6452_v35, %v1083_v37  ;;  %v1085_v5 = vmul.f32 %v6447_v33, %v1053_v22 }
  0x94   : > { %5809 = vpow2.f32 %v1229_v56  ;;  %v1122_v42 = vmul.f32 %v6452_v35, %v1084_v50  ;;  %v1086_v19 = vmul.f32 %v6447_v33, %v1054_v18  ;;  %v1087_v43 = vmul.f32 %v6447_v33, %v1055_v20 }
  0x95   : > { %5811 = vpow2.f32 %v1231_v57  ;;  %v6586_v21 = vadd.f32 %v6469_v11, %v1121_v60  ;;  %v1123_v49 = vmul.f32 %v6452_v35, %v1085_v5  ;;  %v1088_v22 = vmul.f32 %v6447_v33, %v1056_v27 }
  0x96   : > { %v5790_v45 = vpop.eup %5789  ;;  %5813 = vpow2.f32 %v1233_v61  ;;  %v6594_v53 = vadd.f32 %v6469_v11, %v1122_v42  ;;  %v1124_v54 = vmul.f32 %v6452_v35, %v1086_v19  ;;  %v1125_v18 = vmul.f32 %v6452_v35, %v1087_v43 }
  0x97   : > { %v5792_v20 = vpop.eup %5791  ;;  %v1275_v4 = vadd.f32 1.0, %v5790_v45  ;;  %5815 = vpow2.f32 %v1235_v6  ;;  %v1191_v46 = vsub.f32 0.0, %v6586_v21  ;;  %v6600_v23 = vadd.f32 %v6469_v11, %v1123_v49 }
  0x98   : > { %v5794_v62 = vpop.eup %5793  ;;  %v1276_v25 = vadd.f32 1.0, %v5792_v20  ;;  %v1192_v27 = vsub.f32 0.0, %v6594_v53  ;;  %v6604_v10 = vadd.f32 %v6469_v11, %v1124_v54  ;;  %v1126_v32 = vmul.f32 %v6452_v35, %v1088_v22 }
  0x99   : > { %v5796_v26 = vpop.eup %5795  ;;  %5817 = vrcp.f32 %v1275_v4  ;;  %v1273_v14 = vadd.f32 1.0, %v5794_v62  ;;  %v1237_v39 = vmul.f32 1.442695, %v1191_v46  ;;  %v1193_v38 = vsub.f32 0.0, %v6600_v23 }
  0x9a   : > { %v5798_v24 = vpop.eup %5797  ;;  %5819 = vrcp.f32 %v1276_v25  ;;  %v1274_v36 = vadd.f32 1.0, %v5796_v26  ;;  %v6608_v51 = vmul.f32 1.442695, %v1192_v27  ;;  %v1194_v52 = vsub.f32 0.0, %v6604_v10 }
  0x9b   : > { %v5800_v55 = vpop.eup %5799  ;;  %5821 = vrcp.f32 %v1273_v14  ;;  %v1277_v37 = vadd.f32 1.0, %v5798_v24  ;;  %v6611_v56 = vmul.f32 1.442695, %v1193_v38  ;;  %v6614_v57 = vadd.f32 %v6469_v11, %v1125_v18 }
  0x9c   : > { %v5802_v50 = vpop.eup %5801  ;;  %5823 = vrcp.f32 %v1274_v36  ;;  %v1278_v61 = vadd.f32 1.0, %v5800_v55  ;;  %v6616_v6 = vmul.f32 1.442695, %v1194_v52  ;;  %v6619_v60 = vadd.f32 %v6469_v11, %v1126_v32 }
  0x9d   : > { %v5804_v5 = vpop.eup %5803  ;;  %5825 = vrcp.f32 %v1277_v37  ;;  %v1279_v42 = vadd.f32 1.0, %v5802_v50  ;;  %v1195_v19 = vsub.f32 0.0, %v6614_v57  ;;  %v1089_v43 = vmul.f32 %v6447_v33, %v1057_v29 }
  0x9e   : > { %v5806_v49 = vpop.eup %5805  ;;  %5827 = vrcp.f32 %v1278_v61  ;;  %v1280_v22 = vadd.f32 1.0, %v5804_v5  ;;  %v1196_v45 = vsub.f32 0.0, %v6619_v60  ;;  %v1090_v54 = vmul.f32 %v6447_v33, %v1058_v30 }
  0x9f   : > { %v5808_v18 = vpop.eup %5807  ;;  %5829 = vrcp.f32 %v1279_v42  ;;  %v1281_v20 = vadd.f32 1.0, %v5806_v49  ;;  %v6631_v4 = vmul.f32 1.442695, %v1195_v19  ;;  %v1127_v46 = vmul.f32 %v6452_v35, %v1089_v43 }
  0xa0   : > { %5831 = vrcp.f32 %v1280_v22  ;;  %v1282_v63 = vadd.f32 1.0, %v5808_v18  ;;  %v6634_v29 = vmul.f32 1.442695, %v1196_v45  ;;  %v1128_v62 = vmul.f32 %v6452_v35, %v1090_v54  ;;  %v5743_v18 = vld [vmem:[%s10081_s4 + $0x88] sm:$0xff]  }
  0xa1   : > { %v5810_v25 = vpop.eup %5809  ;;  %5833 = vrcp.f32 %v1281_v20  ;;  %v6638_v27 = vadd.f32 %v6469_v11, %v1127_v46  ;;  %v1091_v30 = vmul.f32 %v6447_v33, %v10308_v8  ;;  %v10309_v32 = vsub.f32 %v6315_v59, %v6395_v48  ;;  %5638 = vmatprep.subr.bf16.mxu1 %v5743_v18 }
  0xa2   : > { %v5812_v14 = vpop.eup %5811  ;;  %5835 = vrcp.f32 %v1282_v63  ;;  %v1283_v38 = vadd.f32 1.0, %v5810_v25  ;;  %v6649_v24 = vadd.f32 %v6469_v11, %v1128_v62  ;;  %v10310_v36 = vsub.f32 %v6322_v9, %v6395_v48  ;;  %5639 = vmatpush3.bf16.msra.mxu1 %v5743_v18 }
  0xa3   : > { %v1092_v26 = vmul.f32 %v6447_v33, %v10309_v32  ;;  %v5814_v55 = vpop.eup %5813  ;;  %v1284_v15 = vadd.f32 1.0, %v5812_v14  ;;  %5837 = vpow2.f32 %v1237_v39  ;;  %v1197_v37 = vsub.f32 0.0, %v6638_v27 }
  0xa4   : > { %v1093_v52 = vmul.f32 %v6447_v33, %v10310_v36  ;;  %v1129_v59 = vmul.f32 %v6452_v35, %v1091_v30  ;;  %v5816_v50 = vpop.eup %5815  ;;  %5839 = vrcp.f32 %v1283_v38  ;;  %v1285_v61 = vadd.f32 1.0, %v5814_v55 }
  0xa5   : > { %v1198_v5 = vsub.f32 0.0, %v6649_v24  ;;  %v1130_v42 = vmul.f32 %v6452_v35, %v1092_v26  ;;  %5841 = vrcp.f32 %v1284_v15  ;;  %v1286_v19 = vadd.f32 1.0, %v5816_v50 }
  0xa6   : > { %v1249_v43 = vmul.f32 1.442695, %v1197_v37  ;;  %v6660_v9 = vadd.f32 %v6469_v11, %v1129_v59  ;;  %v5818_v49 = vpop.eup %5817  ;;  %5843 = vrcp.f32 %v1285_v61  ;;  %v10311_v45 = vsub.f32 %v6332_v28, %v6395_v48 }
  0xa7   : > { %v1251_v39 = vmul.f32 1.442695, %v1198_v5  ;;  %v6663_v22 = vadd.f32 %v6469_v11, %v1130_v42  ;;  %v5820_v20 = vpop.eup %5819  ;;  %v6673_v46 = vmul.f32 %v5818_v49, %v6484_v7  ;;  %5845 = vrcp.f32 %v1286_v19 }
  0xa8   : > { %v1094_v54 = vmul.f32 %v6447_v33, %v10311_v45  ;;  %v1199_v63 = vsub.f32 0.0, %v6660_v9  ;;  %v1131_v62 = vmul.f32 %v6452_v35, %v1093_v52  ;;  %v5822_v25 = vpop.eup %5821  ;;  %v6678_v8 = vmul.f32 %v5820_v20, %v6487_v12 }
  0xa9   : > { %10312 = vst [vmem:[#allocation3_spill] sm:$0xff] %v6673_v46  ;;  %5847 = vpow2.f32 %v6608_v51  ;;  %v1200_v28 = vsub.f32 0.0, %v6663_v22  ;;  %v5824_v32 = vpop.eup %5823  ;;  %1372 = vst.msk [vmem:[#allocation2 + $0x28] sm:$0xff] %vm10131_vm0, %v6673_v46  ;;  %v6686_v7 = vmul.f32 %v5822_v25, %v6490_v13  ;;  %v10320_v19 = vmov 0.0  }
  0xaa   : > { %10313 = vst [vmem:[#allocation4_spill] sm:$0xff] %v6678_v8  ;;  %v1132_v30 = vmul.f32 %v6452_v35, %v1094_v54  ;;  %5849 = vpow2.f32 %v6611_v56  ;;  %v1253_v26 = vmul.f32 1.442695, %v1199_v63  ;;  %v6690_v12 = vadd.f32 %v6469_v11, %v1131_v62  ;;  %v5826_v51 = vpop.eup %5825  ;;  %1373 = vst.msk [vmem:[#allocation2 + $0x30] sm:$0xff] %vm10131_vm0, %v6678_v8  ;;  %v5744_v56 = vld [vmem:[%s10081_s4 + $0x80] sm:$0xff]  }
  0xab   : > { %v6695_v14 = vmul.f32 %v5824_v32, %v6493_v16  ;;  %5851 = vpow2.f32 %v6616_v6  ;;  %v1255_v38 = vmul.f32 1.442695, %v1200_v28  ;;  %v5828_v36 = vpop.eup %5827  ;;  %1370 = vst.msk [vmem:[#allocation2 + $0x18] sm:$0xff] %vm10131_vm0, %v6686_v7  ;;  %v6707_v52 = vmul.f32 %v5826_v51, %v6496_v3  ;;  %5640 = vmatprep.subr.bf16.mxu1 %v5744_v56 }
  0xac   : > { %v6699_v13 = vadd.f32 %v6469_v11, %v1132_v30  ;;  %5853 = vpow2.f32 %v6631_v4  ;;  %v1201_v16 = vsub.f32 0.0, %v6690_v12  ;;  %v10315_v6 = vsub.f32 %v6340_v34, %v6395_v48  ;;  %v5830_v15 = vpop.eup %5829  ;;  %5641 = vmatpush3.bf16.msra.mxu1 %v5744_v56 }
  0xad   : > { %10314 = vst [vmem:[#allocation5_spill] sm:$0xff] %v6707_v52  ;;  %1371 = vst.msk [vmem:[#allocation2 + $0x20] sm:$0xff] %vm10131_vm0, %v6695_v14  ;;  %v6718_v37 = vmul.f32 %v5828_v36, %v6499_v58  ;;  %5855 = vpow2.f32 %v6634_v29  ;;  %v10317_v4 = vsub.f32 %v6348_v41, %v6395_v48  ;;  %v5832_v34 = vpop.eup %5831  ;;  %v6729_v50 = vmul.f32 %v5830_v15, %v6502_v40 }
  0xae   : > { %v1095_v55 = vmul.f32 %v6447_v33, %v10315_v6  ;;  %v1202_v3 = vsub.f32 0.0, %v6699_v13  ;;  %1374 = vst.msk [vmem:[#allocation2 + $0x38] sm:$0xff] %vm10131_vm0, %v6707_v52  ;;  %5857 = vpow2.f32 %v1249_v43  ;;  %v1257_v58 = vmul.f32 1.442695, %v1201_v16  ;;  %v5834_v29 = vpop.eup %5833  ;;  %5674 = vmatprep.subr.bf16.mxu1 %v10320_v19 }
  0xaf   : > { %10316 = vst [vmem:[#allocation6_spill] sm:$0xff] %v6718_v37  ;;  %v1096_v59 = vmul.f32 %v6447_v33, %v10317_v4  ;;  %10318 = vst [vmem:[#allocation7_spill] sm:$0xff] %v6729_v50  ;;  %v6735_v41 = vmul.f32 %v5832_v34, %v6505_v44  ;;  %5859 = vpow2.f32 %v1251_v39  ;;  %v5836_v40 = vpop.eup %5835  ;;  %v6742_v43 = vmul.f32 %v5834_v29, %v6528_v1 }
  0xb0   : > { %v1133_v61 = vmul.f32 %v6452_v35, %v1095_v55  ;;  %1375 = vst.msk [vmem:[#allocation2 + $0x40] sm:$0xff] %vm10131_vm0, %v6718_v37  ;;  %v1259_v5 = vmul.f32 1.442695, %v1202_v3  ;;  %1376 = vst.msk [vmem:[#allocation2 + $0x48] sm:$0xff] %vm10131_vm0, %v6729_v50  ;;  %5861 = vpow2.f32 %v1253_v26  ;;  %v5838_v45 = vpop.eup %5837  ;;  %v1518_v44 = vld [vmem:[#allocation2 + $0x28] sm:$0xff] }
  0xb1   : > { %10319 = vst [vmem:[#allocation8_spill] sm:$0xff] %v6735_v41  ;;  %v1134_v42 = vmul.f32 %v6452_v35, %v1096_v59  ;;  %10321 = vst [vmem:[#allocation9_spill] sm:$0xff] %v6742_v43  ;;  %v6750_v35 = vmul.f32 %v5836_v40, %v6539_v2  ;;  %5863 = vpow2.f32 %v1255_v38  ;;  %v5840_v54 = vpop.eup %5839  ;;  %v1519_v18 = vld [vmem:[#allocation2 + $0x30] sm:$0xff]  ;;  %v1287_v1 = vadd.f32 1.0, %v5838_v45  ;;  %v6048_v37 = vld [vmem:[%s6156_s22 + $0xe8] sm:$0xff] }
  0xb2   : > { %v6745_v49 = vadd.f32 %v6469_v11, %v1133_v61  ;;  %1377 = vst.msk [vmem:[#allocation2 + $0x50] sm:$0xff] %vm10131_vm0, %v6735_v41  ;;  %1378 = vst.msk [vmem:[#allocation2 + $0x58] sm:$0xff] %vm10131_vm0, %v6742_v43  ;;  %5865 = vpow2.f32 %v1257_v58  ;;  %v5842_v63 = vpop.eup %5841  ;;  %v1548_v62 = vpack.c.bf16 %v1519_v18, %v1518_v44  ;;  %v1516_v25 = vld [vmem:[#allocation2 + $0x18] sm:$0xff]  ;;  %v6761_v2 = vmul.f32 %v5840_v54, %v6548_v17  ;;  %v5767_v41 = vld [vmem:[%s10083_s6 + $0x8] sm:$0xff]  }
  0xb3   : > { %10322 = vst [vmem:[#allocation10_spill] sm:$0xff] %v6750_v35  ;;  %v6753_v39 = vadd.f32 %v6469_v11, %v1134_v42  ;;  %1379 = vst.msk [vmem:[#allocation2 + $0x60] sm:$0xff] %vm10131_vm0, %v6750_v35  ;;  %5867 = vpow2.f32 %v1259_v5  ;;  %v5844_v28 = vpop.eup %5843  ;;  %v6765_v32 = vmul.f32 %v5842_v63, %v6551_v31  ;;  %v1066_v52 = vsub.f32 %v6048_v37, %v6395_v48  ;;  %v6049_v37 = vld [vmem:[%s10079_s2] ss:$0 sm:$0xff] }
  0xb4   : > { %v1203_v20 = vsub.f32 0.0, %v6745_v49  ;;  %10323 = vst [vmem:[#allocation11_spill] sm:$0xff] %v6761_v2  ;;  %v1517_v30 = vld [vmem:[#allocation2 + $0x20] sm:$0xff]  ;;  %5869 = vrcp.f32 %v1287_v1  ;;  %v5846_v51 = vpop.eup %5845  ;;  %2138 = vrot.lane.b32.xlu0 %v1548_v62, %s6065_s13  ;;  %1380 = vst.msk [vmem:[#allocation2 + $0x68] sm:$0xff] %vm10131_vm0, %v6761_v2  ;;  %v6771_v17 = vmul.f32 %v5844_v28, %v6554_v47 }
  0xb5   : > { %v1204_v11 = vsub.f32 0.0, %v6753_v39  ;;  %10324 = vst [vmem:[#allocation12_spill] sm:$0xff] %v6765_v32  ;;  %v1547_v38 = vpack.c.bf16 %v1517_v30, %v1516_v25  ;;  %v1520_v56 = vld [vmem:[#allocation2 + $0x38] sm:$0xff]  ;;  %1381 = vst.msk [vmem:[#allocation2 + $0x70] sm:$0xff] %vm10131_vm0, %v6765_v32  ;;  %v6776_v31 = vmul.f32 %v5846_v51, %v6557_v0  ;;  %v10373_v32 = vmov 0  ;;  %v6047_v2 = vld [vmem:[%s6156_s22 + $0xe0] sm:$0xff] }
  0xb6   : > { %v1261_v26 = vmul.f32 1.442695, %v1203_v20  ;;  %10325 = vst [vmem:[#allocation13_spill] sm:$0xff] %v6771_v17  ;;  %v5848_v16 = vpop.eup %5847  ;;  %1382 = vst.msk [vmem:[#allocation2 + $0x78] sm:$0xff] %vm10131_vm0, %v6771_v17  ;;  %v1065_v35 = vsub.f32 %v6047_v2, %v6395_v48 }
  0xb7   : > { %v1263_v36 = vmul.f32 1.442695, %v1204_v11  ;;  %v1521_v6 = vld [vmem:[#allocation2 + $0x40] sm:$0xff]  ;;  %10326 = vst [vmem:[#allocation14_spill] sm:$0xff] %v6776_v31  ;;  %v5850_v55 = vpop.eup %5849  ;;  %1914 = vrot.lane.b32.xlu1 %v1547_v38, %s6064_s23  ;;  %v1522_v3 = vld [vmem:[#allocation2 + $0x48] sm:$0xff]  ;;  %v1288_v47 = vadd.f32 1.0, %v5848_v16 }
  0xb8   : > { %5871 = vpow2.f32 %v1261_v26  ;;  %v1549_v15 = vpack.c.bf16 %v1521_v6, %v1520_v56  ;;  %v5852_v4 = vpop.eup %5851  ;;  %1383 = vst.msk [vmem:[#allocation2 + $0x80] sm:$0xff] %vm10131_vm0, %v6776_v31  ;;  %v1289_v34 = vadd.f32 1.0, %v5850_v55  ;;  %v1097_v2 = vmul.f32 %v6447_v33, %v1065_v35 }
  0xb9   : > { %5873 = vpow2.f32 %v1263_v36  ;;  %v1523_v59 = vld [vmem:[#allocation2 + $0x50] sm:$0xff]  ;;  %v5854_v58 = vpop.eup %5853  ;;  %v1290_v61 = vadd.f32 1.0, %v5852_v4  ;;  %v1524_v5 = vld [vmem:[#allocation2 + $0x58] sm:$0xff] }
  0xba   : > { %2140 = vrot.lane.b32.xlu0 %v1549_v15, %s6065_s13  ;;  %v1550_v0 = vpack.c.bf16 %v1523_v59, %v1522_v3  ;;  %5875 = vrcp.f32 %v1288_v47  ;;  %v5856_v29 = vpop.eup %5855  ;;  %v1525_v42 = vld [vmem:[#allocation2 + $0x60] sm:$0xff]  ;;  %v1291_v40 = vadd.f32 1.0, %v5854_v58 }
  0xbb   : > { %5877 = vrcp.f32 %v1289_v34  ;;  %v5858_v45 = vpop.eup %5857  ;;  %1916 = vrot.lane.b32.xlu1 %v1548_v62, %s6064_s23  ;;  %v1292_v44 = vadd.f32 1.0, %v5856_v29  ;;  %v1551_v20 = vpack.c.bf16 %v1525_v42, %v1524_v5  ;;  %v1526_v11 = vld [vmem:[#allocation2 + $0x68] sm:$0xff] }
  0xbc   : > { %5879 = vrcp.f32 %v1290_v61  ;;  %v5860_v54 = vpop.eup %5859  ;;  %v1293_v18 = vadd.f32 1.0, %v5858_v45  ;;  %v1527_v28 = vld [vmem:[#allocation2 + $0x70] sm:$0xff] }
  0xbd   : > { %5881 = vrcp.f32 %v1291_v40  ;;  %v5862_v1 = vpop.eup %5861  ;;  %v1294_v63 = vadd.f32 1.0, %v5860_v54  ;;  %v1552_v36 = vpack.c.bf16 %v1527_v28, %v1526_v11  ;;  %v1528_v6 = vld [vmem:[#allocation2 + $0x78] sm:$0xff]  ;;  %v409_v40 = vlaneseq  ;;  %v5748_v28 = vld [vmem:[%s10081_s4 + $0x30] sm:$0xff]  }
  0xbe   : > { %2142 = vrot.lane.b32.xlu0 %v1550_v0, %s6065_s13  ;;  %5883 = vrcp.f32 %v1292_v44  ;;  %v5864_v25 = vpop.eup %5863  ;;  %v1295_v30 = vadd.f32 1.0, %v5862_v1  ;;  %v5746_v44 = vld [vmem:[%s10081_s4 + $0x38] sm:$0xff]  }
  0xbf   : > { %5885 = vrcp.f32 %v1293_v18  ;;  %v5866_v26 = vpop.eup %5865  ;;  %1918 = vrot.lane.b32.xlu1 %v1549_v15, %s6064_s23  ;;  %v1296_v62 = vadd.f32 1.0, %v5864_v25  ;;  %v1529_v55 = vld [vmem:[#allocation2 + $0x80] sm:$0xff] }
  0xc0   : > { %5887 = vrcp.f32 %v1294_v63  ;;  %v5868_v51 = vpop.eup %5867  ;;  %v1297_v38 = vadd.f32 1.0, %v5866_v26  ;;  %v1553_v59 = vpack.c.bf16 %v1529_v55, %v1528_v6  ;;  %v6835_v63 = vshrl.u32 %v409_v40, 7  ;;  %v6890_v40 = vld [vmem:[#allocation2 + $0x31] sm:$0xff] }
  0xc1   : > { %5889 = vrcp.f32 %v1295_v30  ;;  %v5870_v56 = vpop.eup %5869  ;;  %v1298_v16 = vadd.f32 1.0, %v5868_v51 }
  0xc2   : > { %2144 = vrot.lane.b32.xlu0 %v1551_v20, %s6065_s13  ;;  %5891 = vrcp.f32 %v1296_v62  ;;  %v6789_v3 = vmul.f32 %v5870_v56, %v6586_v21  ;;  %10335 = vst [vmem:[#allocation23_spill] sm:$0xff] %v6835_v63 }
  0xc3   : > { %5893 = vrcp.f32 %v1297_v38  ;;  %1920 = vrot.lane.b32.xlu1 %v1550_v0, %s6064_s23 }
  0xc4   : > { %10327 = vst [vmem:[#allocation15_spill] sm:$0xff] %v6789_v3  ;;  %5895 = vrcp.f32 %v1298_v16  ;;  %1384 = vst.msk [vmem:[#allocation2 + $0x88] sm:$0xff] %vm10131_vm0, %v6789_v3  ;;  %v10370_v3 = vmov 0 }
  0xc5   : > { %v5872_v47 = vpop.eup %5871 }
  0xc6   : > { %v5874_v15 = vpop.eup %5873  ;;  %v1299_v4 = vadd.f32 1.0, %v5872_v47  ;;  %2146 = vrot.lane.b32.xlu0 %v1552_v36, %s6065_s13 }
  0xc7   : > { %v1300_v34 = vadd.f32 1.0, %v5874_v15  ;;  %v5876_v58 = vpop.eup %5875  ;;  %1922 = vrot.lane.b32.xlu1 %v1551_v20, %s6064_s23 }
  0xc8   : > { %5897 = vrcp.f32 %v1299_v4  ;;  %v5878_v61 = vpop.eup %5877  ;;  %v6797_v21 = vmul.f32 %v5876_v58, %v6594_v53  ;;  %v5745_v53 = vld [vmem:[%s10081_s4 + $0x78] sm:$0xff]  }
  0xc9   : > { %5899 = vrcp.f32 %v1300_v34  ;;  %v5880_v0 = vpop.eup %5879  ;;  %v6800_v29 = vmul.f32 %v5878_v61, %v6600_v23  ;;  %5369 = vmatprep.subr.bf16.mxu0 %v5745_v53  ;;  %v415_v61 = vadd.s32 40, %v6835_v63  ;;  %v10345_v53 = vmov 0 }
  0xca   : > { %10328 = vst [vmem:[#allocation16_spill] sm:$0xff] %v6797_v21  ;;  %v5882_v5 = vpop.eup %5881  ;;  %2148 = vrot.lane.b32.xlu0 %v1553_v59, %s6065_s13  ;;  %1385 = vst.msk [vmem:[#allocation2 + $0x90] sm:$0xff] %vm10131_vm0, %v6797_v21  ;;  %v6806_v42 = vmul.f32 %v5880_v0, %v6604_v10  ;;  %5370 = vmatpush3.bf16.msra.mxu0 %v5746_v44  ;;  %v6898_v44 = vld [vmem:[#allocation2 + $0x29] sm:$0xff]  ;;  %v7075_v21 = vld [vmem:[#allocation2 + $0x37] sm:$0xff] }
  0xcb   : > { %10329 = vst [vmem:[#allocation17_spill] sm:$0xff] %v6800_v29  ;;  %v5884_v45 = vpop.eup %5883  ;;  %1386 = vst.msk [vmem:[#allocation2 + $0x98] sm:$0xff] %vm10131_vm0, %v6800_v29  ;;  %v6814_v23 = vmul.f32 %v5882_v5, %v6614_v57  ;;  %1924 = vrot.lane.b32.xlu1 %v1552_v36, %s6064_s23  ;;  %v1530_v11 = vld [vmem:[#allocation2 + $0x88] sm:$0xff]  ;;  %v413_v36 = vadd.s32 24, %v6835_v63  ;;  %v10342_v5 = vmov 0  ;;  %v5765_v29 = vld [vmem:[%s10081_s4 + $0x40] sm:$0xff]  }
  0xcc   : > { %10330 = vst [vmem:[#allocation18_spill] sm:$0xff] %v6806_v42  ;;  %v5886_v54 = vpop.eup %5885  ;;  %1387 = vst.msk [vmem:[#allocation2 + $0xa0] sm:$0xff] %vm10131_vm0, %v6806_v42  ;;  %v6823_v10 = vmul.f32 %v5884_v45, %v6619_v60  ;;  %v5747_v60 = vld [vmem:[%s10081_s4 + $0x70] sm:$0xff]   ;;  %v6896_v45 = vld [vmem:[#allocation2 + $0x41] sm:$0xff] }
  0xcd   : > { %10331 = vst [vmem:[#allocation19_spill] sm:$0xff] %v6814_v23  ;;  %v5888_v18 = vpop.eup %5887  ;;  %1388 = vst.msk [vmem:[#allocation2 + $0xa8] sm:$0xff] %vm10131_vm0, %v6814_v23  ;;  %v6828_v57 = vmul.f32 %v5886_v54, %v6638_v27  ;;  %5371 = vmatprep.subr.bf16.mxu0 %v5747_v60  ;;  %v467_v34 = vand.u32 15, %v413_v36  ;;  %v5753_v36 = vld [vmem:[%s10081_s4 + $0x60] sm:$0xff]  }
  0xce   : > { %10332 = vst [vmem:[#allocation20_spill] sm:$0xff] %v6823_v10  ;;  %v5890_v1 = vpop.eup %5889  ;;  %1389 = vst.msk [vmem:[#allocation2 + $0xb0] sm:$0xff] %vm10131_vm0, %v6823_v10  ;;  %v6833_v20 = vmul.f32 %v5888_v18, %v6649_v24  ;;  %5372 = vmatpush3.bf16.msra.mxu0 %v5748_v28  ;;  %v7056_v10 = vld [vmem:[#allocation2 + $0x79] sm:$0xff] }
  0xcf   : > { %10333 = vst [vmem:[#allocation21_spill] sm:$0xff] %v6828_v57  ;;  %v5892_v25 = vpop.eup %5891  ;;  %1390 = vst.msk [vmem:[#allocation2 + $0xb8] sm:$0xff] %vm10131_vm0, %v6828_v57  ;;  %v6843_v27 = vmul.f32 %v5890_v1, %v6660_v9  ;;  %1926 = vrot.lane.b32.xlu1 %v1553_v59, %s6064_s23  ;;  %vm6892_vm2 = vcmp.le.s32.totalorder %v467_v34, 14  ;;  %v6941_v34 = vld [vmem:[#allocation2 + $0x61] sm:$0xff]  ;;  %v7031_v57 = vld [vmem:[#allocation2 + $0x17] sm:$0xff] }
  0xd0   : > { %10334 = vst [vmem:[#allocation22_spill] sm:$0xff] %v6833_v20  ;;  %v5894_v24 = vpop.eup %5893  ;;  %1391 = vst.msk [vmem:[#allocation2 + $0xc0] sm:$0xff] %vm10131_vm0, %v6833_v20  ;;  %v6852_v30 = vmul.f32 %v5892_v25, %v6663_v22  ;;  %v411_v22 = vadd.s32 8, %v6835_v63  ;;  %v10346_v53 = vsel %vm6892_vm2, 4294967295, %v10345_v53  ;;  %v1851_v18 = vsel %vm6892_vm2, %v6896_v45, 0.0  ;;  %v7064_v42 = vld [vmem:[#allocation2 + $0x1f] sm:$0xff] }
  0xd1   : > { %10336 = vst [vmem:[#allocation24_spill] sm:$0xff] %v6843_v27  ;;  %v5896_v26 = vpop.eup %5895  ;;  %v1531_v62 = vld [vmem:[#allocation2 + $0x90] sm:$0xff]  ;;  %1392 = vst.msk [vmem:[#allocation2 + $0xc8] sm:$0xff] %vm10131_vm0, %v6843_v27  ;;  %v6857_v9 = vmul.f32 %v5894_v24, %v6690_v12  ;;  %v481_v25 = vand.u32 15, %v415_v61  ;;  %v5750_v24 = vld [vmem:[%s10081_s4 + $0x68] sm:$0xff]   ;;  %v10361_v20 = vmov 0 }
  0xd2   : > { %10337 = vst [vmem:[#allocation25_spill] sm:$0xff] %v6852_v30  ;;  %v1554_v51 = vpack.c.bf16 %v1531_v62, %v1530_v11  ;;  %v1532_v38 = vld [vmem:[#allocation2 + $0x98] sm:$0xff]  ;;  %1393 = vst.msk [vmem:[#allocation2 + $0xd0] sm:$0xff] %vm10131_vm0, %v6852_v30  ;;  %v6862_v56 = vmul.f32 %v5896_v26, %v6699_v13  ;;  %v453_v59 = vand.u32 15, %v411_v22  ;;  %v419_v62 = vadd.s32 72, %v6835_v63  ;;  %v5751_v22 = vld [vmem:[%s10081_s4 + $0x28] sm:$0xff]   ;;  %5373 = vmatprep.subr.bf16.mxu0 %v5750_v24 }
  0xd3   : > { %10338 = vst [vmem:[#allocation26_spill] sm:$0xff] %v6857_v9  ;;  %v1533_v16 = vld [vmem:[#allocation2 + $0xa0] sm:$0xff]  ;;  %1394 = vst.msk [vmem:[#allocation2 + $0xd8] sm:$0xff] %vm10131_vm0, %v6857_v9  ;;  %5374 = vmatpush3.bf16.msra.mxu0 %v5751_v22  ;;  %vm6931_vm3 = vcmp.le.s32.totalorder %v481_v25, 14  ;;  %v5752_v24 = vld [vmem:[%s10083_s6 + $0x30] sm:$0xff]   ;;  %v1745_v23 = vsel %vm6892_vm2, %v6890_v40, 0.0 }
  0xd4   : > { %10339 = vst [vmem:[#allocation27_spill] sm:$0xff] %v6862_v56  ;;  %2150 = vrot.lane.b32.xlu0 %v1554_v51, %s6065_s13  ;;  %v1555_v12 = vpack.c.bf16 %v1533_v16, %v1532_v38  ;;  %1928 = vrot.lane.b32.xlu1 %v1554_v51, %s6064_s23  ;;  %1395 = vst.msk [vmem:[#allocation2 + $0xe0] sm:$0xff] %vm10131_vm0, %v6862_v56  ;;  %v1534_v13 = vld [vmem:[#allocation2 + $0xa8] sm:$0xff]  ;;  %vm6886_vm1 = vcmp.le.s32.totalorder %v453_v59, 14  ;;  %v6908_v11 = vld [vmem:[#allocation2 + $0x39] sm:$0xff]  ;;  %v446_v16 = vand.u32 15, %v6835_v63 }
  0xd5   : > { %v5898_v6 = vpop.eup %5897  ;;  %v1535_v47 = vld [vmem:[#allocation2 + $0xb0] sm:$0xff]  ;;  %v10343_v5 = vsel %vm6886_vm1, 4294967295, %v10342_v5  ;;  %10347 = vst [vmem:[#allocation31_spill] sm:$0xff] %v10346_v53  ;;  %v1849_v54 = vsel %vm6886_vm1, %v6890_v40, 0.0  ;;  %v1881_v38 = vpack.c.bf16 %v1851_v18, %v6908_v11  ;;  %v10351_v59 = vmov 0  ;;  %5375 = vmatprep.subr.bf16.mxu0 %v5753_v36  ;;  %v5756_v18 = vld [vmem:[%s10081_s4 + $0x58] sm:$0xff]  }
  0xd6   : > { %v5900_v55 = vpop.eup %5899  ;;  %v6873_v15 = vmul.f32 %v5898_v6, %v6745_v49  ;;  %v1556_v58 = vpack.c.bf16 %v1535_v47, %v1534_v13  ;;  %v417_v49 = vadd.s32 56, %v6835_v63  ;;  %v1536_v0 = vld [vmem:[#allocation2 + $0xb8] sm:$0xff]  ;;  %10344 = vst [vmem:[#allocation30_spill] sm:$0xff] %v10343_v5  ;;  %v1880_v51 = vpack.c.bf16 %v1849_v54, %v6898_v44  ;;  %v6995_v9 = vld [vmem:[#allocation2 + $0x69] sm:$0xff]  ;;  %10364 = vst [vmem:[#allocation38_spill] sm:$0xff] %v7031_v57 }
  0xd7   : > { %v6876_v4 = vmul.f32 %v5900_v55, %v6753_v39  ;;  %v1537_v39 = vld [vmem:[#allocation2 + $0xc0] sm:$0xff]  ;;  %v5749_v6 = vld [vmem:[%s10083_s6 + $0x38] sm:$0xff]   ;;  %v10348_v13 = vmov 0  ;;  %vm6956_vm5 = vcmp.ge.s32.totalorder %v446_v16, 1  ;;  %v412_v56 = vadd.s32 16, %v6835_v63  ;;  %10368 = vst [vmem:[#allocation40_spill] sm:$0xff] %v7064_v42 }
  0xd8   : > { %10340 = vst [vmem:[#allocation28_spill] sm:$0xff] %v6873_v15  ;;  %1396 = vst.msk [vmem:[#allocation2 + $0xe8] sm:$0xff] %vm10131_vm0, %v6873_v15  ;;  %2152 = vrot.lane.b32.xlu0 %v1555_v12, %s6065_s13  ;;  %1930 = vrot.lane.b32.xlu1 %v1555_v12, %s6064_s23  ;;  %v1557_v1 = vpack.c.bf16 %v1537_v39, %v1536_v0  ;;  %v1538_v60 = vld [vmem:[#allocation2 + $0xc8] sm:$0xff]  ;;  %v495_v28 = vand.u32 15, %v417_v49  ;;  %v10349_v13 = vsel %vm6931_vm3, 4294967295, %v10348_v13  ;;  %v6935_v47 = vld [vmem:[#allocation2 + $0x51] sm:$0xff] }
  0xd9   : > { %10341 = vst [vmem:[#allocation29_spill] sm:$0xff] %v6876_v4  ;;  %1397 = vst.msk [vmem:[#allocation2 + $0xf0] sm:$0xff] %vm10131_vm0, %v6876_v4  ;;  %v1539_v26 = vld [vmem:[#allocation2 + $0xd0] sm:$0xff]  ;;  %5642 = vmatprep.mubr.msk.bf16.mxu1 %vm10131_vm0, %v1880_v51  ;;  %v509_v0 = vand.u32 15, %v419_v62  ;;  %v421_v39 = vadd.s32 88, %v6835_v63  ;;  %v1853_v54 = vsel %vm6931_vm3, %v6935_v47, 0.0 }
  0xda   : > { %v6926_v12 = vld [vmem:[#allocation2 + $0x49] sm:$0xff]  ;;  %v1558_v55 = vpack.c.bf16 %v1539_v26, %v1538_v60  ;;  %10350 = vst [vmem:[#allocation32_spill] sm:$0xff] %v10349_v13  ;;  %vm6937_vm4 = vcmp.le.s32.totalorder %v495_v28, 14  ;;  %v1540_v61 = vld [vmem:[#allocation2 + $0xd8] sm:$0xff]  ;;  %5643 = vmatmul.mubr.msk.bf16.vlgmr.msra.gmra.mxu1 %vm10131_vm0, %v1881_v38  ;;  %v10354_v60 = vmov 0  ;;  %v423_v62 = vadd.s32 104, %v6835_v63 }
  0xdb   : > { %v10352_v59 = vsel %vm6937_vm4, 4294967295, %v10351_v59  ;;  %v1541_v49 = vld [vmem:[#allocation2 + $0xe0] sm:$0xff]  ;;  %v10355_v60 = vsel %vm6956_vm5, 4294967295, %v10354_v60  ;;  %v1882_v25 = vpack.c.bf16 %v1853_v54, %v6926_v12  ;;  %v1855_v28 = vsel %vm6937_vm4, %v6941_v34, 0.0  ;;  %5675 = vmatpush3.bf16.msra.mxu1 %v5749_v6  ;;  %v6967_v26 = vld [vmem:[#allocation2 + $0x2f] sm:$0xff]  ;;  %v5757_v51 = vld [vmem:[%s10081_s4 + $0x18] sm:$0xff]  }
  0xdc   : > { %2154 = vrot.lane.b32.xlu0 %v1556_v58, %s6065_s13  ;;  %1932 = vrot.lane.b32.xlu1 %v1556_v58, %s6064_s23  ;;  %10353 = vst [vmem:[#allocation33_spill] sm:$0xff] %v10352_v59  ;;  %v5754_v58 = vld [vmem:[%s10081_s4 + $0x20] sm:$0xff]   ;;  %10356 = vst [vmem:[#allocation34_spill] sm:$0xff] %v10355_v60  ;;  %v1559_v38 = vpack.c.bf16 %v1541_v49, %v1540_v61  ;;  %v1563_v22 = vld [vmem:[#allocation2 + $0x11] sm:$0xff]  ;;  %vm6983_vm6 = vcmp.le.s32.totalorder %v509_v0, 14  ;;  %v10357_v4 = vmov 0 }
  0xdd   : > { %5676 = vmatprep.subr.bf16.mxu1 %v10320_v19  ;;  %5376 = vmatpush3.bf16.msra.mxu0 %v5754_v58  ;;  %v6976_v36 = vld [vmem:[#allocation2 + $0x59] sm:$0xff]  ;;  %v6978_v16 = vld [vmem:[#allocation2 + $0x71] sm:$0xff]  ;;  %v10358_v4 = vsel %vm6983_vm6, 4294967295, %v10357_v4  ;;  %v523_v15 = vand.u32 15, %v421_v39  ;;  %v6992_v49 = vld [vmem:[#allocation2 + $0x21] sm:$0xff]  ;;  %v414_v5 = vadd.s32 32, %v6835_v63 }
  0xde   : > { %10359 = vst [vmem:[#allocation35_spill] sm:$0xff] %v10358_v4  ;;  %5646 = vmatprep.mubr.msk.bf16.mxu1 %vm10131_vm0, %v1882_v25  ;;  %5377 = vmatprep.subr.bf16.mxu0 %v5756_v18  ;;  %v5759_v61 = vld [vmem:[%s10081_s4 + $0x50] sm:$0xff]   ;;  %v1857_v0 = vsel %vm6983_vm6, %v6978_v16, 0.0  ;;  %v5755_v39 = vld [vmem:[%s10083_s6 + $0x28] sm:$0xff]   ;;  %v537_v18 = vand.u32 15, %v423_v62  ;;  %10369 = vst [vmem:[#allocation41_spill] sm:$0xff] %v7075_v21 }
  0xdf   : > { %v1542_v6 = vld [vmem:[#allocation2 + $0xe8] sm:$0xff]  ;;  %5677 = vmatpush3.bf16.msra.mxu1 %v5752_v24  ;;  %v1884_v25 = vpack.c.bf16 %v1857_v0, %v6995_v9  ;;  %v7012_v24 = vld [vmem:[#allocation2 + $0x19] sm:$0xff]  ;;  %v1743_v0 = vsel %vm6886_vm1, %v6992_v49, 0.0  ;;  %vm7020_vm7 = vcmp.le.s32.totalorder %v523_v15, 14  ;;  %v439_v59 = vadd.s32 232, %v6835_v63 }
  0xe0   : > { %2156 = vrot.lane.b32.xlu0 %v1557_v1, %s6065_s13  ;;  %1934 = vrot.lane.b32.xlu1 %v1557_v1, %s6064_s23  ;;  %v6954_v1 = vld [vmem:[#allocation2 + $0x27] sm:$0xff]  ;;  %v1543_v54 = vld [vmem:[#allocation2 + $0xf0] sm:$0xff]  ;;  %v10362_v20 = vsel %vm7020_vm7, 4294967295, %v10361_v20  ;;  %vm7041_vm8 = vcmp.le.s32.totalorder %v537_v18, 14  ;;  %v7136_v53 = vld [vmem:[#allocation2 + $0x99] sm:$0xff] }
  0xe1   : > { %v1792_v58 = vsel %vm6956_vm5, %v6954_v1, 0.0  ;;  %5678 = vmatprep.subr.bf16.mxu1 %v10320_v19  ;;  %5378 = vmatpush3.bf16.msra.mxu0 %v5757_v51  ;;  %v7009_v30 = vpack.c.bf16 %v1543_v54, %v1542_v6  ;;  %v1562_v62 = vld [vmem:[#allocation2 + $0x9] sm:$0xff]  ;;  %v1627_v51 = vsel %vm6886_vm1, %v1563_v22, 0.0  ;;  %10363 = vst [vmem:[#allocation37_spill] sm:$0xff] %v10362_v20  ;;  %v7024_v6 = vld [vmem:[#allocation2 + $0x81] sm:$0xff]  ;;  %v427_v22 = vadd.s32 136, %v6835_v63 }
  0xe2   : > { %v1824_v27 = vpack.c.bf16 %v6967_v26, %v1792_v58  ;;  %5379 = vmatprep.subr.bf16.mxu0 %v5759_v61  ;;  %v5762_v54 = vld [vmem:[%s10081_s4 + $0x48] sm:$0xff]   ;;  %v460_v58 = vand.u32 15, %v412_v56  ;;  %v1859_v15 = vsel %vm7020_vm7, %v7024_v6, 0.0  ;;  %v10365_v61 = vmov 0  ;;  %v7045_v56 = vld [vmem:[#allocation2 + $0x91] sm:$0xff] }
  0xe3   : > { %10360 = vst [vmem:[#allocation36_spill] sm:$0xff] %v7009_v30  ;;  %5679 = vmatpush3.bf16.msra.mxu1 %v5755_v39  ;;  %v10366_v61 = vsel %vm7041_vm8, 4294967295, %v10365_v61  ;;  %v1774_v39 = vpack.c.bf16 %v1743_v0, %v7012_v24  ;;  %v1658_v18 = vpack.c.bf16 %v1627_v51, %v1562_v62  ;;  %v1676_v0 = vsel %vm6956_vm5, %v7031_v57, 0.0  ;;  %v7069_v62 = vld [vmem:[#allocation2 + $0x89] sm:$0xff] }
  0xe4   : > { %2158 = vrot.lane.b32.xlu0 %v1558_v55, %s6065_s13  ;;  %1936 = vrot.lane.b32.xlu1 %v1558_v55, %s6064_s23  ;;  %v1883_v55 = vpack.c.bf16 %v1855_v28, %v6976_v36  ;;  %v5760_v28 = vld [vmem:[%s10081_s4 + $0x10] sm:$0xff]   ;;  %10367 = vst [vmem:[#allocation39_spill] sm:$0xff] %v10366_v61  ;;  %v1885_v51 = vpack.c.bf16 %v1859_v15, %v7056_v10  ;;  %vm7077_vm9 = vcmp.ge.s32.totalorder %v460_v58, 1  ;;  %v565_v31 = vand.u32 15, %v427_v22 }
  0xe5   : > { %5680 = vmatprep.subr.bf16.mxu1 %v10320_v19  ;;  %5380 = vmatpush3.bf16.msra.mxu0 %v5760_v28  ;;  %v1861_v28 = vsel %vm7041_vm8, %v7045_v56, 0.0  ;;  %v10371_v3 = vsel %vm7077_vm9, 4294967295, %v10370_v3  ;;  %v1775_v58 = vpack.c.bf16 %v1745_v23, %v6898_v44  ;;  %v1708_v22 = vpack.c.bf16 %v7064_v42, %v1676_v0  ;;  %v7105_v23 = vld [vmem:[#allocation2 + $0xa1] sm:$0xff]  ;;  %v7221_v42 = vld [vmem:[#allocation2 + $0x57] sm:$0xff] }
  0xe6   : > { %5647 = vmatmul.mubr.msk.bf16.gmra.mxu1 %vm10131_vm0, %v1883_v55  ;;  %v5758_v55 = vld [vmem:[%s10083_s6 + $0x20] sm:$0xff]   ;;  %5381 = vmatprep.subr.bf16.mxu0 %v5762_v54  ;;  %10372 = vst [vmem:[#allocation42_spill] sm:$0xff] %v10371_v3  ;;  %v1886_v17 = vpack.c.bf16 %v1861_v28, %v7069_v62  ;;  %v474_v15 = vand.u32 15, %v414_v5  ;;  %v1794_v28 = vsel %vm7077_vm9, %v7075_v21, 0.0  ;;  %vm7109_vm11 = vcmp.le.s32.totalorder %v565_v31, 14  ;;  %v7226_v3 = vld [vmem:[#allocation2 + $0xc9] sm:$0xff] }
  0xe7   : > { %5650 = vmatprep.mubr.msk.bf16.mxu1 %vm10131_vm0, %v1884_v25  ;;  %v5763_v25 = vld [vmem:[%s10081_s4 + $0x8] sm:$0xff]   ;;  %5681 = vmatpush3.bf16.msra.mxu1 %v5758_v55  ;;  %v5766_v54 = vld [vmem:[%s10081_s4] sm:$0xff]   ;;  %v10376_v5 = vmov 0  ;;  %v416_v31 = vadd.s32 48, %v6835_v63 }
  0xe8   : > { %2160 = vrot.lane.b32.xlu0 %v1559_v38, %s6065_s13  ;;  %1938 = vrot.lane.b32.xlu1 %v1559_v38, %s6064_s23  ;;  %v425_v38 = vadd.s32 120, %v6835_v63  ;;  %v7093_v55 = vld [vmem:[#allocation2 + $0x3f] sm:$0xff]  ;;  %v10377_v5 = vsel %vm7109_vm11, 4294967295, %v10376_v5  ;;  %vm7132_vm12 = vcmp.ge.s32.totalorder %v474_v15, 1  ;;  %v7148_v15 = vld [vmem:[#allocation2 + $0xa9] sm:$0xff] }
  0xe9   : > { %5682 = vmatprep.subr.bf16.mxu1 %v10320_v19  ;;  %5382 = vmatpush3.bf16.msra.mxu0 %v5763_v25  ;;  %v1629_v25 = vsel %vm6892_vm2, %v6992_v49, 0.0  ;;  %10378 = vst [vmem:[#allocation44_spill] sm:$0xff] %v10377_v5  ;;  %v431_v49 = vadd.s32 168, %v6835_v63  ;;  %v488_v50 = vand.u32 15, %v416_v31  ;;  %v10382_v31 = vmov 0 }
  0xea   : > { %5383 = vmatprep.subr.bf16.mxu0 %v5765_v29  ;;  %v5764_v29 = vld [vmem:[%s10083_s6 + $0x10] sm:$0xff]  }
  0xeb   : > { %vm7202_vm15 = vcmp.ge.s32.totalorder %v488_v50, 1 }
  0xec   : > { %2162 = vrot.lane.b32.xlu0 %v7009_v30, %s6065_s13  ;;  %2104 = vrot.lane.b32.xlu1 %v1824_v27, %s6066_s29  ;;  %v551_v27 = vand.u32 15, %v425_v38  ;;  %v5761_v38 = vld [vmem:[%s10083_s6 + $0x18] sm:$0xff]  }
  0xed   : > { %5683 = vmatpush3.bf16.msra.mxu1 %v5761_v38  ;;  %5384 = vmatpush3.bf16.msra.mxu0 %v5766_v54  ;;  %v10379_v38 = vmov 0  ;;  %v1747_v54 = vsel %vm6931_vm3, %v6896_v45, 0.0 }
  0xee   : > { %vm7101_vm10 = vcmp.le.s32.totalorder %v551_v27, 14  ;;  %5651 = vmatmul.mubr.msk.bf16.gmra.mxu1 %vm10131_vm0, %v1885_v51  ;;  %5684 = vmatprep.subr.bf16.mxu1 %v10320_v19  ;;  %v1659_v51 = vpack.c.bf16 %v1629_v25, %v7012_v24  ;;  %v10380_v38 = vsel %vm7132_vm12, 4294967295, %v10379_v38  ;;  %v1678_v24 = vsel %vm7077_vm9, %v6954_v1, 0.0 }
  0xef   : > { %v10374_v32 = vsel %vm7101_vm10, 4294967295, %v10373_v32  ;;  %5654 = vmatprep.mubr.msk.bf16.mxu1 %vm10131_vm0, %v1886_v17  ;;  %v1863_v0 = vsel %vm7101_vm10, %v7105_v23, 0.0  ;;  %v1825_v17 = vpack.c.bf16 %v7093_v55, %v1794_v28  ;;  %10381 = vst [vmem:[#allocation45_spill] sm:$0xff] %v10380_v38  ;;  %v593_v25 = vand.u32 15, %v431_v49 }
  0xf0   : > { %2056 = vrot.lane.b32.xlu0 %v1774_v39, %s6064_s23  ;;  %1960 = vrot.lane.b32.xlu1 %v1658_v18, %s6066_s29  ;;  %10375 = vst [vmem:[#allocation43_spill] sm:$0xff] %v10374_v32  ;;  %v429_v39 = vadd.s32 152, %v6835_v63  ;;  %v7113_v18 = vld [vmem:[#allocation2 + $0xb1] sm:$0xff]  ;;  %v1887_v28 = vpack.c.bf16 %v1863_v0, %v7136_v53  ;;  %v1776_v1 = vpack.c.bf16 %v1747_v54, %v6908_v11 }
  0xf1   : > { %v1865_v27 = vsel %vm7109_vm11, %v7113_v18, 0.0  ;;  %5685 = vmatpush3.bf16.msra.mxu1 %v5764_v29  ;;  %v1709_v49 = vpack.c.bf16 %v6967_v26, %v1678_v24  ;;  %v1135_v0 = vmul.f32 %v6049_v37, %v1097_v2  ;;  %v1631_v29 = vsel %vm6931_vm3, %v6890_v40, 0.0  ;;  %v7187_v54 = vld [vmem:[#allocation2 + $0xd1] sm:$0xff]  ;;  %v6050_v24 = vld [vmem:[%s10080_s3] ss:$0 sm:$0xff] }
  0xf2   : > { %v1888_v43 = vpack.c.bf16 %v1865_v27, %v7148_v15  ;;  %5686 = vmatprep.subr.bf16.mxu1 %v10320_v19  ;;  %v7178_v27 = vld [vmem:[#allocation2 + $0xc1] sm:$0xff]  ;;  %v1098_v26 = vmul.f32 %v6447_v33, %v1066_v52  ;;  %vm7183_vm14 = vcmp.le.s32.totalorder %v593_v25, 14  ;;  %v1660_v50 = vpack.c.bf16 %v1631_v29, %v6898_v44 }
  0xf3   : > { %v5768_v52 = vld [vmem:[%s10083_s6] sm:$0xff]   ;;  %v1869_v2 = vsel %vm7183_vm14, %v7187_v54, 0.0  ;;  %v418_v29 = vadd.s32 64, %v6835_v63  ;;  %vm10395_vm3 = vcmask 261120  }
  0xf4   : > { %2058 = vrot.lane.b32.xlu0 %v1775_v58, %s6064_s23  ;;  %2008 = vrot.lane.b32.xlu1 %v1708_v22, %s6065_s13  ;;  %v7143_v58 = vld [vmem:[#allocation2 + $0x47] sm:$0xff]  ;;  %v579_v22 = vand.u32 15, %v429_v39  ;;  %v7162_v39 = vld [vmem:[#allocation2 + $0x4f] sm:$0xff]  ;;  %v1136_v25 = vmul.f32 %v6049_v37, %v1098_v26  ;;  %v1890_v46 = vpack.c.bf16 %v1869_v2, %v7226_v3  ;;  %v1633_v2 = vsel %vm6937_vm4, %v6896_v45, 0.0  ;;  %vm10396_vm2 = vmmov %vm10395_vm3 }
  0xf5   : > { %v1796_v35 = vsel %vm7132_vm12, %v7143_v58, 0.0  ;;  %5687 = vmatpush3.bf16.msra.mxu1 %v5767_v41  ;;  %v1749_v41 = vsel %vm6937_vm4, %v6935_v47, 0.0  ;;  %v6051_v26 = vld [vmem:[%s6156_s22 + $0xf0] sm:$0xff] }
  0xf6   : > { %vm7174_vm13 = vcmp.le.s32.totalorder %v579_v22, 14  ;;  %5655 = vmatmul.mubr.msk.bf16.gmra.mxu1 %vm10131_vm0, %v1887_v28  ;;  %v7196_v22 = vadd.f32 %v6050_v24, %v1135_v0  ;;  %v1826_v28 = vpack.c.bf16 %v7162_v39, %v1796_v35  ;;  %5688 = vmatprep.subr.bf16.mxu1 %v10320_v19  ;;  %v7216_v35 = vld [vmem:[#allocation2 + $0xb9] sm:$0xff]  ;;  %v1067_v13 = vsub.f32 %v6051_v26, %v6395_v48 }
  0xf7   : > { %v10383_v31 = vsel %vm7174_vm13, 4294967295, %v10382_v31  ;;  %5658 = vmatprep.mubr.msk.bf16.mxu1 %vm10131_vm0, %v1888_v43  ;;  %v1867_v40 = vsel %vm7174_vm13, %v7178_v27, 0.0  ;;  %v10388_v43 = vmov 0  ;;  %v7229_v44 = vadd.f32 %v6050_v24, %v1136_v25 }
  0xf8   : > { %2106 = vrot.lane.b32.xlu0 %v1825_v17, %s6066_s29  ;;  %1962 = vrot.lane.b32.xlu1 %v1659_v51, %s6066_s29  ;;  %10384 = vst [vmem:[#allocation46_spill] sm:$0xff] %v10383_v31  ;;  %v433_v17 = vadd.s32 184, %v6835_v63  ;;  %v10385_v51 = vmov 0  ;;  %v10389_v43 = vsel %vm7202_vm15, 4294967295, %v10388_v43  ;;  %v1205_v0 = vsub.f32 0.0, %v7196_v22 }
  0xf9   : > { %v10386_v51 = vsel %vm7183_vm14, 4294967295, %v10385_v51  ;;  %10390 = vst [vmem:[#allocation48_spill] sm:$0xff] %v10389_v43  ;;  %v1889_v57 = vpack.c.bf16 %v1867_v40, %v7216_v35  ;;  %v1099_v26 = vmul.f32 %v6447_v33, %v1067_v13  ;;  %5689 = vmatpush3.bf16.msra.mxu1 %v5768_v52  ;;  %v1777_v30 = vpack.c.bf16 %v1749_v41, %v6926_v12  ;;  %v7244_v52 = vld [vmem:[#allocation2 + $0x5f] sm:$0xff] }
  0xfa   : > { %10387 = vst [vmem:[#allocation47_spill] sm:$0xff] %v10386_v51  ;;  %v1265_v8 = vmul.f32 1.442695, %v1205_v0  ;;  %v1206_v38 = vsub.f32 0.0, %v7229_v44  ;;  %v1798_v40 = vsel %vm7202_vm15, %v7221_v42, 0.0  ;;  %10391 = vst [vmem:[#allocation49_spill] sm:$0xff] %v7244_v52 }
  0xfb   : > { %v1137_v13 = vmul.f32 %v6049_v37, %v1099_v26  ;;  %v420_v26 = vadd.s32 80, %v6835_v63  ;;  %v7596_v51 = vld [vmem:[#allocation2 + $0xdf] sm:$0xff] }
  0xfc   : > { %2060 = vrot.lane.b32.xlu0 %v1776_v1, %s6064_s23  ;;  %2010 = vrot.lane.b32.xlu1 %v1709_v49, %s6065_s13  ;;  %v1680_v1 = vsel %vm7132_vm12, %v7075_v21, 0.0  ;;  %v607_v49 = vand.u32 15, %v433_v17  ;;  %v6052_v21 = vld [vmem:[%s6156_s22 + $0xf8] sm:$0xff]  ;;  %5901 = vpow2.f32 %v1265_v8  ;;  %10457 = vst [vmem:[#allocation81_spill] sm:$0xff] %v7596_v51 }
  0xfd   : > { %v1068_v17 = vsub.f32 %v6052_v21, %v6395_v48  ;;  %v1710_v25 = vpack.c.bf16 %v7093_v55, %v1680_v1  ;;  %v10392_v48 = vmov 0  ;;  %v7253_v21 = vld [vmem:[#allocation2 + $0xe1] sm:$0xff]  ;;  %v7261_v0 = vadd.f32 %v6050_v24, %v1137_v13  ;;  %v7291_v13 = vld [vmem:[#allocation2 + $0x6f] sm:$0xff] }
  0xfe   : > { %vm7249_vm0 = vcmp.le.s32.totalorder %v607_v49, 14  ;;  %5659 = vmatmul.mubr.msk.bf16.gmra.mxu1 %vm10395_vm3, %v1889_v57  ;;  %v1827_v1 = vpack.c.bf16 %v7244_v52, %v1798_v40  ;;  %v1661_v57 = vpack.c.bf16 %v1633_v2, %v6908_v11  ;;  %v10398_v11 = vmov 0  ;;  %10401 = vst [vmem:[#allocation53_spill] sm:$0xff] %v7291_v13 }
  0xff   : > { %v10393_v48 = vsel %vm7249_vm0, 4294967295, %v10392_v48  ;;  %v1100_v41 = vmul.f32 %v6447_v33, %v1068_v17  ;;  %5662 = vmatprep.mubr.msk.bf16.mxu1 %vm10396_vm2, %v1890_v46  ;;  %v1871_v8 = vsel %vm7249_vm0, %v7253_v21, 0.0  ;;  %v7267_v33 = vld [vmem:[#allocation2 + $0xd9] sm:$0xff]  ;;  %v1207_v46 = vsub.f32 0.0, %v7261_v0 }
 0x100   : > { %2108 = vrot.lane.b32.xlu0 %v1826_v28, %s6066_s29  ;;  %1964 = vrot.lane.b32.xlu1 %v1660_v50, %s6066_s29  ;;  %10394 = vst [vmem:[#allocation50_spill] sm:$0xff] %v10393_v48  ;;  %v1267_v28 = vmul.f32 1.442695, %v1206_v38  ;;  %v502_v50 = vand.u32 15, %v418_v29  ;;  %v1751_v38 = vsel %vm6983_vm6, %v6941_v34, 0.0  ;;  %v7279_v29 = vld [vmem:[#allocation2 + $0x67] sm:$0xff] }
 0x101   : > { %v1138_v45 = vmul.f32 %v6049_v37, %v1100_v41  ;;  %v1682_v37 = vsel %vm7202_vm15, %v7143_v58, 0.0  ;;  %10397 = vst [vmem:[#allocation51_spill] sm:$0xff] %v7279_v29  ;;  %v1269_v17 = vmul.f32 1.442695, %v1207_v46  ;;  %v7310_v46 = vld [vmem:[#allocation2 + $0x77] sm:$0xff] }
 0x102   : > { %5903 = vpow2.f32 %v1267_v28  ;;  %vm7281_vm2 = vcmp.ge.s32.totalorder %v502_v50, 1  ;;  %v1635_v28 = vsel %vm6983_vm6, %v6935_v47, 0.0  ;;  %v516_v50 = vand.u32 15, %v420_v26  ;;  %10402 = vst [vmem:[#allocation54_spill] sm:$0xff] %v7310_v46 }
 0x103   : > { %v7277_v49 = vadd.f32 %v6050_v24, %v1138_v45  ;;  %v10399_v11 = vsel %vm7281_vm2, 4294967295, %v10398_v11  ;;  %v1711_v24 = vpack.c.bf16 %v7162_v39, %v1682_v37  ;;  %5905 = vpow2.f32 %v1269_v17 }
 0x104   : > { %2062 = vrot.lane.b32.xlu0 %v1777_v30, %s6064_s23  ;;  %2012 = vrot.lane.b32.xlu1 %v1710_v25, %s6065_s13  ;;  %v1891_v30 = vpack.c.bf16 %v1871_v8, %v7267_v33  ;;  %10400 = vst [vmem:[#allocation52_spill] sm:$0xff] %v10399_v11  ;;  %v1778_v25 = vpack.c.bf16 %v1751_v38, %v6976_v36  ;;  %v1800_v2 = vsel %vm7281_vm2, %v7279_v29, 0.0  ;;  %v1684_v47 = vsel %vm7281_vm2, %v7221_v42, 0.0 }
 0x105   : > { %v1208_v40 = vsub.f32 0.0, %v7277_v49  ;;  %v1828_v8 = vpack.c.bf16 %v7291_v13, %v1800_v2  ;;  %v1662_v45 = vpack.c.bf16 %v1635_v28, %v6926_v12  ;;  %v10403_v38 = vmov 0 }
 0x106   : > { %5663 = vmatmul.mubr.msk.bf16.gmra.mxu1 %vm10395_vm3, %v1891_v30  ;;  %vm7312_vm3 = vcmp.ge.s32.totalorder %v516_v50, 1  ;;  %v422_v37 = vadd.s32 96, %v6835_v63  ;;  %v1712_v17 = vpack.c.bf16 %v7244_v52, %v1684_v47  ;;  %v424_v47 = vadd.s32 112, %v6835_v63 }
 0x107   : > { %v1271_v41 = vmul.f32 1.442695, %v1208_v40  ;;  %v10404_v38 = vsel %vm7312_vm3, 4294967295, %v10403_v38  ;;  %v7321_v40 = vld [vmem:[#allocation2 + $0x7f] sm:$0xff]  ;;  %vm10417_vm6 = vcmask 261120   ;;  %v1647_v52 = vsel %vm7183_vm14, %v7113_v18, 0.0 }
 0x108   : > { %2110 = vrot.lane.b32.xlu0 %v1827_v1, %s6066_s29  ;;  %1966 = vrot.lane.b32.xlu1 %v1661_v57, %s6066_s29  ;;  %v1753_v57 = vsel %vm7020_vm7, %v6978_v16, 0.0  ;;  %10405 = vst [vmem:[#allocation55_spill] sm:$0xff] %v10404_v38  ;;  %10406 = vst [vmem:[#allocation56_spill] sm:$0xff] %v7321_v40  ;;  %v530_v28 = vand.u32 15, %v422_v37 }
 0x109   : > { %5907 = vpow2.f32 %v1271_v41  ;;  %v5902_v1 = vpop.eup %5901  ;;  %v1779_v12 = vpack.c.bf16 %v1753_v57, %v6995_v9  ;;  %v10408_v57 = vmov 0  ;;  %vm10420_vm4 = vmmov %vm10417_vm6 }
 0x10a   : > { %v1301_v30 = vadd.f32 1.0, %v5902_v1  ;;  %v7339_v1 = vld [vmem:[#allocation2 + $0x87] sm:$0xff] }
 0x10b   : > { %10407 = vst [vmem:[#allocation57_spill] sm:$0xff] %v7339_v1 }
 0x10c   : > { %2064 = vrot.lane.b32.xlu0 %v1778_v25, %s6064_s23  ;;  %2014 = vrot.lane.b32.xlu1 %v1711_v24, %s6065_s13  ;;  %5909 = vrcp.f32 %v1301_v30  ;;  %v1802_v25 = vsel %vm7312_vm3, %v7310_v46, 0.0  ;;  %v1637_v24 = vsel %vm7020_vm7, %v6941_v34, 0.0  ;;  %v1686_v34 = vsel %vm7312_vm3, %v7279_v29, 0.0 }
 0x10d   : > { %v1829_v41 = vpack.c.bf16 %v7321_v40, %v1802_v25  ;;  %v1663_v50 = vpack.c.bf16 %v1637_v24, %v6976_v36  ;;  %vm7341_vm7 = vcmp.ge.s32.totalorder %v530_v28, 1  ;;  %v1639_v25 = vsel %vm7041_vm8, %v6978_v16, 0.0 }
 0x10e   : > { %v10409_v57 = vsel %vm7341_vm7, 4294967295, %v10408_v57  ;;  %v1688_v16 = vsel %vm7341_vm7, %v7310_v46, 0.0 }
 0x10f   : > { %v5904_v26 = vpop.eup %5903  ;;  %10410 = vst [vmem:[#allocation58_spill] sm:$0xff] %v10409_v57  ;;  %v10448_v57 = vmov 0 }
 0x110   : > { %2112 = vrot.lane.b32.xlu0 %v1828_v8, %s6066_s29  ;;  %1968 = vrot.lane.b32.xlu1 %v1662_v45, %s6066_s29  ;;  %v1302_v2 = vadd.f32 1.0, %v5904_v26  ;;  %v5906_v8 = vpop.eup %5905  ;;  %v1755_v45 = vsel %vm7041_vm8, %v7024_v6, 0.0  ;;  %v1713_v26 = vpack.c.bf16 %v7291_v13, %v1686_v34  ;;  %v10413_v34 = vmov 0 }
 0x111   : > { %v1303_v37 = vadd.f32 1.0, %v5906_v8  ;;  %v1780_v36 = vpack.c.bf16 %v1755_v45, %v7056_v10  ;;  %v1757_v8 = vsel %vm7101_vm10, %v7045_v56, 0.0  ;;  %v7368_v45 = vld [vmem:[#allocation2 + $0x97] sm:$0xff]  ;;  %v10443_v13 = vmov 0 }
 0x112   : > { %5911 = vrcp.f32 %v1302_v2  ;;  %v544_v2 = vand.u32 15, %v424_v47  ;;  %10412 = vst [vmem:[#allocation60_spill] sm:$0xff] %v7368_v45  ;;  %v426_v47 = vadd.s32 128, %v6835_v63 }
 0x113   : > { %5913 = vrcp.f32 %v1303_v37 }
 0x114   : > { %2066 = vrot.lane.b32.xlu0 %v1779_v12, %s6064_s23  ;;  %2016 = vrot.lane.b32.xlu1 %v1712_v17, %s6065_s13  ;;  %v7350_v12 = vld [vmem:[#allocation2 + $0x8f] sm:$0xff]  ;;  %v1804_v17 = vsel %vm7341_vm7, %v7339_v1, 0.0  ;;  %vm7370_vm8 = vcmp.ge.s32.totalorder %v544_v2, 1  ;;  %v7396_v2 = vpop.permute.xlu0 %1912 }
 0x115   : > { %10411 = vst [vmem:[#allocation59_spill] sm:$0xff] %v7350_v12  ;;  %v1830_v28 = vpack.c.bf16 %v7350_v12, %v1804_v17  ;;  %v10414_v34 = vsel %vm7370_vm8, 4294967295, %v10413_v34  ;;  %v7385_v17 = vld [vmem:[#allocation2 + $0x9f] sm:$0xff] }
 0x116   : > { %v5908_v30 = vpop.eup %5907  ;;  %10415 = vst [vmem:[#allocation61_spill] sm:$0xff] %v10414_v34  ;;  %10418 = vst [vmem:[#allocation63_spill] sm:$0xff] %v7385_v17 }
 0x117   : > { %v1304_v24 = vadd.f32 1.0, %v5908_v30 }
 0x118   : > { %2114 = vrot.lane.b32.xlu0 %v1829_v41, %s6066_s29  ;;  %1970 = vrot.lane.b32.xlu1 %v1663_v50, %s6066_s29  ;;  %v1664_v41 = vpack.c.bf16 %v1639_v25, %v6995_v9  ;;  %v435_v9 = vadd.s32 200, %v6835_v63  ;;  %v1641_v25 = vsel %vm7101_vm10, %v7024_v6, 0.0  ;;  %v1759_v6 = vsel %vm7109_vm11, %v7105_v23, 0.0 }
 0x119   : > { %5915 = vrcp.f32 %v1304_v24  ;;  %v5910_v50 = vpop.eup %5909  ;;  %vm10429_vm10 = vcmask 261120  }
 0x11a   : > { %v7376_v37 = vmul.f32 %v5910_v50, %v7196_v22  ;;  %v1806_v22 = vsel %vm7370_vm8, %v7368_v45, 0.0 }
 0x11b   : > { %v1831_v50 = vpack.c.bf16 %v7385_v17, %v1806_v22 }
 0x11c   : > { %2068 = vrot.lane.b32.xlu0 %v1780_v36, %s6064_s23  ;;  %2018 = vrot.lane.b32.xlu1 %v1713_v26, %s6065_s13  ;;  %10416 = vst [vmem:[#allocation62_spill] sm:$0xff] %v7376_v37  ;;  %v1781_v36 = vpack.c.bf16 %v1757_v8, %v7069_v62  ;;  %v1714_v26 = vpack.c.bf16 %v7321_v40, %v1688_v16  ;;  %1398 = vst.msk [vmem:[#allocation2 + $0xf8] sm:$0xff] %vm10417_vm6, %v7376_v37  ;;  %v7497_v40 = vld [vmem:[#allocation2 + $0xbf] sm:$0xff] }
 0x11d   : > { %v1665_v8 = vpack.c.bf16 %v1641_v25, %v7056_v10  ;;  %v10426_v10 = vmov 0  ;;  %10439 = vst [vmem:[#allocation73_spill] sm:$0xff] %v7497_v40 }
 0x11f   : > { %v5912_v30 = vpop.eup %5911 }
 0x120   : > { %2116 = vrot.lane.b32.xlu0 %v1830_v28, %s6066_s29  ;;  %1972 = vrot.lane.b32.xlu1 %v1664_v41, %s6066_s29  ;;  %v7394_v24 = vmul.f32 %v5912_v30, %v7229_v44  ;;  %v558_v28 = vand.u32 15, %v426_v47  ;;  %v621_v41 = vand.u32 15, %v435_v9  ;;  %v5914_v16 = vpop.eup %5913  ;;  %v1690_v44 = vsel %vm7370_vm8, %v7339_v1, 0.0  ;;  %v7410_v47 = vld [vmem:[#allocation2 + $0xa7] sm:$0xff] }
 0x121   : > { %10421 = vst [vmem:[#allocation65_spill] sm:$0xff] %v7410_v47  ;;  %v10422_v9 = vmov 0  ;;  %v428_v30 = vadd.s32 144, %v6835_v63  ;;  %vm10446_vm8 = vcmask 261120  }
 0x122   : > { %10419 = vst [vmem:[#allocation64_spill] sm:$0xff] %v7394_v24  ;;  %1399 = vst.msk [vmem:[#allocation2 + $0x100] sm:$0xff] %vm10420_vm4, %v7394_v24  ;;  %vm7412_vm4 = vcmp.ge.s32.totalorder %v558_v28, 1  ;;  %vm7420_vm6 = vcmp.le.s32.totalorder %v621_v41, 14  ;;  %v1782_v28 = vpack.c.bf16 %v1759_v6, %v7136_v53  ;;  %v1643_v41 = vsel %vm7109_vm11, %v7045_v56, 0.0  ;;  %v7443_v6 = vld [vmem:[#allocation2 + $0xaf] sm:$0xff] }
 0x123   : > { %v10423_v9 = vsel %vm7412_vm4, 4294967295, %v10422_v9  ;;  %v10427_v10 = vsel %vm7420_vm6, 4294967295, %v10426_v10  ;;  %v7425_v22 = vld [vmem:[#allocation2 + $0xf1] sm:$0xff]  ;;  %v441_v56 = vadd.s32 248, %v6835_v63  ;;  %v572_v20 = vand.u32 15, %v428_v30  ;;  %vm10431_vm11 = vmmov %vm10429_vm10 }
 0x124   : > { %2070 = vrot.lane.b32.xlu0 %v1781_v36, %s6064_s23  ;;  %2020 = vrot.lane.b32.xlu1 %v1714_v26, %s6065_s13  ;;  %10424 = vst [vmem:[#allocation66_spill] sm:$0xff] %v10423_v9  ;;  %v7418_v36 = vmul.f32 %v5914_v16, %v7261_v0  ;;  %10428 = vst [vmem:[#allocation68_spill] sm:$0xff] %v10427_v10  ;;  %v437_v26 = vadd.s32 216, %v6835_v63  ;;  %v1715_v0 = vpack.c.bf16 %v7350_v12, %v1690_v44  ;;  %v7436_v16 = vld [vmem:[#allocation2 + $0xe9] sm:$0xff]  ;;  %v1544_v37 = vld [vmem:[#allocation2 + $0xf8] sm:$0xff] }
 0x125   : > { %v1761_v30 = vsel %vm7174_vm13, %v7113_v18, 0.0  ;;  %v2948_v18 = vld [vmem:[%s395_s21] sm:$0x1] }
 0x126   : > { %10425 = vst [vmem:[#allocation67_spill] sm:$0xff] %v7418_v36  ;;  %v5916_v25 = vpop.eup %5915  ;;  %v7430_v32 = vpop.permute.xlu0 %2138  ;;  %1400 = vst.msk [vmem:[#allocation2 + $0x108] sm:$0xff] %vm10429_vm10, %v7418_v36  ;;  %v635_v4 = vand.u32 15, %v437_v26  ;;  %v1692_v26 = vsel %vm7412_vm4, %v7368_v45, 0.0 }
 0x127   : > { %v7450_v5 = vmul.f32 %v5916_v25, %v7277_v49  ;;  %v1666_v25 = vpack.c.bf16 %v1643_v41, %v7069_v62  ;;  %v10436_v62 = vmov 0  ;;  %v649_v41 = vand.u32 15, %v439_v59 }
 0x128   : > { %2118 = vrot.lane.b32.xlu0 %v1831_v50, %s6066_s29  ;;  %1974 = vrot.lane.b32.xlu1 %v1665_v8, %s6066_s29  ;;  %v1873_v50 = vsel %vm7420_vm6, %v7425_v22, 0.0  ;;  %v1808_v8 = vsel %vm7412_vm4, %v7410_v47, 0.0 }
 0x129   : > { %v1892_v44 = vpack.c.bf16 %v1873_v50, %v7436_v16  ;;  %10430 = vst [vmem:[#allocation69_spill] sm:$0xff] %v7450_v5  ;;  %v7453_v61 = vpop.permute.xlu1 %1914  ;;  %1401 = vst.msk [vmem:[#allocation2 + $0x110] sm:$0xff] %vm10431_vm11, %v7450_v5  ;;  %v1832_v50 = vpack.c.bf16 %v7443_v6, %v1808_v8  ;;  %vm7475_vm11 = vcmp.ge.s32.totalorder %v572_v20, 1  ;;  %v10433_v8 = vmov 0  ;;  %v7492_v9 = vld [vmem:[#allocation2 + $0xf9] sm:$0xff] }
 0x12a   : > { %v10434_v8 = vsel %vm7475_vm11, 4294967295, %v10433_v8  ;;  %v1716_v20 = vpack.c.bf16 %v7385_v17, %v1692_v26  ;;  %v1847_v26 = vld [vmem:[#allocation2 + $0x121] sm:$0xff]  ;;  %vm7514_vm4 = vcmp.le.s32.totalorder %v649_v41, 14  ;;  %v10473_v5 = vld [vmem:[#allocation36_spill] sm:$0xff] }
 0x12b   : > { %5666 = vmatprep.mubr.msk.bf16.mxu1 %vm10429_vm10, %v1892_v44  ;;  %v663_v44 = vand.u32 15, %v441_v56  ;;  %10435 = vst [vmem:[#allocation71_spill] sm:$0xff] %v10434_v8  ;;  %vm7480_vm10 = vcmp.le.s32.totalorder %v635_v4, 14  ;;  %v1783_v56 = vpack.c.bf16 %v1761_v30, %v7148_v15  ;;  %v10440_v30 = vmov 0  ;;  %v1545_v24 = vld [vmem:[#allocation2 + $0x100] sm:$0xff] }
 0x12c   : > { %2072 = vrot.lane.b32.xlu0 %v1782_v28, %s6064_s23  ;;  %2022 = vrot.lane.b32.xlu1 %v1715_v0, %s6065_s13  ;;  %v7462_v49 = vpop.permute.xlu0 %2140  ;;  %v7473_v28 = vld [vmem:[#allocation2 + $0xb7] sm:$0xff]  ;;  %v430_v0 = vadd.s32 160, %v6835_v63  ;;  %v10437_v62 = vsel %vm7480_vm10, 4294967295, %v10436_v62  ;;  %v10444_v13 = vsel %vm7514_vm4, 4294967295, %v10443_v13 }
 0x12d   : > { %v7471_v12 = vpop.permute.xlu1 %1916  ;;  %10432 = vst [vmem:[#allocation70_spill] sm:$0xff] %v7473_v28  ;;  %10438 = vst [vmem:[#allocation72_spill] sm:$0xff] %v10437_v62  ;;  %v7484_v1 = vld [vmem:[#allocation2 + $0x101] sm:$0xff]  ;;  %v1810_v59 = vsel %vm7475_vm11, %v7473_v28, 0.0  ;;  %vm7506_vm1 = vcmp.le.s32.totalorder %v663_v44, 14 }
 0x12e   : > { %v1875_v4 = vsel %vm7480_vm10, %v7484_v1, 0.0  ;;  %v10441_v30 = vsel %vm7506_vm1, 4294967295, %v10440_v30  ;;  %v586_v34 = vand.u32 15, %v430_v0  ;;  %10445 = vst [vmem:[#allocation75_spill] sm:$0xff] %v10444_v13 }
 0x12f   : > { %10442 = vst [vmem:[#allocation74_spill] sm:$0xff] %v10441_v30 }
 0x130   : > { %2120 = vrot.lane.b32.xlu0 %v1832_v50, %s6066_s29  ;;  %1976 = vrot.lane.b32.xlu1 %v1666_v25, %s6066_s29  ;;  %v7489_v45 = vpop.permute.xlu0 %2142  ;;  %v1645_v50 = vsel %vm7174_vm13, %v7105_v23, 0.0  ;;  %v1893_v25 = vpack.c.bf16 %v1875_v4, %v7492_v9  ;;  %v7512_v46 = vld [vmem:[#allocation2 + $0x109] sm:$0xff]  ;;  %v7519_v31 = vld [vmem:[#allocation2 + $0x111] sm:$0xff]  ;;  %v1833_v23 = vpack.c.bf16 %v7497_v40, %v1810_v59  ;;  %v1846_v4 = vld [vmem:[#allocation2 + $0x119] sm:$0xff]  ;;  %vm10451_vm13 = vcmask 261120  }
 0x131   : > { %v7510_v17 = vpop.permute.xlu1 %1918  ;;  %v1667_v0 = vpack.c.bf16 %v1645_v50, %v7136_v53  ;;  %v1877_v41 = vsel %vm7514_vm4, %v7519_v31, 0.0  ;;  %v7541_v50 = vld [vmem:[#allocation2 + $0xc7] sm:$0xff]  ;;  %v1841_v60 = vld [vmem:[#allocation2 + $0x110] sm:$0xff] }
 0x132   : > { %5667 = vmatmul.mubr.msk.bf16.gmra.mxu1 %vm10446_vm8, %v1893_v25  ;;  %v1879_v25 = vsel %vm7506_vm1, %v1847_v26, 0.0  ;;  %v1894_v59 = vpack.c.bf16 %v1877_v41, %v7512_v46  ;;  %10447 = vst [vmem:[#allocation76_spill] sm:$0xff] %v7541_v50  ;;  %vm7543_vm8 = vcmp.ge.s32.totalorder %v586_v34, 1  ;;  %v432_v26 = vadd.s32 176, %v6835_v63 }
 0x133   : > { %v10449_v57 = vsel %vm7543_vm8, 4294967295, %v10448_v57  ;;  %v1895_v29 = vpack.c.bf16 %v1879_v25, %v1846_v4  ;;  %v1812_v34 = vsel %vm7543_vm8, %v7541_v50, 0.0 }
 0x134   : > { %2074 = vrot.lane.b32.xlu0 %v1783_v56, %s6064_s23  ;;  %2024 = vrot.lane.b32.xlu1 %v1716_v20, %s6065_s13  ;;  %v7524_v44 = vpop.permute.xlu0 %2144  ;;  %v1763_v56 = vsel %vm7183_vm14, %v7178_v27, 0.0  ;;  %v1694_v20 = vsel %vm7475_vm11, %v7410_v47, 0.0  ;;  %10450 = vst [vmem:[#allocation77_spill] sm:$0xff] %v10449_v57  ;;  %v7553_v47 = vld [vmem:[#allocation2 + $0xcf] sm:$0xff]  ;;  %vm6067_vm14 = vmmov 0  }
 0x135   : > { %v7539_v53 = vpop.permute.xlu1 %1920  ;;  %5670 = vmatprep.mubr.msk.bf16.mxu1 %vm10451_vm13, %v1894_v59  ;;  %v1784_v8 = vpack.c.bf16 %v1763_v56, %v7216_v35  ;;  %v1717_v41 = vpack.c.bf16 %v7443_v6, %v1694_v20  ;;  %10452 = vst [vmem:[#allocation78_spill] sm:$0xff] %v7553_v47  ;;  %v1834_v25 = vpack.c.bf16 %v7553_v47, %v1812_v34  ;;  %v1765_v20 = vsel %vm7249_vm0, %v7187_v54, 0.0 }
 0x136   : > { %v1668_v56 = vpack.c.bf16 %v1647_v52, %v7148_v15  ;;  %v1696_v59 = vsel %vm7543_vm8, %v7473_v28, 0.0  ;;  %v434_v15 = vadd.s32 192, %v6835_v63  ;;  %v2949_v52 = vpack.c.bf16 %v2948_v18, %v2948_v18 }
 0x137   : > { %v1785_v34 = vpack.c.bf16 %v1765_v20, %v7226_v3  ;;  %v1649_v18 = vsel %vm7249_vm0, %v7178_v27, 0.0  ;;  %vm10474_vm0 = vcmask 261120  }
 0x138   : > { %2122 = vrot.lane.b32.xlu0 %v1833_v23, %s6066_s29  ;;  %1978 = vrot.lane.b32.xlu1 %v1667_v0, %s6066_s29  ;;  %v7565_v23 = vpop.permute.xlu0 %2146  ;;  %v600_v0 = vand.u32 15, %v432_v26  ;;  %v10454_v26 = vmov 0  ;;  %v1669_v20 = vpack.c.bf16 %v1649_v18, %v7216_v35  ;;  %v436_v35 = vadd.s32 208, %v6835_v63  ;;  %v7631_v18 = vld [vmem:[#allocation2 + $0xef] sm:$0xff] }
 0x139   : > { %v7567_v4 = vpop.permute.xlu1 %1922  ;;  %10462 = vst [vmem:[#allocation84_spill] sm:$0xff] %v7631_v18 }
 0x13a   : > { %5671 = vmatmul.mubr.msk.bf16.gmra.mxu1 %vm10451_vm13, %v1895_v29  ;;  %vm7585_vm13 = vcmp.ge.s32.totalorder %v600_v0, 1 }
 0x13b   : > { %5690 = vmatprep.mubr.msk.bf16.mxu1 %vm6067_vm14, %v10320_v19  ;;  %v10455_v26 = vsel %vm7585_vm13, 4294967295, %v10454_v26  ;;  %v1718_v19 = vpack.c.bf16 %v7497_v40, %v1696_v59  ;;  %v1767_v59 = vsel %vm7420_vm6, %v7253_v21, 0.0  ;;  %v1698_v27 = vsel %vm7585_vm13, %v7541_v50, 0.0 }
 0x13c   : > { %2076 = vrot.lane.b32.xlu0 %v1784_v8, %s6064_s23  ;;  %2026 = vrot.lane.b32.xlu1 %v1717_v41, %s6065_s13  ;;  %v7583_v8 = vld [vmem:[#allocation2 + $0xd7] sm:$0xff]  ;;  %10456 = vst [vmem:[#allocation80_spill] sm:$0xff] %v10455_v26  ;;  %v7591_v41 = vpop.permute.xlu0 %2148 }
 0x13d   : > { %v7581_v29 = vpop.permute.xlu1 %1924  ;;  %10453 = vst [vmem:[#allocation79_spill] sm:$0xff] %v7583_v8  ;;  %v1814_v0 = vsel %vm7585_vm13, %v7583_v8, 0.0 }
 0x140   : > { %2124 = vrot.lane.b32.xlu0 %v1834_v25, %s6066_s29  ;;  %1980 = vrot.lane.b32.xlu1 %v1668_v56, %s6066_s29  ;;  %v614_v25 = vand.u32 15, %v434_v15  ;;  %v1835_v56 = vpack.c.bf16 %v7596_v51, %v1814_v0  ;;  %v1719_v0 = vpack.c.bf16 %v7553_v47, %v1698_v27  ;;  %v1769_v27 = vsel %vm7480_vm10, %v7425_v22, 0.0 }
 0x141   : > { %v7604_v28 = vpop.permute.xlu1 %1926 }
 0x142   : > { %5691 = vmatmul.mubr.bf16.vlgmr.msra.gmra.mxu1 %v2949_v52  ;;  %v7620_v52 = vld [vmem:[#allocation2 + $0xe7] sm:$0xff]  ;;  %vm7622_vm14 = vcmp.ge.s32.totalorder %v614_v25, 1  ;;  %v1651_v25 = vsel %vm7420_vm6, %v7187_v54, 0.0 }
 0x143   : > { %10458 = vst [vmem:[#allocation82_spill] sm:$0xff] %v7620_v52  ;;  %v1816_v50 = vsel %vm7622_vm14, %v7620_v52, 0.0  ;;  %v1700_v54 = vsel %vm7622_vm14, %v7583_v8, 0.0  ;;  %v1653_v8 = vsel %vm7480_vm10, %v7253_v21, 0.0 }
 0x144   : > { %2078 = vrot.lane.b32.xlu0 %v1785_v34, %s6064_s23  ;;  %2028 = vrot.lane.b32.xlu1 %v1718_v19, %s6065_s13  ;;  %v10459_v34 = vmov 0  ;;  %v1786_v19 = vpack.c.bf16 %v1767_v59, %v7267_v33  ;;  %v1670_v59 = vpack.c.bf16 %v1651_v25, %v7226_v3  ;;  %v1787_v3 = vpack.c.bf16 %v1769_v27, %v7436_v16  ;;  %v7669_v25 = vld [vmem:[#allocation2 + $0xff] sm:$0xff] }
 0x145   : > { %v10460_v34 = vsel %vm7622_vm14, 4294967295, %v10459_v34 }
 0x146   : > { %v7616_v48 = vpop.permute.xlu0 %2150  ;;  %v7618_v15 = vpop.permute.xlu1 %1928  ;;  %10461 = vst [vmem:[#allocation83_spill] sm:$0xff] %v10460_v34 }
 0x148   : > { %2126 = vrot.lane.b32.xlu0 %v1835_v56, %s6066_s29  ;;  %1982 = vrot.lane.b32.xlu1 %v1669_v20, %s6066_s29  ;;  %v628_v56 = vand.u32 15, %v436_v35  ;;  %v1836_v20 = vpack.c.bf16 %v7631_v18, %v1816_v50  ;;  %v7657_v35 = vld [vmem:[#allocation2 + $0xf7] sm:$0xff]  ;;  %v10463_v50 = vmov 0 }
 0x14a   : > { %v7639_v40 = vpop.permute.xlu0 %2152  ;;  %v7641_v26 = vpop.permute.xlu1 %1930  ;;  %vm7659_vm6 = vcmp.ge.s32.totalorder %v628_v56, 1 }
 0x14b   : > { %v10464_v50 = vsel %vm7659_vm6, 4294967295, %v10463_v50  ;;  %v1818_v56 = vsel %vm7659_vm6, %v7657_v35, 0.0  ;;  %v1702_v21 = vsel %vm7659_vm6, %v7620_v52, 0.0  ;;  %v10469_v52 = vmov 0 }
 0x14c   : > { %2080 = vrot.lane.b32.xlu0 %v1786_v19, %s6064_s23  ;;  %2030 = vrot.lane.b32.xlu1 %v1719_v0, %s6065_s13  ;;  %10465 = vst [vmem:[#allocation85_spill] sm:$0xff] %v10464_v50  ;;  %v1720_v19 = vpack.c.bf16 %v7596_v51, %v1700_v54  ;;  %v1837_v54 = vpack.c.bf16 %v7669_v25, %v1818_v56  ;;  %v440_v50 = vadd.s32 240, %v6835_v63 }
 0x14d   : > { %v1671_v0 = vpack.c.bf16 %v1653_v8, %v7267_v33  ;;  %v1771_v33 = vsel %vm7514_vm4, %v7484_v1, 0.0 }
 0x14e   : > { %v7653_v10 = vpop.permute.xlu0 %2154  ;;  %v7655_v47 = vpop.permute.xlu1 %1932 }
 0x150   : > { %2128 = vrot.lane.b32.xlu0 %v1836_v20, %s6066_s29  ;;  %1984 = vrot.lane.b32.xlu1 %v1670_v59, %s6066_s29  ;;  %v438_v59 = vadd.s32 224, %v6835_v63 }
 0x152   : > { %v7677_v20 = vpop.permute.xlu0 %2156  ;;  %v7679_v27 = vpop.permute.xlu1 %1934  ;;  %v642_v34 = vand.u32 15, %v438_v59  ;;  %v7709_v59 = vld [vmem:[#allocation2 + $0x107] sm:$0xff] }
 0x153   : > { %10466 = vst [vmem:[#allocation86_spill] sm:$0xff] %v7679_v27 }
 0x154   : > { %2082 = vrot.lane.b32.xlu0 %v1787_v3, %s6064_s23  ;;  %2032 = vrot.lane.b32.xlu1 %v1720_v19, %s6065_s13  ;;  %v7694_v3 = vpack.c.bf16 %v1545_v24, %v1544_v37  ;;  %v1721_v19 = vpack.c.bf16 %v7631_v18, %v1702_v21  ;;  %vm7705_vm10 = vcmp.ge.s32.totalorder %v642_v34, 1  ;;  %v1402_v37 = vld [vmem:[#allocation2 + $0x7] sm:$0xff]  ;;  %v1788_v24 = vpack.c.bf16 %v1771_v33, %v7492_v9  ;;  %v1403_v18 = vld [vmem:[#allocation2 + $0xf] sm:$0xff] }
 0x155   : > { %v10470_v52 = vsel %vm7705_vm10, 4294967295, %v10469_v52  ;;  %v1820_v34 = vsel %vm7705_vm10, %v7709_v59, 0.0  ;;  %v1655_v21 = vsel %vm7514_vm4, %v7425_v22, 0.0  ;;  %vm10256_vm4 = vcmask 523264  }
 0x156   : > { %v7689_v62 = vpop.permute.xlu0 %2158  ;;  %v7691_v51 = vpop.permute.xlu1 %1936  ;;  %10471 = vst [vmem:[#allocation89_spill] sm:$0xff] %v10470_v52  ;;  %v1672_v22 = vpack.c.bf16 %v1655_v21, %v7436_v16  ;;  %v1704_v63 = vsel %vm7705_vm10, %v7657_v35, 0.0  ;;  %vm10477_vm10 = vmmov %vm10474_vm0 }
 0x157   : > { %10467 = vst [vmem:[#allocation87_spill] sm:$0xff] %v7691_v51 }
 0x158   : > { %2130 = vrot.lane.b32.xlu0 %v1837_v54, %s6066_s29  ;;  %1986 = vrot.lane.b32.xlu1 %v1671_v0, %s6066_s29  ;;  %v7717_v54 = vld [vmem:[#allocation2 + $0x10f] sm:$0xff]  ;;  %v1724_v0 = vpack.c.bf16 %v6695_v14, %v6686_v7  ;;  %v656_v14 = vand.u32 15, %v440_v50 }
 0x159   : > { %v1838_v36 = vpack.c.bf16 %v7717_v54, %v1820_v34  ;;  %v10475_v34 = vld [vmem:[#allocation3_spill] sm:$0xff] }
 0x15a   : > { %v7701_v8 = vpop.permute.xlu0 %2160  ;;  %v7703_v56 = vpop.permute.xlu1 %1938 }
 0x15b   : > { %10468 = vst [vmem:[#allocation88_spill] sm:$0xff] %v7703_v56  ;;  %v1466_v56 = vsel %vm6956_vm5, %v1402_v37, 0.0  ;;  %v1840_v37 = vld [vmem:[#allocation2 + $0x108] sm:$0xff]  ;;  %vm10237_vm5 = vcmask 785408  }
 0x15c   : > { %2164 = vrot.lane.b32.xlu0 %v7694_v3, %s6065_s13  ;;  %2034 = vrot.lane.b32.xlu1 %v1721_v19, %s6065_s13  ;;  %v1498_v13 = vpack.c.bf16 %v1403_v18, %v1466_v56  ;;  %v1844_v16 = vpack.c.bf16 %v1841_v60, %v1840_v37  ;;  %v1722_v18 = vpack.c.bf16 %v7669_v25, %v1704_v63  ;;  %v10480_v63 = vmov 0 }
 0x15e   : > { %v7727_v33 = vpop.permute.xlu0 %2162  ;;  %v2105_v19 = vpop.permute.xlu1 %2104  ;;  %v2172_v56 = vsel %vm10477_vm10, %v1498_v13, %v7396_v2  ;;  %v1790_v13 = vld [vmem:[#allocation2 + $0x117] sm:$0xff] }
 0x15f   : > { %10472 = vst [vmem:[#allocation90_spill] sm:$0xff] %v7727_v33  ;;  %v10476_v33 = vld [vmem:[#allocation4_spill] sm:$0xff] }
 0x160   : > { %2084 = vrot.lane.b32.xlu0 %v1788_v24, %s6064_s23  ;;  %1940 = vrot.lane.b32.xlu1 %v10473_v5, %s6064_s23  ;;  %v1725_v27 = vpack.c.bf16 %v10476_v33, %v10475_v34 }
 0x162   : > { %v2057_v51 = vpop.permute.xlu0 %2056  ;;  %v1961_v7 = vpop.permute.xlu1 %1960 }
 0x163   : > { %v2302_v24 = vsel %vm10474_vm0, %v1724_v0, %v2057_v51  ;;  %v1773_v51 = vsel %vm7506_vm1, %v7519_v31, 0.0  ;;  %v10478_v0 = vld [vmem:[#allocation38_spill] sm:$0xff]  ;;  %v2220_v60 = vsel %vm10256_vm4, %v2172_v56, %v1961_v7  ;;  %vm7758_vm0 = vcmp.ge.s32.totalorder %v656_v14, 1  ;;  %v1791_v7 = vld [vmem:[#allocation2 + $0x11f] sm:$0xff] }
 0x164   : > { %v2349_v5 = vsel %vm10256_vm4, %v2302_v24, %v2105_v19  ;;  %2132 = vrot.lane.b32.xlu0 %v1838_v36, %s6066_s29  ;;  %1988 = vrot.lane.b32.xlu1 %v1672_v22, %s6066_s29  ;;  %v1468_v33 = vsel %vm7077_vm9, %v10478_v0, 0.0  ;;  %v10481_v63 = vsel %vm7758_vm0, 4294967295, %v10480_v63  ;;  %v1789_v31 = vpack.c.bf16 %v1773_v51, %v7512_v46  ;;  %v10483_v22 = vld [vmem:[#allocation40_spill] sm:$0xff]  ;;  %v10485_v56 = vld [vmem:[#allocation6_spill] sm:$0xff] }
 0x165   : > { %v2381_v50 = vsel %vm10237_vm5, %v2349_v5, %v7430_v32  ;;  %10482 = vst [vmem:[#allocation36_spill] sm:$0xff] %v10481_v63  ;;  %v1499_v37 = vpack.c.bf16 %v10483_v22, %v1468_v33  ;;  %v1822_v14 = vsel %vm7758_vm0, %v1790_v13, 0.0  ;;  %v1657_v24 = vsel %vm7506_vm1, %v7484_v1, 0.0  ;;  %v1842_v0 = vld [vmem:[#allocation2 + $0x118] sm:$0xff]  ;;  %v1843_v33 = vld [vmem:[#allocation2 + $0x120] sm:$0xff]  ;;  %vm10487_vm1 = vmmov %vm10477_vm10 }
 0x166   : > { %v2059_v36 = vpop.permute.xlu0 %2058  ;;  %2658 = vmatprep.mubr.bf16.mxu0 %v2381_v50  ;;  %v2009_v19 = vpop.permute.xlu1 %2008  ;;  %v1839_v50 = vpack.c.bf16 %v1791_v7, %v1822_v14  ;;  %v1673_v51 = vpack.c.bf16 %v1657_v24, %v7492_v9 }
 0x167   : > { %v2253_v32 = vsel %vm10237_vm5, %v2220_v60, %v2009_v19  ;;  %v2305_v2 = vsel %vm10477_vm10, %v1725_v27, %v2059_v36  ;;  %v2175_v1 = vsel %vm10477_vm10, %v1499_v37, %v7453_v61  ;;  %v1706_v36 = vsel %vm7758_vm0, %v7709_v59, 0.0  ;;  %v6053_v60 = vld [vmem:[#allocation2 + $0x27] sm:$0xff]  ;;  %v6054_v59 = vld [vmem:[#allocation2 + $0x2f] sm:$0xff]  ;;  %vm10491_vm10 = vmmov %vm10487_vm1 }
 0x168   : > { %2166 = vrot.lane.b32.xlu0 %v1844_v16, %s6065_s13  ;;  %2036 = vrot.lane.b32.xlu1 %v1722_v18, %s6065_s13  ;;  %v10484_v16 = vld [vmem:[#allocation5_spill] sm:$0xff]  ;;  %v1845_v61 = vpack.c.bf16 %v1843_v33, %v1842_v0 }
 0x169   : > { %2659 = vmatmul.mubr.bf16.vlgmr.msra.gmra.mxu0 %v2253_v32  ;;  %v1726_v46 = vpack.c.bf16 %v10485_v56, %v10484_v16  ;;  %v10490_v16 = vld [vmem:[#allocation41_spill] sm:$0xff] }
 0x16a   : > { %v2107_v34 = vpop.permute.xlu0 %2106  ;;  %v1963_v5 = vpop.permute.xlu1 %1962  ;;  %v1472_v56 = vsel %vm7202_vm15, %v10490_v16, 0.0 }
 0x16b   : > { %v2351_v27 = vsel %vm10256_vm4, %v2305_v2, %v2107_v34  ;;  %v2222_v32 = vsel %vm10256_vm4, %v2175_v1, %v1963_v5  ;;  %v10488_v34 = vld [vmem:[#allocation7_spill] sm:$0xff]  ;;  %v10489_v5 = vld [vmem:[#allocation8_spill] sm:$0xff]  ;;  %v1501_v1 = vpack.c.bf16 %v7093_v55, %v1472_v56 }
 0x16c   : > { %2086 = vrot.lane.b32.xlu0 %v1789_v31, %s6064_s23  ;;  %v2384_v18 = vsel %vm10237_vm5, %v2351_v27, %v7462_v49  ;;  %1942 = vrot.lane.b32.xlu1 %v7694_v3, %s6064_s23  ;;  %v1470_v49 = vsel %vm7132_vm12, %v6053_v60, 0.0  ;;  %v1723_v31 = vpack.c.bf16 %v7717_v54, %v1706_v36  ;;  %v1727_v27 = vpack.c.bf16 %v10489_v5, %v10488_v34  ;;  %v10492_v60 = vld [vmem:[#allocation9_spill] sm:$0xff] }
 0x16d   : > { %2666 = vmatprep.mubr.bf16.mxu0 %v2384_v18  ;;  %v1500_v22 = vpack.c.bf16 %v6054_v59, %v1470_v49  ;;  %v10493_v49 = vld [vmem:[#allocation10_spill] sm:$0xff]  ;;  %v1476_v34 = vsel %vm7312_vm3, %v7221_v42, 0.0 }
 0x16e   : > { %v2061_v13 = vpop.permute.xlu0 %2060  ;;  %v2011_v3 = vpop.permute.xlu1 %2010  ;;  %v10500_v42 = vld [vmem:[#allocation14_spill] sm:$0xff] }
 0x16f   : > { %v2256_v9 = vsel %vm10237_vm5, %v2222_v32, %v2011_v3  ;;  %v2308_v2 = vsel %vm10487_vm1, %v1726_v46, %v2061_v13  ;;  %v2178_v54 = vsel %vm10487_vm1, %v1500_v22, %v7471_v12  ;;  %v1728_v13 = vpack.c.bf16 %v10493_v49, %v10492_v60 }
 0x170   : > { %2134 = vrot.lane.b32.xlu0 %v1839_v50, %s6066_s29  ;;  %1990 = vrot.lane.b32.xlu1 %v1673_v51, %s6066_s29  ;;  %v2181_v32 = vsel %vm10487_vm1, %v1501_v1, %v7510_v17  ;;  %v1474_v3 = vsel %vm7281_vm2, %v7143_v58, 0.0  ;;  %v10496_v58 = vld [vmem:[#allocation12_spill] sm:$0xff] }
 0x171   : > { %2667 = vmatmul.mubr.bf16.gmra.mxu0 %v2256_v9 }
 0x172   : > { %v2109_v37 = vpop.permute.xlu0 %2108  ;;  %v1965_v7 = vpop.permute.xlu1 %1964 }
 0x173   : > { %v2353_v14 = vsel %vm10256_vm4, %v2308_v2, %v2109_v37  ;;  %v2224_v18 = vsel %vm10256_vm4, %v2178_v54, %v1965_v7  ;;  %v10495_v7 = vld [vmem:[#allocation11_spill] sm:$0xff] }
 0x174   : > { %2168 = vrot.lane.b32.xlu0 %v1845_v61, %s6065_s13  ;;  %v2387_v24 = vsel %vm10237_vm5, %v2353_v14, %v7489_v45  ;;  %2038 = vrot.lane.b32.xlu1 %v1723_v31, %s6065_s13  ;;  %v1729_v14 = vpack.c.bf16 %v10496_v58, %v10495_v7 }
 0x175   : > { %2674 = vmatprep.mubr.bf16.mxu0 %v2387_v24 }
 0x176   : > { %v2063_v46 = vpop.permute.xlu0 %2062  ;;  %v2013_v50 = vpop.permute.xlu1 %2012 }
 0x177   : > { %v2259_v51 = vsel %vm10237_vm5, %v2224_v18, %v2013_v50  ;;  %v2311_v45 = vsel %vm10491_vm10, %v1727_v27, %v2063_v46  ;;  %vm10494_vm10 = vmmov %vm10487_vm1 }
 0x179   : > { %2675 = vmatmul.mubr.bf16.gmra.mxu0 %v2259_v51  ;;  %v10499_v51 = vld [vmem:[#allocation13_spill] sm:$0xff] }
 0x17a   : > { %v2111_v0 = vpop.permute.xlu0 %2110  ;;  %v1967_v33 = vpop.permute.xlu1 %1966 }
 0x17b   : > { %v2355_v12 = vsel %vm10256_vm4, %v2311_v45, %v2111_v0  ;;  %v2226_v9 = vsel %vm10256_vm4, %v2181_v32, %v1967_v33  ;;  %v1730_v45 = vpack.c.bf16 %v10500_v42, %v10499_v51  ;;  %v10501_v0 = vld [vmem:[#allocation51_spill] sm:$0xff] }
 0x17c   : > { %v2390_v36 = vsel %vm10237_vm5, %v2355_v12, %v7524_v44  ;;  %v1502_v44 = vpack.c.bf16 %v7162_v39, %v1474_v3  ;;  %v1478_v12 = vsel %vm7341_vm7, %v10501_v0, 0.0  ;;  %vm10510_vm7 = vmmov %vm10487_vm1 }
 0x17d   : > { %2682 = vmatprep.mubr.bf16.mxu0 %v2390_v36 }
 0x17e   : > { %v2065_v55 = vpop.permute.xlu0 %2064  ;;  %v2015_v2 = vpop.permute.xlu1 %2014  ;;  %v2184_v24 = vsel %vm10487_vm1, %v1502_v44, %v7539_v53 }
 0x17f   : > { %v2262_v61 = vsel %vm10237_vm5, %v2226_v9, %v2015_v2  ;;  %v2314_v31 = vsel %vm10494_vm10, %v1728_v13, %v2065_v55  ;;  %vm10497_vm10 = vmmov %vm10487_vm1 }
 0x181   : > { %2683 = vmatmul.mubr.bf16.gmra.mxu0 %v2262_v61  ;;  %v10505_v61 = vld [vmem:[#allocation15_spill] sm:$0xff] }
 0x182   : > { %v2113_v59 = vpop.permute.xlu0 %2112  ;;  %v1969_v22 = vpop.permute.xlu1 %1968 }
 0x183   : > { %v2357_v17 = vsel %vm10256_vm4, %v2314_v31, %v2113_v59  ;;  %v2228_v5 = vsel %vm10256_vm4, %v2184_v24, %v1969_v22  ;;  %v10506_v31 = vld [vmem:[#allocation16_spill] sm:$0xff]  ;;  %v10507_v22 = vld [vmem:[#allocation54_spill] sm:$0xff] }
 0x184   : > { %v2393_v37 = vsel %vm10237_vm5, %v2357_v17, %v7565_v23  ;;  %v10498_v23 = vld [vmem:[#allocation49_spill] sm:$0xff]  ;;  %v1731_v44 = vpack.c.bf16 %v10506_v31, %v10505_v61 }
 0x185   : > { %2690 = vmatprep.mubr.bf16.mxu0 %v2393_v37  ;;  %v1503_v56 = vpack.c.bf16 %v10498_v23, %v1476_v34  ;;  %v10508_v17 = vld [vmem:[#allocation61_spill] sm:$0xff]  ;;  %v10513_v23 = vld [vmem:[#allocation18_spill] sm:$0xff] }
 0x186   : > { %v2067_v39 = vpop.permute.xlu0 %2066  ;;  %v2017_v27 = vpop.permute.xlu1 %2016 }
 0x187   : > { %v2265_v54 = vsel %vm10237_vm5, %v2228_v5, %v2017_v27  ;;  %v2317_v16 = vsel %vm10497_vm10, %v1729_v14, %v2067_v39  ;;  %v2187_v1 = vsel %vm10487_vm1, %v1503_v56, %v7567_v4  ;;  %vm10503_vm10 = vmmov %vm10487_vm1 }
 0x189   : > { %2691 = vmatmul.mubr.bf16.gmra.mxu0 %v2265_v54 }
 0x18a   : > { %v2115_v46 = vpop.permute.xlu0 %2114  ;;  %v1971_v18 = vpop.permute.xlu1 %1970 }
 0x18b   : > { %v2359_v53 = vsel %vm10256_vm4, %v2317_v16, %v2115_v46  ;;  %v2230_v60 = vsel %vm10256_vm4, %v2187_v1, %v1971_v18  ;;  %v10512_v16 = vld [vmem:[#allocation17_spill] sm:$0xff] }
 0x18c   : > { %v2396_v50 = vsel %vm10237_vm5, %v2359_v53, %v7591_v41  ;;  %v10504_v41 = vld [vmem:[#allocation53_spill] sm:$0xff]  ;;  %v1732_v56 = vpack.c.bf16 %v10513_v23, %v10512_v16  ;;  %v10515_v53 = vld [vmem:[#allocation66_spill] sm:$0xff] }
 0x18d   : > { %2698 = vmatprep.mubr.bf16.mxu0 %v2396_v50  ;;  %v1504_v3 = vpack.c.bf16 %v10504_v41, %v1478_v12  ;;  %v10514_v18 = vld [vmem:[#allocation57_spill] sm:$0xff]  ;;  %v10519_v41 = vld [vmem:[#allocation19_spill] sm:$0xff] }
 0x18e   : > { %v2069_v36 = vpop.permute.xlu0 %2068  ;;  %v2019_v49 = vpop.permute.xlu1 %2018 }
 0x18f   : > { %v2268_v13 = vsel %vm10237_vm5, %v2230_v60, %v2019_v49  ;;  %v2320_v32 = vsel %vm10503_vm10, %v1730_v45, %v2069_v36  ;;  %v2190_v59 = vsel %vm10487_vm1, %v1504_v3, %v7581_v29  ;;  %vm10509_vm10 = vnez %v10508_v17  ;;  %v10520_v3 = vld [vmem:[#allocation20_spill] sm:$0xff] }
 0x190   : > { %v1480_v37 = vsel %vm10509_vm10, %v10507_v22, 0.0  ;;  %vm10517_vm10 = vmmov %vm10487_vm1 }
 0x191   : > { %2699 = vmatmul.mubr.bf16.gmra.mxu0 %v2268_v13 }
 0x192   : > { %v2117_v55 = vpop.permute.xlu0 %2116  ;;  %v1973_v9 = vpop.permute.xlu1 %1972 }
 0x193   : > { %v2361_v4 = vsel %vm10256_vm4, %v2320_v32, %v2117_v55  ;;  %v2232_v58 = vsel %vm10256_vm4, %v2190_v59, %v1973_v9  ;;  %v1733_v55 = vpack.c.bf16 %v10520_v3, %v10519_v41  ;;  %v10531_v3 = vld [vmem:[#allocation70_spill] sm:$0xff] }
 0x194   : > { %v2399_v2 = vsel %vm10237_vm5, %v2361_v4, %v7616_v48  ;;  %v10511_v48 = vld [vmem:[#allocation56_spill] sm:$0xff] }
 0x195   : > { %2706 = vmatprep.mubr.bf16.mxu0 %v2399_v2  ;;  %v1505_v39 = vpack.c.bf16 %v10511_v48, %v1480_v37  ;;  %v10521_v2 = vld [vmem:[#allocation60_spill] sm:$0xff] }
 0x196   : > { %v2071_v7 = vpop.permute.xlu0 %2070  ;;  %v2021_v14 = vpop.permute.xlu1 %2020  ;;  %v1484_v31 = vsel %vm7475_vm11, %v10521_v2, 0.0 }
 0x197   : > { %v2271_v24 = vsel %vm10237_vm5, %v2232_v58, %v2021_v14  ;;  %v2323_v34 = vsel %vm10510_vm7, %v1731_v44, %v2071_v7  ;;  %v2193_v46 = vsel %vm10487_vm1, %v1505_v39, %v7604_v28  ;;  %vm10516_vm7 = vnez %v10515_v53  ;;  %v10524_v58 = vld [vmem:[#allocation63_spill] sm:$0xff] }
 0x198   : > { %v1482_v50 = vsel %vm10516_vm7, %v10514_v18, 0.0  ;;  %v1507_v14 = vpack.c.bf16 %v10524_v58, %v1484_v31 }
 0x199   : > { %2707 = vmatmul.mubr.bf16.gmra.mxu0 %v2271_v24 }
 0x19a   : > { %v2119_v5 = vpop.permute.xlu0 %2118  ;;  %v1975_v27 = vpop.permute.xlu1 %1974  ;;  %v2199_v16 = vsel %vm10487_vm1, %v1507_v14, %v7641_v26 }
 0x19b   : > { %v2363_v29 = vsel %vm10256_vm4, %v2323_v34, %v2119_v5  ;;  %v2234_v42 = vsel %vm10256_vm4, %v2193_v46, %v1975_v27  ;;  %v7881_v36 = vpop.f32.mrf.mxu1  ;;  %v10525_v27 = vld [vmem:[#allocation21_spill] sm:$0xff] }
 0x19c   : > { %v2402_v54 = vsel %vm10237_vm5, %v2363_v29, %v7639_v40  ;;  %v10518_v40 = vld [vmem:[#allocation59_spill] sm:$0xff]  ;;  %v10526_v29 = vld [vmem:[#allocation22_spill] sm:$0xff] }
 0x19d   : > { %2714 = vmatprep.mubr.bf16.mxu0 %v2402_v54  ;;  %v1506_v12 = vpack.c.bf16 %v10518_v40, %v1482_v50  ;;  %v7884_v13 = vpop.f32.mrf.mxu1  ;;  %v1734_v54 = vpack.c.bf16 %v10526_v29, %v10525_v27  ;;  %v10537_v27 = vld [vmem:[#allocation86_spill] sm:$0xff] }
 0x19e   : > { %v2073_v51 = vpop.permute.xlu0 %2072  ;;  %v2023_v45 = vpop.permute.xlu1 %2022 }
 0x19f   : > { %v2274_v1 = vsel %vm10237_vm5, %v2234_v42, %v2023_v45  ;;  %v2326_v0 = vsel %vm10517_vm10, %v1732_v56, %v2073_v51  ;;  %v2196_v9 = vsel %vm10487_vm1, %v1506_v12, %v7618_v15  ;;  %v7892_v4 = vpop.f32.mrf.mxu1  ;;  %vm10523_vm10 = vmmov %vm10487_vm1  ;;  %v10527_v56 = vld [vmem:[#allocation65_spill] sm:$0xff] }
 0x1a0   : > { %v1486_v46 = vsel %vm7543_vm8, %v10527_v56, 0.0 }
 0x1a1   : > { %2715 = vmatmul.mubr.bf16.gmra.mxu0 %v2274_v1  ;;  %v1508_v1 = vpack.c.bf16 %v7443_v6, %v1486_v46  ;;  %v1488_v6 = vsel %vm7585_vm13, %v10531_v3, 0.0  ;;  %v10544_v3 = vld [vmem:[#allocation79_spill] sm:$0xff] }
 0x1a2   : > { %v2121_v60 = vpop.permute.xlu0 %2120  ;;  %v1977_v28 = vpop.permute.xlu1 %1976 }
 0x1a3   : > { %v2365_v49 = vsel %vm10256_vm4, %v2326_v0, %v2121_v60  ;;  %v2236_v59 = vsel %vm10256_vm4, %v2196_v9, %v1977_v28  ;;  %v10529_v28 = vld [vmem:[#allocation24_spill] sm:$0xff]  ;;  %v2202_v41 = vsel %vm10487_vm1, %v1508_v1, %v7655_v47 }
 0x1a4   : > { %v2405_v32 = vsel %vm10237_vm5, %v2365_v49, %v7653_v10  ;;  %v7899_v10 = vpop.f32.mrf.mxu1  ;;  %v10530_v49 = vld [vmem:[#allocation25_spill] sm:$0xff] }
 0x1a5   : > { %2722 = vmatprep.mubr.bf16.mxu0 %v2405_v32  ;;  %v1735_v32 = vpack.c.bf16 %v10530_v49, %v10529_v28  ;;  %v10542_v28 = vld [vmem:[#allocation90_spill] sm:$0xff] }
 0x1a6   : > { %v2075_v44 = vpop.permute.xlu0 %2074  ;;  %v2025_v22 = vpop.permute.xlu1 %2024 }
 0x1a7   : > { %v2277_v37 = vsel %vm10237_vm5, %v2236_v59, %v2025_v22  ;;  %v2329_v7 = vsel %vm10523_vm10, %v1733_v55, %v2075_v44  ;;  %v7903_v15 = vpop.f32.mrf.mxu1  ;;  %vm10528_vm10 = vmmov %vm10487_vm1  ;;  %v10534_v22 = vld [vmem:[#allocation73_spill] sm:$0xff] }
 0x1a9   : > { %2723 = vmatmul.mubr.bf16.gmra.mxu0 %v2277_v37  ;;  %v7906_v39 = vpop.f32.mrf.mxu1  ;;  %v1509_v37 = vpack.c.bf16 %v10534_v22, %v1488_v6  ;;  %v10547_v22 = vld [vmem:[#allocation29_spill] sm:$0xff] }
 0x1aa   : > { %v2123_v24 = vpop.permute.xlu0 %2122  ;;  %v1979_v34 = vpop.permute.xlu1 %1978 }
 0x1ab   : > { %v2367_v48 = vsel %vm10256_vm4, %v2329_v7, %v2123_v24  ;;  %v7914_v23 = vpop.f32.mrf.mxu1  ;;  %v2238_v50 = vsel %vm10256_vm4, %v2199_v16, %v1979_v34  ;;  %v10535_v34 = vld [vmem:[#allocation26_spill] sm:$0xff]  ;;  %v2205_v29 = vsel %vm10487_vm1, %v1509_v37, %v10537_v27 }
 0x1ac   : > { %v2408_v5 = vsel %vm10237_vm5, %v2367_v48, %v7677_v20  ;;  %v10536_v48 = vld [vmem:[#allocation27_spill] sm:$0xff] }
 0x1ad   : > { %2730 = vmatprep.mubr.bf16.mxu0 %v2408_v5  ;;  %v7921_v20 = vpop.f32.mrf.mxu1  ;;  %v1736_v5 = vpack.c.bf16 %v10536_v48, %v10535_v34 }
 0x1ae   : > { %v2077_v18 = vpop.permute.xlu0 %2076  ;;  %v2027_v51 = vpop.permute.xlu1 %2026 }
 0x1af   : > { %v2280_v42 = vsel %vm10237_vm5, %v2238_v50, %v2027_v51  ;;  %v2332_v45 = vsel %vm10528_vm10, %v1734_v54, %v2077_v18  ;;  %v7926_v12 = vpop.f32.mrf.mxu1  ;;  %vm10533_vm10 = vmmov %vm10487_vm1  ;;  %v10538_v54 = vld [vmem:[#allocation76_spill] sm:$0xff] }
 0x1b0   : > { %v1490_v56 = vsel %vm7622_vm14, %v10538_v54, 0.0 }
 0x1b1   : > { %2731 = vmatmul.mubr.bf16.gmra.mxu0 %v2280_v42  ;;  %v7939_v59 = vpop.f32.mrf.mxu1 }
 0x1b2   : > { %v2125_v26 = vpop.permute.xlu0 %2124  ;;  %v1981_v0 = vpop.permute.xlu1 %1980 }
 0x1b3   : > { %v2369_v40 = vsel %vm10256_vm4, %v2332_v45, %v2125_v26  ;;  %v2240_v2 = vsel %vm10256_vm4, %v2202_v41, %v1981_v0  ;;  %v7944_v14 = vpop.f32.mrf.mxu1  ;;  %v10541_v45 = vld [vmem:[#allocation78_spill] sm:$0xff] }
 0x1b4   : > { %v2411_v60 = vsel %vm10237_vm5, %v2369_v40, %v7689_v62  ;;  %v1510_v1 = vpack.c.bf16 %v10541_v45, %v1490_v56 }
 0x1b5   : > { %2738 = vmatprep.mubr.bf16.mxu0 %v2411_v60  ;;  %v7957_v42 = vpop.f32.mrf.mxu1 }
 0x1b6   : > { %v2079_v9 = vpop.permute.xlu0 %2078  ;;  %v2029_v31 = vpop.permute.xlu1 %2028 }
 0x1b7   : > { %v2283_v44 = vsel %vm10237_vm5, %v2240_v2, %v2029_v31  ;;  %v2335_v62 = vsel %vm10533_vm10, %v1735_v32, %v2079_v9  ;;  %vm10540_vm10 = vmmov %vm10487_vm1  ;;  %v7962_v60 = vpop.f32.mrf.mxu1  ;;  %v10543_v32 = vld [vmem:[#allocation87_spill] sm:$0xff]  ;;  %v1492_v9 = vsel %vm7659_vm6, %v10544_v3, 0.0 }
 0x1b8   : > { %v2208_v41 = vsel %vm10487_vm1, %v1510_v1, %v10543_v32 }
 0x1b9   : > { %2739 = vmatmul.mubr.bf16.gmra.mxu0 %v2283_v44 }
 0x1ba   : > { %v2127_v7 = vpop.permute.xlu0 %2126  ;;  %v1983_v47 = vpop.permute.xlu1 %1982 }
 0x1bb   : > { %v2371_v58 = vsel %vm10256_vm4, %v2335_v62, %v2127_v7  ;;  %v2242_v18 = vsel %vm10256_vm4, %v2205_v29, %v1983_v47  ;;  %v10546_v62 = vld [vmem:[#allocation28_spill] sm:$0xff]  ;;  %v7975_v47 = vpop.f32.mrf.mxu1 }
 0x1bc   : > { %v2414_v24 = vsel %vm10237_vm5, %v2371_v58, %v7701_v8  ;;  %v1737_v37 = vpack.c.bf16 %v10547_v22, %v10546_v62  ;;  %v10548_v58 = vld [vmem:[#allocation81_spill] sm:$0xff]  ;;  %v10550_v29 = vld [vmem:[#allocation88_spill] sm:$0xff] }
 0x1bd   : > { %2746 = vmatprep.mubr.bf16.mxu0 %v2414_v24  ;;  %v1511_v24 = vpack.c.bf16 %v10548_v58, %v1492_v9  ;;  %v7979_v27 = vpop.f32.mrf.mxu1  ;;  %v10554_v9 = vld [vmem:[#allocation64_spill] sm:$0xff] }
 0x1be   : > { %v2081_v46 = vpop.permute.xlu0 %2080  ;;  %v2031_v50 = vpop.permute.xlu1 %2030 }
 0x1bf   : > { %v2286_v51 = vsel %vm10237_vm5, %v2242_v18, %v2031_v50  ;;  %v2338_v8 = vsel %vm10540_vm10, %v1736_v5, %v2081_v46  ;;  %vm10549_vm10 = vmmov %vm10487_vm1  ;;  %v2211_v54 = vsel %vm10487_vm1, %v1511_v24, %v10550_v29  ;;  %v7987_v45 = vpop.f32.mrf.mxu1 }
 0x1c1   : > { %2747 = vmatmul.mubr.bf16.gmra.mxu0 %v2286_v51 }
 0x1c2   : > { %v2129_v26 = vpop.permute.xlu0 %2128  ;;  %v1985_v0 = vpop.permute.xlu1 %1984 }
 0x1c3   : > { %v2373_v40 = vsel %vm10256_vm4, %v2338_v8, %v2129_v26  ;;  %v2244_v31 = vsel %vm10256_vm4, %v2208_v41, %v1985_v0  ;;  %v10551_v26 = vld [vmem:[#allocation82_spill] sm:$0xff] }
 0x1c4   : > { %v2417_v49 = vsel %vm10237_vm5, %v2373_v40, %v10542_v28  ;;  %v7992_v28 = vpop.f32.mrf.mxu1 }
 0x1c5   : > { %2754 = vmatprep.mubr.bf16.mxu0 %v2417_v49  ;;  %v10553_v49 = vld [vmem:[#allocation84_spill] sm:$0xff] }
 0x1c6   : > { %v2083_v2 = vpop.permute.xlu0 %2082  ;;  %v2033_v44 = vpop.permute.xlu1 %2032 }
 0x1c7   : > { %v2289_v7 = vsel %vm10237_vm5, %v2244_v31, %v2033_v44  ;;  %v2341_v5 = vsel %vm10549_vm10, %v1737_v37, %v2083_v2  ;;  %vm10552_vm10 = vnez %v10470_v52  ;;  %v10555_v2 = vld [vmem:[#allocation62_spill] sm:$0xff]  ;;  %v7999_v62 = vpop.f32.mrf.mxu1 }
 0x1c8   : > { %v1494_v0 = vsel %vm10552_vm10, %v10551_v26, 0.0  ;;  %v10556_v31 = vpack.c.bf16 %v10554_v9, %v10555_v2  ;;  %vm10558_vm10 = vcmask 785408  }
 0x1c9   : > { %2755 = vmatmul.mubr.bf16.gmra.mxu0 %v2289_v7  ;;  %v1512_v32 = vpack.c.bf16 %v10553_v49, %v1494_v0  ;;  %vm10559_vm6 = vmmov %vm10558_vm10 }
 0x1ca   : > { %v2131_v34 = vpop.permute.xlu0 %2130  ;;  %v1987_v48 = vpop.permute.xlu1 %1986 }
 0x1cb   : > { %v2375_v56 = vsel %vm10256_vm4, %v2341_v5, %v2131_v34  ;;  %v2246_v18 = vsel %vm10256_vm4, %v2211_v54, %v1987_v48  ;;  %v8006_v5 = vpop.f32.mrf.mxu1  ;;  %v1496_v54 = vsel %vm7758_vm0, %v7657_v35, 0.0 }
 0x1ce   : > { %v2165_v46 = vpop.permute.xlu0 %2164  ;;  %v2035_v50 = vpop.permute.xlu1 %2034 }
 0x1cf   : > { %v2420_v51 = vsel %vm10237_vm5, %v2375_v56, %v2165_v46  ;;  %v2292_v8 = vsel %vm10237_vm5, %v2246_v18, %v2035_v50  ;;  %vm10557_vm5 = vmmov %vm10487_vm1  ;;  %v8011_v46 = vpop.f32.mrf.mxu1  ;;  %v1513_v18 = vpack.c.bf16 %v7669_v25, %v1496_v54 }
 0x1d0   : > { %2762 = vmatprep.mubr.bf16.mxu0 %v2420_v51 }
 0x1d1   : > { %2763 = vmatmul.mubr.bf16.gmra.mxu0 %v2292_v8  ;;  %v10560_v8 = vld [vmem:[#allocation69_spill] sm:$0xff] }
 0x1d2   : > { %v2085_v1 = vpop.permute.xlu0 %2084  ;;  %v1941_v40 = vpop.permute.xlu1 %1940 }
 0x1d3   : > { %v2344_v44 = vsel %vm10487_vm1, %v10556_v31, %v2085_v1  ;;  %v2214_v22 = vsel %vm10557_vm5, %v1512_v32, %v1941_v40  ;;  %v10561_v1 = vld [vmem:[#allocation67_spill] sm:$0xff]  ;;  %vm10563_vm5 = vmmov %vm10487_vm1  ;;  %v8018_v40 = vpop.f32.mrf.mxu1 }
 0x1d4   : > { %v10562_v26 = vpack.c.bf16 %v10560_v8, %v10561_v1  ;;  %v10573_v8 = vld [vmem:[#allocation23_spill] sm:$0xff] }
 0x1d5   : > { %v8025_v2 = vpop.f32.mrf.mxu1  ;;  %v3056_v1 = vsub.s32 0, %v10573_v8 }
 0x1d6   : > { %v2133_v41 = vpop.permute.xlu0 %2132  ;;  %v1989_v3 = vpop.permute.xlu1 %1988 }
 0x1d7   : > { %v2377_v37 = vsel %vm10256_vm4, %v2344_v44, %v2133_v41  ;;  %v2248_v58 = vsel %vm10256_vm4, %v2214_v22, %v1989_v3  ;;  %v8027_v31 = vpop.f32.mrf.mxu1 }
 0x1d9   : > { %v8029_v44 = vpop.f32.mrf.mxu1 }
 0x1da   : > { %v2167_v7 = vpop.permute.xlu0 %2166  ;;  %v2037_v24 = vpop.permute.xlu1 %2036 }
 0x1db   : > { %v2423_v34 = vsel %vm10558_vm10, %v2377_v37, %v2167_v7  ;;  %v2295_v48 = vsel %vm10559_vm6, %v2248_v58, %v2037_v24  ;;  %vm10564_vm6 = vmmov %vm10487_vm1 }
 0x1dc   : > { %2770 = vmatprep.mubr.bf16.mxu0 %v2423_v34  ;;  %vm10565_vm1 = vmmov %vm10558_vm10 }
 0x1dd   : > { %2771 = vmatmul.mubr.bf16.gmra.mxu0 %v2295_v48 }
 0x1de   : > { %v2087_v29 = vpop.permute.xlu0 %2086  ;;  %v1943_v56 = vpop.permute.xlu1 %1942 }
 0x1df   : > { %v2347_v0 = vsel %vm10563_vm5, %v10562_v26, %v2087_v29  ;;  %v2217_v49 = vsel %vm10564_vm6, %v1513_v18, %v1943_v56  ;;  %v8051_v26 = vld [vmem:[%s10082_s5] ss:$0 sm:$0xff]  ;;  %vm10576_vm6 = vmmov %vm10563_vm5 }
 0x1e2   : > { %v2135_v50 = vpop.permute.xlu0 %2134  ;;  %v1991_v51 = vpop.permute.xlu1 %1990 }
 0x1e3   : > { %v2379_v32 = vsel %vm10256_vm4, %v2347_v0, %v2135_v50  ;;  %v2250_v35 = vsel %vm10256_vm4, %v2217_v49, %v1991_v51 }
 0x1e6   : > { %v2169_v41 = vpop.permute.xlu0 %2168  ;;  %v2039_v3 = vpop.permute.xlu1 %2038 }
 0x1e7   : > { %v2426_v9 = vsel %vm10558_vm10, %v2379_v32, %v2169_v41  ;;  %v2298_v25 = vsel %vm10565_vm1, %v2250_v35, %v2039_v3  ;;  %vm10577_vm10 = vmmov %vm10563_vm5 }
 0x1e8   : > { %2778 = vmatprep.mubr.bf16.mxu0 %v2426_v9  ;;  %vm10578_vm1 = vmmov %vm10563_vm5 }
 0x1e9   : > { %2779 = vmatmul.mubr.bf16.gmra.mxu0 %v2298_v25  ;;  %vm10660_vm4 = vmmov %vm10578_vm1 }
 0x1f2   : > { %v8031_v22 = vpop.f32.mrf.mxu1 }
 0x1f3   : > { %10566 = vst [vmem:[#allocation3_spill] sm:$0xff] %v8031_v22 }
 0x1f4   : > { %v8033_v37 = vpop.f32.mrf.mxu1 }
 0x1f6   : > { %v8035_v7 = vpop.f32.mrf.mxu1 }
 0x1f7   : > { %10567 = vst [vmem:[#allocation4_spill] sm:$0xff] %v8035_v7 }
 0x1f8   : > { %v8037_v58 = vpop.f32.mrf.mxu1 }
 0x1f9   : > { %10568 = vst [vmem:[#allocation38_spill] sm:$0xff] %v8037_v58 }
 0x1fa   : > { %v8039_v24 = vpop.f32.mrf.mxu1 }
 0x1fb   : > { %10569 = vst [vmem:[#allocation40_spill] sm:$0xff] %v8039_v24 }
 0x1fc   : > { %v8041_v34 = vpop.f32.mrf.mxu1 }
 0x1fd   : > { %10570 = vst [vmem:[#allocation5_spill] sm:$0xff] %v8041_v34 }
 0x1fe   : > { %v8043_v48 = vpop.f32.mrf.mxu1 }
 0x1ff   : > { %10571 = vst [vmem:[#allocation6_spill] sm:$0xff] %v8043_v48 }
 0x200   : > { %v8045_v29 = vpop.f32.mrf.mxu1 }
 0x201   : > { %10572 = vst [vmem:[#allocation7_spill] sm:$0xff] %v8045_v29 }
 0x202   : > { %v3048_v54 = vpop.f32.mrf.mxu1 }
 0x203   : > { %v8054_v35 = vrot.slane %v3048_v54, %v3056_v1 }
 0x204   : > { %v5692_v56 = vpop.f32.mrf.mxu1 }
 0x206   : > { %v3051_v18 = vpop.f32.mrf.mxu1 }
 0x208   : > { %v5693_v50 = vpop.f32.mrf.mxu1 }
 0x229   : > { %v5385_v51 = vpop.f32.mrf.mxu0 }
 0x22b   : > { %v5386_v0 = vpop.f32.mrf.mxu0 }
 0x22c   : > { %v5387_v49 = vadd.f32 %v5386_v0, %v5385_v51 }
 0x22d   : > { %v5388_v32 = vpop.f32.mrf.mxu0 }
 0x22e   : > { %v2661_v41 = vadd.f32 %v5387_v49, %v8051_v26 }
 0x22f   : > { %v5389_v3 = vpop.f32.mrf.mxu0 }
 0x230   : > { %v2822_v9 = vadd.f32 %v7884_v13, %v2661_v41  ;;  %v5390_v38 = vadd.f32 %v5389_v3, %v5388_v32 }
 0x231   : > { %v5391_v25 = vpop.f32.mrf.mxu0 }
 0x232   : > { %v8058_v56 = vadd.f32 %v8054_v35, %v2822_v9  ;;  %v2664_v21 = vadd.f32 %v5390_v38, %v8051_v26 }
 0x233   : > { %v5392_v18 = vpop.f32.mrf.mxu0 }
 0x234   : > { %v5393_v43 = vadd.f32 %v5392_v18, %v5391_v25  ;;  %v2825_v7 = vadd.f32 %v7899_v10, %v2664_v21 }
 0x235   : > { %v5394_v50 = vpop.f32.mrf.mxu0 }
 0x236   : > { %v2669_v29 = vadd.f32 %v5393_v43, %v8051_v26  ;;  %v8088_v38 = vadd.f32 %v8054_v35, %v2825_v7 }
 0x237   : > { %v5395_v8 = vpop.f32.mrf.mxu0 }
 0x238   : > { %v5396_v48 = vadd.f32 %v5395_v8, %v5394_v50  ;;  %v2830_v25 = vadd.f32 %v7881_v36, %v2669_v29  ;;  %10574 = vst [vmem:[#allocation8_spill] sm:$0xff] %v8088_v38  ;;  %v3162_v36 = vmul.f32 %v8088_v38, %v8088_v38 }
 0x239   : > { %v5397_v30 = vpop.f32.mrf.mxu0 }
 0x23a   : > { %v2672_v58 = vadd.f32 %v5396_v48, %v8051_v26 }
 0x23b   : > { %v5398_v63 = vpop.f32.mrf.mxu0 }
 0x23c   : > { %v5399_v22 = vadd.f32 %v5398_v63, %v5397_v30  ;;  %v2833_v8 = vadd.f32 %v7892_v4, %v2672_v58 }
 0x23d   : > { %v5400_v52 = vpop.f32.mrf.mxu0 }
 0x23e   : > { %v2677_v50 = vadd.f32 %v5399_v22, %v8051_v26  ;;  %v8105_v7 = vadd.f32 %v8054_v35, %v2833_v8 }
 0x23f   : > { %v5401_v6 = vpop.f32.mrf.mxu0 }
 0x240   : > { %v5402_v32 = vadd.f32 %v5401_v6, %v5400_v52  ;;  %v8096_v52 = vadd.f32 %v8054_v35, %v2830_v25  ;;  %v2838_v6 = vadd.f32 %v7906_v39, %v2677_v50  ;;  %v3164_v50 = vmul.f32 %v8105_v7, %v8105_v7 }
 0x241   : > { %v5403_v51 = vpop.f32.mrf.mxu0 }
 0x242   : > { %v2680_v21 = vadd.f32 %v5402_v32, %v8051_v26  ;;  %10575 = vst [vmem:[#allocation41_spill] sm:$0xff] %v8096_v52  ;;  %v3163_v39 = vmul.f32 %v8096_v52, %v8096_v52  ;;  %v3095_v25 = vsel %vm10578_vm1, %v8096_v52, 0.0 }
 0x243   : > { %v5404_v0 = vpop.f32.mrf.mxu0 }
 0x244   : > { %v5405_v43 = vadd.f32 %v5404_v0, %v5403_v51  ;;  %v2841_v4 = vadd.f32 %v7921_v20, %v2680_v21  ;;  %v3093_v51 = vsel %vm10563_vm5, %v8088_v38, 0.0  ;;  %v3092_v20 = vsel %vm10576_vm6, %v8058_v56, 0.0  ;;  %vm10579_vm5 = vmmov %vm10578_vm1 }
 0x245   : > { %v5406_v16 = vpop.f32.mrf.mxu0  ;;  %v3094_v8 = vadd.f32 %v3093_v51, %v3092_v20  ;;  %vm10580_vm6 = vmmov %vm10578_vm1 }
 0x246   : > { %v2685_v22 = vadd.f32 %v5405_v43, %v8051_v26 }
 0x247   : > { %v5407_v49 = vpop.f32.mrf.mxu0  ;;  %v3096_v38 = vadd.f32 %v3095_v25, %v3094_v8 }
 0x248   : > { %v5408_v63 = vadd.f32 %v5407_v49, %v5406_v16  ;;  %v3161_v16 = vmul.f32 %v8058_v56, %v8058_v56  ;;  %v2846_v32 = vadd.f32 %v7903_v15, %v2685_v22 }
 0x249   : > { %v5409_v54 = vpop.f32.mrf.mxu0 }
 0x24a   : > { %v2688_v29 = vadd.f32 %v5408_v63, %v8051_v26  ;;  %v3193_v21 = vsel %vm10579_vm5, %v3161_v16, 0.0  ;;  %v8147_v51 = vadd.f32 %v8054_v35, %v2846_v32  ;;  %vm10582_vm5 = vmmov %vm10578_vm1 }
 0x24b   : > { %v5410_v1 = vpop.f32.mrf.mxu0 }
 0x24c   : > { %v5411_v58 = vadd.f32 %v5410_v1, %v5409_v54  ;;  %v3194_v54 = vsel %vm10577_vm10, %v3162_v36, 0.0  ;;  %v8123_v1 = vadd.f32 %v8054_v35, %v2838_v6  ;;  %v2849_v63 = vadd.f32 %v7914_v23, %v2688_v29  ;;  %vm10581_vm10 = vmmov %vm10578_vm1 }
 0x24d   : > { %v5412_v55 = vpop.f32.mrf.mxu0  ;;  %v3195_v15 = vadd.f32 %v3194_v54, %v3193_v21  ;;  %v3196_v6 = vsel %vm10580_vm6, %v3163_v39, 0.0  ;;  %v3198_v23 = vsel %vm10578_vm1, %v3164_v50, 0.0  ;;  %vm10583_vm6 = vmmov %vm10578_vm1  ;;  %v3167_v8 = vmul.f32 %v8147_v51, %v8147_v51 }
 0x24e   : > { %v8160_v20 = vadd.f32 %v8054_v35, %v2849_v63 }
 0x24f   : > { %v5413_v57 = vpop.f32.mrf.mxu0  ;;  %v3197_v39 = vadd.f32 %v3196_v6, %v3195_v15 }
 0x250   : > { %v5414_v0 = vadd.f32 %v5413_v57, %v5412_v55  ;;  %v8131_v57 = vadd.f32 %v8054_v35, %v2841_v4  ;;  %v2693_v55 = vadd.f32 %v5411_v58, %v8051_v26  ;;  %v3097_v4 = vsel %vm10581_vm10, %v8105_v7, 0.0  ;;  %vm10584_vm10 = vmmov %vm10578_vm1 }
 0x251   : > { %v5415_v13 = vpop.f32.mrf.mxu0  ;;  %v3165_v58 = vmul.f32 %v8123_v1, %v8123_v1  ;;  %v3098_v32 = vadd.f32 %v3097_v4, %v3096_v38 }
 0x252   : > { %v2696_v22 = vadd.f32 %v5414_v0, %v8051_v26  ;;  %v3099_v0 = vsel %vm10582_vm5, %v8123_v1, 0.0  ;;  %vm10585_vm5 = vmmov %vm10578_vm1 }
 0x253   : > { %v5416_v41 = vpop.f32.mrf.mxu0  ;;  %v3100_v21 = vadd.f32 %v3099_v0, %v3098_v32 }
 0x254   : > { %v5417_v36 = vadd.f32 %v5416_v41, %v5415_v13  ;;  %v3166_v13 = vmul.f32 %v8131_v57, %v8131_v57  ;;  %v2854_v41 = vadd.f32 %v7939_v59, %v2693_v55  ;;  %v2857_v25 = vadd.f32 %v7957_v42, %v2696_v22 }
 0x255   : > { %v8060_v61 = vpop.f32.mrf.mxu0  ;;  %v3101_v55 = vsel %vm10584_vm10, %v8131_v57, 0.0  ;;  %vm10587_vm10 = vmmov %vm10578_vm1 }
 0x256   : > { %v2701_v54 = vadd.f32 %v5417_v36, %v8051_v26  ;;  %v3202_v63 = vsel %vm10578_vm1, %v3166_v13, 0.0  ;;  %v8175_v38 = vadd.f32 %v8054_v35, %v2854_v41  ;;  %v3168_v36 = vmul.f32 %v8160_v20, %v8160_v20 }
 0x257   : > { %v8062_v9 = vpop.f32.mrf.mxu0  ;;  %v3102_v4 = vadd.f32 %v3101_v55, %v3100_v21 }
 0x258   : > { %v5420_v16 = vadd.f32 %v8062_v9, %v8060_v61  ;;  %v3199_v61 = vadd.f32 %v3198_v23, %v3197_v39  ;;  %v3200_v9 = vsel %vm10583_vm6, %v3165_v58, 0.0  ;;  %v2862_v15 = vadd.f32 %v7926_v12, %v2701_v54  ;;  %vm10586_vm6 = vmmov %vm10578_vm1 }
 0x259   : > { %v8064_v53 = vpop.f32.mrf.mxu0  ;;  %v8188_v58 = vadd.f32 %v8054_v35, %v2857_v25  ;;  %v3204_v41 = vsel %vm10586_vm6, %v3167_v8, 0.0  ;;  %v3169_v12 = vmul.f32 %v8175_v38, %v8175_v38  ;;  %v3105_v54 = vsel %vm10587_vm10, %v8160_v20, 0.0  ;;  %vm10589_vm6 = vmmov %vm10578_vm1 }
 0x25a   : > { %v2704_v42 = vadd.f32 %v5420_v16, %v8051_v26  ;;  %v3201_v22 = vadd.f32 %v3200_v9, %v3199_v61  ;;  %v3206_v32 = vsel %vm10578_vm1, %v3168_v36, 0.0  ;;  %v8205_v25 = vadd.f32 %v8054_v35, %v2862_v15  ;;  %vm10590_vm10 = vmmov %vm10578_vm1 }
 0x25b   : > { %v8066_v17 = vpop.f32.mrf.mxu0 }
 0x25c   : > { %v5423_v59 = vadd.f32 %v8066_v17, %v8064_v53  ;;  %v3103_v53 = vsel %vm10585_vm5, %v8147_v51, 0.0  ;;  %v3203_v39 = vadd.f32 %v3202_v63, %v3201_v22  ;;  %vm10588_vm5 = vmmov %vm10578_vm1 }
 0x25d   : > { %v8068_v33 = vpop.f32.mrf.mxu0  ;;  %v3104_v0 = vadd.f32 %v3103_v53, %v3102_v4  ;;  %v3107_v55 = vsel %vm10588_vm5, %v8175_v38, 0.0  ;;  %vm10591_vm5 = vmmov %vm10578_vm1 }
 0x25e   : > { %v2709_v23 = vadd.f32 %v5423_v59, %v8051_v26 }
 0x25f   : > { %v8070_v11 = vpop.f32.mrf.mxu0  ;;  %v3106_v21 = vadd.f32 %v3105_v54, %v3104_v0 }
 0x260   : > { %v5426_v6 = vadd.f32 %v8070_v11, %v8068_v33  ;;  %v2865_v11 = vadd.f32 %v7944_v14, %v2704_v42  ;;  %v2870_v61 = vadd.f32 %v7975_v47, %v2709_v23  ;;  %v3208_v42 = vsel %vm10589_vm6, %v3169_v12, 0.0  ;;  %vm10592_vm6 = vmmov %vm10578_vm1 }
 0x261   : > { %v8072_v19 = vpop.f32.mrf.mxu0  ;;  %v3109_v47 = vsel %vm10590_vm10, %v8188_v58, 0.0  ;;  %vm10593_vm10 = vmmov %vm10578_vm1 }
 0x262   : > { %v2712_v59 = vadd.f32 %v5426_v6, %v8051_v26  ;;  %v8220_v53 = vadd.f32 %v8054_v35, %v2865_v11  ;;  %v3108_v6 = vadd.f32 %v3107_v55, %v3106_v21  ;;  %v8233_v4 = vadd.f32 %v8054_v35, %v2870_v61  ;;  %v5769_v61 = vld [vmem:[%s10086_s9 + $0x88] sm:$0xff]   ;;  %v3715_v55 = vld [vmem:[#allocation2 + $0x10] sm:$0xff] }
 0x263   : > { %v8075_v24 = vpop.f32.mrf.mxu0  ;;  %5694 = vmatprep.subr.bf16.mxu0 %v5769_v61 }
 0x264   : > { %v5429_v16 = vadd.f32 %v8075_v24, %v8072_v19  ;;  %v3205_v19 = vadd.f32 %v3204_v41, %v3203_v39  ;;  %v3170_v24 = vmul.f32 %v8188_v58, %v8188_v58  ;;  %v3111_v39 = vsel %vm10591_vm5, %v8205_v25, 0.0  ;;  %5695 = vmatpush3.bf16.msra.mxu0 %v5769_v61  ;;  %vm10594_vm5 = vmmov %vm10578_vm1 }
 0x265   : > { %v8078_v34 = vpop.f32.mrf.mxu0 }
 0x266   : > { %v2717_v8 = vadd.f32 %v5429_v16, %v8051_v26  ;;  %v3207_v63 = vadd.f32 %v3206_v32, %v3205_v19  ;;  %v3210_v22 = vsel %vm10578_vm1, %v3170_v24, 0.0 }
 0x267   : > { %v8082_v3 = vpop.f32.mrf.mxu0 }
 0x268   : > { %v5432_v14 = vadd.f32 %v8082_v3, %v8078_v34  ;;  %v3171_v34 = vmul.f32 %v8205_v25, %v8205_v25  ;;  %v2873_v3 = vadd.f32 %v7987_v45, %v2712_v59  ;;  %v3209_v16 = vadd.f32 %v3208_v42, %v3207_v63 }
 0x269   : > { %v8085_v18 = vpop.f32.mrf.mxu0  ;;  %v2878_v0 = vadd.f32 %v7962_v60, %v2717_v8  ;;  %v3113_v60 = vsel %vm10593_vm10, %v8220_v53, 0.0  ;;  %vm10596_vm10 = vmmov %vm10578_vm1 }
 0x26a   : > { %v2720_v23 = vadd.f32 %v5432_v14, %v8051_v26  ;;  %v3211_v11 = vadd.f32 %v3210_v22, %v3209_v16  ;;  %v3212_v54 = vsel %vm10592_vm6, %v3171_v34, 0.0  ;;  %v8249_v32 = vadd.f32 %v8054_v35, %v2873_v3  ;;  %v3714_v14 = vld [vmem:[#allocation2 + $0x8] sm:$0xff]  ;;  %vm10595_vm6 = vmmov %vm10578_vm1 }
 0x26b   : > { %v8093_v30 = vpop.f32.mrf.mxu0  ;;  %v8263_v8 = vadd.f32 %v8054_v35, %v2878_v0  ;;  %v3746_v42 = vpack.c.bf16 %v3715_v55, %v3714_v14 }
 0x26c   : > { %v5435_v15 = vadd.f32 %v8093_v30, %v8085_v18  ;;  %v3110_v18 = vadd.f32 %v3109_v47, %v3108_v6  ;;  %v3172_v30 = vmul.f32 %v8220_v53, %v8220_v53  ;;  %v3213_v47 = vadd.f32 %v3212_v54, %v3211_v11 }
 0x26d   : > { %v8098_v10 = vpop.f32.mrf.mxu0  ;;  %v3174_v22 = vmul.f32 %v8249_v32, %v8249_v32  ;;  %4080 = vrot.lane.b32.xlu1 %v3746_v42, %s6064_s23 }
 0x26e   : > { %v2725_v59 = vadd.f32 %v5435_v15, %v8051_v26  ;;  %v3112_v19 = vadd.f32 %v3111_v39, %v3110_v18  ;;  %v3214_v34 = vsel %vm10578_vm1, %v3172_v30, 0.0  ;;  %v3117_v18 = vsel %vm10596_vm10, %v8249_v32, 0.0  ;;  %vm10599_vm10 = vmmov %vm10578_vm1 }
 0x26f   : > { %v8108_v48 = vpop.f32.mrf.mxu0  ;;  %v3215_v39 = vadd.f32 %v3214_v34, %v3213_v47 }
 0x270   : > { %v5438_v45 = vadd.f32 %v8108_v48, %v8098_v10  ;;  %v3173_v10 = vmul.f32 %v8233_v4, %v8233_v4  ;;  %v2881_v48 = vadd.f32 %v7979_v27, %v2720_v23  ;;  %v5770_v27 = vld [vmem:[%s10086_s9 + $0x80] sm:$0xff]   ;;  %v3114_v6 = vadd.f32 %v3113_v60, %v3112_v19 }
 0x271   : > { %v8117_v49 = vpop.f32.mrf.mxu0  ;;  %v2886_v23 = vadd.f32 %v7999_v62, %v2725_v59  ;;  %5696 = vmatprep.subr.bf16.mxu0 %v5770_v27  ;;  %v3175_v62 = vmul.f32 %v8263_v8, %v8263_v8  ;;  %v3218_v59 = vsel %vm10578_vm1, %v3174_v22, 0.0 }
 0x272   : > { %v2728_v21 = vadd.f32 %v5438_v45, %v8051_v26  ;;  %v8282_v16 = vadd.f32 %v8054_v35, %v2881_v48  ;;  %5697 = vmatpush3.bf16.msra.mxu0 %v5770_v27 }
 0x273   : > { %v8134_v43 = vpop.f32.mrf.mxu0  ;;  %v8297_v19 = vadd.f32 %v8054_v35, %v2886_v23 }
 0x274   : > { %v5441_v63 = vadd.f32 %v8134_v43, %v8117_v49  ;;  %v3115_v49 = vsel %vm10594_vm5, %v8233_v4, 0.0  ;;  %v3216_v43 = vsel %vm10595_vm6, %v3173_v10, 0.0  ;;  %v2889_v0 = vadd.f32 %v8011_v46, %v2728_v21  ;;  %vm10597_vm5 = vmmov %vm10578_vm1 }
 0x275   : > { %v8140_v52 = vpop.f32.mrf.mxu0  ;;  %v3119_v46 = vsel %vm10597_vm5, %v8263_v8, 0.0  ;;  %v3176_v60 = vmul.f32 %v8282_v16, %v8282_v16  ;;  %vm10598_vm6 = vmmov %vm10578_vm1  ;;  %v3121_v34 = vsel %vm10599_vm10, %v8282_v16, 0.0 }
 0x276   : > { %v2733_v45 = vadd.f32 %v5441_v63, %v8051_v26  ;;  %v3220_v61 = vsel %vm10598_vm6, %v3175_v62, 0.0  ;;  %v8308_v14 = vadd.f32 %v8054_v35, %v2889_v0  ;;  %vm10600_vm5 = vmmov %vm10578_vm1 }
 0x277   : > { %v8155_v29 = vpop.f32.mrf.mxu0  ;;  %v3123_v23 = vsel %vm10600_vm5, %v8297_v19, 0.0  ;;  %vm10601_vm6 = vmmov %vm10578_vm1 }
 0x278   : > { %v5444_v3 = vadd.f32 %v8155_v29, %v8140_v52  ;;  %v2894_v55 = vadd.f32 %v7992_v28, %v2733_v45  ;;  %vm10602_vm10 = vmmov %vm10578_vm1 }
 0x279   : > { %v8166_v50 = vpop.f32.mrf.mxu0  ;;  %vm10603_vm5 = vmmov %vm10578_vm1 }
 0x27a   : > { %v2736_v30 = vadd.f32 %v5444_v3, %v8051_v26 }
 0x27b   : > { %v8178_v17 = vpop.f32.mrf.mxu0 }
 0x27c   : > { %v5447_v52 = vadd.f32 %v8178_v17, %v8166_v50  ;;  %v3116_v50 = vadd.f32 %v3115_v49, %v3114_v6  ;;  %v3217_v17 = vadd.f32 %v3216_v43, %v3215_v39  ;;  %v2897_v63 = vadd.f32 %v8006_v5, %v2736_v30 }
 0x27d   : > { %v8191_v13 = vpop.f32.mrf.mxu0  ;;  %v3222_v6 = vsel %vm10578_vm1, %v3176_v60, 0.0  ;;  %v3178_v49 = vmul.f32 %v8308_v14, %v8308_v14  ;;  %v8327_v43 = vadd.f32 %v8054_v35, %v2894_v55 }
 0x27e   : > { %v2741_v10 = vadd.f32 %v5447_v52, %v8051_v26  ;;  %v3118_v48 = vadd.f32 %v3117_v18, %v3116_v50  ;;  %v3219_v21 = vadd.f32 %v3218_v59, %v3217_v17 }
 0x27f   : > { %v8199_v33 = vpop.f32.mrf.mxu0 }
 0x280   : > { %v5450_v11 = vadd.f32 %v8199_v33, %v8191_v13  ;;  %v3120_v47 = vadd.f32 %v3119_v46, %v3118_v48  ;;  %v3221_v3 = vadd.f32 %v3220_v61, %v3219_v21  ;;  %v2902_v28 = vadd.f32 %v8025_v2, %v2741_v10 }
 0x281   : > { %v8213_v9 = vpop.f32.mrf.mxu0  ;;  %v3127_v10 = vsel %vm10603_vm5, %v8327_v43, 0.0  ;;  %vm10606_vm5 = vmmov %vm10578_vm1 }
 0x282   : > { %v2744_v42 = vadd.f32 %v5450_v11, %v8051_v26  ;;  %v3223_v39 = vadd.f32 %v3222_v6, %v3221_v3  ;;  %v3125_v11 = vsel %vm10602_vm10, %v8308_v14, 0.0  ;;  %v8339_v50 = vadd.f32 %v8054_v35, %v2902_v28  ;;  %vm10605_vm10 = vmmov %vm10578_vm1 }
 0x283   : > { %v8222_v36 = vpop.f32.mrf.mxu0 }
 0x284   : > { %v5453_v13 = vadd.f32 %v8222_v36, %v8213_v9  ;;  %v3177_v9 = vmul.f32 %v8297_v19, %v8297_v19  ;;  %v2905_v2 = vadd.f32 %v8029_v44, %v2744_v42  ;;  %v3179_v44 = vmul.f32 %v8327_v43, %v8327_v43 }
 0x285   : > { %v8236_v41 = vpop.f32.mrf.mxu0  ;;  %v3131_v6 = vsel %vm10606_vm5, %v8339_v50, 0.0  ;;  %vm10612_vm5 = vmmov %vm10578_vm1 }
 0x286   : > { %v2749_v5 = vadd.f32 %v5453_v13, %v8051_v26  ;;  %v3224_v62 = vsel %vm10601_vm6, %v3177_v9, 0.0  ;;  %vm10604_vm6 = vmmov %vm10578_vm1 }
 0x287   : > { %v8245_v12 = vpop.f32.mrf.mxu0  ;;  %v3225_v46 = vadd.f32 %v3224_v62, %v3223_v39 }
 0x288   : > { %v5456_v36 = vadd.f32 %v8245_v12, %v8236_v41  ;;  %v3122_v41 = vadd.f32 %v3121_v34, %v3120_v47  ;;  %v8331_v12 = vadd.f32 %v8054_v35, %v2897_v63  ;;  %v3228_v63 = vsel %vm10604_vm6, %v3179_v44, 0.0  ;;  %vm10608_vm6 = vmmov %vm10578_vm1 }
 0x289   : > { %v8257_v24 = vpop.f32.mrf.mxu0 }
 0x28a   : > { %v2752_v0 = vadd.f32 %v5456_v36, %v8051_v26  ;;  %v3124_v30 = vadd.f32 %v3123_v23, %v3122_v41  ;;  %v3129_v42 = vsel %vm10605_vm10, %v8331_v12, 0.0  ;;  %vm10609_vm10 = vmmov %vm10578_vm1 }
 0x28b   : > { %v5458_v15 = vpop.f32.mrf.mxu0 }
 0x28c   : > { %v5459_v52 = vadd.f32 %v5458_v15, %v8257_v24  ;;  %v2910_v24 = vadd.f32 %v8018_v40, %v2749_v5  ;;  %v3226_v15 = vsel %vm10578_vm1, %v3178_v49, 0.0  ;;  %v2913_v40 = vadd.f32 %v8027_v31, %v2752_v0  ;;  %v10607_v5 = vld [vmem:[#allocation38_spill] sm:$0xff]  ;;  %v10610_v0 = vld [vmem:[#allocation3_spill] sm:$0xff] }
 0x28d   : > { %v5460_v29 = vpop.f32.mrf.mxu0  ;;  %v3126_v48 = vadd.f32 %v3125_v11, %v3124_v30  ;;  %v3227_v61 = vadd.f32 %v3226_v15, %v3225_v46  ;;  %v10611_v15 = vld [vmem:[#allocation4_spill] sm:$0xff] }
 0x28e   : > { %v2757_v17 = vadd.f32 %v5459_v52, %v8051_v26  ;;  %v8358_v55 = vadd.f32 %v8054_v35, %v2910_v24  ;;  %v8372_v28 = vadd.f32 %v8054_v35, %v2913_v40 }
 0x28f   : > { %v5461_v54 = vpop.f32.mrf.mxu0  ;;  %v3128_v47 = vadd.f32 %v3127_v10, %v3126_v48  ;;  %v3229_v23 = vadd.f32 %v3228_v63, %v3227_v61 }
 0x290   : > { %v5462_v45 = vadd.f32 %v5461_v54, %v5460_v29  ;;  %v3180_v29 = vmul.f32 %v8331_v12, %v8331_v12  ;;  %v8349_v54 = vadd.f32 %v8054_v35, %v2905_v2  ;;  %v3183_v41 = vmul.f32 %v8358_v55, %v8358_v55 }
 0x291   : > { %v5463_v33 = vpop.f32.mrf.mxu0  ;;  %v3130_v49 = vadd.f32 %v3129_v42, %v3128_v47  ;;  %v3184_v46 = vmul.f32 %v8372_v28, %v8372_v28 }
 0x292   : > { %v2760_v13 = vadd.f32 %v5462_v45, %v8051_v26  ;;  %v3230_v34 = vsel %vm10578_vm1, %v3180_v29, 0.0  ;;  %v3182_v9 = vmul.f32 %v8349_v54, %v8349_v54  ;;  %v3133_v39 = vsel %vm10609_vm10, %v8349_v54, 0.0  ;;  %vm10614_vm10 = vmmov %vm10578_vm1 }
 0x293   : > { %v5464_v27 = vpop.f32.mrf.mxu0  ;;  %v3231_v30 = vadd.f32 %v3230_v34, %v3229_v23  ;;  %v3132_v11 = vadd.f32 %v3131_v6, %v3130_v49  ;;  %v3137_v48 = vsel %vm10614_vm10, %v8372_v28, 0.0  ;;  %v3238_v34 = vsel %vm10578_vm1, %v3184_v46, 0.0  ;;  %vm10619_vm10 = vmmov %vm10578_vm1 }
 0x294   : > { %v5465_v59 = vadd.f32 %v5464_v27, %v5463_v33  ;;  %v3181_v33 = vmul.f32 %v8339_v50, %v8339_v50  ;;  %v2918_v27 = vadd.f32 %v8033_v37, %v2757_v17  ;;  %v3234_v24 = vsel %vm10578_vm1, %v3182_v9, 0.0 }
 0x295   : > { %v5466_v22 = vpop.f32.mrf.mxu0  ;;  %v3134_v40 = vadd.f32 %v3133_v39, %v3132_v11 }
 0x296   : > { %v2765_v31 = vadd.f32 %v5465_v59, %v8051_v26  ;;  %v3232_v52 = vsel %vm10608_vm6, %v3181_v33, 0.0  ;;  %v8381_v62 = vadd.f32 %v8054_v35, %v2918_v27  ;;  %v3135_v59 = vsel %vm10612_vm5, %v8358_v55, 0.0  ;;  %vm10613_vm6 = vmmov %vm10578_vm1 }
 0x297   : > { %v5467_v18 = vpop.f32.mrf.mxu0  ;;  %v3233_v10 = vadd.f32 %v3232_v52, %v3231_v30  ;;  %vm10616_vm5 = vmmov %vm10578_vm1 }
 0x298   : > { %v5468_v60 = vadd.f32 %v5467_v18, %v5466_v22  ;;  %v2921_v22 = vadd.f32 %v10607_v5, %v2760_v13  ;;  %v2926_v45 = vadd.f32 %v10610_v0, %v2765_v31  ;;  %v3236_v13 = vsel %vm10613_vm6, %v3183_v41, 0.0  ;;  %vm10618_vm6 = vmmov %vm10578_vm1 }
 0x299   : > { %v3185_v61 = vmul.f32 %v8381_v62, %v8381_v62  ;;  %v3235_v27 = vadd.f32 %v3234_v24, %v3233_v10  ;;  %v3136_v31 = vadd.f32 %v3135_v59, %v3134_v40  ;;  %v3139_v9 = vsel %vm10616_vm5, %v8381_v62, 0.0  ;;  %vm10620_vm5 = vmmov %vm10578_vm1 }
 0x29a   : > { %v2768_v36 = vadd.f32 %v5468_v60, %v8051_v26  ;;  %v8392_v29 = vadd.f32 %v8054_v35, %v2921_v22  ;;  %v8400_v33 = vadd.f32 %v8054_v35, %v2926_v45 }
 0x29b   : > { %v3237_v5 = vadd.f32 %v3236_v13, %v3235_v27  ;;  %v3138_v22 = vadd.f32 %v3137_v48, %v3136_v31  ;;  %v3240_v23 = vsel %vm10618_vm6, %v3185_v61, 0.0  ;;  %vm10621_vm6 = vmmov %vm10578_vm1 }
 0x29c   : > { %v2929_v44 = vadd.f32 %v10611_v15, %v2768_v36  ;;  %v3186_v36 = vmul.f32 %v8392_v29, %v8392_v29  ;;  %v3141_v49 = vsel %vm10619_vm10, %v8392_v29, 0.0  ;;  %v3187_v52 = vmul.f32 %v8400_v33, %v8400_v33  ;;  %vm10622_vm10 = vmmov %vm10578_vm1 }
 0x29d   : > { %v5469_v21 = vpop.f32.mrf.mxu0  ;;  %v3140_v39 = vadd.f32 %v3139_v9, %v3138_v22  ;;  %v3143_v30 = vsel %vm10620_vm5, %v8400_v33, 0.0  ;;  %vm10623_vm5 = vmmov %vm10578_vm1 }
 0x29e   : > { %v8405_v47 = vadd.f32 %v8054_v35, %v2929_v44  ;;  %v3244_v59 = vsel %vm10621_vm6, %v3187_v52, 0.0  ;;  %vm10625_vm6 = vmmov %vm10578_vm1 }
 0x29f   : > { %v5470_v3 = vpop.f32.mrf.mxu0  ;;  %v3142_v44 = vadd.f32 %v3141_v49, %v3140_v39 }
 0x2a0   : > { %v5471_v37 = vadd.f32 %v5470_v3, %v5469_v21  ;;  %v10615_v21 = vld [vmem:[#allocation5_spill] sm:$0xff]  ;;  %v10617_v3 = vld [vmem:[#allocation7_spill] sm:$0xff]  ;;  %v3188_v0 = vmul.f32 %v8405_v47, %v8405_v47  ;;  %v3145_v46 = vsel %vm10622_vm10, %v8405_v47, 0.0  ;;  %vm10626_vm10 = vmmov %vm10578_vm1 }
 0x2a1   : > { %v5472_v2 = vpop.f32.mrf.mxu0  ;;  %v3144_v13 = vadd.f32 %v3143_v30, %v3142_v44 }
 0x2a2   : > { %v2773_v18 = vadd.f32 %v5471_v37, %v8051_v26  ;;  %v3246_v48 = vsel %vm10578_vm1, %v3188_v0, 0.0 }
 0x2a3   : > { %v5473_v17 = vpop.f32.mrf.mxu0  ;;  %v3146_v9 = vadd.f32 %v3145_v46, %v3144_v13 }
 0x2a4   : > { %v5474_v60 = vadd.f32 %v5473_v17, %v5472_v2  ;;  %v2934_v63 = vadd.f32 %v10615_v21, %v2773_v18  ;;  %v3239_v2 = vadd.f32 %v3238_v34, %v3237_v5  ;;  %v3242_v18 = vsel %vm10578_vm1, %v3186_v36, 0.0 }
 0x2a6   : > { %v2776_v42 = vadd.f32 %v5474_v60, %v8051_v26  ;;  %v8419_v41 = vadd.f32 %v8054_v35, %v2934_v63  ;;  %v3241_v15 = vadd.f32 %v3240_v23, %v3239_v2  ;;  %v10628_v2 = vld [vmem:[#allocation6_spill] sm:$0xff] }
 0x2a8   : > { %v2937_v6 = vadd.f32 %v10617_v3, %v2776_v42  ;;  %v3189_v60 = vmul.f32 %v8419_v41, %v8419_v41  ;;  %v3243_v40 = vadd.f32 %v3242_v18, %v3241_v15  ;;  %v3147_v21 = vsel %vm10623_vm5, %v8419_v41, 0.0  ;;  %v10624_v42 = vld [vmem:[#allocation40_spill] sm:$0xff]  ;;  %vm10627_vm5 = vmmov %vm10578_vm1 }
 0x2a9   : > { %v5475_v37 = vpop.f32.mrf.mxu0 }
 0x2aa   : > { %v8427_v11 = vadd.f32 %v8054_v35, %v2937_v6  ;;  %v3245_v34 = vadd.f32 %v3244_v59, %v3243_v40  ;;  %v3248_v36 = vsel %vm10625_vm6, %v3189_v60, 0.0  ;;  %vm10629_vm6 = vmmov %vm10578_vm1 }
 0x2ab   : > { %v5476_v45 = vpop.f32.mrf.mxu0 }
 0x2ac   : > { %v5477_v24 = vadd.f32 %v5476_v45, %v5475_v37  ;;  %v3190_v63 = vmul.f32 %v8427_v11, %v8427_v11  ;;  %v3149_v3 = vsel %vm10626_vm10, %v8427_v11, 0.0  ;;  %v3247_v22 = vadd.f32 %v3246_v48, %v3245_v34  ;;  %vm10630_vm10 = vmmov %vm10578_vm1 }
 0x2ad   : > { %v5478_v17 = vpop.f32.mrf.mxu0  ;;  %v3148_v37 = vadd.f32 %v3147_v21, %v3146_v9 }
 0x2ae   : > { %v2781_v10 = vadd.f32 %v5477_v24, %v8051_v26  ;;  %v3250_v23 = vsel %vm10578_vm1, %v3190_v63, 0.0  ;;  %v3249_v0 = vadd.f32 %v3248_v36, %v3247_v22 }
 0x2af   : > { %v5479_v61 = vpop.f32.mrf.mxu0  ;;  %v3150_v45 = vadd.f32 %v3149_v3, %v3148_v37 }
 0x2b0   : > { %v2942_v27 = vadd.f32 %v10624_v42, %v2781_v10  ;;  %v5480_v31 = vadd.f32 %v5479_v61, %v5478_v17  ;;  %v3251_v24 = vadd.f32 %v3250_v23, %v3249_v0 }
 0x2b2   : > { %v8445_v6 = vadd.f32 %v8054_v35, %v2942_v27  ;;  %v2784_v5 = vadd.f32 %v5480_v31, %v8051_v26 }
 0x2b4   : > { %v3151_v49 = vsel %vm10627_vm5, %v8445_v6, 0.0  ;;  %v3191_v52 = vmul.f32 %v8445_v6, %v8445_v6  ;;  %v2945_v39 = vadd.f32 %v10628_v2, %v2784_v5  ;;  %vm10634_vm5 = vmmov %vm10578_vm1 }
 0x2b5   : > { %v3152_v26 = vadd.f32 %v3151_v49, %v3150_v45 }
 0x2b6   : > { %v3252_v18 = vsel %vm10629_vm6, %v3191_v52, 0.0  ;;  %v3089_v30 = vadd.f32 %v8054_v35, %v2945_v39  ;;  %vm10637_vm6 = vmmov %vm10578_vm1 }
 0x2b7   : > { %v3253_v17 = vadd.f32 %v3252_v18, %v3251_v24  ;;  %v10631_v18 = vld [vmem:[#allocation8_spill] sm:$0xff] }
 0x2b8   : > { %v3153_v15 = vsel %vm10630_vm10, %v3089_v30, 0.0  ;;  %v3192_v44 = vmul.f32 %v3089_v30, %v3089_v30  ;;  %vm10638_vm10 = vmmov %vm10578_vm1 }
 0x2b9   : > { %v3154_v59 = vadd.f32 %v3153_v15, %v3152_v26 }
 0x2ba   : > { %v3254_v46 = vsel %vm10578_vm1, %v3192_v44, 0.0 }
 0x2bb   : > { %v3155_v60 = vrot.slane %v3154_v59, 4  ;;  %v3255_v10 = vadd.f32 %v3254_v46, %v3253_v17  ;;  %v8527_v17 = vld [vmem:[%s10085_s8] ss:$0 sm:$0xff] }
 0x2bd   : > { %v3156_v40 = vadd.f32 %v3155_v60, %v3154_v59  ;;  %v3256_v13 = vrot.slane %v3255_v10, 4 }
 0x2bf   : > { %v3157_v48 = vrot.slane %v3156_v40, 2  ;;  %v3257_v61 = vadd.f32 %v3256_v13, %v3255_v10 }
 0x2c1   : > { %v3158_v21 = vadd.f32 %v3157_v48, %v3156_v40  ;;  %v3258_v63 = vrot.slane %v3257_v61, 2 }
 0x2c3   : > { %v3159_v42 = vrot.slane %v3158_v21, 1  ;;  %v3259_v27 = vadd.f32 %v3258_v63, %v3257_v61 }
 0x2c5   : > { %v3160_v35 = vadd.f32 %v3159_v42, %v3158_v21  ;;  %v3260_v31 = vrot.slane %v3259_v27, 1 }
 0x2c7   : > { %v3261_v34 = vadd.f32 %v3260_v31, %v3259_v27  ;;  %v8458_v9 = vmul.f32 0.00390625, %v3160_v35 }
 0x2c9   : > { %v3263_v36 = vmul.f32 0.00390625, %v3261_v34  ;;  %v3264_v3 = vmul.f32 %v8458_v9, %v8458_v9  ;;  %v3292_v23 = vsub.f32 %v8372_v28, %v8458_v9  ;;  %v3293_v49 = vsub.f32 %v8381_v62, %v8458_v9 }
 0x2ca   : > { %v3294_v52 = vsub.f32 %v8392_v29, %v8458_v9  ;;  %v3295_v2 = vsub.f32 %v8400_v33, %v8458_v9  ;;  %v3296_v39 = vsub.f32 %v8405_v47, %v8458_v9  ;;  %v3297_v0 = vsub.f32 %v8419_v41, %v8458_v9 }
 0x2cb   : > { %v3265_v5 = vsub.f32 %v3263_v36, %v3264_v3  ;;  %v3298_v45 = vsub.f32 %v8427_v11, %v8458_v9  ;;  %v3299_v28 = vsub.f32 %v8445_v6, %v8458_v9  ;;  %v3300_v62 = vsub.f32 %v3089_v30, %v8458_v9 }
 0x2cc   : > { %v3269_v29 = vsub.f32 %v8058_v56, %v8458_v9  ;;  %v3270_v33 = vsub.f32 %v10631_v18, %v8458_v9  ;;  %v3273_v47 = vsub.f32 %v8123_v1, %v8458_v9  ;;  %v3274_v41 = vsub.f32 %v8131_v57, %v8458_v9 }
 0x2cd   : > { %v3266_v22 = vmax.f32 %v3265_v5, 0.0  ;;  %v3275_v11 = vsub.f32 %v8147_v51, %v8458_v9  ;;  %v3276_v6 = vsub.f32 %v8160_v20, %v8458_v9  ;;  %v3277_v30 = vsub.f32 %v8175_v38, %v8458_v9 }
 0x2ce   : > { %v3278_v56 = vsub.f32 %v8188_v58, %v8458_v9  ;;  %v3279_v24 = vsub.f32 %v8205_v25, %v8458_v9  ;;  %v3280_v1 = vsub.f32 %v8220_v53, %v8458_v9  ;;  %v3281_v57 = vsub.f32 %v8233_v4, %v8458_v9  ;;  %v8512_v25 = vld [vmem:[%s10084_s7] ss:$0 sm:$0xff] }
 0x2cf   : > { %v3267_v37 = vadd.f32 1e-05, %v3266_v22  ;;  %v3282_v51 = vsub.f32 %v8249_v32, %v8458_v9  ;;  %v3283_v20 = vsub.f32 %v8263_v8, %v8458_v9  ;;  %v3284_v38 = vsub.f32 %v8282_v16, %v8458_v9 }
 0x2d0   : > { %v3285_v58 = vsub.f32 %v8297_v19, %v8458_v9  ;;  %v3286_v53 = vsub.f32 %v8308_v14, %v8458_v9  ;;  %v3287_v4 = vsub.f32 %v8327_v43, %v8458_v9  ;;  %v3288_v32 = vsub.f32 %v8331_v12, %v8458_v9 }
 0x2d1   : > { %5917 = vrsqrt.f32 %v3267_v37  ;;  %v3289_v8 = vsub.f32 %v8339_v50, %v8458_v9  ;;  %v3290_v19 = vsub.f32 %v8349_v54, %v8458_v9  ;;  %v3291_v14 = vsub.f32 %v8358_v55, %v8458_v9 }
 0x2de   : > { %v5918_v26 = vpop.eup %5917 }
 0x2df   : > { %v3332_v16 = vmul.f32 %v5918_v26, %v3300_v62  ;;  %v3301_v15 = vmul.f32 %v5918_v26, %v3269_v29  ;;  %v3302_v44 = vmul.f32 %v5918_v26, %v3270_v33  ;;  %v3305_v43 = vmul.f32 %v5918_v26, %v3273_v47 }
 0x2e0   : > { %v3306_v59 = vmul.f32 %v5918_v26, %v3274_v41  ;;  %v3307_v12 = vmul.f32 %v5918_v26, %v3275_v11  ;;  %v3308_v50 = vmul.f32 %v5918_v26, %v3276_v6  ;;  %v3309_v60 = vmul.f32 %v5918_v26, %v3277_v30  ;;  %v10632_v11 = vld [vmem:[#allocation41_spill] sm:$0xff] }
 0x2e1   : > { %v3370_v46 = vmul.f32 %v8512_v25, %v3332_v16  ;;  %v3310_v10 = vmul.f32 %v5918_v26, %v3278_v56  ;;  %v3311_v40 = vmul.f32 %v5918_v26, %v3279_v24  ;;  %v8532_v54 = vmul.f32 %v5918_v26, %v3280_v1 }
 0x2e2   : > { %v8534_v13 = vmul.f32 %v5918_v26, %v3281_v57  ;;  %v8536_v48 = vmul.f32 %v5918_v26, %v3282_v51  ;;  %v8541_v21 = vmul.f32 %v5918_v26, %v3283_v20  ;;  %v8543_v55 = vmul.f32 %v5918_v26, %v3284_v38 }
 0x2e3   : > { %v8539_v61 = vadd.f32 %v8527_v17, %v3370_v46  ;;  %v8545_v63 = vmul.f32 %v5918_v26, %v3285_v58  ;;  %v8547_v42 = vmul.f32 %v5918_v26, %v3286_v53  ;;  %v8549_v27 = vmul.f32 %v5918_v26, %v3287_v4 }
 0x2e4   : > { %v8551_v35 = vmul.f32 %v5918_v26, %v3288_v32  ;;  %v8553_v31 = vmul.f32 %v5918_v26, %v3289_v8  ;;  %v8556_v36 = vmul.f32 %v5918_v26, %v3290_v19  ;;  %v8558_v3 = vmul.f32 %v5918_v26, %v3291_v14 }
 0x2e5   : > { %v3440_v34 = vsub.f32 0.0, %v8539_v61  ;;  %v3324_v5 = vmul.f32 %v5918_v26, %v3292_v23  ;;  %v3325_v22 = vmul.f32 %v5918_v26, %v3293_v49  ;;  %v3326_v37 = vmul.f32 %v5918_v26, %v3294_v52 }
 0x2e6   : > { %v3327_v62 = vmul.f32 %v5918_v26, %v3295_v2  ;;  %v3328_v29 = vmul.f32 %v5918_v26, %v3296_v39  ;;  %v3329_v33 = vmul.f32 %v5918_v26, %v3297_v0  ;;  %v3330_v47 = vmul.f32 %v5918_v26, %v3298_v45 }
 0x2e7   : > { %v3503_v18 = vmul.f32 1.442695, %v3440_v34  ;;  %v3331_v41 = vmul.f32 %v5918_v26, %v3299_v28  ;;  %v3271_v6 = vsub.f32 %v10632_v11, %v8458_v9  ;;  %v3272_v30 = vsub.f32 %v8105_v7, %v8458_v9 }
 0x2e8   : > { %v3362_v56 = vmul.f32 %v8512_v25, %v3324_v5  ;;  %v3363_v24 = vmul.f32 %v8512_v25, %v3325_v22  ;;  %v3364_v23 = vmul.f32 %v8512_v25, %v3326_v37  ;;  %v3365_v49 = vmul.f32 %v8512_v25, %v3327_v62 }
 0x2e9   : > { %5919 = vpow2.f32 %v3503_v18  ;;  %v3366_v52 = vmul.f32 %v8512_v25, %v3328_v29  ;;  %v3367_v2 = vmul.f32 %v8512_v25, %v3329_v33  ;;  %v3368_v39 = vmul.f32 %v8512_v25, %v3330_v47 }
 0x2ea   : > { %v3369_v0 = vmul.f32 %v8512_v25, %v3331_v41  ;;  %v3303_v45 = vmul.f32 %v5918_v26, %v3271_v6  ;;  %v3304_v28 = vmul.f32 %v5918_v26, %v3272_v30  ;;  %v3339_v7 = vmul.f32 %v8512_v25, %v3301_v15 }
 0x2eb   : > { %v3340_v1 = vmul.f32 %v8512_v25, %v3302_v44  ;;  %v3343_v51 = vmul.f32 %v8512_v25, %v3305_v43  ;;  %v8578_v20 = vadd.f32 %v8527_v17, %v3362_v56  ;;  %v8581_v58 = vadd.f32 %v8527_v17, %v3363_v24 }
 0x2ec   : > { %v3341_v9 = vmul.f32 %v8512_v25, %v3303_v45  ;;  %v3342_v57 = vmul.f32 %v8512_v25, %v3304_v28  ;;  %v8584_v53 = vadd.f32 %v8527_v17, %v3364_v23  ;;  %v8587_v26 = vadd.f32 %v8527_v17, %v3365_v49 }
 0x2ed   : > { %v8590_v4 = vadd.f32 %v8527_v17, %v3366_v52  ;;  %v8593_v8 = vadd.f32 %v8527_v17, %v3367_v2  ;;  %v8596_v16 = vadd.f32 %v8527_v17, %v3368_v39  ;;  %v8599_v19 = vadd.f32 %v8527_v17, %v3369_v0 }
 0x2ee   : > { %v3344_v15 = vmul.f32 %v8512_v25, %v3306_v59  ;;  %v8603_v44 = vadd.f32 %v8527_v17, %v3341_v9  ;;  %v3345_v14 = vmul.f32 %v8512_v25, %v3307_v12  ;;  %v8607_v43 = vadd.f32 %v8527_v17, %v3339_v7 }
 0x2ef   : > { %v8610_v46 = vadd.f32 %v8527_v17, %v3342_v57  ;;  %v3346_v34 = vmul.f32 %v8512_v25, %v3308_v50  ;;  %v8614_v5 = vadd.f32 %v8527_v17, %v3340_v1  ;;  %v3347_v22 = vmul.f32 %v8512_v25, %v3309_v60 }
 0x2f0   : > { %v3348_v59 = vmul.f32 %v8512_v25, %v3310_v10  ;;  %v3349_v37 = vmul.f32 %v8512_v25, %v3311_v40  ;;  %v8620_v62 = vadd.f32 %v8527_v17, %v3343_v51  ;;  %v3350_v12 = vmul.f32 %v8512_v25, %v8532_v54 }
 0x2f1   : > { %v3351_v29 = vmul.f32 %v8512_v25, %v8534_v13  ;;  %v8627_v50 = vadd.f32 %v8527_v17, %v3344_v15  ;;  %v3411_v18 = vsub.f32 0.0, %v8603_v44  ;;  %v3352_v60 = vmul.f32 %v8512_v25, %v8536_v48 }
 0x2f2   : > { %v8633_v10 = vadd.f32 %v8527_v17, %v3345_v14  ;;  %v3409_v40 = vsub.f32 0.0, %v8607_v43  ;;  %v3412_v33 = vsub.f32 0.0, %v8610_v46  ;;  %v3353_v54 = vmul.f32 %v8512_v25, %v8541_v21 }
 0x2f3   : > { %v3354_v13 = vmul.f32 %v8512_v25, %v8543_v55  ;;  %v8642_v47 = vadd.f32 %v8527_v17, %v3346_v34  ;;  %v3410_v41 = vsub.f32 0.0, %v8614_v5  ;;  %v3355_v48 = vmul.f32 %v8512_v25, %v8545_v63 }
 0x2f4   : > { %v3356_v11 = vmul.f32 %v8512_v25, %v8547_v42  ;;  %v8650_v6 = vadd.f32 %v8527_v17, %v3347_v22  ;;  %v3413_v30 = vsub.f32 0.0, %v8620_v62  ;;  %v3357_v21 = vmul.f32 %v8512_v25, %v8549_v27 }
 0x2f5   : > { %v8656_v55 = vadd.f32 %v8527_v17, %v3348_v59  ;;  %v3414_v56 = vsub.f32 0.0, %v8627_v50  ;;  %v3445_v24 = vmul.f32 1.442695, %v3411_v18  ;;  %v8660_v23 = vadd.f32 %v8527_v17, %v3349_v37 }
 0x2f6   : > { %v5920_v38 = vpop.eup %5919  ;;  %v3415_v63 = vsub.f32 0.0, %v8633_v10  ;;  %v3441_v42 = vmul.f32 1.442695, %v3409_v40  ;;  %v3447_v49 = vmul.f32 1.442695, %v3412_v33  ;;  %v8664_v52 = vadd.f32 %v8527_v17, %v3350_v12 }
 0x2f7   : > { %v3536_v32 = vadd.f32 1.0, %v5920_v38  ;;  %v3416_v2 = vsub.f32 0.0, %v8642_v47  ;;  %v3443_v39 = vmul.f32 1.442695, %v3410_v41  ;;  %v8668_v27 = vadd.f32 %v8527_v17, %v3351_v29 }
 0x2f8   : > { %v3417_v0 = vsub.f32 0.0, %v8650_v6  ;;  %v3449_v45 = vmul.f32 1.442695, %v3413_v30  ;;  %v3358_v28 = vmul.f32 %v8512_v25, %v8551_v35  ;;  %v8674_v7 = vadd.f32 %v8527_v17, %v3352_v60 }
 0x2f9   : > { %5921 = vrcp.f32 %v3536_v32  ;;  %v3418_v9 = vsub.f32 0.0, %v8656_v55  ;;  %v3451_v1 = vmul.f32 1.442695, %v3414_v56  ;;  %v8678_v57 = vadd.f32 %v8527_v17, %v3353_v54 }
 0x2fa   : > { %5923 = vpow2.f32 %v3445_v24  ;;  %v3419_v51 = vsub.f32 0.0, %v8660_v23  ;;  %v3453_v38 = vmul.f32 1.442695, %v3415_v63  ;;  %v3359_v15 = vmul.f32 %v8512_v25, %v8553_v31 }
 0x2fb   : > { %5925 = vpow2.f32 %v3447_v49  ;;  %v3420_v14 = vsub.f32 0.0, %v8664_v52  ;;  %v3455_v35 = vmul.f32 1.442695, %v3416_v2  ;;  %v3421_v22 = vsub.f32 0.0, %v8668_v27 }
 0x2fc   : > { %5927 = vpow2.f32 %v3441_v42  ;;  %v3457_v59 = vmul.f32 1.442695, %v3417_v0  ;;  %v8689_v37 = vadd.f32 %v8527_v17, %v3354_v13  ;;  %v3422_v12 = vsub.f32 0.0, %v8674_v7 }
 0x2fd   : > { %5929 = vpow2.f32 %v3443_v39  ;;  %v3459_v29 = vmul.f32 1.442695, %v3418_v9  ;;  %v8695_v31 = vadd.f32 %v8527_v17, %v3355_v48  ;;  %v3461_v18 = vmul.f32 1.442695, %v3419_v51 }
 0x2fe   : > { %5931 = vpow2.f32 %v3449_v45  ;;  %v3360_v60 = vmul.f32 %v8512_v25, %v8556_v36  ;;  %v8701_v40 = vadd.f32 %v8527_v17, %v3356_v11  ;;  %v3463_v33 = vmul.f32 1.442695, %v3420_v14 }
 0x2ff   : > { %5933 = vpow2.f32 %v3451_v1  ;;  %v3361_v54 = vmul.f32 %v8512_v25, %v8558_v3  ;;  %v8706_v13 = vadd.f32 %v8527_v17, %v3357_v21  ;;  %v3465_v41 = vmul.f32 1.442695, %v3421_v22 }
 0x300   : > { %5935 = vpow2.f32 %v3453_v38  ;;  %v8709_v48 = vadd.f32 %v8527_v17, %v3358_v28  ;;  %v3424_v30 = vsub.f32 0.0, %v8689_v37  ;;  %v3467_v56 = vmul.f32 1.442695, %v3422_v12 }
 0x301   : > { %5937 = vpow2.f32 %v3455_v35  ;;  %v8713_v36 = vadd.f32 %v8527_v17, %v3359_v15  ;;  %v3425_v11 = vsub.f32 0.0, %v8695_v31  ;;  %v8717_v25 = vadd.f32 %v8527_v17, %v3360_v60 }
 0x302   : > { %5939 = vpow2.f32 %v3457_v59  ;;  %v3426_v3 = vsub.f32 0.0, %v8701_v40  ;;  %v8721_v63 = vadd.f32 %v8527_v17, %v3361_v54  ;;  %v3427_v42 = vsub.f32 0.0, %v8706_v13 }
 0x303   : > { %5941 = vpow2.f32 %v3459_v29  ;;  %v3428_v2 = vsub.f32 0.0, %v8709_v48  ;;  %v3471_v39 = vmul.f32 1.442695, %v3424_v30  ;;  %v3429_v45 = vsub.f32 0.0, %v8713_v36 }
 0x304   : > { %5943 = vpow2.f32 %v3461_v18  ;;  %v3473_v28 = vmul.f32 1.442695, %v3425_v11  ;;  %v3430_v51 = vsub.f32 0.0, %v8717_v25  ;;  %v3475_v38 = vmul.f32 1.442695, %v3426_v3 }
 0x305   : > { %5945 = vpow2.f32 %v3463_v33  ;;  %v3477_v15 = vmul.f32 1.442695, %v3427_v42  ;;  %v3432_v35 = vsub.f32 0.0, %v8578_v20  ;;  %v3479_v22 = vmul.f32 1.442695, %v3428_v2 }
 0x306   : > { %v5922_v32 = vpop.eup %5921  ;;  %5947 = vpow2.f32 %v3465_v41  ;;  %v3433_v12 = vsub.f32 0.0, %v8581_v58  ;;  %v3481_v29 = vmul.f32 1.442695, %v3429_v45  ;;  %v3434_v18 = vsub.f32 0.0, %v8584_v53 }
 0x307   : > { %v8685_v34 = vmul.f32 %v5922_v32, %v8539_v61  ;;  %v3423_v61 = vsub.f32 0.0, %v8678_v57  ;;  %v5924_v21 = vpop.eup %5923  ;;  %5949 = vpow2.f32 %v3467_v56  ;;  %v3431_v32 = vsub.f32 0.0, %v8721_v63 }
 0x308   : > { %v5926_v49 = vpop.eup %5925  ;;  %v3507_v0 = vadd.f32 1.0, %v5924_v21  ;;  %v3483_v60 = vmul.f32 1.442695, %v3430_v51  ;;  %v3435_v54 = vsub.f32 0.0, %v8587_v26  ;;  %v3436_v56 = vsub.f32 0.0, %v8590_v4 }
 0x309   : > { %10633 = vst [vmem:[#allocation9_spill] sm:$0xff] %v8685_v34  ;;  %3633 = vst.msk [vmem:[#allocation2 + $0x110] sm:$0xff] %vm10634_vm5, %v8685_v34  ;;  %v3469_v24 = vmul.f32 1.442695, %v3423_v61  ;;  %v3508_v9 = vadd.f32 1.0, %v5926_v49  ;;  %v5928_v1 = vpop.eup %5927  ;;  %v3437_v3 = vsub.f32 0.0, %v8593_v8 }
 0x30a   : > { %v5930_v17 = vpop.eup %5929  ;;  %v3485_v41 = vmul.f32 1.442695, %v3431_v32  ;;  %v3487_v11 = vmul.f32 1.442695, %v3432_v35  ;;  %v3489_v21 = vmul.f32 1.442695, %v3433_v12  ;;  %vm10642_vm5 = vmmov %vm10578_vm1 }
 0x30b   : > { %5951 = vpow2.f32 %v3469_v24  ;;  %v5932_v14 = vpop.eup %5931  ;;  %v3438_v49 = vsub.f32 0.0, %v8596_v16  ;;  %v3491_v2 = vmul.f32 1.442695, %v3434_v18  ;;  %v3493_v45 = vmul.f32 1.442695, %v3435_v54 }
 0x30c   : > { %5953 = vrcp.f32 %v3507_v0  ;;  %v5934_v59 = vpop.eup %5933  ;;  %v3439_v0 = vsub.f32 0.0, %v8599_v19  ;;  %v3505_v18 = vadd.f32 1.0, %v5928_v1 }
 0x30d   : > { %5955 = vrcp.f32 %v3508_v9  ;;  %v5936_v61 = vpop.eup %5935  ;;  %v3495_v9 = vmul.f32 1.442695, %v3436_v56 }
 0x30e   : > { %5957 = vpow2.f32 %v3471_v39  ;;  %v5938_v33 = vpop.eup %5937 }
 0x30f   : > { %5959 = vpow2.f32 %v3473_v28  ;;  %v5940_v30 = vpop.eup %5939 }
 0x310   : > { %5961 = vpow2.f32 %v3475_v38  ;;  %v5942_v24 = vpop.eup %5941  ;;  %v3497_v38 = vmul.f32 1.442695, %v3437_v3 }
 0x311   : > { %5963 = vpow2.f32 %v3477_v15  ;;  %v5944_v42 = vpop.eup %5943  ;;  %v3499_v15 = vmul.f32 1.442695, %v3438_v49 }
 0x312   : > { %5965 = vpow2.f32 %v3479_v22  ;;  %v5946_v39 = vpop.eup %5945  ;;  %v3501_v22 = vmul.f32 1.442695, %v3439_v0  ;;  %v3513_v0 = vadd.f32 1.0, %v5940_v30 }
 0x313   : > { %5967 = vpow2.f32 %v3481_v29  ;;  %v5948_v28 = vpop.eup %5947 }
 0x314   : > { %5969 = vpow2.f32 %v3483_v60  ;;  %v5950_v51 = vpop.eup %5949 }
 0x315   : > { %5971 = vpow2.f32 %v3485_v41  ;;  %v3506_v41 = vadd.f32 1.0, %v5930_v17  ;;  %v3512_v17 = vadd.f32 1.0, %v5938_v33  ;;  %v3518_v33 = vadd.f32 1.0, %v5950_v51 }
 0x316   : > { %5973 = vpow2.f32 %v3487_v11  ;;  %v3509_v11 = vadd.f32 1.0, %v5932_v14  ;;  %v3514_v14 = vadd.f32 1.0, %v5942_v24 }
 0x317   : > { %5975 = vpow2.f32 %v3489_v21 }
 0x318   : > { %v5952_v32 = vpop.eup %5951  ;;  %5977 = vpow2.f32 %v3491_v2 }
 0x319   : > { %v5954_v35 = vpop.eup %5953  ;;  %5979 = vpow2.f32 %v3493_v45 }
 0x31a   : > { %v5956_v12 = vpop.eup %5955  ;;  %v8737_v29 = vmul.f32 %v5954_v35, %v8603_v44  ;;  %5981 = vpow2.f32 %v3495_v9  ;;  %v3510_v44 = vadd.f32 1.0, %v5934_v59  ;;  %v3516_v35 = vadd.f32 1.0, %v5946_v39 }
 0x31b   : > { %v5958_v60 = vpop.eup %5957  ;;  %v8740_v54 = vmul.f32 %v5956_v12, %v8610_v46  ;;  %5983 = vpow2.f32 %v3497_v38  ;;  %v3511_v46 = vadd.f32 1.0, %v5936_v61  ;;  %v3515_v38 = vadd.f32 1.0, %v5944_v42 }
 0x31c   : > { %10635 = vst [vmem:[#allocation10_spill] sm:$0xff] %v8737_v29  ;;  %v5960_v56 = vpop.eup %5959  ;;  %3604 = vst.msk [vmem:[#allocation2 + $0x28] sm:$0xff] %vm10637_vm6, %v8737_v29  ;;  %5985 = vpow2.f32 %v3499_v15  ;;  %v3520_v42 = vadd.f32 1.0, %v5958_v60 }
 0x31d   : > { %10636 = vst [vmem:[#allocation11_spill] sm:$0xff] %v8740_v54  ;;  %v5962_v3 = vpop.eup %5961  ;;  %3605 = vst.msk [vmem:[#allocation2 + $0x30] sm:$0xff] %vm10638_vm10, %v8740_v54  ;;  %5987 = vpow2.f32 %v3501_v22 }
 0x31e   : > { %v5964_v21 = vpop.eup %5963  ;;  %5989 = vrcp.f32 %v3505_v18  ;;  %v3517_v18 = vadd.f32 1.0, %v5948_v28  ;;  %v3522_v28 = vadd.f32 1.0, %v5962_v3  ;;  %vm10644_vm6 = vmmov %vm10578_vm1 }
 0x31f   : > { %v5966_v49 = vpop.eup %5965  ;;  %5991 = vrcp.f32 %v3506_v41  ;;  %vm10646_vm10 = vmmov %vm10578_vm1 }
 0x320   : > { %v5968_v2 = vpop.eup %5967  ;;  %5993 = vrcp.f32 %v3509_v11  ;;  %v3519_v11 = vadd.f32 1.0, %v5952_v32 }
 0x321   : > { %v5970_v45 = vpop.eup %5969  ;;  %5995 = vrcp.f32 %v3510_v44  ;;  %v3521_v44 = vadd.f32 1.0, %v5960_v56 }
 0x322   : > { %v5972_v9 = vpop.eup %5971  ;;  %5997 = vrcp.f32 %v3511_v46  ;;  %v3526_v56 = vadd.f32 1.0, %v5970_v45 }
 0x323   : > { %v5974_v15 = vpop.eup %5973  ;;  %v3718_v59 = vld [vmem:[#allocation2 + $0x28] sm:$0xff]  ;;  %5999 = vrcp.f32 %v3512_v17 }
 0x324   : > { %v5976_v22 = vpop.eup %5975  ;;  %v3719_v12 = vld [vmem:[#allocation2 + $0x30] sm:$0xff]  ;;  %6001 = vrcp.f32 %v3513_v0  ;;  %v3523_v0 = vadd.f32 1.0, %v5964_v21  ;;  %v3527_v21 = vadd.f32 1.0, %v5972_v9 }
 0x325   : > { %v5978_v61 = vpop.eup %5977  ;;  %v8748_v41 = vpack.c.bf16 %v3719_v12, %v3718_v59  ;;  %6003 = vrcp.f32 %v3514_v14  ;;  %v3524_v14 = vadd.f32 1.0, %v5966_v49  ;;  %v3525_v59 = vadd.f32 1.0, %v5968_v2 }
 0x326   : > { %v5980_v30 = vpop.eup %5979  ;;  %6005 = vrcp.f32 %v3515_v38 }
 0x327   : > { %v5982_v24 = vpop.eup %5981  ;;  %4306 = vrot.lane.b32.xlu0 %v8748_v41, %s6065_s13  ;;  %6007 = vrcp.f32 %v3516_v35 }
 0x328   : > { %v5984_v39 = vpop.eup %5983  ;;  %6009 = vrcp.f32 %v3517_v18  ;;  %v3529_v18 = vadd.f32 1.0, %v5976_v22 }
 0x329   : > { %v5986_v46 = vpop.eup %5985  ;;  %6011 = vrcp.f32 %v3518_v33  ;;  %v3530_v33 = vadd.f32 1.0, %v5978_v61 }
 0x32a   : > { %v5988_v17 = vpop.eup %5987  ;;  %6013 = vrcp.f32 %v3519_v11  ;;  %v3531_v11 = vadd.f32 1.0, %v5980_v30 }
 0x32b   : > { %v5990_v51 = vpop.eup %5989  ;;  %6015 = vrcp.f32 %v3520_v42  ;;  %v3532_v42 = vadd.f32 1.0, %v5982_v24 }
 0x32c   : > { %v5992_v32 = vpop.eup %5991  ;;  %v8753_v38 = vmul.f32 %v5990_v51, %v8607_v43  ;;  %6017 = vrcp.f32 %v3521_v44  ;;  %v3528_v43 = vadd.f32 1.0, %v5974_v15  ;;  %v3534_v51 = vadd.f32 1.0, %v5986_v46 }
 0x32d   : > { %v5994_v60 = vpop.eup %5993  ;;  %v8756_v35 = vmul.f32 %v5992_v32, %v8614_v5  ;;  %6019 = vrcp.f32 %v3522_v28  ;;  %v3533_v28 = vadd.f32 1.0, %v5984_v39 }
 0x32e   : > { %10639 = vst [vmem:[#allocation12_spill] sm:$0xff] %v8753_v38  ;;  %v5996_v3 = vpop.eup %5995  ;;  %3602 = vst.msk [vmem:[#allocation2 + $0x18] sm:$0xff] %vm10578_vm1, %v8753_v38  ;;  %v8761_v49 = vmul.f32 %v5994_v60, %v8620_v62  ;;  %6021 = vrcp.f32 %v3523_v0 }
 0x32f   : > { %10640 = vst [vmem:[#allocation49_spill] sm:$0xff] %v8756_v35  ;;  %v5998_v12 = vpop.eup %5997  ;;  %3603 = vst.msk [vmem:[#allocation2 + $0x20] sm:$0xff] %vm10642_vm5, %v8756_v35  ;;  %6023 = vrcp.f32 %v3524_v14  ;;  %v8766_v5 = vmul.f32 %v5996_v3, %v8627_v50 }
 0x330   : > { %10641 = vst [vmem:[#allocation13_spill] sm:$0xff] %v8761_v49  ;;  %v6000_v45 = vpop.eup %5999  ;;  %3606 = vst.msk [vmem:[#allocation2 + $0x38] sm:$0xff] %vm10644_vm6, %v8761_v49  ;;  %6025 = vrcp.f32 %v3525_v59  ;;  %v8773_v62 = vmul.f32 %v5998_v12, %v8633_v10  ;;  %v8806_v59 = vld [vmem:[#allocation2 + $0x29] sm:$0xff] }
 0x331   : > { %10643 = vst [vmem:[#allocation14_spill] sm:$0xff] %v8766_v5  ;;  %v6002_v9 = vpop.eup %6001  ;;  %6027 = vrcp.f32 %v3526_v56  ;;  %3607 = vst.msk [vmem:[#allocation2 + $0x40] sm:$0xff] %vm10646_vm10, %v8766_v5  ;;  %v8778_v50 = vmul.f32 %v6000_v45, %v8642_v47  ;;  %v10654_v12 = vld [vmem:[#allocation30_spill] sm:$0xff] }
 0x332   : > { %10645 = vst [vmem:[#allocation51_spill] sm:$0xff] %v8773_v62  ;;  %v6004_v22 = vpop.eup %6003  ;;  %6029 = vrcp.f32 %v3527_v21  ;;  %3608 = vst.msk [vmem:[#allocation2 + $0x48] sm:$0xff] %vm10578_vm1, %v8773_v62  ;;  %v8785_v10 = vmul.f32 %v6002_v9, %v8650_v6 }
 0x333   : > { %10647 = vst [vmem:[#allocation53_spill] sm:$0xff] %v8778_v50  ;;  %v6006_v61 = vpop.eup %6005  ;;  %6031 = vrcp.f32 %v3528_v43  ;;  %v8788_v44 = vmul.f32 %v6004_v22, %v8656_v55  ;;  %vm10650_vm5 = vmmov %vm10578_vm1 }
 0x334   : > { %10648 = vst [vmem:[#allocation15_spill] sm:$0xff] %v8785_v10  ;;  %3609 = vst.msk [vmem:[#allocation2 + $0x50] sm:$0xff] %vm10650_vm5, %v8778_v50  ;;  %v6008_v30 = vpop.eup %6007  ;;  %6033 = vrcp.f32 %v3529_v18  ;;  %v8795_v0 = vmul.f32 %v6006_v61, %v8660_v23  ;;  %v3535_v23 = vadd.f32 1.0, %v5988_v17  ;;  %v10657_v61 = vld [vmem:[#allocation31_spill] sm:$0xff] }
 0x335   : > { %10649 = vst [vmem:[#allocation16_spill] sm:$0xff] %v8788_v44  ;;  %vm10651_vm6 = vmmov %vm10578_vm1  ;;  %v6010_v6 = vpop.eup %6009  ;;  %v3716_v24 = vld [vmem:[#allocation2 + $0x18] sm:$0xff]  ;;  %6035 = vrcp.f32 %v3530_v33  ;;  %v8800_v55 = vmul.f32 %v6008_v30, %v8664_v52 }
 0x336   : > { %3610 = vst.msk [vmem:[#allocation2 + $0x58] sm:$0xff] %vm10651_vm6, %v8785_v10  ;;  %vm10652_vm10 = vmmov %vm10578_vm1  ;;  %v6012_v14 = vpop.eup %6011  ;;  %v3717_v32 = vld [vmem:[#allocation2 + $0x20] sm:$0xff]  ;;  %6037 = vrcp.f32 %v3531_v11  ;;  %v8809_v60 = vmul.f32 %v6010_v6, %v8668_v27  ;;  %vm10655_vm6 = vnez %v10654_v12 }
 0x337   : > { %3611 = vst.msk [vmem:[#allocation2 + $0x60] sm:$0xff] %vm10652_vm10, %v8788_v44  ;;  %v6014_v52 = vpop.eup %6013  ;;  %v3747_v46 = vpack.c.bf16 %v3717_v32, %v3716_v24  ;;  %v8813_v56 = vld [vmem:[#allocation2 + $0x31] sm:$0xff]  ;;  %6039 = vrcp.f32 %v3532_v42  ;;  %v8816_v3 = vmul.f32 %v6012_v14, %v8674_v7  ;;  %vm10653_vm5 = vmmov %vm10578_vm1  ;;  %v9058_v62 = vld [vmem:[#allocation2 + $0x1f] sm:$0xff] }
 0x338   : > { %3612 = vst.msk [vmem:[#allocation2 + $0x68] sm:$0xff] %vm10578_vm1, %v8795_v0  ;;  %v3720_v17 = vld [vmem:[#allocation2 + $0x38] sm:$0xff]  ;;  %v6016_v21 = vpop.eup %6015  ;;  %v4017_v27 = vsel %vm10655_vm6, %v8813_v56, 0.0  ;;  %6041 = vrcp.f32 %v3533_v28  ;;  %v8826_v45 = vmul.f32 %v6014_v52, %v8678_v57  ;;  %vm10656_vm10 = vmmov %vm10578_vm1  ;;  %v3721_v7 = vld [vmem:[#allocation2 + $0x40] sm:$0xff] }
 0x339   : > { %3613 = vst.msk [vmem:[#allocation2 + $0x70] sm:$0xff] %vm10653_vm5, %v8800_v55  ;;  %v8823_v43 = vld [vmem:[#allocation2 + $0x39] sm:$0xff]  ;;  %v6018_v18 = vpop.eup %6017  ;;  %4082 = vrot.lane.b32.xlu1 %v3747_v46, %s6064_s23  ;;  %v4048_v9 = vpack.c.bf16 %v4017_v27, %v8806_v59  ;;  %6043 = vrcp.f32 %v3534_v51  ;;  %v8832_v33 = vld [vmem:[#allocation2 + $0x41] sm:$0xff]  ;;  %v8835_v22 = vmul.f32 %v6016_v21, %v8689_v37  ;;  %v3749_v57 = vpack.c.bf16 %v3721_v7, %v3720_v17  ;;  %vm10664_vm6 = vmmov %vm10578_vm1 }
 0x33a   : > { %3614 = vst.msk [vmem:[#allocation2 + $0x78] sm:$0xff] %vm10656_vm10, %v8809_v60  ;;  %v6020_v11 = vpop.eup %6019  ;;  %6045 = vrcp.f32 %v3535_v23  ;;  %vm10658_vm5 = vnez %v10657_v61  ;;  %v8843_v30 = vmul.f32 %v6018_v18, %v8695_v31  ;;  %vm10659_vm10 = vmmov %vm10578_vm1  ;;  %v3722_v37 = vld [vmem:[#allocation2 + $0x48] sm:$0xff]  ;;  %v10661_v52 = vld [vmem:[#allocation32_spill] sm:$0xff] }
 0x33b   : > { %3615 = vst.msk [vmem:[#allocation2 + $0x80] sm:$0xff] %vm10578_vm1, %v8816_v3  ;;  %v4019_v42 = vsel %vm10658_vm5, %v8832_v33, 0.0  ;;  %v8845_v28 = vld [vmem:[#allocation2 + $0x49] sm:$0xff]  ;;  %v6022_v24 = vpop.eup %6021  ;;  %5698 = vmatprep.mubr.msk.bf16.mxu0 %vm10660_vm4, %v4048_v9  ;;  %v8852_v14 = vmul.f32 %v6020_v11, %v8701_v40  ;;  %3617 = vst.msk [vmem:[#allocation2 + $0x90] sm:$0xff] %vm10578_vm1, %v8835_v22  ;;  %4308 = vrot.lane.b32.xlu0 %v3749_v57, %s6065_s13  ;;  %v3913_v7 = vsel %vm10658_vm5, %v8813_v56, 0.0  ;;  %v9056_v44 = vld [vmem:[#allocation2 + $0x17] sm:$0xff] }
 0x33c   : > { %3616 = vst.msk [vmem:[#allocation2 + $0x88] sm:$0xff] %vm10659_vm10, %v8826_v45  ;;  %v3723_v6 = vld [vmem:[#allocation2 + $0x50] sm:$0xff]  ;;  %v4049_v51 = vpack.c.bf16 %v4019_v42, %v8823_v43  ;;  %v6024_v31 = vpop.eup %6023  ;;  %v8860_v23 = vmul.f32 %v6022_v24, %v8706_v13  ;;  %vm10662_vm10 = vnez %v10661_v52  ;;  %vm10663_vm4 = vmmov %vm10578_vm1  ;;  %v8887_v42 = vpack.c.bf16 %v3913_v7, %v8806_v59 }
 0x33d   : > { %v8854_v32 = vld [vmem:[#allocation2 + $0x51] sm:$0xff]  ;;  %3618 = vst.msk [vmem:[#allocation2 + $0x98] sm:$0xff] %vm10663_vm4, %v8843_v30  ;;  %v6026_v40 = vpop.eup %6025  ;;  %v8869_v17 = vmul.f32 %v6024_v31, %v8709_v48  ;;  %4084 = vrot.lane.b32.xlu1 %v8748_v41, %s6064_s23  ;;  %v3750_v13 = vpack.c.bf16 %v3723_v6, %v3722_v37  ;;  %vm10666_vm4 = vmmov %vm10578_vm1 }
 0x33e   : > { %v4021_v46 = vsel %vm10662_vm10, %v8854_v32, 0.0  ;;  %5699 = vmatmul.mubr.msk.bf16.vlgmr.msra.gmra.mxu0 %vm10664_vm6, %v4049_v51  ;;  %3619 = vst.msk [vmem:[#allocation2 + $0xa0] sm:$0xff] %vm10578_vm1, %v8852_v14  ;;  %v6028_v18 = vpop.eup %6027  ;;  %v8882_v9 = vmul.f32 %v6026_v40, %v8713_v36  ;;  %vm10665_vm6 = vmmov %vm10578_vm1  ;;  %v3724_v48 = vld [vmem:[#allocation2 + $0x58] sm:$0xff]  ;;  %v3725_v11 = vld [vmem:[#allocation2 + $0x60] sm:$0xff] }
 0x33f   : > { %v4050_v21 = vpack.c.bf16 %v4021_v46, %v8845_v28  ;;  %v8876_v27 = vld [vmem:[#allocation2 + $0x61] sm:$0xff]  ;;  %3620 = vst.msk [vmem:[#allocation2 + $0xa8] sm:$0xff] %vm10665_vm6, %v8860_v23  ;;  %v6030_v41 = vpop.eup %6029  ;;  %v8890_v37 = vmul.f32 %v6028_v18, %v8717_v25  ;;  %4310 = vrot.lane.b32.xlu0 %v3750_v13, %s6065_s13  ;;  %vm10667_vm6 = vmmov %vm10578_vm1  ;;  %v8903_v51 = vld [vmem:[#allocation2 + $0x59] sm:$0xff]  ;;  %v3751_v18 = vpack.c.bf16 %v3725_v11, %v3724_v48 }
 0x340   : > { %3621 = vst.msk [vmem:[#allocation2 + $0xb0] sm:$0xff] %vm10578_vm1, %v8869_v17  ;;  %v6032_v6 = vpop.eup %6031  ;;  %v8899_v24 = vmul.f32 %v6030_v41, %v8721_v63  ;;  %v10668_v25 = vld [vmem:[#allocation33_spill] sm:$0xff]  ;;  %v8914_v63 = vld [vmem:[#allocation2 + $0x69] sm:$0xff]  ;;  %v9072_v49 = vld [vmem:[#allocation2 + $0x37] sm:$0xff] }
 0x341   : > { %5702 = vmatprep.mubr.msk.bf16.mxu0 %vm10666_vm4, %v4050_v21  ;;  %v8896_v36 = vld [vmem:[#allocation2 + $0x71] sm:$0xff]  ;;  %3622 = vst.msk [vmem:[#allocation2 + $0xb8] sm:$0xff] %vm10667_vm6, %v8882_v9  ;;  %vm10669_vm5 = vnez %v10668_v25  ;;  %v6034_v46 = vpop.eup %6033  ;;  %v8909_v40 = vmul.f32 %v6032_v6, %v8578_v20  ;;  %vm10670_vm4 = vmmov %vm10578_vm1  ;;  %4086 = vrot.lane.b32.xlu1 %v3749_v57, %s6064_s23  ;;  %v3726_v20 = vld [vmem:[#allocation2 + $0x68] sm:$0xff]  ;;  %v3915_v57 = vsel %vm10662_vm10, %v8832_v33, 0.0  ;;  %v3848_v35 = vsel %vm7132_vm12, %v9072_v49, 0.0 }
 0x342   : > { %v4023_v31 = vsel %vm10669_vm5, %v8876_v27, 0.0  ;;  %3623 = vst.msk [vmem:[#allocation2 + $0xc0] sm:$0xff] %vm10670_vm4, %v8890_v37  ;;  %v10671_v21 = vld [vmem:[#allocation35_spill] sm:$0xff]  ;;  %v6036_v41 = vpop.eup %6035  ;;  %v8920_v39 = vmul.f32 %v6034_v46, %v8581_v58  ;;  %vm10673_vm6 = vmmov %vm10670_vm4  ;;  %v8935_v58 = vpack.c.bf16 %v3915_v57, %v8823_v43  ;;  %v3729_v52 = vld [vmem:[#allocation2 + $0x80] sm:$0xff] }
 0x343   : > { %vm10672_vm1 = vnez %v10671_v21  ;;  %3624 = vst.msk [vmem:[#allocation2 + $0xc8] sm:$0xff] %vm10673_vm6, %v8899_v24  ;;  %v3727_v6 = vld [vmem:[#allocation2 + $0x70] sm:$0xff]  ;;  %v6038_v47 = vpop.eup %6037  ;;  %v8928_v15 = vmul.f32 %v6036_v41, %v8584_v53  ;;  %v4051_v48 = vpack.c.bf16 %v4023_v31, %v8903_v51  ;;  %4312 = vrot.lane.b32.xlu0 %v3751_v18, %s6065_s13  ;;  %vm10676_vm6 = vmmov %vm10670_vm4  ;;  %v3799_v41 = vsel %vm10662_vm10, %v8813_v56, 0.0  ;;  %v3728_v56 = vld [vmem:[#allocation2 + $0x78] sm:$0xff] }
 0x344   : > { %v4025_v7 = vsel %vm10672_vm1, %v8896_v36, 0.0  ;;  %3625 = vst.msk [vmem:[#allocation2 + $0xd0] sm:$0xff] %vm10670_vm4, %v8909_v40  ;;  %10674 = vst [vmem:[#allocation54_spill] sm:$0xff] %v8935_v58  ;;  %v6040_v11 = vpop.eup %6039  ;;  %v8938_v46 = vmul.f32 %v6038_v47, %v8587_v26  ;;  %v3752_v26 = vpack.c.bf16 %v3727_v6, %v3726_v20  ;;  %v8953_v47 = vld [vmem:[#allocation2 + $0x81] sm:$0xff]  ;;  %v3731_v25 = vld [vmem:[#allocation2 + $0x90] sm:$0xff] }
 0x345   : > { %3626 = vst.msk [vmem:[#allocation2 + $0xd8] sm:$0xff] %vm10676_vm6, %v8920_v39  ;;  %v4052_v53 = vpack.c.bf16 %v4025_v7, %v8914_v63  ;;  %v6042_v1 = vpop.eup %6041  ;;  %v8947_v31 = vmul.f32 %v6040_v11, %v8590_v4  ;;  %vm10678_vm0 = vmmov %vm10670_vm4  ;;  %4088 = vrot.lane.b32.xlu1 %v3750_v13, %s6064_s23  ;;  %v8961_v4 = vld [vmem:[#allocation2 + $0x91] sm:$0xff]  ;;  %v3801_v11 = vsel %vm10669_vm5, %v8832_v33, 0.0  ;;  %v3730_v33 = vld [vmem:[#allocation2 + $0x88] sm:$0xff] }
 0x346   : > { %10675 = vst [vmem:[#allocation56_spill] sm:$0xff] %v8938_v46  ;;  %3627 = vst.msk [vmem:[#allocation2 + $0xe0] sm:$0xff] %vm10670_vm4, %v8928_v15  ;;  %5703 = vmatmul.mubr.msk.bf16.gmra.mxu0 %vm10678_vm0, %v4051_v48  ;;  %v6044_v57 = vpop.eup %6043  ;;  %v8956_v7 = vmul.f32 %v6042_v1, %v8593_v8  ;;  %v8964_v48 = vpack.c.bf16 %v3799_v41, %v8806_v59  ;;  %v8977_v1 = vld [vmem:[#allocation2 + $0x79] sm:$0xff]  ;;  %v9000_v2 = vpack.c.bf16 %v3801_v11, %v8823_v43  ;;  %v9018_v11 = vld [vmem:[#allocation2 + $0xa1] sm:$0xff] }
 0x347   : > { %10677 = vst [vmem:[#allocation17_spill] sm:$0xff] %v8947_v31  ;;  %vm10680_vm10 = vmmov %vm10678_vm0  ;;  %v6046_v13 = vpop.eup %6045  ;;  %v8967_v20 = vmul.f32 %v6044_v57, %v8596_v16  ;;  %4314 = vrot.lane.b32.xlu0 %v3752_v26, %s6065_s13  ;;  %v10686_v59 = vld [vmem:[#allocation37_spill] sm:$0xff]  ;;  %v3917_v16 = vsel %vm10669_vm5, %v8854_v32, 0.0  ;;  %v3753_v57 = vpack.c.bf16 %v3729_v52, %v3728_v56  ;;  %v3803_v43 = vsel %vm10672_vm1, %v8854_v32, 0.0 }
 0x348   : > { %10679 = vst [vmem:[#allocation18_spill] sm:$0xff] %v8956_v7  ;;  %3628 = vst.msk [vmem:[#allocation2 + $0xe8] sm:$0xff] %vm10680_vm10, %v8938_v46  ;;  %v8973_v8 = vmul.f32 %v6046_v13, %v8599_v19  ;;  %vm10687_vm10 = vnez %v10686_v59  ;;  %v8991_v19 = vld [vmem:[#allocation2 + $0x89] sm:$0xff]  ;;  %v8997_v13 = vpack.c.bf16 %v3917_v16, %v8845_v28  ;;  %v3754_v16 = vpack.c.bf16 %v3731_v25, %v3730_v33  ;;  %v3736_v54 = vld [vmem:[#allocation2 + $0xb8] sm:$0xff] }
 0x349   : > { %vm10681_vm6 = vmmov %vm10678_vm0  ;;  %10682 = vst [vmem:[#allocation57_spill] sm:$0xff] %v8964_v48  ;;  %v4027_v6 = vsel %vm10687_vm10, %v8953_v47, 0.0  ;;  %4090 = vrot.lane.b32.xlu1 %v3751_v18, %s6064_s23  ;;  %v3919_v18 = vsel %vm10672_vm1, %v8876_v27, 0.0  ;;  %v3921_v32 = vsel %vm10687_vm10, %v8896_v36, 0.0  ;;  %v10698_v33 = vld [vmem:[#allocation43_spill] sm:$0xff]  ;;  %v3737_v38 = vld [vmem:[#allocation2 + $0xc0] sm:$0xff] }
 0x34a   : > { %5706 = vmatprep.mubr.msk.bf16.mxu0 %vm10681_vm6, %v4052_v53  ;;  %10683 = vst [vmem:[#allocation59_spill] sm:$0xff] %v8967_v20  ;;  %3629 = vst.msk [vmem:[#allocation2 + $0xf0] sm:$0xff] %vm10678_vm0, %v8947_v31  ;;  %v10689_v53 = vld [vmem:[#allocation39_spill] sm:$0xff]  ;;  %v4053_v34 = vpack.c.bf16 %v4027_v6, %v8977_v1  ;;  %v9011_v52 = vpack.c.bf16 %v3919_v18, %v8903_v51  ;;  %v9021_v6 = vpack.c.bf16 %v3803_v43, %v8845_v28  ;;  %v3733_v18 = vld [vmem:[#allocation2 + $0xa0] sm:$0xff] }
 0x34b   : > { %10684 = vst [vmem:[#allocation19_spill] sm:$0xff] %v8973_v8  ;;  %vm10685_vm4 = vmmov %vm10678_vm0  ;;  %4316 = vrot.lane.b32.xlu0 %v3753_v57, %s6065_s13  ;;  %v9034_v21 = vpack.c.bf16 %v3921_v32, %v8914_v63  ;;  %v3805_v28 = vsel %vm10687_vm10, %v8876_v27, 0.0  ;;  %vm10699_vm1 = vnez %v10698_v33  ;;  %v5772_v43 = vld [vmem:[%s10086_s9 + $0x38] sm:$0xff]   ;;  %v9051_v32 = vld [vmem:[#allocation2 + $0xa9] sm:$0xff]  ;;  %v9123_v33 = vpack.c.bf16 %v3737_v38, %v3736_v54 }
 0x34c   : > { %3630 = vst.msk [vmem:[#allocation2 + $0xf8] sm:$0xff] %vm10685_vm4, %v8956_v7  ;;  %vm10688_vm6 = vmmov %vm10678_vm0  ;;  %vm10690_vm0 = vnez %v10689_v53  ;;  %v4031_v25 = vsel %vm10699_vm1, %v9018_v11, 0.0  ;;  %v10701_v27 = vld [vmem:[#allocation44_spill] sm:$0xff]  ;;  %v9092_v53 = vld [vmem:[#allocation2 + $0xc1] sm:$0xff] }
 0x34d   : > { %3631 = vst.msk [vmem:[#allocation2 + $0x100] sm:$0xff] %vm10688_vm6, %v8967_v20  ;;  %v4029_v41 = vsel %vm10690_vm0, %v8961_v4, 0.0  ;;  %10691 = vst [vmem:[#allocation20_spill] sm:$0xff] %v8997_v13  ;;  %4092 = vrot.lane.b32.xlu1 %v3752_v26, %s6064_s23  ;;  %v9039_v26 = vld [vmem:[#allocation2 + $0x99] sm:$0xff]  ;;  %vm10702_vm10 = vnez %v10701_v27  ;;  %v9142_v38 = vld [vmem:[#allocation2 + $0x67] sm:$0xff] }
 0x34e   : > { %10692 = vst [vmem:[#allocation60_spill] sm:$0xff] %v9000_v2  ;;  %vm10693_vm5 = vmmov %vm10685_vm4  ;;  %v4054_v56 = vpack.c.bf16 %v4029_v41, %v8991_v19  ;;  %5707 = vmatmul.mubr.msk.bf16.gmra.mxu0 %vm10685_vm4, %v4053_v34  ;;  %v9024_v41 = vld [vmem:[#allocation2 + $0xb1] sm:$0xff]  ;;  %v4055_v50 = vpack.c.bf16 %v4031_v25, %v9039_v26  ;;  %v3738_v13 = vld [vmem:[#allocation2 + $0xc8] sm:$0xff] }
 0x34f   : > { %3632 = vst.msk [vmem:[#allocation2 + $0x108] sm:$0xff] %vm10693_vm5, %v8973_v8  ;;  %10694 = vst [vmem:[#allocation63_spill] sm:$0xff] %v9011_v52  ;;  %v3732_v8 = vld [vmem:[#allocation2 + $0x98] sm:$0xff]  ;;  %4318 = vrot.lane.b32.xlu0 %v3754_v16, %s6065_s13  ;;  %v4033_v59 = vsel %vm10702_vm10, %v9024_v41, 0.0 }
 0x350   : > { %10695 = vst [vmem:[#allocation21_spill] sm:$0xff] %v9021_v6  ;;  %vm10696_vm6 = vmmov %vm10685_vm4  ;;  %v5771_v34 = vld [vmem:[%s10086_s9 + $0x78] sm:$0xff]   ;;  %v3755_v10 = vpack.c.bf16 %v3733_v18, %v3732_v8  ;;  %v9068_v8 = vld [vmem:[#allocation2 + $0x27] sm:$0xff]  ;;  %v4056_v29 = vpack.c.bf16 %v4033_v59, %v9051_v32 }
 0x351   : > { %5710 = vmatprep.mubr.msk.bf16.mxu0 %vm10696_vm6, %v4054_v56  ;;  %10697 = vst [vmem:[#allocation22_spill] sm:$0xff] %v9034_v21  ;;  %v9045_v56 = vpack.c.bf16 %v3805_v28, %v8903_v51  ;;  %5508 = vmatprep.subr.bf16.mxu1 %v5771_v34  ;;  %v3734_v51 = vld [vmem:[#allocation2 + $0xa8] sm:$0xff]  ;;  %v3735_v28 = vld [vmem:[#allocation2 + $0xb0] sm:$0xff]  ;;  %v3923_v34 = vsel %vm10690_vm0, %v8953_v47, 0.0  ;;  %vm10706_vm5 = vmmov %vm10685_vm4 }
 0x352   : > { %4094 = vrot.lane.b32.xlu1 %v3753_v57, %s6064_s23  ;;  %5509 = vmatpush3.bf16.msra.mxu1 %v5772_v43  ;;  %v5773_v57 = vld [vmem:[%s10086_s9 + $0x70] sm:$0xff]   ;;  %v9075_v5 = vpack.c.bf16 %v3923_v34, %v8977_v1  ;;  %v3807_v43 = vsel %vm10690_vm0, %v8896_v36, 0.0  ;;  %v3756_v36 = vpack.c.bf16 %v3735_v28, %v3734_v51  ;;  %v9094_v59 = vld [vmem:[#allocation2 + $0x3f] sm:$0xff]  ;;  %vm10708_vm0 = vmmov %vm10685_vm4 }
 0x353   : > { %10700 = vst [vmem:[#allocation65_spill] sm:$0xff] %v9045_v56  ;;  %4320 = vrot.lane.b32.xlu0 %v3755_v10, %s6065_s13  ;;  %v9070_v18 = vld [vmem:[#allocation2 + $0x2f] sm:$0xff]  ;;  %v9082_v25 = vpack.c.bf16 %v3807_v43, %v8914_v63  ;;  %v3668_v56 = vsel %vm7077_vm9, %v9056_v44, 0.0  ;;  %5510 = vmatprep.subr.bf16.mxu1 %v5773_v57  ;;  %v3925_v57 = vsel %vm10699_vm1, %v8961_v4, 0.0  ;;  %v3809_v43 = vsel %vm10699_vm1, %v8953_v47, 0.0  ;;  %v9111_v51 = vld [vmem:[#allocation2 + $0x47] sm:$0xff] }
 0x354   : > { %10703 = vst [vmem:[#allocation24_spill] sm:$0xff] %v9075_v5  ;;  %v5774_v34 = vld [vmem:[%s10086_s9 + $0x30] sm:$0xff]   ;;  %v9097_v63 = vpack.c.bf16 %v9058_v62, %v3668_v56  ;;  %v9114_v56 = vpack.c.bf16 %v3925_v57, %v8991_v19  ;;  %v9117_v28 = vpack.c.bf16 %v3809_v43, %v8977_v1  ;;  %v3670_v47 = vsel %vm7132_vm12, %v9068_v8, 0.0  ;;  %v9129_v5 = vld [vmem:[#allocation2 + $0x5f] sm:$0xff] }
 0x355   : > { %10704 = vst [vmem:[#allocation25_spill] sm:$0xff] %v9082_v25  ;;  %v9127_v25 = vld [vmem:[#allocation2 + $0x57] sm:$0xff]  ;;  %10713 = vst [vmem:[#allocation86_spill] sm:$0xff] %v9129_v5  ;;  %v9132_v57 = vpack.c.bf16 %v9070_v18, %v3670_v47  ;;  %v3672_v43 = vsel %vm7202_vm15, %v9072_v49, 0.0  ;;  %v3927_v47 = vsel %vm10702_vm10, %v9018_v11, 0.0  ;;  %v9157_v21 = vld [vmem:[#allocation2 + $0xc9] sm:$0xff] }
 0x356   : > { %5711 = vmatmul.mubr.msk.bf16.gmra.mxu0 %vm10706_vm5, %v4055_v50  ;;  %4096 = vrot.lane.b32.xlu1 %v3754_v16, %s6064_s23  ;;  %10707 = vst [vmem:[#allocation70_spill] sm:$0xff] %v9097_v63  ;;  %v5775_v50 = vld [vmem:[%s10086_s9 + $0x68] sm:$0xff]   ;;  %v9109_v16 = vld [vmem:[#allocation2 + $0xd1] sm:$0xff]  ;;  %10709 = vst [vmem:[#allocation73_spill] sm:$0xff] %v9114_v56  ;;  %v9145_v56 = vpack.c.bf16 %v9094_v59, %v3672_v43  ;;  %v9165_v52 = vpack.c.bf16 %v3927_v47, %v9039_v26  ;;  %v3674_v2 = vsel %vm7281_vm2, %v9111_v51, 0.0 }
 0x357   : > { %5714 = vmatprep.mubr.msk.bf16.mxu0 %vm10708_vm0, %v4056_v29  ;;  %10710 = vst [vmem:[#allocation26_spill] sm:$0xff] %v9117_v28  ;;  %5511 = vmatpush3.bf16.msra.mxu1 %v5774_v34  ;;  %v9125_v29 = vld [vmem:[#allocation2 + $0x4f] sm:$0xff]  ;;  %10712 = vst [vmem:[#allocation27_spill] sm:$0xff] %v9127_v25  ;;  %v9137_v28 = vld [vmem:[#allocation2 + $0xb9] sm:$0xff] }
 0x358   : > { %4322 = vrot.lane.b32.xlu0 %v3756_v36, %s6065_s13  ;;  %10714 = vst [vmem:[#allocation76_spill] sm:$0xff] %v9132_v57  ;;  %5512 = vmatprep.subr.bf16.mxu1 %v5775_v50  ;;  %v10716_v34 = vld [vmem:[#allocation46_spill] sm:$0xff]  ;;  %10718 = vst [vmem:[#allocation78_spill] sm:$0xff] %v9145_v56  ;;  %v3811_v57 = vsel %vm10702_vm10, %v8961_v4, 0.0  ;;  %v10719_v6 = vld [vmem:[#allocation47_spill] sm:$0xff]  ;;  %v9179_v58 = vpack.c.bf16 %v9125_v29, %v3674_v2 }
 0x359   : > { %vm10717_vm4 = vnez %v10716_v34  ;;  %v5776_v50 = vld [vmem:[%s10086_s9 + $0x28] sm:$0xff]   ;;  %vm10720_vm6 = vnez %v10719_v6  ;;  %10721 = vst [vmem:[#allocation90_spill] sm:$0xff] %v9165_v52  ;;  %v9168_v27 = vpack.c.bf16 %v3811_v57, %v8991_v19  ;;  %v3739_v1 = vld [vmem:[#allocation2 + $0xd0] sm:$0xff]  ;;  %v3676_v19 = vsel %vm7312_vm3, %v9127_v25, 0.0  ;;  %vm10736_vm10 = vmmov %vm10708_vm0 }
 0x35a   : > { %v4035_v54 = vsel %vm10717_vm4, %v9092_v53, 0.0  ;;  %4098 = vrot.lane.b32.xlu1 %v3755_v10, %s6064_s23  ;;  %v4037_v43 = vsel %vm10720_vm6, %v9109_v16, 0.0  ;;  %v9162_v56 = vld [vmem:[#allocation2 + $0x6f] sm:$0xff]  ;;  %v5777_v10 = vld [vmem:[%s10086_s9 + $0x60] sm:$0xff]   ;;  %v9176_v48 = vld [vmem:[#allocation2 + $0x77] sm:$0xff]  ;;  %10725 = vst [vmem:[#allocation28_spill] sm:$0xff] %v9179_v58  ;;  %v9194_v63 = vpack.c.bf16 %v9129_v5, %v3676_v19  ;;  %v3758_v34 = vpack.c.bf16 %v3739_v1, %v3738_v13 }
 0x35b   : > { %10722 = vst [vmem:[#allocation87_spill] sm:$0xff] %v9168_v27  ;;  %10724 = vst [vmem:[#allocation79_spill] sm:$0xff] %v9176_v48  ;;  %5513 = vmatpush3.bf16.msra.mxu1 %v5776_v50  ;;  %v4057_v57 = vpack.c.bf16 %v4035_v54, %v9137_v28  ;;  %v9187_v27 = vld [vmem:[#allocation2 + $0x7f] sm:$0xff]  ;;  %v9189_v52 = vld [vmem:[#allocation2 + $0x87] sm:$0xff]  ;;  %v3929_v2 = vsel %vm10717_vm4, %v9024_v41, 0.0  ;;  %v3813_v54 = vsel %vm10717_vm4, %v9018_v11, 0.0  ;;  %v4058_v50 = vpack.c.bf16 %v4037_v43, %v9157_v21 }
 0x35c   : > { %4324 = vrot.lane.b32.xlu0 %v9123_v33, %s6065_s13  ;;  %10727 = vst [vmem:[#allocation29_spill] sm:$0xff] %v9187_v27  ;;  %10728 = vst [vmem:[#allocation81_spill] sm:$0xff] %v9189_v52  ;;  %v9191_v4 = vld [vmem:[#allocation2 + $0x8f] sm:$0xff]  ;;  %5514 = vmatprep.subr.bf16.mxu1 %v5777_v10  ;;  %v3740_v58 = vld [vmem:[#allocation2 + $0xd8] sm:$0xff]  ;;  %v9206_v25 = vpack.c.bf16 %v3929_v2, %v9051_v32  ;;  %v9209_v19 = vpack.c.bf16 %v3813_v54, %v9039_v26  ;;  %v3815_v1 = vsel %vm10720_vm6, %v9024_v41, 0.0 }
 0x35d   : > { %10729 = vst [vmem:[#allocation88_spill] sm:$0xff] %v9191_v4  ;;  %10730 = vst [vmem:[#allocation82_spill] sm:$0xff] %v9194_v63  ;;  %v9203_v47 = vld [vmem:[#allocation2 + $0x97] sm:$0xff]  ;;  %v10734_v63 = vld [vmem:[#allocation58_spill] sm:$0xff] }
 0x35e   : > { %10731 = vst [vmem:[#allocation84_spill] sm:$0xff] %v9203_v47  ;;  %10732 = vst [vmem:[#allocation64_spill] sm:$0xff] %v9206_v25  ;;  %vm10735_vm1 = vnez %v10734_v63  ;;  %v5778_v11 = vld [vmem:[%s10086_s9 + $0x20] sm:$0xff]   ;;  %5715 = vmatmul.mubr.msk.bf16.gmra.mxu0 %vm10736_vm10, %v4057_v57  ;;  %4100 = vrot.lane.b32.xlu1 %v3756_v36, %s6064_s23  ;;  %v9231_v57 = vld [vmem:[#allocation2 + $0xf1] sm:$0xff] }
 0x35f   : > { %10733 = vst [vmem:[#allocation62_spill] sm:$0xff] %v9209_v19  ;;  %v3678_v5 = vsel %vm10735_vm1, %v9142_v38, 0.0  ;;  %v9219_v43 = vld [vmem:[#allocation2 + $0xe1] sm:$0xff]  ;;  %v5779_v19 = vld [vmem:[%s10086_s9 + $0x58] sm:$0xff]   ;;  %5718 = vmatprep.mubr.msk.bf16.mxu0 %vm10708_vm0, %v4058_v50  ;;  %5515 = vmatpush3.bf16.msra.mxu1 %v5778_v11  ;;  %v9247_v50 = vld [vmem:[#allocation2 + $0xaf] sm:$0xff] }
 0x360   : > { %v3741_v10 = vld [vmem:[#allocation2 + $0xe0] sm:$0xff]  ;;  %v9222_v2 = vpack.c.bf16 %v9162_v56, %v3678_v5  ;;  %v3931_v5 = vsel %vm10720_vm6, %v9092_v53, 0.0  ;;  %4326 = vrot.lane.b32.xlu0 %v3758_v34, %s6065_s13  ;;  %5516 = vmatprep.subr.bf16.mxu1 %v5779_v19  ;;  %v10745_v41 = vld [vmem:[#allocation50_spill] sm:$0xff]  ;;  %v5780_v19 = vld [vmem:[%s10086_s9 + $0x18] sm:$0xff]  }
 0x361   : > { %v10738_v26 = vld [vmem:[#allocation61_spill] sm:$0xff]  ;;  %v9250_v25 = vpack.c.bf16 %v3931_v5, %v9137_v28  ;;  %vm10746_vm4 = vnez %v10745_v41  ;;  %v9263_v63 = vpack.c.bf16 %v3741_v10, %v3740_v58  ;;  %v10750_v58 = vld [vmem:[#allocation68_spill] sm:$0xff]  ;;  %vm10764_vm10 = vmmov %vm10708_vm0 }
 0x362   : > { %10737 = vst [vmem:[#allocation69_spill] sm:$0xff] %v9222_v2  ;;  %vm10739_vm5 = vnez %v10738_v26  ;;  %v9233_v36 = vld [vmem:[#allocation2 + $0x9f] sm:$0xff]  ;;  %v9245_v2 = vld [vmem:[#allocation2 + $0xa7] sm:$0xff]  ;;  %v3682_v26 = vsel %vm10516_vm7, %v9189_v52, 0.0  ;;  %v4039_v11 = vsel %vm10746_vm4, %v9219_v43, 0.0  ;;  %4102 = vrot.lane.b32.xlu1 %v9123_v33, %s6064_s23  ;;  %vm10751_vm6 = vnez %v10750_v58  ;;  %v5781_v33 = vld [vmem:[%s10086_s9 + $0x50] sm:$0xff]  }
 0x363   : > { %v3680_v54 = vsel %vm10739_vm5, %v9176_v48, 0.0  ;;  %10740 = vst [vmem:[#allocation67_spill] sm:$0xff] %v9233_v36  ;;  %10742 = vst [vmem:[#allocation38_spill] sm:$0xff] %v9250_v25  ;;  %v9258_v6 = vld [vmem:[#allocation2 + $0xd9] sm:$0xff]  ;;  %v9268_v5 = vpack.c.bf16 %v9191_v4, %v3682_v26  ;;  %v4041_v10 = vsel %vm10751_vm6, %v9231_v57, 0.0  ;;  %v9297_v4 = vld [vmem:[#allocation2 + $0xc7] sm:$0xff]  ;;  %5517 = vmatpush3.bf16.msra.mxu1 %v5780_v19 }
 0x364   : > { %v9236_v13 = vpack.c.bf16 %v9187_v27, %v3680_v54  ;;  %v9253_v54 = vpack.c.bf16 %v3815_v1, %v9051_v32  ;;  %v9265_v27 = vld [vmem:[#allocation2 + $0xb7] sm:$0xff]  ;;  %v3684_v1 = vsel %vm7475_vm11, %v9203_v47, 0.0  ;;  %v9283_v25 = vld [vmem:[#allocation2 + $0xbf] sm:$0xff]  ;;  %v3817_v32 = vsel %vm10746_vm4, %v9092_v53, 0.0  ;;  %10754 = vst [vmem:[#allocation6_spill] sm:$0xff] %v9297_v4  ;;  %4328 = vrot.lane.b32.xlu0 %v9263_v63, %s6065_s13  ;;  %v9313_v48 = vld [vmem:[#allocation2 + $0xcf] sm:$0xff]  ;;  %5518 = vmatprep.subr.bf16.mxu1 %v5781_v33 }
 0x365   : > { %10747 = vst [vmem:[#allocation4_spill] sm:$0xff] %v9265_v27  ;;  %10748 = vst [vmem:[#allocation5_spill] sm:$0xff] %v9268_v5  ;;  %v9286_v26 = vpack.c.bf16 %v9233_v36, %v3684_v1  ;;  %v3933_v5 = vsel %vm10746_vm4, %v9109_v16, 0.0  ;;  %v3743_v47 = vld [vmem:[#allocation2 + $0xf0] sm:$0xff]  ;;  %v9303_v1 = vpack.c.bf16 %v3817_v32, %v9137_v28  ;;  %v3686_v36 = vsel %vm7543_vm8, %v9245_v2, 0.0  ;;  %v3793_v28 = vld [vmem:[#allocation2 + $0x101] sm:$0xff] }
 0x366   : > { %10741 = vst [vmem:[#allocation23_spill] sm:$0xff] %v9236_v13  ;;  %10743 = vst [vmem:[#allocation3_spill] sm:$0xff] %v9253_v54  ;;  %v9278_v54 = vld [vmem:[#allocation2 + $0xe9] sm:$0xff]  ;;  %v9300_v52 = vpack.c.bf16 %v3933_v5, %v9157_v21  ;;  %v4059_v53 = vpack.c.bf16 %v4039_v11, %v9258_v6  ;;  %v9311_v41 = vld [vmem:[#allocation2 + $0x111] sm:$0xff]  ;;  %v9316_v5 = vpack.c.bf16 %v9247_v50, %v3686_v36  ;;  %v3688_v32 = vsel %vm7585_vm13, %v9265_v27, 0.0 }
 0x367   : > { %10752 = vst [vmem:[#allocation7_spill] sm:$0xff] %v9283_v25  ;;  %10753 = vst [vmem:[#allocation40_spill] sm:$0xff] %v9286_v26  ;;  %v3742_v13 = vld [vmem:[#allocation2 + $0xe8] sm:$0xff]  ;;  %v4060_v19 = vpack.c.bf16 %v4041_v10, %v9278_v54  ;;  %v3744_v11 = vld [vmem:[#allocation2 + $0xf8] sm:$0xff]  ;;  %v9327_v26 = vpack.c.bf16 %v9283_v25, %v3688_v32  ;;  %v3935_v36 = vsel %vm10751_vm6, %v9219_v43, 0.0  ;;  %4104 = vrot.lane.b32.xlu1 %v3758_v34, %s6064_s23 }
 0x368   : > { %10755 = vst [vmem:[#allocation8_spill] sm:$0xff] %v9300_v52  ;;  %10756 = vst [vmem:[#allocation41_spill] sm:$0xff] %v9303_v1  ;;  %v9318_v52 = vld [vmem:[#allocation2 + $0xd7] sm:$0xff]  ;;  %v9324_v1 = vld [vmem:[#allocation2 + $0xdf] sm:$0xff]  ;;  %5719 = vmatmul.mubr.msk.bf16.gmra.mxu0 %vm10764_vm10, %v4059_v53  ;;  %v3760_v10 = vpack.c.bf16 %v3743_v47, %v3742_v13  ;;  %v9341_v32 = vpack.c.bf16 %v3935_v36, %v9258_v6 }
 0x369   : > { %10758 = vst [vmem:[#allocation30_spill] sm:$0xff] %v9313_v48  ;;  %10759 = vst [vmem:[#allocation31_spill] sm:$0xff] %v9316_v5  ;;  %v3819_v5 = vsel %vm10751_vm6, %v9109_v16, 0.0  ;;  %v5782_v33 = vld [vmem:[%s10086_s9 + $0x10] sm:$0xff]   ;;  %v3690_v16 = vsel %vm7622_vm14, %v9297_v4, 0.0  ;;  %v9349_v58 = vld [vmem:[#allocation2 + $0xe7] sm:$0xff]  ;;  %5722 = vmatprep.mubr.msk.bf16.mxu0 %vm10708_vm0, %v4060_v19 }
 0x36a   : > { %10760 = vst [vmem:[#allocation32_spill] sm:$0xff] %v9318_v52  ;;  %10762 = vst [vmem:[#allocation33_spill] sm:$0xff] %v9324_v1  ;;  %v5783_v53 = vld [vmem:[%s10086_s9 + $0x48] sm:$0xff]   ;;  %v3745_v47 = vld [vmem:[#allocation2 + $0x100] sm:$0xff]  ;;  %v9356_v34 = vpack.c.bf16 %v9313_v48, %v3690_v16  ;;  %5519 = vmatpush3.bf16.msra.mxu1 %v5782_v33  ;;  %4330 = vrot.lane.b32.xlu0 %v3760_v10, %s6065_s13 }
 0x36b   : > { %10763 = vst [vmem:[#allocation35_spill] sm:$0xff] %v9327_v26  ;;  %10765 = vst [vmem:[#allocation37_spill] sm:$0xff] %v9341_v32  ;;  %v9344_v26 = vpack.c.bf16 %v3819_v5, %v9157_v21  ;;  %v9358_v13 = vld [vmem:[#allocation2 + $0xef] sm:$0xff]  ;;  %v10769_v21 = vld [vmem:[#allocation85_spill] sm:$0xff]  ;;  %5520 = vmatprep.subr.bf16.mxu1 %v5783_v53  ;;  %4106 = vrot.lane.b32.xlu1 %v9263_v63, %s6064_s23 }
 0x36c   : > { %10768 = vst [vmem:[#allocation43_spill] sm:$0xff] %v9356_v34  ;;  %vm10770_vm4 = vnez %v10769_v21  ;;  %v9363_v36 = vld [vmem:[#allocation2 + $0xf7] sm:$0xff]  ;;  %v9378_v25 = vld [vmem:[#allocation2 + $0xff] sm:$0xff]  ;;  %v3908_v53 = vld [vmem:[#allocation2 + $0x109] sm:$0xff] }
 0x36d   : > { %10766 = vst [vmem:[#allocation39_spill] sm:$0xff] %v9344_v26  ;;  %v3692_v5 = vsel %vm10770_vm4, %v9318_v52, 0.0  ;;  %10771 = vst [vmem:[#allocation44_spill] sm:$0xff] %v9363_v36  ;;  %v10772_v26 = vld [vmem:[#allocation75_spill] sm:$0xff]  ;;  %v10775_v16 = vld [vmem:[#allocation72_spill] sm:$0xff]  ;;  %vm10790_vm4 = vnez %v10654_v12 }
 0x36e   : > { %vm10773_vm6 = vnez %v10772_v26  ;;  %v9370_v19 = vpack.c.bf16 %v9324_v1, %v3692_v5  ;;  %vm10776_vm10 = vnez %v10775_v16  ;;  %10777 = vst [vmem:[#allocation46_spill] sm:$0xff] %v9378_v25  ;;  %v3792_v33 = vld [vmem:[#allocation2 + $0xf9] sm:$0xff]  ;;  %v4009_v48 = vld [vmem:[#allocation2 + $0x110] sm:$0xff]  ;;  %v3761_v16 = vpack.c.bf16 %v3745_v47, %v3744_v11  ;;  %v4008_v27 = vld [vmem:[#allocation2 + $0x108] sm:$0xff] }
 0x36f   : > { %v4045_v32 = vsel %vm10773_vm6, %v9311_v41, 0.0  ;;  %v3937_v34 = vsel %vm10776_vm10, %v9231_v57, 0.0  ;;  %v3821_v21 = vsel %vm10776_vm10, %v9219_v43, 0.0  ;;  %v4043_v52 = vsel %vm10776_vm10, %v3793_v28, 0.0  ;;  %v5784_v43 = vld [vmem:[%s10086_s9 + $0x8] sm:$0xff]   ;;  %4108 = vrot.lane.b32.xlu1 %v3760_v10, %s6064_s23 }
 0x370   : > { %10774 = vst [vmem:[#allocation42_spill] sm:$0xff] %v9370_v19  ;;  %v9383_v4 = vpack.c.bf16 %v3937_v34, %v9278_v54  ;;  %v9386_v5 = vpack.c.bf16 %v3821_v21, %v9258_v6  ;;  %v10780_v19 = vld [vmem:[#allocation89_spill] sm:$0xff]  ;;  %v10783_v6 = vld [vmem:[#allocation36_spill] sm:$0xff]  ;;  %v3939_v11 = vsel %vm10773_vm6, %v3793_v28, 0.0  ;;  %5521 = vmatpush3.bf16.msra.mxu1 %v5784_v43  ;;  %v4061_v47 = vpack.c.bf16 %v4043_v52, %v3792_v33 }
 0x371   : > { %vm10781_vm0 = vnez %v10780_v19  ;;  %vm10784_vm10 = vnez %v10783_v6  ;;  %v5785_v19 = vld [vmem:[%s10086_s9 + $0x40] sm:$0xff]   ;;  %4332 = vrot.lane.b32.xlu0 %v3761_v16, %s6065_s13 }
 0x372   : > { %10778 = vst [vmem:[#allocation47_spill] sm:$0xff] %v9383_v4  ;;  %10779 = vst [vmem:[#allocation50_spill] sm:$0xff] %v9386_v5  ;;  %v3694_v1 = vsel %vm10781_vm0, %v9349_v58, 0.0  ;;  %v3696_v21 = vsel %vm10784_vm10, %v9363_v36, 0.0  ;;  %v10785_v5 = vld [vmem:[#allocation74_spill] sm:$0xff]  ;;  %5522 = vmatprep.subr.bf16.mxu1 %v5785_v19 }
 0x373   : > { %v9397_v34 = vpack.c.bf16 %v9358_v13, %v3694_v1  ;;  %vm10786_vm0 = vnez %v10785_v5  ;;  %v9409_v63 = vpack.c.bf16 %v9378_v25, %v3696_v21  ;;  %v3823_v1 = vsel %vm10773_vm6, %v9231_v57, 0.0  ;;  %v3765_v6 = vld [vmem:[#allocation2 + $0x21] sm:$0xff]  ;;  %v3763_v57 = vld [vmem:[#allocation2 + $0x11] sm:$0xff]  ;;  %4110 = vrot.lane.b32.xlu1 %v3761_v16, %s6064_s23 }
 0x374   : > { %v3941_v4 = vsel %vm10786_vm0, %v9311_v41, 0.0  ;;  %v9420_v36 = vpack.c.bf16 %v3823_v1, %v9278_v54  ;;  %v4062_v41 = vpack.c.bf16 %v4045_v32, %v3908_v53  ;;  %v4012_v21 = vpack.c.bf16 %v4009_v48, %v4008_v27  ;;  %v3764_v27 = vld [vmem:[#allocation2 + $0x19] sm:$0xff]  ;;  %v10860_v48 = vld [vmem:[#allocation35_spill] sm:$0xff]  ;;  %v3842_v31 = vld [vmem:[#allocation2 + $0x107] sm:$0xff] }
 0x375   : > { %10782 = vst [vmem:[#allocation68_spill] sm:$0xff] %v9397_v34  ;;  %10787 = vst [vmem:[#allocation75_spill] sm:$0xff] %v9409_v63  ;;  %v9417_v34 = vpack.c.bf16 %v3939_v11, %v3792_v33  ;;  %v5786_v63 = vld [vmem:[%s10086_s9] sm:$0xff]   ;;  %v9425_v25 = vpack.c.bf16 %v3941_v4, %v3908_v53  ;;  %v3825_v52 = vsel %vm10786_vm0, %v3793_v28, 0.0  ;;  %vm10788_vm6 = vcmask 261120   ;;  %v3762_v53 = vld [vmem:[#allocation2 + $0x9] sm:$0xff] }
 0x376   : > { %5723 = vmatmul.mubr.msk.bf16.gmra.mxu0 %vm10788_vm6, %v4061_v47  ;;  %v9431_v26 = vpack.c.bf16 %v3825_v52, %v3792_v33  ;;  %vm10789_vm10 = vmmov %vm10788_vm6  ;;  %v3911_v4 = vsel %vm10790_vm4, %v3765_v6, 0.0  ;;  %5523 = vmatpush3.bf16.msra.mxu1 %v5786_v63  ;;  %v3795_v63 = vsel %vm10790_vm4, %v3763_v57, 0.0  ;;  %vm10793_vm4 = vnez %v10657_v61  ;;  %v10843_v11 = vld [vmem:[#allocation23_spill] sm:$0xff]  ;;  %v10847_v33 = vld [vmem:[#allocation5_spill] sm:$0xff] }
 0x377   : > { %5726 = vmatprep.mubr.msk.bf16.mxu0 %vm10789_vm10, %v4062_v41  ;;  %4334 = vrot.lane.b32.xlu0 %v4012_v21, %s6065_s13  ;;  %v3942_v47 = vpack.c.bf16 %v3911_v4, %v3764_v27  ;;  %v10791_v41 = vld [vmem:[#allocation34_spill] sm:$0xff]  ;;  %v3826_v52 = vpack.c.bf16 %v3795_v63, %v3762_v53  ;;  %v3797_v4 = vsel %vm10793_vm4, %v3765_v6, 0.0  ;;  %v3962_v53 = vsel %vm7077_vm9, %v9072_v49, 0.0  ;;  %v10852_v32 = vld [vmem:[#allocation40_spill] sm:$0xff]  ;;  %v10856_v28 = vld [vmem:[#allocation31_spill] sm:$0xff] }
 0x378   : > { %vm10792_vm10 = vnez %v10791_v41  ;;  %v3846_v63 = vsel %vm7077_vm9, %v9068_v8, 0.0  ;;  %v3850_v49 = vsel %vm7202_vm15, %v9111_v51, 0.0  ;;  %vm10819_vm9 = vmmov %vm10788_vm6  ;;  %v10863_v54 = vld [vmem:[#allocation43_spill] sm:$0xff]  ;;  %v10871_v20 = vld [vmem:[#allocation42_spill] sm:$0xff] }
 0x379   : > { %v3960_v21 = vsel %vm10792_vm10, %v9068_v8, 0.0  ;;  %v3844_v12 = vsel %vm10792_vm10, %v9056_v44, 0.0  ;;  %4128 = vrot.lane.b32.xlu1 %v3826_v52, %s6066_s29  ;;  %v3827_v44 = vpack.c.bf16 %v3797_v4, %v3764_v27  ;;  %v3877_v61 = vpack.c.bf16 %v9070_v18, %v3846_v63  ;;  %v10796_v8 = vld [vmem:[#allocation57_spill] sm:$0xff]  ;;  %v10801_v4 = vld [vmem:[#allocation86_spill] sm:$0xff] }
 0x37a   : > { %v3992_v57 = vpack.c.bf16 %v9070_v18, %v3960_v21  ;;  %v3876_v16 = vpack.c.bf16 %v9058_v62, %v3844_v12  ;;  %v3993_v62 = vpack.c.bf16 %v9094_v59, %v3962_v53  ;;  %v3878_v18 = vpack.c.bf16 %v9094_v59, %v3848_v35  ;;  %v10797_v21 = vld [vmem:[#allocation27_spill] sm:$0xff] }
 0x37b   : > { %4224 = vrot.lane.b32.xlu0 %v3942_v47, %s6064_s23  ;;  %v3964_v47 = vsel %vm7132_vm12, %v9111_v51, 0.0  ;;  %v3966_v12 = vsel %vm7202_vm15, %v10797_v21, 0.0  ;;  %v3879_v59 = vpack.c.bf16 %v9125_v29, %v3850_v49  ;;  %v3968_v63 = vsel %vm7281_vm2, %v9142_v38, 0.0  ;;  %vm10823_vm12 = vmmov %vm10788_vm6 }
 0x37c   : > { %v3994_v27 = vpack.c.bf16 %v9125_v29, %v3964_v47  ;;  %v3995_v53 = vpack.c.bf16 %v10801_v4, %v3966_v12  ;;  %v3852_v51 = vsel %vm7281_vm2, %v10797_v21, 0.0  ;;  %v3996_v6 = vpack.c.bf16 %v9162_v56, %v3968_v63  ;;  %v10805_v47 = vld [vmem:[#allocation79_spill] sm:$0xff]  ;;  %v10809_v21 = vld [vmem:[#allocation29_spill] sm:$0xff]  ;;  %vm10827_vm15 = vmmov %vm10788_vm6 }
 0x37d   : > { %4176 = vrot.lane.b32.xlu1 %v3876_v16, %s6065_s13  ;;  %v10800_v16 = vld [vmem:[#allocation60_spill] sm:$0xff]  ;;  %v3880_v29 = vpack.c.bf16 %v10801_v4, %v3852_v51  ;;  %v3970_v35 = vsel %vm7312_vm3, %v10805_v47, 0.0  ;;  %vm10830_vm2 = vmmov %vm10788_vm6 }
 0x37e   : > { %v3997_v52 = vpack.c.bf16 %v10809_v21, %v3970_v35  ;;  %v10812_v4 = vld [vmem:[#allocation24_spill] sm:$0xff] }
 0x37f   : > { %4272 = vrot.lane.b32.xlu0 %v3992_v57, %s6066_s29  ;;  %v10799_v57 = vld [vmem:[#allocation20_spill] sm:$0xff] }
 0x380   : > { %v10815_v51 = vld [vmem:[#allocation84_spill] sm:$0xff] }
 0x381   : > { %4130 = vrot.lane.b32.xlu1 %v3827_v44, %s6066_s29  ;;  %v10814_v44 = vld [vmem:[#allocation88_spill] sm:$0xff] }
 0x383   : > { %4226 = vrot.lane.b32.xlu0 %v8887_v42, %s6064_s23  ;;  %v10795_v42 = vld [vmem:[#allocation54_spill] sm:$0xff] }
 0x385   : > { %4178 = vrot.lane.b32.xlu1 %v3877_v61, %s6065_s13  ;;  %v10804_v61 = vld [vmem:[#allocation21_spill] sm:$0xff] }
 0x387   : > { %4274 = vrot.lane.b32.xlu0 %v3993_v62, %s6066_s29  ;;  %v10803_v62 = vld [vmem:[#allocation63_spill] sm:$0xff] }
 0x389   : > { %4132 = vrot.lane.b32.xlu1 %v10796_v8, %s6066_s29  ;;  %v10807_v8 = vld [vmem:[#allocation22_spill] sm:$0xff] }
 0x38b   : > { %4228 = vrot.lane.b32.xlu0 %v10795_v42, %s6064_s23  ;;  %v10818_v42 = vld [vmem:[#allocation70_spill] sm:$0xff] }
 0x38d   : > { %4180 = vrot.lane.b32.xlu1 %v3878_v18, %s6065_s13  ;;  %v10808_v18 = vld [vmem:[#allocation65_spill] sm:$0xff] }
 0x38f   : > { %4276 = vrot.lane.b32.xlu0 %v3994_v27, %s6066_s29  ;;  %v3854_v27 = vsel %vm7312_vm3, %v9142_v38, 0.0  ;;  %v3856_v38 = vsel %vm10735_vm1, %v10805_v47, 0.0  ;;  %v10817_v47 = vld [vmem:[#allocation73_spill] sm:$0xff]  ;;  %vm10835_vm3 = vmmov %vm10830_vm2 }
 0x390   : > { %v3881_v12 = vpack.c.bf16 %v9162_v56, %v3854_v27  ;;  %v3882_v63 = vpack.c.bf16 %v10809_v21, %v3856_v38  ;;  %v10820_v27 = vld [vmem:[#allocation26_spill] sm:$0xff]  ;;  %v10821_v21 = vld [vmem:[#allocation67_spill] sm:$0xff] }
 0x391   : > { %4134 = vrot.lane.b32.xlu1 %v10800_v16, %s6066_s29 }
 0x393   : > { %4230 = vrot.lane.b32.xlu0 %v10799_v57, %s6064_s23  ;;  %v10810_v57 = vld [vmem:[#allocation81_spill] sm:$0xff] }
 0x394   : > { %v3972_v16 = vsel %vm10735_vm1, %v10810_v57, 0.0  ;;  %vm10848_vm1 = vmmov %vm10830_vm2 }
 0x395   : > { %4182 = vrot.lane.b32.xlu1 %v3879_v59, %s6065_s13  ;;  %v9553_v59 = vpop.permute.xlu1 %4080  ;;  %v3998_v56 = vpack.c.bf16 %v10814_v44, %v3972_v16  ;;  %v10822_v16 = vld [vmem:[#allocation76_spill] sm:$0xff]  ;;  %vm10864_vm6 = vmmov %vm10848_vm1 }
 0x396   : > { %vm10872_vm4 = vmmov %vm10848_vm1 }
 0x397   : > { %4278 = vrot.lane.b32.xlu0 %v3995_v53, %s6066_s29  ;;  %v10813_v53 = vld [vmem:[#allocation25_spill] sm:$0xff] }
 0x399   : > { %4136 = vrot.lane.b32.xlu1 %v10804_v61, %s6066_s29  ;;  %v10826_v61 = vld [vmem:[#allocation78_spill] sm:$0xff] }
 0x39b   : > { %4232 = vrot.lane.b32.xlu0 %v10803_v62, %s6064_s23  ;;  %v9558_v62 = vpop.permute.xlu0 %4306 }
 0x39d   : > { %4184 = vrot.lane.b32.xlu1 %v3880_v29, %s6065_s13 }
 0x39f   : > { %4280 = vrot.lane.b32.xlu0 %v3996_v6, %s6066_s29  ;;  %v3974_v6 = vsel %vm10739_vm5, %v10815_v51, 0.0 }
 0x3a1   : > { %4138 = vrot.lane.b32.xlu1 %v10808_v18, %s6066_s29 }
 0x3a3   : > { %4234 = vrot.lane.b32.xlu0 %v10807_v8, %s6064_s23  ;;  %v3858_v8 = vsel %vm10739_vm5, %v10810_v57, 0.0  ;;  %vm10857_vm5 = vmmov %vm10848_vm1 }
 0x3a4   : > { %v3883_v49 = vpack.c.bf16 %v10814_v44, %v3858_v8  ;;  %v3860_v44 = vsel %vm10516_vm7, %v10815_v51, 0.0  ;;  %v10831_v51 = vld [vmem:[#allocation4_spill] sm:$0xff] }
 0x3a5   : > { %4186 = vrot.lane.b32.xlu1 %v3881_v12, %s6065_s13  ;;  %v3978_v57 = vsel %vm7475_vm11, %v10831_v51, 0.0 }
 0x3a7   : > { %4282 = vrot.lane.b32.xlu0 %v3997_v52, %s6066_s29  ;;  %v3999_v52 = vpack.c.bf16 %v10821_v21, %v3974_v6 }
 0x3a9   : > { %4140 = vrot.lane.b32.xlu1 %v10813_v53, %s6066_s29  ;;  %v3976_v53 = vsel %vm10516_vm7, %v9245_v2, 0.0  ;;  %vm10839_vm7 = vmmov %vm10830_vm2 }
 0x3ab   : > { %4236 = vrot.lane.b32.xlu0 %v10812_v4, %s6064_s23  ;;  %v4083_v29 = vpop.permute.xlu1 %4082 }
 0x3ac   : > { %v9568_v35 = vsel %vm10819_vm9, %v10818_v42, %v4083_v29  ;;  %v10828_v29 = vld [vmem:[#allocation87_spill] sm:$0xff]  ;;  %v4000_v42 = vpack.c.bf16 %v9247_v50, %v3976_v53  ;;  %v10833_v53 = vld [vmem:[#allocation64_spill] sm:$0xff]  ;;  %vm10878_vm9 = vmmov %vm10848_vm1 }
 0x3ad   : > { %4188 = vrot.lane.b32.xlu1 %v3882_v63, %s6065_s13  ;;  %v9575_v18 = vpop.permute.xlu0 %4308  ;;  %v10825_v63 = vld [vmem:[#allocation90_spill] sm:$0xff] }
 0x3af   : > { %4284 = vrot.lane.b32.xlu0 %v3998_v56, %s6066_s29  ;;  %v4085_v12 = vpop.permute.xlu1 %4084 }
 0x3b0   : > { %v9582_v4 = vsel %vm10823_vm12, %v10822_v16, %v4085_v12 }
 0x3b1   : > { %4142 = vrot.lane.b32.xlu1 %v10820_v27, %s6066_s29  ;;  %v9585_v38 = vpop.permute.xlu0 %4310  ;;  %v3884_v27 = vpack.c.bf16 %v10821_v21, %v3860_v44  ;;  %v3862_v21 = vsel %vm7475_vm11, %v9245_v2, 0.0  ;;  %v10836_v44 = vld [vmem:[#allocation62_spill] sm:$0xff]  ;;  %vm10844_vm11 = vmmov %vm10830_vm2 }
 0x3b2   : > { %v10840_v2 = vld [vmem:[#allocation6_spill] sm:$0xff] }
 0x3b3   : > { %4238 = vrot.lane.b32.xlu0 %v10817_v47, %s6064_s23  ;;  %v4087_v56 = vpop.permute.xlu1 %4086 }
 0x3b4   : > { %v9594_v6 = vsel %vm10827_vm15, %v10826_v61, %v4087_v56  ;;  %vm10882_vm15 = vmmov %vm10848_vm1 }
 0x3b5   : > { %4190 = vrot.lane.b32.xlu1 %v3883_v49, %s6065_s13  ;;  %v9601_v47 = vpop.permute.xlu0 %4312 }
 0x3b7   : > { %4286 = vrot.lane.b32.xlu0 %v3999_v52, %s6066_s29  ;;  %v4089_v8 = vpop.permute.xlu1 %4088  ;;  %v10829_v52 = vld [vmem:[#allocation28_spill] sm:$0xff] }
 0x3b8   : > { %v9608_v12 = vsel %vm10830_vm2, %v10829_v52, %v4089_v8  ;;  %v3885_v52 = vpack.c.bf16 %v9247_v50, %v3862_v21  ;;  %v3864_v50 = vsel %vm7543_vm8, %v10831_v51, 0.0  ;;  %v10845_v21 = vld [vmem:[#allocation3_spill] sm:$0xff]  ;;  %v10849_v51 = vld [vmem:[#allocation32_spill] sm:$0xff] }
 0x3b9   : > { %4144 = vrot.lane.b32.xlu1 %v10828_v29, %s6066_s29  ;;  %v9611_v49 = vpop.permute.xlu0 %4314 }
 0x3bb   : > { %4240 = vrot.lane.b32.xlu0 %v10825_v63, %s6064_s23  ;;  %v4091_v56 = vpop.permute.xlu1 %4090  ;;  %v10834_v63 = vld [vmem:[#allocation82_spill] sm:$0xff] }
 0x3bc   : > { %v9620_v61 = vsel %vm10835_vm3, %v10834_v63, %v4091_v56  ;;  %v3984_v63 = vsel %vm7622_vm14, %v9349_v58, 0.0  ;;  %vm10890_vm3 = vcmask 523264  }
 0x3bd   : > { %4192 = vrot.lane.b32.xlu1 %v3884_v27, %s6065_s13  ;;  %v9627_v29 = vpop.permute.xlu0 %4316 }
 0x3bf   : > { %4288 = vrot.lane.b32.xlu0 %v4000_v42, %s6066_s29  ;;  %v10837_v42 = vld [vmem:[#allocation7_spill] sm:$0xff]  ;;  %v4093_v27 = vpop.permute.xlu1 %4092 }
 0x3c0   : > { %v4001_v8 = vpack.c.bf16 %v10837_v42, %v3978_v57  ;;  %v10842_v57 = vld [vmem:[#allocation38_spill] sm:$0xff] }
 0x3c1   : > { %4146 = vrot.lane.b32.xlu1 %v10836_v44, %s6066_s29  ;;  %v9637_v16 = vpop.permute.xlu0 %4318  ;;  %v3980_v44 = vsel %vm7543_vm8, %v10840_v2, 0.0  ;;  %vm10853_vm8 = vmmov %vm10848_vm1 }
 0x3c3   : > { %4242 = vrot.lane.b32.xlu0 %v10833_v53, %s6064_s23  ;;  %v10838_v53 = vld [vmem:[#allocation69_spill] sm:$0xff] }
 0x3c4   : > { %v9634_v56 = vsel %vm10839_vm7, %v10838_v53, %v4093_v27  ;;  %v4095_v1 = vpop.permute.xlu1 %4094 }
 0x3c5   : > { %4194 = vrot.lane.b32.xlu1 %v3885_v52, %s6065_s13  ;;  %v9653_v27 = vpop.permute.xlu0 %4320  ;;  %v10846_v52 = vld [vmem:[#allocation30_spill] sm:$0xff] }
 0x3c6   : > { %v4002_v53 = vpack.c.bf16 %v10846_v52, %v3980_v44  ;;  %v10851_v44 = vld [vmem:[#allocation8_spill] sm:$0xff] }
 0x3c7   : > { %4290 = vrot.lane.b32.xlu0 %v4001_v8, %s6066_s29  ;;  %v9646_v8 = vsel %vm10844_vm11, %v10843_v11, %v4095_v1  ;;  %vm10893_vm11 = vmmov %vm10890_vm3 }
 0x3c8   : > { %v4097_v43 = vpop.permute.xlu1 %4096 }
 0x3c9   : > { %4148 = vrot.lane.b32.xlu1 %v10845_v21, %s6066_s29  ;;  %v9660_v11 = vsel %vm10848_vm1, %v10847_v33, %v4097_v43  ;;  %v3982_v21 = vsel %vm7585_vm13, %v10849_v51, 0.0  ;;  %v3866_v33 = vsel %vm7585_vm13, %v10840_v2, 0.0  ;;  %v10854_v43 = vld [vmem:[#allocation41_spill] sm:$0xff]  ;;  %vm10861_vm13 = vmmov %vm10848_vm1 }
 0x3ca   : > { %v9663_v1 = vpop.permute.xlu0 %4322 }
 0x3cb   : > { %4244 = vrot.lane.b32.xlu0 %v10842_v57, %s6064_s23  ;;  %v3886_v57 = vpack.c.bf16 %v10837_v42, %v3864_v50  ;;  %v10855_v50 = vld [vmem:[#allocation33_spill] sm:$0xff] }
 0x3cc   : > { %v4099_v19 = vpop.permute.xlu1 %4098 }
 0x3cd   : > { %4196 = vrot.lane.b32.xlu1 %v3886_v57, %s6065_s13  ;;  %v4003_v57 = vpack.c.bf16 %v10855_v50, %v3982_v21  ;;  %v10859_v21 = vld [vmem:[#allocation37_spill] sm:$0xff] }
 0x3ce   : > { %v9679_v42 = vpop.permute.xlu0 %4324 }
 0x3cf   : > { %4292 = vrot.lane.b32.xlu0 %v4002_v53, %s6066_s29  ;;  %v9672_v53 = vsel %vm10853_vm8, %v10852_v32, %v4099_v19 }
 0x3d0   : > { %v4101_v10 = vpop.permute.xlu1 %4100 }
 0x3d1   : > { %4150 = vrot.lane.b32.xlu1 %v10854_v43, %s6066_s29  ;;  %v9686_v32 = vsel %vm10857_vm5, %v10856_v28, %v4101_v10  ;;  %v3868_v28 = vsel %vm7622_vm14, %v10849_v51, 0.0  ;;  %v10862_v10 = vld [vmem:[#allocation39_spill] sm:$0xff]  ;;  %v10867_v51 = vld [vmem:[#allocation44_spill] sm:$0xff] }
 0x3d2   : > { %v9689_v19 = vpop.permute.xlu0 %4326 }
 0x3d3   : > { %4246 = vrot.lane.b32.xlu0 %v10851_v44, %s6064_s23  ;;  %v3887_v44 = vpack.c.bf16 %v10846_v52, %v3866_v33  ;;  %v4004_v33 = vpack.c.bf16 %v9358_v13, %v3984_v63  ;;  %v10870_v63 = vld [vmem:[#allocation47_spill] sm:$0xff] }
 0x3d4   : > { %v4103_v43 = vpop.permute.xlu1 %4102 }
 0x3d5   : > { %4198 = vrot.lane.b32.xlu1 %v3887_v44, %s6065_s13 }
 0x3d6   : > { %v9705_v52 = vpop.permute.xlu0 %4328 }
 0x3d7   : > { %4294 = vrot.lane.b32.xlu0 %v4003_v57, %s6066_s29  ;;  %v9698_v57 = vsel %vm10861_vm13, %v10860_v48, %v4103_v43  ;;  %v10868_v43 = vld [vmem:[#allocation85_spill] sm:$0xff]  ;;  %vm10900_vm13 = vmmov %vm10890_vm3 }
 0x3d8   : > { %vm10869_vm14 = vnez %v10868_v43  ;;  %v4014_v43 = vld [vmem:[#allocation2 + $0x119] sm:$0xff] }
 0x3d9   : > { %4152 = vrot.lane.b32.xlu1 %v10862_v10, %s6066_s29  ;;  %v4105_v44 = vpop.permute.xlu1 %4104  ;;  %v3986_v10 = vsel %vm10869_vm14, %v10867_v51, 0.0 }
 0x3da   : > { %v9712_v48 = vsel %vm10864_vm6, %v10863_v54, %v4105_v44  ;;  %v3870_v54 = vsel %vm10869_vm14, %v9349_v58, 0.0  ;;  %v10876_v44 = vld [vmem:[#allocation46_spill] sm:$0xff]  ;;  %vm10901_vm6 = vmmov %vm10890_vm3 }
 0x3db   : > { %4248 = vrot.lane.b32.xlu0 %v10859_v21, %s6064_s23  ;;  %v3888_v21 = vpack.c.bf16 %v10855_v50, %v3868_v28  ;;  %10865 = vst [vmem:[#allocation72_spill] sm:$0xff] %v9712_v48  ;;  %v10874_v50 = vld [vmem:[#allocation50_spill] sm:$0xff] }
 0x3dc   : > { %v9715_v2 = vpop.permute.xlu0 %4330  ;;  %v4015_v58 = vld [vmem:[#allocation2 + $0x121] sm:$0xff] }
 0x3dd   : > { %4200 = vrot.lane.b32.xlu1 %v3888_v21, %s6065_s13  ;;  %10866 = vst [vmem:[#allocation74_spill] sm:$0xff] %v9715_v2  ;;  %v4107_v7 = vpop.permute.xlu1 %4106  ;;  %v4005_v21 = vpack.c.bf16 %v10876_v44, %v3986_v10  ;;  %v3634_v2 = vld [vmem:[#allocation2 + $0x7] sm:$0xff]  ;;  %v4047_v10 = vsel %vm10786_vm0, %v4015_v58, 0.0  ;;  %vm10884_vm0 = vmmov %vm10848_vm1  ;;  %vm10894_vm1 = vcmask 785408  }
 0x3de   : > { %v3666_v48 = vsel %vm10792_vm10, %v3634_v2, 0.0  ;;  %vm10888_vm10 = vmmov %vm10884_vm0 }
 0x3df   : > { %4296 = vrot.lane.b32.xlu0 %v4004_v33, %s6066_s29  ;;  %v9724_v33 = vsel %vm10872_vm4, %v10871_v20, %v4107_v7  ;;  %v10877_v7 = vld [vmem:[#allocation68_spill] sm:$0xff]  ;;  %vm10889_vm2 = vmmov %vm10884_vm0 }
 0x3e0   : > { %10873 = vst [vmem:[#allocation34_spill] sm:$0xff] %v9724_v33  ;;  %v10879_v33 = vld [vmem:[#allocation89_spill] sm:$0xff]  ;;  %vm10895_vm8 = vmmov %vm10894_vm1 }
 0x3e1   : > { %4154 = vrot.lane.b32.xlu1 %v10874_v50, %s6066_s29  ;;  %v4109_v46 = vpop.permute.xlu1 %4108  ;;  %vm10880_vm12 = vnez %v10879_v33  ;;  %vm10899_vm5 = vmmov %vm10884_vm0 }
 0x3e2   : > { %v9738_v20 = vsel %vm10878_vm9, %v10877_v7, %v4109_v46  ;;  %v10881_v7 = vld [vmem:[#allocation75_spill] sm:$0xff]  ;;  %v3872_v5 = vsel %vm10880_vm12, %v10867_v51, 0.0  ;;  %vm10902_vm14 = vmmov %vm10894_vm1 }
 0x3e3   : > { %4250 = vrot.lane.b32.xlu0 %v10870_v63, %s6064_s23  ;;  %v9731_v28 = vpop.permute.xlu0 %4332  ;;  %v3889_v63 = vpack.c.bf16 %v9358_v13, %v3870_v54  ;;  %v4063_v13 = vpack.c.bf16 %v4047_v10, %v4014_v43  ;;  %v3635_v54 = vld [vmem:[#allocation2 + $0xf] sm:$0xff]  ;;  %v3958_v10 = vld [vmem:[#allocation2 + $0x117] sm:$0xff]  ;;  %vm10903_vm4 = vmmov %vm10894_vm1 }
 0x3e4   : > { %10875 = vst [vmem:[#allocation45_spill] sm:$0xff] %v9731_v28  ;;  %v3843_v28 = vld [vmem:[#allocation2 + $0x10f] sm:$0xff]  ;;  %v3698_v2 = vpack.c.bf16 %v3635_v54, %v3666_v48  ;;  %v3959_v48 = vld [vmem:[#allocation2 + $0x11f] sm:$0xff]  ;;  %vm10907_vm9 = vmmov %vm10884_vm0 }
 0x3e5   : > { %4202 = vrot.lane.b32.xlu1 %v3889_v63, %s6065_s13  ;;  %v4111_v46 = vpop.permute.xlu1 %4110  ;;  %5727 = vmatmul.mubr.msk.bf16.gmra.mxu0 %vm10884_vm0, %v4063_v13  ;;  %v10891_v13 = vld [vmem:[#allocation36_spill] sm:$0xff]  ;;  %vm10910_vm0 = vmmov %vm10894_vm1 }
 0x3e6   : > { %v9753_v63 = vsel %vm10882_vm15, %v10881_v7, %v4111_v46  ;;  %v10885_v46 = vld [vmem:[#allocation49_spill] sm:$0xff]  ;;  %v10886_v7 = vld [vmem:[#allocation12_spill] sm:$0xff]  ;;  %vm10892_vm7 = vnez %v10891_v13  ;;  %vm10909_vm15 = vmmov %vm10890_vm3 }
 0x3e7   : > { %4298 = vrot.lane.b32.xlu0 %v4005_v21, %s6066_s29  ;;  %v3988_v21 = vsel %vm10880_vm12, %v3842_v31, 0.0  ;;  %10883 = vst [vmem:[#allocation54_spill] sm:$0xff] %v9753_v63  ;;  %v10887_v63 = vpack.c.bf16 %v10885_v46, %v10886_v7  ;;  %v3990_v54 = vsel %vm10892_vm7, %v3958_v10, 0.0  ;;  %v10897_v7 = vld [vmem:[#allocation10_spill] sm:$0xff]  ;;  %vm10908_vm12 = vmmov %vm10890_vm3 }
 0x3e8   : > { %v4006_v41 = vpack.c.bf16 %v3843_v28, %v3988_v21 }
 0x3e9   : > { %v9741_v50 = vpop.permute.xlu0 %4334  ;;  %4156 = vrot.lane.b32.xlu1 %v9420_v36, %s6066_s29  ;;  %v4340_v36 = vsel %vm10889_vm2, %v3698_v2, %v9553_v59  ;;  %v3874_v59 = vsel %vm10892_vm7, %v3842_v31, 0.0  ;;  %v4011_v2 = vld [vmem:[#allocation2 + $0x120] sm:$0xff]  ;;  %vm10915_vm7 = vmmov %vm10890_vm3 }
 0x3eb   : > { %4252 = vrot.lane.b32.xlu0 %v9417_v34, %s6064_s23  ;;  %v4129_v58 = vpop.permute.xlu1 %4128  ;;  %v3890_v34 = vpack.c.bf16 %v10876_v44, %v3872_v5 }
 0x3ec   : > { %v4387_v44 = vsel %vm10893_vm11, %v4340_v36, %v4129_v58  ;;  %v4007_v58 = vpack.c.bf16 %v3959_v48, %v3990_v54  ;;  %vm10916_vm11 = vmmov %vm10910_vm0 }
 0x3ed   : > { %v4225_v43 = vpop.permute.xlu0 %4224  ;;  %4204 = vrot.lane.b32.xlu1 %v3890_v34, %s6065_s13 }
 0x3ee   : > { %v4468_v33 = vsel %vm10888_vm10, %v10887_v63, %v4225_v43  ;;  %vm10911_vm10 = vmmov %vm10910_vm0 }
 0x3ef   : > { %4300 = vrot.lane.b32.xlu0 %v4006_v41, %s6066_s29  ;;  %v4177_v5 = vpop.permute.xlu1 %4176  ;;  %v4010_v41 = vld [vmem:[#allocation2 + $0x118] sm:$0xff] }
 0x3f0   : > { %v4419_v43 = vsel %vm10895_vm8, %v4387_v44, %v4177_v5  ;;  %v4013_v46 = vpack.c.bf16 %v4011_v2, %v4010_v41  ;;  %v10904_v44 = vld [vmem:[#allocation14_spill] sm:$0xff]  ;;  %v10905_v5 = vld [vmem:[#allocation13_spill] sm:$0xff]  ;;  %vm10921_vm8 = vmmov %vm10889_vm2 }
 0x3f1   : > { %v4273_v51 = vpop.permute.xlu0 %4272  ;;  %4158 = vrot.lane.b32.xlu1 %v9431_v26, %s6066_s29 }
 0x3f2   : > { %v4515_v21 = vsel %vm10890_vm3, %v4468_v33, %v4273_v51 }
 0x3f3   : > { %4254 = vrot.lane.b32.xlu0 %v9425_v25, %s6064_s23  ;;  %v4547_v63 = vsel %vm10894_vm1, %v4515_v21, %v9558_v62  ;;  %v4131_v10 = vpop.permute.xlu1 %4130  ;;  %v3891_v25 = vpack.c.bf16 %v3843_v28, %v3874_v59  ;;  %v10896_v62 = vld [vmem:[#allocation11_spill] sm:$0xff]  ;;  %vm10917_vm1 = vmmov %vm10910_vm0 }
 0x3f4   : > { %4824 = vmatprep.mubr.bf16.mxu1 %v4547_v63  ;;  %v10898_v33 = vpack.c.bf16 %v10896_v62, %v10897_v7  ;;  %v4389_v26 = vsel %vm10901_vm6, %v9568_v35, %v4131_v10  ;;  %v10906_v63 = vpack.c.bf16 %v10904_v44, %v10905_v5  ;;  %vm10924_vm6 = vmmov %vm10910_vm0 }
 0x3f5   : > { %v4227_v34 = vpop.permute.xlu0 %4226  ;;  %4825 = vmatmul.mubr.bf16.vlgmr.msra.gmra.mxu1 %v4419_v43  ;;  %4206 = vrot.lane.b32.xlu1 %v3891_v25, %s6065_s13  ;;  %v10912_v25 = vld [vmem:[#allocation53_spill] sm:$0xff] }
 0x3f6   : > { %v4471_v51 = vsel %vm10899_vm5, %v10898_v33, %v4227_v34  ;;  %vm10922_vm5 = vmmov %vm10890_vm3 }
 0x3f7   : > { %4302 = vrot.lane.b32.xlu0 %v4007_v58, %s6066_s29  ;;  %v4179_v21 = vpop.permute.xlu1 %4178 }
 0x3f8   : > { %v4422_v48 = vsel %vm10903_vm4, %v4389_v26, %v4179_v21  ;;  %vm10927_vm4 = vmmov %vm10889_vm2 }
 0x3f9   : > { %v4275_v31 = vpop.permute.xlu0 %4274 }
 0x3fa   : > { %v4517_v36 = vsel %vm10900_vm13, %v4471_v51, %v4275_v31  ;;  %vm10923_vm13 = vmmov %vm10890_vm3 }
 0x3fb   : > { %4336 = vrot.lane.b32.xlu0 %v4013_v46, %s6065_s13  ;;  %v4550_v28 = vsel %vm10902_vm14, %v4517_v36, %v9575_v18  ;;  %v4133_v54 = vpop.permute.xlu1 %4132  ;;  %v10913_v46 = vld [vmem:[#allocation51_spill] sm:$0xff]  ;;  %vm10925_vm14 = vmmov %vm10910_vm0 }
 0x3fc   : > { %4832 = vmatprep.mubr.bf16.mxu1 %v4550_v28  ;;  %v4391_v41 = vsel %vm10909_vm15, %v9582_v4, %v4133_v54  ;;  %v10914_v62 = vpack.c.bf16 %v10912_v25, %v10913_v46  ;;  %v10918_v28 = vld [vmem:[#allocation16_spill] sm:$0xff]  ;;  %vm10930_vm15 = vmmov %vm10910_vm0 }
 0x3fd   : > { %v4229_v13 = vpop.permute.xlu0 %4228  ;;  %4833 = vmatmul.mubr.bf16.gmra.mxu1 %v4422_v48  ;;  %v10919_v48 = vld [vmem:[#allocation15_spill] sm:$0xff] }
 0x3fe   : > { %v4474_v43 = vsel %vm10907_vm9, %v10906_v63, %v4229_v13  ;;  %v10920_v13 = vpack.c.bf16 %v10918_v28, %v10919_v48  ;;  %vm10928_vm9 = vmmov %vm10890_vm3 }
 0x3ff   : > { %v4181_v2 = vpop.permute.xlu1 %4180 }
 0x400   : > { %v4425_v34 = vsel %vm10911_vm10, %v4391_v41, %v4181_v2  ;;  %v10926_v41 = vpack.c.bf16 %v8800_v55, %v8795_v0  ;;  %v10931_v0 = vpack.c.bf16 %v8816_v3, %v8809_v60  ;;  %vm10932_vm10 = vmmov %vm10889_vm2  ;;  %v10937_v60 = vpack.c.bf16 %v8835_v22, %v8826_v45 }
 0x401   : > { %v4277_v59 = vpop.permute.xlu0 %4276  ;;  %v10943_v45 = vpack.c.bf16 %v8852_v14, %v8843_v30  ;;  %v10949_v30 = vpack.c.bf16 %v8869_v17, %v8860_v23  ;;  %v10954_v23 = vpack.c.bf16 %v8890_v37, %v8882_v9  ;;  %v10960_v9 = vpack.c.bf16 %v8909_v40, %v8899_v24 }
 0x402   : > { %v4519_v35 = vsel %vm10908_vm12, %v4474_v43, %v4277_v59  ;;  %vm10929_vm12 = vmmov %vm10890_vm3  ;;  %v10966_v24 = vpack.c.bf16 %v8928_v15, %v8920_v39  ;;  %v10975_v15 = vld [vmem:[#allocation56_spill] sm:$0xff] }
 0x403   : > { %v4553_v18 = vsel %vm10910_vm0, %v4519_v35, %v9585_v38  ;;  %v4135_v10 = vpop.permute.xlu1 %4134 }
 0x404   : > { %4840 = vmatprep.mubr.bf16.mxu1 %v4553_v18  ;;  %v4393_v4 = vsel %vm10915_vm7, %v9594_v6, %v4135_v10  ;;  %vm10935_vm7 = vmmov %vm10910_vm0 }
 0x405   : > { %v4231_v58 = vpop.permute.xlu0 %4230  ;;  %4841 = vmatmul.mubr.bf16.gmra.mxu1 %v4425_v34 }
 0x406   : > { %v4477_v7 = vsel %vm10889_vm2, %v10914_v62, %v4231_v58  ;;  %vm10933_vm2 = vmmov %vm10890_vm3 }
 0x407   : > { %v4183_v31 = vpop.permute.xlu1 %4182 }
 0x408   : > { %v4428_v36 = vsel %vm10917_vm1, %v4393_v4, %v4183_v31  ;;  %vm10938_vm1 = vmmov %vm10927_vm4 }
 0x409   : > { %v4279_v33 = vpop.permute.xlu0 %4278 }
 0x40a   : > { %v4521_v51 = vsel %vm10890_vm3, %v4477_v7, %v4279_v33  ;;  %vm10934_vm3 = vmmov %vm10933_vm2 }
 0x40b   : > { %v4556_v38 = vsel %vm10916_vm11, %v4521_v51, %v9601_v47  ;;  %v4137_v21 = vpop.permute.xlu1 %4136  ;;  %vm10936_vm11 = vmmov %vm10910_vm0 }
 0x40c   : > { %4848 = vmatprep.mubr.bf16.mxu1 %v4556_v38  ;;  %v4395_v6 = vsel %vm10923_vm13, %v9608_v12, %v4137_v21  ;;  %vm10941_vm13 = vmmov %vm10910_vm0 }
 0x40d   : > { %v4233_v26 = vpop.permute.xlu0 %4232  ;;  %4849 = vmatmul.mubr.bf16.gmra.mxu1 %v4428_v36 }
 0x40e   : > { %v4480_v54 = vsel %vm10921_vm8, %v10920_v13, %v4233_v26  ;;  %vm10939_vm8 = vmmov %vm10933_vm2 }
 0x40f   : > { %v4185_v63 = vpop.permute.xlu1 %4184 }
 0x410   : > { %v4431_v43 = vsel %vm10925_vm14, %v4395_v6, %v4185_v63  ;;  %vm10944_vm14 = vmmov %vm10938_vm1 }
 0x411   : > { %v4281_v44 = vpop.permute.xlu0 %4280 }
 0x412   : > { %v4523_v5 = vsel %vm10922_vm5, %v4480_v54, %v4281_v44  ;;  %vm10940_vm5 = vmmov %vm10933_vm2 }
 0x413   : > { %v4559_v47 = vsel %vm10924_vm6, %v4523_v5, %v9611_v49  ;;  %v4139_v35 = vpop.permute.xlu1 %4138  ;;  %vm10942_vm6 = vmmov %vm10910_vm0 }
 0x414   : > { %4856 = vmatprep.mubr.bf16.mxu1 %v4559_v47  ;;  %v4397_v12 = vsel %vm10929_vm12, %v9620_v61, %v4139_v35  ;;  %vm10947_vm12 = vmmov %vm10910_vm0 }
 0x415   : > { %v4235_v59 = vpop.permute.xlu0 %4234  ;;  %4857 = vmatmul.mubr.bf16.gmra.mxu1 %v4431_v43 }
 0x416   : > { %v4483_v2 = vsel %vm10927_vm4, %v10926_v41, %v4235_v59  ;;  %vm10945_vm4 = vmmov %vm10933_vm2 }
 0x417   : > { %v4187_v58 = vpop.permute.xlu1 %4186 }
 0x418   : > { %v4434_v10 = vsel %vm10910_vm0, %v4397_v12, %v4187_v58 }
 0x419   : > { %v4283_v18 = vpop.permute.xlu0 %4282 }
 0x41a   : > { %v4525_v34 = vsel %vm10928_vm9, %v4483_v2, %v4283_v18  ;;  %vm10946_vm9 = vmmov %vm10933_vm2 }
 0x41b   : > { %v4562_v49 = vsel %vm10930_vm15, %v4525_v34, %v9627_v29  ;;  %v4141_v46 = vpop.permute.xlu1 %4140  ;;  %vm10948_vm15 = vmmov %vm10910_vm0 }
 0x41c   : > { %4864 = vmatprep.mubr.bf16.mxu1 %v4562_v49  ;;  %v4399_v61 = vsel %vm10934_vm3, %v9634_v56, %v4141_v46  ;;  %vm10950_vm0 = vmmov %vm10938_vm1 }
 0x41d   : > { %v4237_v25 = vpop.permute.xlu0 %4236  ;;  %4865 = vmatmul.mubr.bf16.gmra.mxu1 %v4434_v10  ;;  %vm10952_vm3 = vmmov %vm10942_vm6 }
 0x41e   : > { %v4486_v55 = vsel %vm10932_vm10, %v10931_v0, %v4237_v25  ;;  %vm10951_vm10 = vmmov %vm10933_vm2 }
 0x41f   : > { %v4189_v33 = vpop.permute.xlu1 %4188 }
 0x420   : > { %v4437_v51 = vsel %vm10936_vm11, %v4399_v61, %v4189_v33  ;;  %vm10955_vm11 = vmmov %vm10950_vm0 }
 0x421   : > { %v4285_v62 = vpop.permute.xlu0 %4284 }
 0x422   : > { %v4527_v7 = vsel %vm10933_vm2, %v4486_v55, %v4285_v62 }
 0x423   : > { %v4565_v29 = vsel %vm10935_vm7, %v4527_v7, %v9637_v16  ;;  %v4143_v31 = vpop.permute.xlu1 %4142  ;;  %vm10953_vm7 = vmmov %vm10952_vm3 }
 0x424   : > { %4872 = vmatprep.mubr.bf16.mxu1 %v4565_v29  ;;  %v4401_v56 = vsel %vm10940_vm5, %v9646_v8, %v4143_v31  ;;  %vm10958_vm5 = vmmov %vm10952_vm3  ;;  %v10969_v29 = vld [vmem:[#allocation72_spill] sm:$0xff] }
 0x425   : > { %v4239_v4 = vpop.permute.xlu0 %4238  ;;  %4873 = vmatmul.mubr.bf16.gmra.mxu1 %v4437_v51 }
 0x426   : > { %v4489_v3 = vsel %vm10938_vm1, %v10937_v60, %v4239_v4  ;;  %vm10956_vm1 = vmmov %vm10933_vm2  ;;  %v10971_v4 = vld [vmem:[#allocation74_spill] sm:$0xff] }
 0x427   : > { %v4191_v26 = vpop.permute.xlu1 %4190 }
 0x428   : > { %v4440_v21 = vsel %vm10942_vm6, %v4401_v56, %v4191_v26  ;;  %vm10961_vm6 = vmmov %vm10950_vm0 }
 0x429   : > { %v4287_v38 = vpop.permute.xlu0 %4286 }
 0x42a   : > { %v4529_v36 = vsel %vm10939_vm8, %v4489_v3, %v4287_v38  ;;  %vm10957_vm8 = vmmov %vm10956_vm1  ;;  %v10974_v38 = vld [vmem:[#allocation17_spill] sm:$0xff] }
 0x42b   : > { %v4568_v16 = vsel %vm10941_vm13, %v4529_v36, %v9653_v27  ;;  %v4145_v48 = vpop.permute.xlu1 %4144  ;;  %vm10959_vm13 = vmmov %vm10952_vm3  ;;  %v10976_v39 = vpack.c.bf16 %v10974_v38, %v10975_v15 }
 0x42c   : > { %4880 = vmatprep.mubr.bf16.mxu1 %v4568_v16  ;;  %v4403_v8 = vsel %vm10946_vm9, %v9660_v11, %v4145_v48  ;;  %vm10964_vm9 = vmmov %vm10952_vm3  ;;  %v10979_v16 = vld [vmem:[#allocation34_spill] sm:$0xff]  ;;  %v10981_v48 = vld [vmem:[#allocation45_spill] sm:$0xff] }
 0x42d   : > { %v4241_v28 = vpop.permute.xlu0 %4240  ;;  %4881 = vmatmul.mubr.bf16.gmra.mxu1 %v4440_v21 }
 0x42e   : > { %v4492_v22 = vsel %vm10944_vm14, %v10943_v45, %v4241_v28  ;;  %vm10962_vm14 = vmmov %vm10956_vm1 }
 0x42f   : > { %v4193_v44 = vpop.permute.xlu1 %4192 }
 0x430   : > { %v4443_v5 = vsel %vm10948_vm15, %v4403_v8, %v4193_v44  ;;  %vm10967_vm15 = vmmov %vm10950_vm0  ;;  %v10984_v8 = vld [vmem:[#allocation59_spill] sm:$0xff]  ;;  %v10985_v44 = vld [vmem:[#allocation18_spill] sm:$0xff] }
 0x431   : > { %v4289_v13 = vpop.permute.xlu0 %4288 }
 0x432   : > { %v4531_v54 = vsel %vm10945_vm4, %v4492_v22, %v4289_v13  ;;  %vm10963_vm4 = vmmov %vm10956_vm1 }
 0x433   : > { %v4571_v27 = vsel %vm10947_vm12, %v4531_v54, %v9663_v1  ;;  %v4147_v63 = vpop.permute.xlu1 %4146  ;;  %vm10965_vm12 = vmmov %vm10952_vm3 }
 0x434   : > { %4888 = vmatprep.mubr.bf16.mxu1 %v4571_v27  ;;  %v4405_v11 = vsel %vm10933_vm2, %v9672_v53, %v4147_v63  ;;  %vm10972_vm2 = vmmov %vm10952_vm3  ;;  %v10986_v27 = vpack.c.bf16 %v10984_v8, %v10985_v44  ;;  %v5118_v44 = vld [vmem:[%s6156_s22 + $0x20] sm:$0xff] }
 0x435   : > { %v4243_v6 = vpop.permute.xlu0 %4242  ;;  %4889 = vmatmul.mubr.bf16.gmra.mxu1 %v4443_v5 }
 0x436   : > { %v4495_v14 = vsel %vm10950_vm0, %v10949_v30, %v4243_v6  ;;  %vm10968_vm0 = vmmov %vm10956_vm1 }
 0x437   : > { %v4195_v59 = vpop.permute.xlu1 %4194 }
 0x438   : > { %v4446_v35 = vsel %vm10953_vm7, %v4405_v11, %v4195_v59  ;;  %vm10977_vm7 = vmmov %vm10961_vm6 }
 0x439   : > { %v4291_v47 = vpop.permute.xlu0 %4290 }
 0x43a   : > { %v4533_v43 = vsel %vm10951_vm10, %v4495_v14, %v4291_v47  ;;  %vm10970_vm10 = vmmov %vm10968_vm0 }
 0x43b   : > { %v4574_v1 = vsel %vm10952_vm3, %v4533_v43, %v9679_v42  ;;  %v4149_v2 = vpop.permute.xlu1 %4148  ;;  %vm10973_vm3 = vmmov %vm10972_vm2 }
 0x43c   : > { %4896 = vmatprep.mubr.bf16.mxu1 %v4574_v1  ;;  %v4407_v53 = vsel %vm10957_vm8, %v9686_v32, %v4149_v2  ;;  %vm10982_vm8 = vmmov %vm10972_vm2 }
 0x43d   : > { %v4245_v41 = vpop.permute.xlu0 %4244  ;;  %4897 = vmatmul.mubr.bf16.gmra.mxu1 %v4446_v35  ;;  %v10992_v35 = vld [vmem:[#allocation19_spill] sm:$0xff] }
 0x43e   : > { %v4498_v17 = vsel %vm10955_vm11, %v10954_v23, %v4245_v41  ;;  %vm10978_vm11 = vmmov %vm10968_vm0  ;;  %v10993_v41 = vld [vmem:[#allocation9_spill] sm:$0xff] }
 0x43f   : > { %v4197_v12 = vpop.permute.xlu1 %4196  ;;  %v3907_v2 = vpack.c.bf16 %v10993_v41, %v10992_v35 }
 0x440   : > { %v4449_v58 = vsel %vm10959_vm13, %v4407_v53, %v4197_v12  ;;  %vm10987_vm13 = vmmov %vm10961_vm6 }
 0x441   : > { %v4293_v18 = vpop.permute.xlu0 %4292 }
 0x442   : > { %v4535_v34 = vsel %vm10956_vm1, %v4498_v17, %v4293_v18  ;;  %vm10980_vm1 = vmmov %vm10968_vm0 }
 0x443   : > { %v4577_v42 = vsel %vm10958_vm5, %v4535_v34, %v9689_v19  ;;  %v4151_v10 = vpop.permute.xlu1 %4150  ;;  %vm10983_vm5 = vmmov %vm10972_vm2  ;;  %v10996_v34 = vld [vmem:[#allocation54_spill] sm:$0xff] }
 0x444   : > { %4904 = vmatprep.mubr.bf16.mxu1 %v4577_v42  ;;  %v4409_v32 = vsel %vm10963_vm4, %v9698_v57, %v4151_v10  ;;  %vm10990_vm4 = vmmov %vm10972_vm2  ;;  %v5700_v42 = vpop.f32.mrf.mxu0  ;;  %v9937_v10 = vld [vmem:[%s10087_s10] ss:$0 sm:$0xff] }
 0x445   : > { %v4247_v49 = vpop.permute.xlu0 %4246  ;;  %4905 = vmatmul.mubr.bf16.gmra.mxu1 %v4449_v58 }
 0x446   : > { %v4501_v37 = vsel %vm10961_vm6, %v10960_v9, %v4247_v49  ;;  %vm10988_vm6 = vmmov %vm10968_vm0  ;;  %v4987_v49 = vpop.f32.mrf.mxu0 }
 0x447   : > { %v4199_v0 = vpop.permute.xlu1 %4198 }
 0x448   : > { %v4452_v55 = vsel %vm10965_vm12, %v4409_v32, %v4199_v0  ;;  %vm10994_vm12 = vmmov %vm10977_vm7  ;;  %v5701_v32 = vpop.f32.mrf.mxu0  ;;  %v5114_v0 = vld [vmem:[%s6156_s22] sm:$0xff] }
 0x449   : > { %v4295_v25 = vpop.permute.xlu0 %4294 }
 0x44a   : > { %v4537_v46 = vsel %vm10962_vm14, %v4501_v37, %v4295_v25  ;;  %vm10989_vm14 = vmmov %vm10968_vm0 }
 0x44b   : > { %v4580_v19 = vsel %vm10964_vm9, %v4537_v46, %v9705_v52  ;;  %v4153_v7 = vpop.permute.xlu1 %4152  ;;  %vm10991_vm9 = vmmov %vm10972_vm2 }
 0x44c   : > { %4912 = vmatprep.mubr.bf16.mxu1 %v4580_v19  ;;  %v4411_v57 = vsel %vm10970_vm10, %v10969_v29, %v4153_v7  ;;  %vm10997_vm10 = vmmov %vm10972_vm2 }
 0x44d   : > { %v4249_v62 = vpop.permute.xlu0 %4248  ;;  %4913 = vmatmul.mubr.bf16.gmra.mxu1 %v4452_v55 }
 0x44e   : > { %v4504_v40 = vsel %vm10967_vm15, %v10966_v24, %v4249_v62  ;;  %vm10995_vm15 = vmmov %vm10968_vm0 }
 0x44f   : > { %v4201_v51 = vpop.permute.xlu1 %4200 }
 0x450   : > { %v4455_v31 = vsel %vm10973_vm3, %v4411_v57, %v4201_v51  ;;  %vm10998_vm3 = vmmov %vm10977_vm7 }
 0x451   : > { %v4297_v61 = vpop.permute.xlu0 %4296 }
 0x452   : > { %v4539_v33 = vsel %vm10968_vm0, %v4504_v40, %v4297_v61  ;;  %v4990_v61 = vpop.f32.mrf.mxu0 }
 0x453   : > { %v4583_v52 = vsel %vm10972_vm2, %v4539_v33, %v10971_v4  ;;  %v4155_v3 = vpop.permute.xlu1 %4154  ;;  %v5115_v33 = vld [vmem:[%s6156_s22 + $0x8] sm:$0xff] }
 0x454   : > { %4920 = vmatprep.mubr.bf16.mxu1 %v4583_v52  ;;  %v4413_v21 = vsel %vm10980_vm1, %v10979_v16, %v4155_v3  ;;  %v5116_v3 = vld [vmem:[%s6156_s22 + $0x10] sm:$0xff]  ;;  %vm11001_vm1 = vmmov %vm10998_vm3 }
 0x455   : > { %v4251_v60 = vpop.permute.xlu0 %4250  ;;  %4921 = vmatmul.mubr.bf16.gmra.mxu1 %v4455_v31 }
 0x456   : > { %v4507_v36 = vsel %vm10977_vm7, %v10976_v39, %v4251_v60  ;;  %v5704_v60 = vpop.f32.mrf.mxu0  ;;  %vm10999_vm7 = vmmov %vm10998_vm3 }
 0x457   : > { %v4203_v28 = vpop.permute.xlu1 %4202 }
 0x458   : > { %v4458_v22 = vsel %vm10983_vm5, %v4413_v21, %v4203_v28  ;;  %v5003_v16 = vpop.f32.mrf.mxu0  ;;  %v5117_v21 = vld [vmem:[%s6156_s22 + $0x18] sm:$0xff]  ;;  %vm11003_vm5 = vmmov %vm11001_vm1 }
 0x459   : > { %v4299_v56 = vpop.permute.xlu0 %4298 }
 0x45a   : > { %v4541_v26 = vsel %vm10978_vm11, %v4507_v36, %v4299_v56  ;;  %vm11000_vm11 = vmmov %vm10998_vm3  ;;  %v5705_v8 = vpop.f32.mrf.mxu0 }
 0x45b   : > { %v4586_v45 = vsel %vm10982_vm8, %v4541_v26, %v10981_v48  ;;  %v4157_v54 = vpop.permute.xlu1 %4156  ;;  %vm11002_vm8 = vmmov %vm11001_vm1 }
 0x45c   : > { %4928 = vmatprep.mubr.bf16.mxu1 %v4586_v45  ;;  %v4415_v30 = vsel %vm10989_vm14, %v9738_v20, %v4157_v54  ;;  %vm11006_vm14 = vmmov %vm11001_vm1 }
 0x45d   : > { %v4253_v13 = vpop.permute.xlu0 %4252  ;;  %4929 = vmatmul.mubr.bf16.gmra.mxu1 %v4458_v22 }
 0x45e   : > { %v4510_v5 = vsel %vm10987_vm13, %v10986_v27, %v4253_v13  ;;  %vm11004_vm13 = vmmov %vm11001_vm1 }
 0x45f   : > { %v4205_v14 = vpop.permute.xlu1 %4204 }
 0x460   : > { %v4461_v43 = vsel %vm10991_vm9, %v4415_v30, %v4205_v14  ;;  %vm11008_vm9 = vmmov %vm11001_vm1 }
 0x461   : > { %v4301_v6 = vpop.permute.xlu0 %4300 }
 0x462   : > { %v4543_v63 = vsel %vm10988_vm6, %v4510_v5, %v4301_v6  ;;  %vm11005_vm6 = vmmov %vm11001_vm1 }
 0x463   : > { %v4589_v47 = vsel %vm10990_vm4, %v4543_v63, %v9741_v50  ;;  %v4159_v59 = vpop.permute.xlu1 %4158  ;;  %vm11007_vm4 = vmmov %vm11001_vm1 }
 0x464   : > { %4936 = vmatprep.mubr.bf16.mxu1 %v4589_v47  ;;  %v4417_v50 = vsel %vm10968_vm0, %v10996_v34, %v4159_v59  ;;  %v5006_v47 = vpop.f32.mrf.mxu0  ;;  %vm11011_vm0 = vmmov %vm11001_vm1 }
 0x465   : > { %v4255_v11 = vpop.permute.xlu0 %4254  ;;  %4937 = vmatmul.mubr.bf16.gmra.mxu1 %v4461_v43  ;;  %v5119_v43 = vld [vmem:[%s6156_s22 + $0x28] sm:$0xff] }
 0x466   : > { %v4513_v23 = vsel %vm10994_vm12, %v3907_v2, %v4255_v11  ;;  %vm11009_vm12 = vmmov %vm11001_vm1 }
 0x467   : > { %v4207_v17 = vpop.permute.xlu1 %4206 }
 0x468   : > { %v4464_v12 = vsel %vm10972_vm2, %v4417_v50, %v4207_v17  ;;  %v5120_v17 = vld [vmem:[%s6156_s22 + $0x30] sm:$0xff]  ;;  %vm11013_vm2 = vmmov %vm11011_vm0 }
 0x469   : > { %v4303_v1 = vpop.permute.xlu0 %4302 }
 0x46a   : > { %v4545_v18 = vsel %vm10995_vm15, %v4513_v23, %v4303_v1  ;;  %v5708_v23 = vpop.f32.mrf.mxu0  ;;  %vm11010_vm15 = vmmov %vm11001_vm1 }
 0x46d   : > { %v4337_v20 = vpop.permute.xlu0 %4336 }
 0x46e   : > { %v4592_v53 = vsel %vm10997_vm10, %v4545_v18, %v4337_v20  ;;  %vm11012_vm10 = vmmov %vm11011_vm0 }
 0x46f   : > { %4944 = vmatprep.mubr.bf16.mxu1 %v4592_v53 }
 0x470   : > { %4945 = vmatmul.mubr.bf16.gmra.mxu1 %v4464_v12 }
 0x4b5   : > { %v5524_v58 = vpop.f32.mrf.mxu1 }
 0x4b7   : > { %v5525_v9 = vpop.f32.mrf.mxu1 }
 0x4b8   : > { %v5526_v37 = vadd.f32 %v5525_v9, %v5524_v58  ;;  %v5121_v58 = vld [vmem:[%s6156_s22 + $0x38] sm:$0xff] }
 0x4b9   : > { %v5527_v25 = vpop.f32.mrf.mxu1 }
 0x4ba   : > { %v4827_v46 = vadd.f32 %v5526_v37, %v9937_v10 }
 0x4bb   : > { %v5528_v19 = vpop.f32.mrf.mxu1 }
 0x4bc   : > { %v4988_v55 = vadd.f32 %v4987_v49, %v4827_v46  ;;  %v5529_v62 = vadd.f32 %v5528_v19, %v5527_v25  ;;  %v5122_v19 = vld [vmem:[%s6156_s22 + $0x40] sm:$0xff] }
 0x4bd   : > { %v5530_v7 = vpop.f32.mrf.mxu1 }
 0x4be   : > { %v5146_v24 = vadd.f32 %v5114_v0, %v4988_v55  ;;  %v4830_v40 = vadd.f32 %v5529_v62, %v9937_v10 }
 0x4bf   : > { %v5531_v29 = vpop.f32.mrf.mxu1 }
 0x4c0   : > { %5178 = vst.msk [vmem:[%s9946_s14] sm:$0xff] %vm10998_vm3, %v5146_v24  ;;  %v4991_v57 = vadd.f32 %v4990_v61, %v4830_v40  ;;  %v5532_v51 = vadd.f32 %v5531_v29, %v5530_v7  ;;  %v5123_v29 = vld [vmem:[%s6156_s22 + $0x48] sm:$0xff]  ;;  %vm11014_vm3 = vmmov %vm11011_vm0 }
 0x4c1   : > { %v5533_v4 = vpop.f32.mrf.mxu1 }
 0x4c2   : > { %v5147_v52 = vadd.f32 %v5115_v33, %v4991_v57  ;;  %v4835_v31 = vadd.f32 %v5532_v51, %v9937_v10 }
 0x4c3   : > { %v5534_v38 = vpop.f32.mrf.mxu1 }
 0x4c4   : > { %5179 = vst.msk [vmem:[%s9946_s14 + $0x8] sm:$0xff] %vm10999_vm7, %v5147_v52  ;;  %v4996_v15 = vadd.f32 %v5700_v42, %v4835_v31  ;;  %v5535_v39 = vadd.f32 %v5534_v38, %v5533_v4  ;;  %v5019_v42 = vpop.f32.mrf.mxu0  ;;  %v5124_v38 = vld [vmem:[%s6156_s22 + $0x50] sm:$0xff]  ;;  %vm11015_vm7 = vmmov %vm11011_vm0 }
 0x4c5   : > { %v5536_v36 = vpop.f32.mrf.mxu1 }
 0x4c6   : > { %v5148_v56 = vadd.f32 %v5116_v3, %v4996_v15  ;;  %v4838_v26 = vadd.f32 %v5535_v39, %v9937_v10  ;;  %v5709_v0 = vpop.f32.mrf.mxu0 }
 0x4c7   : > { %v5537_v28 = vpop.f32.mrf.mxu1 }
 0x4c8   : > { %5180 = vst.msk [vmem:[%s9946_s14 + $0x10] sm:$0xff] %vm11000_vm11, %v5148_v56  ;;  %v4999_v48 = vadd.f32 %v5701_v32, %v4838_v26  ;;  %v5538_v45 = vadd.f32 %v5537_v28, %v5536_v36  ;;  %v5022_v33 = vpop.f32.mrf.mxu0  ;;  %v5125_v28 = vld [vmem:[%s6156_s22 + $0x58] sm:$0xff]  ;;  %vm11016_vm11 = vmmov %vm11011_vm0 }
 0x4c9   : > { %v5539_v22 = vpop.f32.mrf.mxu1 }
 0x4ca   : > { %v5149_v13 = vadd.f32 %v5117_v21, %v4999_v48  ;;  %v4843_v54 = vadd.f32 %v5538_v45, %v9937_v10  ;;  %v5712_v3 = vpop.f32.mrf.mxu0 }
 0x4cb   : > { %v5540_v27 = vpop.f32.mrf.mxu1 }
 0x4cc   : > { %5181 = vst.msk [vmem:[%s9946_s14 + $0x18] sm:$0xff] %vm11001_vm1, %v5149_v13  ;;  %v5004_v5 = vadd.f32 %v5003_v16, %v4843_v54  ;;  %v5541_v6 = vadd.f32 %v5540_v27, %v5539_v22  ;;  %v5035_v21 = vpop.f32.mrf.mxu0  ;;  %v5126_v27 = vld [vmem:[%s6156_s22 + $0x60] sm:$0xff]  ;;  %vm11017_vm1 = vmmov %vm11011_vm0 }
 0x4cd   : > { %v5542_v63 = vpop.f32.mrf.mxu1 }
 0x4ce   : > { %v5150_v30 = vadd.f32 %v5118_v44, %v5004_v5  ;;  %v4846_v14 = vadd.f32 %v5541_v6, %v9937_v10  ;;  %v5713_v44 = vpop.f32.mrf.mxu0 }
 0x4cf   : > { %v5543_v11 = vpop.f32.mrf.mxu1 }
 0x4d0   : > { %5182 = vst.msk [vmem:[%s9946_s14 + $0x20] sm:$0xff] %vm11002_vm8, %v5150_v30  ;;  %v5007_v59 = vadd.f32 %v5006_v47, %v4846_v14  ;;  %v5544_v1 = vadd.f32 %v5543_v11, %v5542_v63  ;;  %v5127_v11 = vld [vmem:[%s6156_s22 + $0x68] sm:$0xff]  ;;  %vm11018_vm8 = vmmov %vm11011_vm0 }
 0x4d1   : > { %v5545_v35 = vpop.f32.mrf.mxu1 }
 0x4d2   : > { %v5151_v41 = vadd.f32 %v5119_v43, %v5007_v59  ;;  %v4851_v2 = vadd.f32 %v5544_v1, %v9937_v10  ;;  %v5038_v43 = vpop.f32.mrf.mxu0 }
 0x4d3   : > { %v5546_v18 = vpop.f32.mrf.mxu1 }
 0x4d4   : > { %5183 = vst.msk [vmem:[%s9946_s14 + $0x28] sm:$0xff] %vm11003_vm5, %v5151_v41  ;;  %v5012_v20 = vadd.f32 %v5704_v60, %v4851_v2  ;;  %v5547_v34 = vadd.f32 %v5546_v18, %v5545_v35  ;;  %v5128_v18 = vld [vmem:[%s6156_s22 + $0x70] sm:$0xff]  ;;  %vm11019_vm5 = vmmov %vm11011_vm0 }
 0x4d5   : > { %v5548_v50 = vpop.f32.mrf.mxu1 }
 0x4d6   : > { %v5152_v53 = vadd.f32 %v5120_v17, %v5012_v20  ;;  %v4854_v12 = vadd.f32 %v5547_v34, %v9937_v10  ;;  %v5716_v17 = vpop.f32.mrf.mxu0 }
 0x4d7   : > { %v5549_v49 = vpop.f32.mrf.mxu1 }
 0x4d8   : > { %5184 = vst.msk [vmem:[%s9946_s14 + $0x30] sm:$0xff] %vm11004_vm13, %v5152_v53  ;;  %v5015_v9 = vadd.f32 %v5705_v8, %v4854_v12  ;;  %v5550_v37 = vadd.f32 %v5549_v49, %v5548_v50  ;;  %v5129_v49 = vld [vmem:[%s6156_s22 + $0x78] sm:$0xff]  ;;  %vm11020_vm13 = vmmov %vm11011_vm0 }
 0x4d9   : > { %v5551_v25 = vpop.f32.mrf.mxu1 }
 0x4da   : > { %v5153_v46 = vadd.f32 %v5121_v58, %v5015_v9  ;;  %v4859_v32 = vadd.f32 %v5550_v37, %v9937_v10  ;;  %v5051_v58 = vpop.f32.mrf.mxu0 }
 0x4db   : > { %v5552_v55 = vpop.f32.mrf.mxu1 }
 0x4dc   : > { %5185 = vst.msk [vmem:[%s9946_s14 + $0x38] sm:$0xff] %vm11005_vm6, %v5153_v46  ;;  %v5020_v62 = vadd.f32 %v5019_v42, %v4859_v32  ;;  %v5553_v7 = vadd.f32 %v5552_v55, %v5551_v25  ;;  %v5130_v55 = vld [vmem:[%s6156_s22 + $0x80] sm:$0xff]  ;;  %vm11021_vm6 = vmmov %vm11011_vm0 }
 0x4dd   : > { %v5554_v24 = vpop.f32.mrf.mxu1 }
 0x4de   : > { %v5154_v40 = vadd.f32 %v5122_v19, %v5020_v62  ;;  %v4862_v61 = vadd.f32 %v5553_v7, %v9937_v10  ;;  %v5717_v19 = vpop.f32.mrf.mxu0 }
 0x4df   : > { %v5555_v57 = vpop.f32.mrf.mxu1 }
 0x4e0   : > { %5186 = vst.msk [vmem:[%s9946_s14 + $0x40] sm:$0xff] %vm11006_vm14, %v5154_v40  ;;  %v5023_v51 = vadd.f32 %v5022_v33, %v4862_v61  ;;  %v5556_v4 = vadd.f32 %v5555_v57, %v5554_v24  ;;  %v5131_v57 = vld [vmem:[%s6156_s22 + $0x88] sm:$0xff]  ;;  %vm11022_vm14 = vmmov %vm11011_vm0 }
 0x4e1   : > { %v5557_v52 = vpop.f32.mrf.mxu1 }
 0x4e2   : > { %v5155_v31 = vadd.f32 %v5123_v29, %v5023_v51  ;;  %v4867_v60 = vadd.f32 %v5556_v4, %v9937_v10  ;;  %v5054_v29 = vpop.f32.mrf.mxu0 }
 0x4e3   : > { %v5558_v15 = vpop.f32.mrf.mxu1 }
 0x4e4   : > { %5187 = vst.msk [vmem:[%s9946_s14 + $0x48] sm:$0xff] %vm11007_vm4, %v5155_v31  ;;  %v5028_v39 = vadd.f32 %v5708_v23, %v4867_v60  ;;  %v5559_v36 = vadd.f32 %v5558_v15, %v5557_v52  ;;  %v5132_v15 = vld [vmem:[%s6156_s22 + $0x90] sm:$0xff]  ;;  %vm11023_vm4 = vmmov %vm11011_vm0 }
 0x4e5   : > { %v5560_v56 = vpop.f32.mrf.mxu1 }
 0x4e6   : > { %v5156_v26 = vadd.f32 %v5124_v38, %v5028_v39  ;;  %v4870_v16 = vadd.f32 %v5559_v36, %v9937_v10  ;;  %v5720_v38 = vpop.f32.mrf.mxu0 }
 0x4e7   : > { %v5561_v48 = vpop.f32.mrf.mxu1 }
 0x4e8   : > { %5188 = vst.msk [vmem:[%s9946_s14 + $0x50] sm:$0xff] %vm11008_vm9, %v5156_v26  ;;  %v5031_v45 = vadd.f32 %v5709_v0, %v4870_v16  ;;  %v5562_v22 = vadd.f32 %v5561_v48, %v5560_v56  ;;  %v5133_v48 = vld [vmem:[%s6156_s22 + $0x98] sm:$0xff]  ;;  %vm11024_vm9 = vmmov %vm11011_vm0 }
 0x4e9   : > { %v5563_v13 = vpop.f32.mrf.mxu1 }
 0x4ea   : > { %v5157_v54 = vadd.f32 %v5125_v28, %v5031_v45  ;;  %v4875_v8 = vadd.f32 %v5562_v22, %v9937_v10  ;;  %v5067_v28 = vpop.f32.mrf.mxu0 }
 0x4eb   : > { %v5564_v5 = vpop.f32.mrf.mxu1 }
 0x4ec   : > { %5189 = vst.msk [vmem:[%s9946_s14 + $0x58] sm:$0xff] %vm11009_vm12, %v5157_v54  ;;  %v5036_v6 = vadd.f32 %v5035_v21, %v4875_v8  ;;  %v5565_v63 = vadd.f32 %v5564_v5, %v5563_v13  ;;  %v5134_v5 = vld [vmem:[%s6156_s22 + $0xa0] sm:$0xff]  ;;  %vm11025_vm12 = vmmov %vm11011_vm0 }
 0x4ed   : > { %v5566_v30 = vpop.f32.mrf.mxu1 }
 0x4ee   : > { %v5158_v14 = vadd.f32 %v5126_v27, %v5036_v6  ;;  %v4878_v47 = vadd.f32 %v5565_v63, %v9937_v10  ;;  %v5721_v27 = vpop.f32.mrf.mxu0 }
 0x4ef   : > { %v5567_v59 = vpop.f32.mrf.mxu1 }
 0x4f0   : > { %5190 = vst.msk [vmem:[%s9946_s14 + $0x60] sm:$0xff] %vm11010_vm15, %v5158_v14  ;;  %v5039_v1 = vadd.f32 %v5038_v43, %v4878_v47  ;;  %v5568_v35 = vadd.f32 %v5567_v59, %v5566_v30  ;;  %v5135_v59 = vld [vmem:[%s6156_s22 + $0xa8] sm:$0xff]  ;;  %vm11026_vm15 = vmmov %vm11011_vm0 }
 0x4f1   : > { %v5569_v41 = vpop.f32.mrf.mxu1 }
 0x4f2   : > { %v5159_v2 = vadd.f32 %v5127_v11, %v5039_v1  ;;  %v4883_v23 = vadd.f32 %v5568_v35, %v9937_v10  ;;  %v5070_v11 = vpop.f32.mrf.mxu0 }
 0x4f3   : > { %v5570_v20 = vpop.f32.mrf.mxu1 }
 0x4f4   : > { %5191 = vst.msk [vmem:[%s9946_s14 + $0x68] sm:$0xff] %vm11011_vm0, %v5159_v2  ;;  %v5044_v34 = vadd.f32 %v5712_v3, %v4883_v23  ;;  %v5571_v50 = vadd.f32 %v5570_v20, %v5569_v41  ;;  %v5136_v20 = vld [vmem:[%s6156_s22 + $0xb0] sm:$0xff] }
 0x4f5   : > { %v5572_v53 = vpop.f32.mrf.mxu1 }
 0x4f6   : > { %v5160_v12 = vadd.f32 %v5128_v18, %v5044_v34  ;;  %v4886_v42 = vadd.f32 %v5571_v50, %v9937_v10  ;;  %v5724_v18 = vpop.f32.mrf.mxu0 }
 0x4f7   : > { %v5573_v9 = vpop.f32.mrf.mxu1 }
 0x4f8   : > { %5192 = vst.msk [vmem:[%s9946_s14 + $0x70] sm:$0xff] %vm11012_vm10, %v5160_v12  ;;  %v5047_v37 = vadd.f32 %v5713_v44, %v4886_v42  ;;  %v5574_v25 = vadd.f32 %v5573_v9, %v5572_v53  ;;  %v5137_v9 = vld [vmem:[%s6156_s22 + $0xb8] sm:$0xff]  ;;  %vm11027_vm10 = vmmov %vm11011_vm0 }
 0x4f9   : > { %v5575_v46 = vpop.f32.mrf.mxu1 }
 0x4fa   : > { %v5161_v32 = vadd.f32 %v5129_v49, %v5047_v37  ;;  %v4891_v0 = vadd.f32 %v5574_v25, %v9937_v10  ;;  %v5083_v49 = vpop.f32.mrf.mxu0 }
 0x4fb   : > { %v5576_v62 = vpop.f32.mrf.mxu1 }
 0x4fc   : > { %5193 = vst.msk [vmem:[%s9946_s14 + $0x78] sm:$0xff] %vm11013_vm2, %v5161_v32  ;;  %v5052_v7 = vadd.f32 %v5051_v58, %v4891_v0  ;;  %v5577_v24 = vadd.f32 %v5576_v62, %v5575_v46  ;;  %v5138_v62 = vld [vmem:[%s6156_s22 + $0xc0] sm:$0xff]  ;;  %vm11028_vm2 = vmmov %vm11011_vm0 }
 0x4fd   : > { %v5578_v40 = vpop.f32.mrf.mxu1 }
 0x4fe   : > { %v5162_v61 = vadd.f32 %v5130_v55, %v5052_v7  ;;  %v4894_v33 = vadd.f32 %v5577_v24, %v9937_v10  ;;  %v5725_v55 = vpop.f32.mrf.mxu0 }
 0x4ff   : > { %v5579_v51 = vpop.f32.mrf.mxu1 }
 0x500   : > { %5194 = vst.msk [vmem:[%s9946_s14 + $0x80] sm:$0xff] %vm11014_vm3, %v5162_v61  ;;  %v5055_v4 = vadd.f32 %v5054_v29, %v4894_v33  ;;  %v5580_v52 = vadd.f32 %v5579_v51, %v5578_v40  ;;  %v5139_v51 = vld [vmem:[%s6156_s22 + $0xc8] sm:$0xff] }
 0x501   : > { %v5581_v31 = vpop.f32.mrf.mxu1 }
 0x502   : > { %v5163_v60 = vadd.f32 %v5131_v57, %v5055_v4  ;;  %v4899_v3 = vadd.f32 %v5580_v52, %v9937_v10  ;;  %v5086_v57 = vpop.f32.mrf.mxu0 }
 0x503   : > { %v5582_v39 = vpop.f32.mrf.mxu1 }
 0x504   : > { %5195 = vst.msk [vmem:[%s9946_s14 + $0x88] sm:$0xff] %vm11015_vm7, %v5163_v60  ;;  %v5060_v36 = vadd.f32 %v5716_v17, %v4899_v3  ;;  %v5583_v56 = vadd.f32 %v5582_v39, %v5581_v31  ;;  %v5728_v3 = vpop.f32.mrf.mxu0  ;;  %v5140_v39 = vld [vmem:[%s6156_s22 + $0xd0] sm:$0xff] }
 0x505   : > { %v5584_v26 = vpop.f32.mrf.mxu1 }
 0x506   : > { %v5164_v16 = vadd.f32 %v5132_v15, %v5060_v36  ;;  %v4902_v21 = vadd.f32 %v5583_v56, %v9937_v10 }
 0x507   : > { %v5585_v45 = vpop.f32.mrf.mxu1 }
 0x508   : > { %5196 = vst.msk [vmem:[%s9946_s14 + $0x90] sm:$0xff] %vm11016_vm11, %v5164_v16  ;;  %v5063_v22 = vadd.f32 %v5717_v19, %v4902_v21  ;;  %v5586_v13 = vadd.f32 %v5585_v45, %v5584_v26  ;;  %v5099_v21 = vpop.f32.mrf.mxu0  ;;  %v5141_v45 = vld [vmem:[%s6156_s22 + $0xd8] sm:$0xff] }
 0x509   : > { %v5587_v54 = vpop.f32.mrf.mxu1 }
 0x50a   : > { %v5165_v8 = vadd.f32 %v5133_v48, %v5063_v22  ;;  %v4907_v44 = vadd.f32 %v5586_v13, %v9937_v10 }
 0x50b   : > { %v5588_v6 = vpop.f32.mrf.mxu1 }
 0x50c   : > { %5197 = vst.msk [vmem:[%s9946_s14 + $0x98] sm:$0xff] %vm11017_vm1, %v5165_v8  ;;  %v5068_v63 = vadd.f32 %v5067_v28, %v4907_v44  ;;  %v5589_v30 = vadd.f32 %v5588_v6, %v5587_v54  ;;  %v5729_v44 = vpop.f32.mrf.mxu0 }
 0x50d   : > { %v5590_v14 = vpop.f32.mrf.mxu1 }
 0x50e   : > { %v5166_v47 = vadd.f32 %v5134_v5, %v5068_v63  ;;  %v4910_v43 = vadd.f32 %v5589_v30, %v9937_v10  ;;  %v5142_v63 = vld [vmem:[%s6156_s22 + $0xe0] sm:$0xff] }
 0x50f   : > { %v5591_v1 = vpop.f32.mrf.mxu1 }
 0x510   : > { %5198 = vst.msk [vmem:[%s9946_s14 + $0xa0] sm:$0xff] %vm11018_vm8, %v5166_v47  ;;  %v5071_v35 = vadd.f32 %v5070_v11, %v4910_v43  ;;  %v5592_v41 = vadd.f32 %v5591_v1, %v5590_v14  ;;  %v5102_v47 = vpop.f32.mrf.mxu0 }
 0x511   : > { %v5593_v2 = vpop.f32.mrf.mxu1 }
 0x512   : > { %v5167_v23 = vadd.f32 %v5135_v59, %v5071_v35  ;;  %v4915_v17 = vadd.f32 %v5592_v41, %v9937_v10  ;;  %v5143_v59 = vld [vmem:[%s6156_s22 + $0xe8] sm:$0xff] }
 0x513   : > { %v5594_v34 = vpop.f32.mrf.mxu1 }
 0x514   : > { %5199 = vst.msk [vmem:[%s9946_s14 + $0xa8] sm:$0xff] %vm11019_vm5, %v5167_v23  ;;  %v5076_v50 = vadd.f32 %v5720_v38, %v4915_v17  ;;  %v5595_v53 = vadd.f32 %v5594_v34, %v5593_v2 }
 0x515   : > { %v5596_v12 = vpop.f32.mrf.mxu1 }
 0x516   : > { %v5168_v42 = vadd.f32 %v5136_v20, %v5076_v50  ;;  %v4918_v58 = vadd.f32 %v5595_v53, %v9937_v10  ;;  %v5144_v20 = vld [vmem:[%s6156_s22 + $0xf0] sm:$0xff] }
 0x517   : > { %v5597_v37 = vpop.f32.mrf.mxu1 }
 0x518   : > { %5200 = vst.msk [vmem:[%s9946_s14 + $0xb0] sm:$0xff] %vm11020_vm13, %v5168_v42  ;;  %v5079_v25 = vadd.f32 %v5721_v27, %v4918_v58  ;;  %v5598_v46 = vadd.f32 %v5597_v37, %v5596_v12  ;;  %v5145_v58 = vld [vmem:[%s6156_s22 + $0xf8] sm:$0xff] }
 0x519   : > { %v5599_v32 = vpop.f32.mrf.mxu1 }
 0x51a   : > { %v5169_v0 = vadd.f32 %v5137_v9, %v5079_v25  ;;  %v4923_v19 = vadd.f32 %v5598_v46, %v9937_v10 }
 0x51b   : > { %v5600_v7 = vpop.f32.mrf.mxu1 }
 0x51c   : > { %5201 = vst.msk [vmem:[%s9946_s14 + $0xb8] sm:$0xff] %vm11021_vm6, %v5169_v0  ;;  %v5084_v24 = vadd.f32 %v5083_v49, %v4923_v19  ;;  %v5601_v40 = vadd.f32 %v5600_v7, %v5599_v32 }
 0x51d   : > { %v5602_v61 = vpop.f32.mrf.mxu1 }
 0x51e   : > { %v5170_v33 = vadd.f32 %v5138_v62, %v5084_v24  ;;  %v4926_v29 = vadd.f32 %v5601_v40, %v9937_v10 }
 0x51f   : > { %v5603_v4 = vpop.f32.mrf.mxu1 }
 0x520   : > { %5202 = vst.msk [vmem:[%s9946_s14 + $0xc0] sm:$0xff] %vm11022_vm14, %v5170_v33  ;;  %v5087_v52 = vadd.f32 %v5086_v57, %v4926_v29  ;;  %v5604_v31 = vadd.f32 %v5603_v4, %v5602_v61 }
 0x521   : > { %v5605_v60 = vpop.f32.mrf.mxu1 }
 0x522   : > { %v5171_v38 = vadd.f32 %v5139_v51, %v5087_v52  ;;  %v4931_v15 = vadd.f32 %v5604_v31, %v9937_v10 }
 0x523   : > { %v5606_v36 = vpop.f32.mrf.mxu1 }
 0x524   : > { %5203 = vst.msk [vmem:[%s9946_s14 + $0xc8] sm:$0xff] %vm11023_vm4, %v5171_v38  ;;  %v5092_v56 = vadd.f32 %v5724_v18, %v4931_v15  ;;  %v5607_v26 = vadd.f32 %v5606_v36, %v5605_v60 }
 0x525   : > { %v5608_v16 = vpop.f32.mrf.mxu1 }
 0x526   : > { %v5172_v28 = vadd.f32 %v5140_v39, %v5092_v56  ;;  %v4934_v48 = vadd.f32 %v5607_v26, %v9937_v10 }
 0x527   : > { %v5609_v22 = vpop.f32.mrf.mxu1 }
 0x528   : > { %5204 = vst.msk [vmem:[%s9946_s14 + $0xd0] sm:$0xff] %vm11024_vm9, %v5172_v28  ;;  %v5095_v13 = vadd.f32 %v5725_v55, %v4934_v48  ;;  %v5610_v54 = vadd.f32 %v5609_v22, %v5608_v16 }
 0x529   : > { %v5611_v8 = vpop.f32.mrf.mxu1 }
 0x52a   : > { %v5173_v27 = vadd.f32 %v5141_v45, %v5095_v13  ;;  %v4939_v5 = vadd.f32 %v5610_v54, %v9937_v10 }
 0x52b   : > { %v5612_v6 = vpop.f32.mrf.mxu1 }
 0x52c   : > { %5205 = vst.msk [vmem:[%s9946_s14 + $0xd8] sm:$0xff] %vm11025_vm12, %v5173_v27  ;;  %v5613_v30 = vadd.f32 %v5612_v6, %v5611_v8  ;;  %v5100_v14 = vadd.f32 %v5099_v21, %v4939_v5 }
 0x52e   : > { %v5174_v43 = vadd.f32 %v5142_v63, %v5100_v14  ;;  %v4942_v11 = vadd.f32 %v5613_v30, %v9937_v10 }
 0x530   : > { %5206 = vst.msk [vmem:[%s9946_s14 + $0xe0] sm:$0xff] %vm11026_vm15, %v5174_v43  ;;  %v5103_v1 = vadd.f32 %v5102_v47, %v4942_v11  ;;  %v5614_v35 = vpop.f32.mrf.mxu1 }
 0x532   : > { %v5175_v41 = vadd.f32 %v5143_v59, %v5103_v1  ;;  %v5615_v2 = vpop.f32.mrf.mxu1 }
 0x533   : > { %v5616_v23 = vadd.f32 %v5615_v2, %v5614_v35 }
 0x534   : > { %5207 = vst.msk [vmem:[%s9946_s14 + $0xe8] sm:$0xff] %vm11011_vm0, %v5175_v41  ;;  %v5617_v17 = vpop.f32.mrf.mxu1 }
 0x535   : > { %v4947_v18 = vadd.f32 %v5616_v23, %v9937_v10 }
 0x536   : > { %v5618_v34 = vpop.f32.mrf.mxu1 }
 0x537   : > { %v5108_v50 = vadd.f32 %v5728_v3, %v4947_v18  ;;  %v5619_v53 = vadd.f32 %v5618_v34, %v5617_v17 }
 0x539   : > { %v5176_v12 = vadd.f32 %v5144_v20, %v5108_v50  ;;  %v4950_v42 = vadd.f32 %v5619_v53, %v9937_v10 }
 0x53b   : > { %5208 = vst.msk [vmem:[%s9946_s14 + $0xf0] sm:$0xff] %vm11027_vm10, %v5176_v12  ;;  %v5111_v49 = vadd.f32 %v5729_v44, %v4950_v42 }
 0x53d   : > { %v5177_v9 = vadd.f32 %v5145_v58, %v5111_v49 }
 0x53f   : > { %5209 = vst.msk [vmem:[%s9946_s14 + $0xf8] sm:$0xff] %vm11028_vm2, %v5177_v9 }
 0x540 PF: > { %s21_s17 = sadd.s32 1, %s6061_s17  }
 0x541   : > { %p18_p4 = scmp.ge.s32.totalorder %s21_s17, 4  }
 0x543   :  { %20 = sbr.rel (!%p18_p4) target bundleno = 1 (0x1), region = 97 }

</bundles_post_ra>
